<compile_context>
chip_gen: v7x
topology: tpu7x:2x2x1
jax: 0.10.0
libtpu: 0.0.40
codegen_flags: <defaults>
</compile_context>

<pallas_src>
import functools

import jax
import jax.numpy as jnp
import numpy as np
from jax.experimental import pallas as pl
from jax.experimental.pallas import tpu as pltpu


# ----------------------------- helpers ------------------------------------- #

def _rup(n, m):
    return ((n + m - 1) // m) * m


def _pad_to(a, target_shape):
    pads = [(0, t - s) for s, t in zip(a.shape, target_shape)]
    return jnp.pad(a, pads)


def _pick_tile(dim, cap, mult):
    t = min(dim, max(cap, mult))
    t = max(mult, (t // mult) * mult)
    while dim % t:
        t -= mult
    return t


# ----------------------- recurrent decode-step kernel ----------------------- #

def _decoder_step_kernel(
    nactive_ref,                       # SMEM (T,) int32: batch_size_t per step
    attn1_ref,                         # (B, P, A) f32  (precomputed, resident)
    enc_ref,                           # (B, P, E) bf16 (resident)
    emb_ref,                           # (1, B, EMB) bf16 (streamed per step)
    h0_ref, c0_ref,                    # (B, D) f32
    w_da_ref, b_da_ref,                # (D, A) bf16, (1, A) f32
    w_fa_ref,                          # (1, A) f32 (full_attn weight row)
    w_fb_ref, b_fb_ref,                # (D, E) bf16, (1, E) f32
    w_ie_ref, w_ia_ref, w_hh_ref,      # (EMB,4D) / (E,4D) / (D,4D) bf16
    b_g_ref,                           # (1, 4D) f32 (b_ih + b_hh)
    h_out_ref, alpha_out_ref,          # (1, B, D) f32, (1, B, P) f32
    h_scr, c_scr,                      # VMEM (B, D) f32, persist across steps
    *, num_pixels,
):
    t = pl.program_id(0)

    @pl.when(t == 0)
    def _init():
        h_scr[...] = h0_ref[...]
        c_scr[...] = c0_ref[...]

    h = h_scr[...]                                    # (B, D) f32
    c = c_scr[...]
    B, D = h.shape
    hb = h.astype(jnp.bfloat16)

    # ---- attention (encoder projection attn1 hoisted to the wrapper) ----
    attn2 = (jnp.dot(hb, w_da_ref[...], preferred_element_type=jnp.float32)
             + b_da_ref[...])                         # (B, A)
    act = jnp.maximum(attn1_ref[...] + attn2[:, None, :], 0.0)        # (B, P, A)
    # full_attn(A->1) as a lane reduction (VPU/XLU) instead of an N=1 MXU matmul;
    # the full_attn bias is constant over pixels and cancels in the softmax.
    score = jnp.sum(act * w_fa_ref[...][None], axis=-1)               # (B, P)
    pix = jax.lax.broadcasted_iota(jnp.int32, score.shape, 1)
    score = jnp.where(pix < num_pixels, score, -1e30)                 # mask pad pixels
    score = score - jnp.max(score, axis=-1, keepdims=True)
    es = jnp.exp(score)
    alpha = es / jnp.sum(es, axis=-1, keepdims=True)                  # (B, P)

    # attention-weighted encoding as an MXU contraction over pixels
    awe = jnp.einsum('bqp,bpe->bqe',
                     alpha[:, None, :].astype(jnp.bfloat16), enc_ref[...],
                     preferred_element_type=jnp.float32)[:, 0, :]     # (B, E)

    gate = jax.nn.sigmoid(jnp.dot(hb, w_fb_ref[...],
                                  preferred_element_type=jnp.float32) + b_fb_ref[...])
    awe = gate * awe

    # ---- LSTMCell (gate order i, f, g, o); concat removed by splitting w_ih ----
    gates = (jnp.dot(emb_ref[0], w_ie_ref[...], preferred_element_type=jnp.float32)
             + jnp.dot(awe.astype(jnp.bfloat16), w_ia_ref[...],
                       preferred_element_type=jnp.float32)
             + jnp.dot(hb, w_hh_ref[...], preferred_element_type=jnp.float32)
             + b_g_ref[...])                                          # (B, 4D)
    i_g = jax.nn.sigmoid(gates[:, 0:D])
    f_g = jax.nn.sigmoid(gates[:, D:2 * D])
    g_g = jnp.tanh(gates[:, 2 * D:3 * D])
    o_g = jax.nn.sigmoid(gates[:, 3 * D:4 * D])
    c_new = f_g * c + i_g * g_g
    h_new = o_g * jnp.tanh(c_new)

    # shrinking-batch semantics: rows with decode_len <= t keep their old state
    # (rows are sorted by length descending, so "active" == row < batch_size_t).
    bs_t = nactive_ref[t]
    row = jax.lax.broadcasted_iota(jnp.int32, (B, 1), 0)
    m = (row < bs_t).astype(jnp.float32)              # (B, 1)
    h_carry = m * h_new + (1.0 - m) * h
    c_carry = m * c_new + (1.0 - m) * c
    h_scr[...] = h_carry
    c_scr[...] = c_carry

    # TODO(synk): nn.Dropout(p=0.5) before fc is stochastic in train mode; identity here (eval).
    h_out_ref[0] = h_carry            # fc projection batched over T outside this kernel
    alpha_out_ref[0] = m * alpha


# --------------------- batched fc projection (tiled GEMM) ------------------- #

def _matmul_kernel(a_ref, b_ref, o_ref, acc_ref):
    @pl.when(pl.program_id(2) == 0)
    def _():
        acc_ref[...] = jnp.zeros_like(acc_ref)
    acc_ref[...] += jnp.dot(a_ref[...], b_ref[...], preferred_element_type=jnp.float32)
    o_ref[...] = acc_ref[...].astype(o_ref.dtype)


def _pallas_matmul_f32(a, b, tm, tn, tk):
    M, K = a.shape
    _, N = b.shape
    return pl.pallas_call(
        _matmul_kernel,
        out_shape=jax.ShapeDtypeStruct((M, N), jnp.float32),
        grid_spec=pltpu.PrefetchScalarGridSpec(
            num_scalar_prefetch=0,
            grid=(M // tm, N // tn, K // tk),
            in_specs=[pl.BlockSpec((tm, tk), lambda i, j, k: (i, k)),
                      pl.BlockSpec((tk, tn), lambda i, j, k: (k, j))],
            out_specs=pl.BlockSpec((tm, tn), lambda i, j, k: (i, j)),
            scratch_shapes=[pltpu.VMEM((tm, tn), jnp.float32)]),
        compiler_params=pltpu.CompilerParams(
            dimension_semantics=("parallel", "parallel", "arbitrary"),
            vmem_limit_bytes=64 * 1024 * 1024),
    )(a, b)


# ------------------------------ parameters ---------------------------------- #

def init_params(key, *, vocab_size, embed_dim, decoder_dim, attention_dim, encoder_dim):
    keys = jax.random.split(key, 18)

    def linear(kw, kb, out_f, in_f):
        bound = 1.0 / (in_f ** 0.5)
        w = jax.random.uniform(kw, (out_f, in_f), jnp.float32, -bound, bound)
        b = jax.random.uniform(kb, (out_f,), jnp.float32, -bound, bound)
        return w, b

    p = {}
    p['enc_attn_w'], p['enc_attn_b'] = linear(keys[0], keys[1], attention_dim, encoder_dim)
    p['dec_attn_w'], p['dec_attn_b'] = linear(keys[2], keys[3], attention_dim, decoder_dim)
    p['full_attn_w'], p['full_attn_b'] = linear(keys[4], keys[5], 1, attention_dim)
    p['init_h_w'], p['init_h_b'] = linear(keys[6], keys[7], decoder_dim, encoder_dim)
    p['init_c_w'], p['init_c_b'] = linear(keys[8], keys[9], decoder_dim, encoder_dim)
    p['f_beta_w'], p['f_beta_b'] = linear(keys[10], keys[11], encoder_dim, decoder_dim)
    p['lstm_w_ih'], p['lstm_b_ih'] = linear(keys[12], keys[13], 4 * decoder_dim,
                                            embed_dim + encoder_dim)
    p['lstm_w_hh'], p['lstm_b_hh'] = linear(keys[14], keys[15], 4 * decoder_dim, decoder_dim)
    # init_weights(): fc.weight ~ U(-0.1, 0.1), fc.bias = 0, embedding ~ U(-0.1, 0.1)
    p['fc_w'] = jax.random.uniform(keys[16], (vocab_size, decoder_dim), jnp.float32, -0.1, 0.1)
    p['fc_b'] = jnp.zeros((vocab_size,), jnp.float32)
    p['embedding'] = jax.random.uniform(keys[17], (vocab_size, embed_dim), jnp.float32, -0.1, 0.1)
    return p


# ------------------------------- forward ------------------------------------ #

def decoder_rnn_forward(params, encoder_out, encoded_captions, caption_lens):
    B = encoder_out.shape[0]
    encoder_dim = encoder_out.shape[-1]
    decoder_dim = params['init_h_w'].shape[0]
    embed_dim = params['embedding'].shape[1]
    attention_dim = params['enc_attn_w'].shape[0]
    vocab_size = params['fc_w'].shape[0]

    enc = encoder_out.reshape(B, -1, encoder_dim).astype(jnp.float32)   # (B, P, E)
    P = enc.shape[1]

    # sort by caption length, descending (as in the PyTorch forward)
    sort_idx = jnp.argsort(-caption_lens)
    caption_lens_s = caption_lens[sort_idx]
    enc = enc[sort_idx]
    caps_s = encoded_captions[sort_idx]

    emb = params['embedding'][caps_s].astype(jnp.float32)               # (B, L, embed)
    decode_lens = [int(l) - 1 for l in np.asarray(jax.device_get(caption_lens_s))]
    T = max(decode_lens)

    # padded, tile-friendly sizes (lanes multiple of 128, batch multiple of 8)
    Bp = _rup(B, 8)
    Pp = _rup(P, 128)
    Ep = _rup(encoder_dim, 128)
    Ap = _rup(attention_dim, 128)
    Dp = _rup(decoder_dim, 128)
    Mp = _rup(embed_dim, 128)
    Vp = _rup(vocab_size, 128)

    # ---- hoisted, time-invariant precompute (plain XLA, f32) ----
    attn1 = jnp.einsum('bpe,ae->bpa', enc, params['enc_attn_w']) + params['enc_attn_b']
    attn1_p = _pad_to(attn1, (Bp, Pp, Ap)).astype(jnp.float32)
    enc_p = _pad_to(enc, (Bp, Pp, Ep)).astype(jnp.bfloat16)

    emb_seq = jnp.transpose(emb, (1, 0, 2))[:T]                         # (T, B, embed)
    emb_p = _pad_to(emb_seq, (T, Bp, Mp)).astype(jnp.bfloat16)

    mean_enc = enc.mean(axis=1)                                         # (B, E)
    h0 = mean_enc @ params['init_h_w'].T + params['init_h_b']
    c0 = mean_enc @ params['init_c_w'].T + params['init_c_b']
    h0_p = _pad_to(h0, (Bp, Dp)).astype(jnp.float32)
    c0_p = _pad_to(c0, (Bp, Dp)).astype(jnp.float32)

    def w2(name, in_pad, out_pad, dtype):   # torch (out,in) -> padded (in_pad, out_pad)
        return _pad_to(params[name].T, (in_pad, out_pad)).astype(dtype)

    def b2(name, out_pad):
        return _pad_to(params[name][None, :], (1, out_pad)).astype(jnp.float32)

    w_da = w2('dec_attn_w', Dp, Ap, jnp.bfloat16)
    b_da = b2('dec_attn_b', Ap)
    w_fa = _pad_to(params['full_attn_w'], (1, Ap)).astype(jnp.float32)
    w_fb = w2('f_beta_w', Dp, Ep, jnp.bfloat16)
    b_fb = b2('f_beta_b', Ep)

    def lstm_w(w, in_dim, in_pad):          # torch (4D, in) -> (in_pad, 4*Dp), gate blocks at Dp strides
        w4 = _pad_to(w.reshape(4, decoder_dim, in_dim), (4, Dp, in_pad))
        return jnp.transpose(w4, (2, 0, 1)).reshape(in_pad, 4 * Dp).astype(jnp.bfloat16)

    w_ih = params['lstm_w_ih']
    w_ie = lstm_w(w_ih[:, :embed_dim], embed_dim, Mp)
    w_ia = lstm_w(w_ih[:, embed_dim:], encoder_dim, Ep)
    w_hh = lstm_w(params['lstm_w_hh'], decoder_dim, Dp)
    b_g = _pad_to((params['lstm_b_ih'] + params['lstm_b_hh']).reshape(4, decoder_dim),
                  (4, Dp)).reshape(1, 4 * Dp).astype(jnp.float32)

    # batch_size_t per step (PyTorch: sum(l > t)) -> SMEM via scalar prefetch
    nactive = jnp.asarray([sum(1 for l in decode_lens if l > t) for t in range(T)],
                          jnp.int32)

    inputs = [attn1_p, enc_p, emb_p, h0_p, c0_p,
              w_da, b_da, w_fa, w_fb, b_fb, w_ie, w_ia, w_hh, b_g]

    def make_call(min_buffer_invariants):
        kw = dict(pipeline_mode=pl.Buffered(1)) if min_buffer_invariants else {}

        def inv_spec(shape):
            if len(shape) == 3:
                return pl.BlockSpec(shape, lambda t, n: (0, 0, 0), **kw)
            return pl.BlockSpec(shape, lambda t, n: (0, 0), **kw)

        in_specs = [
            inv_spec(attn1_p.shape),                              # resident attn1
            inv_spec(enc_p.shape),                                # resident encoder_out
            pl.BlockSpec((1, Bp, Mp), lambda t, n: (t, 0, 0)),    # streamed embeddings[t]
        ] + [inv_spec(a.shape) for a in inputs[3:]]

        out_specs = [
            pl.BlockSpec((1, Bp, Dp), lambda t, n: (t, 0, 0)),    # hidden states
            pl.BlockSpec((1, Bp, Pp), lambda t, n: (t, 0, 0)),    # alphas (lane-padded)
        ]

        return pl.pallas_call(
            functools.partial(_decoder_step_kernel, num_pixels=P),
            out_shape=(jax.ShapeDtypeStruct((T, Bp, Dp), jnp.float32),
                       jax.ShapeDtypeStruct((T, Bp, Pp), jnp.float32)),
            grid_spec=pltpu.PrefetchScalarGridSpec(
                num_scalar_prefetch=1,
                grid=(T,),
                in_specs=in_specs,
                out_specs=out_specs,
                scratch_shapes=[pltpu.VMEM((Bp, Dp), jnp.float32),
                                pltpu.VMEM((Bp, Dp), jnp.float32)]),
            compiler_params=pltpu.CompilerParams(
                dimension_semantics=("arbitrary",),               # T is a true recurrence
                vmem_limit_bytes=64 * 1024 * 1024),
        )

    try:
        h_seq, alpha_seq = make_call(True)(nactive, *inputs)
    except Exception:
        # Fallback if this JAX build rejects single-buffered invariant blocks.
        h_seq, alpha_seq = make_call(False)(nactive, *inputs)

    # ---- fc projection as one batched MXU-shaped GEMM over all T steps ----
    fc_w = _pad_to(params['fc_w'].T, (Dp, Vp)).astype(jnp.bfloat16)
    fc_b = _pad_to(params['fc_b'], (Vp,)).astype(jnp.float32)
    Mrows = T * Bp
    tm = _pick_tile(Mrows, 256, 8)
    tn = _pick_tile(Vp, 512, 128)
    tk = _pick_tile(Dp, 512, 128)
    logits = _pallas_matmul_f32(h_seq.reshape(Mrows, Dp).astype(jnp.bfloat16), fc_w,
                                tm, tn, tk)
    logits = logits.reshape(T, Bp, Vp) + fc_b[None, None, :]

    # torch.zeros semantics: predictions of rows inactive at step t stay zero
    dl = jnp.asarray(decode_lens + [0] * (Bp - B), jnp.int32)
    mask = (jnp.arange(T)[:, None] < dl[None, :]).astype(jnp.float32)[:, :, None]
    preds_t = logits * mask                                           # (T, Bp, Vp)

    predictions = jnp.transpose(preds_t[:, :B, :vocab_size], (1, 0, 2))   # (B, T, V)
    alphas = jnp.transpose(alpha_seq[:, :B, :P], (1, 0, 2))               # (B, T, P)
    return predictions, caps_s, decode_lens, alphas, sort_idx


# ----------------------------- pure-JAX reference ---------------------------- #

def reference_forward(params, enc, emb_seq, mask):
    """Pure-JAX f32 reference with identical masking semantics (time-major)."""
    T = emb_seq.shape[0]
    mean_enc = enc.mean(axis=1)
    h = mean_enc @ params['init_h_w'].T + params['init_h_b']
    c = mean_enc @ params['init_c_w'].T + params['init_c_b']
    D = h.shape[1]
    preds_all, alphas_all = [], []
    for t in range(T):
        attn1 = jnp.einsum('bpe,ae->bpa', enc, params['enc_attn_w']) + params['enc_attn_b']
        attn2 = h @ params['dec_attn_w'].T + params['dec_attn_b']
        act = jnp.maximum(attn1 + attn2[:, None, :], 0.0)
        score = jnp.einsum('bpa,a->bp', act, params['full_attn_w'][0]) + params['full_attn_b'][0]
        alpha = jax.nn.softmax(score, axis=1)
        awe = jnp.sum(enc * alpha[:, :, None], axis=1)
        gate = jax.nn.sigmoid(h @ params['f_beta_w'].T + params['f_beta_b'])
        awe = gate * awe
        x = jnp.concatenate([emb_seq[t], awe], axis=1)
        gates = (x @ params['lstm_w_ih'].T + params['lstm_b_ih']
                 + h @ params['lstm_w_hh'].T + params['lstm_b_hh'])
        i_g = jax.nn.sigmoid(gates[:, :D]); f_g = jax.nn.sigmoid(gates[:, D:2 * D])
        g_g = jnp.tanh(gates[:, 2 * D:3 * D]); o_g = jax.nn.sigmoid(gates[:, 3 * D:])
        c_new = f_g * c + i_g * g_g
        h_new = o_g * jnp.tanh(c_new)
        preds = h_new @ params['fc_w'].T + params['fc_b']
        m = mask[t]
        h = m * h_new + (1.0 - m) * h
        c = m * c_new + (1.0 - m) * c
        preds_all.append(m * preds)
        alphas_all.append(m * alpha)
    return jnp.stack(preds_all), jnp.stack(alphas_all)


if __name__ == "__main__":
    # small shapes consistent with the module's forward
    B, enc_h, enc_w = 4, 4, 4
    encoder_dim, attention_dim, embed_dim, decoder_dim = 64, 32, 32, 32
    vocab_size, max_cap_len = 50, 8

    key = jax.random.PRNGKey(0)
    k_enc, k_cap, k_param = jax.random.split(key, 3)

    encoder_out = jax.random.normal(k_enc, (B, enc_h, enc_w, encoder_dim), jnp.float32)
    encoded_captions = jax.random.randint(k_cap, (B, max_cap_len), 0, vocab_size, jnp.int32)
    caption_lens = jnp.array([6, 8, 5, 7], jnp.int32)

    params = init_params(k_param, vocab_size=vocab_size, embed_dim=embed_dim,
                         decoder_dim=decoder_dim, attention_dim=attention_dim,
                         encoder_dim=encoder_dim)

    predictions, caps_s, decode_lens, alphas, sort_idx = decoder_rnn_forward(
        params, encoder_out, encoded_captions, caption_lens)
    jax.block_until_ready((predictions, alphas))

    # sanity check against a pure-JAX f32 reference (kernel uses bf16 matmul operands)
    sort_idx_np = np.asarray(jax.device_get(sort_idx))
    enc_s = encoder_out.reshape(B, -1, encoder_dim)[sort_idx_np]
    emb_s = params['embedding'][encoded_captions[sort_idx_np]]
    T = max(decode_lens)
    emb_seq = jnp.transpose(emb_s, (1, 0, 2))[:T]
    dl = jnp.asarray(decode_lens, jnp.int32)
    mask = (jnp.arange(T)[:, None] < dl[None, :]).astype(jnp.float32)[:, :, None]
    ref_preds, ref_alphas = reference_forward(params, enc_s, emb_seq, mask)
    np.testing.assert_allclose(np.asarray(jnp.transpose(ref_preds, (1, 0, 2))),
                               np.asarray(predictions), atol=5e-2, rtol=5e-2)
    np.testing.assert_allclose(np.asarray(jnp.transpose(ref_alphas, (1, 0, 2))),
                               np.asarray(alphas), atol=5e-2, rtol=5e-2)

    print("KERNEL_OK")
</pallas_src>

<mosaic_0001>
module attributes {stable_mosaic.version = 11 : i64} {
  func.func @_decoder_step_kernel(%arg0: i32, %arg1: memref<7xi32, #tpu.memory_space<smem>>, %arg2: memref<8x128x128xf32, #tpu.memory_space<vmem>>, %arg3: memref<8x128x128xbf16, #tpu.memory_space<vmem>>, %arg4: memref<1x8x128xbf16, #tpu.memory_space<vmem>>, %arg5: memref<8x128xf32, #tpu.memory_space<vmem>>, %arg6: memref<8x128xf32, #tpu.memory_space<vmem>>, %arg7: memref<128x128xbf16, #tpu.memory_space<vmem>>, %arg8: memref<1x128xf32, #tpu.memory_space<vmem>>, %arg9: memref<1x128xf32, #tpu.memory_space<vmem>>, %arg10: memref<128x128xbf16, #tpu.memory_space<vmem>>, %arg11: memref<1x128xf32, #tpu.memory_space<vmem>>, %arg12: memref<128x512xbf16, #tpu.memory_space<vmem>>, %arg13: memref<128x512xbf16, #tpu.memory_space<vmem>>, %arg14: memref<128x512xbf16, #tpu.memory_space<vmem>>, %arg15: memref<1x512xf32, #tpu.memory_space<vmem>>, %arg16: memref<1x8x128xf32, #tpu.memory_space<vmem>>, %arg17: memref<1x8x128xf32, #tpu.memory_space<vmem>>, %arg18: memref<8x128xf32, #tpu.memory_space<vmem>>, %arg19: memref<8x128xf32, #tpu.memory_space<vmem>>) attributes {dimension_semantics = [#tpu.dimension_semantics<arbitrary>], iteration_bounds = array<i64: 7>, scalar_prefetch = 1 : i64, scratch_operands = 2 : i64, tpu.core_type = #tpu.core_type<tc>, window_params = [{pipeline_mode = #tpu.pipeline_mode<synchronous>, transform_indices = @transform_0, window_bounds = array<i64: 8, 128, 128>}, {pipeline_mode = #tpu.pipeline_mode<synchronous>, transform_indices = @transform_1, window_bounds = array<i64: 8, 128, 128>}, {transform_indices = @transform_2, window_bounds = array<i64: 1, 8, 128>}, {pipeline_mode = #tpu.pipeline_mode<synchronous>, transform_indices = @transform_3, window_bounds = array<i64: 8, 128>}, {pipeline_mode = #tpu.pipeline_mode<synchronous>, transform_indices = @transform_4, window_bounds = array<i64: 8, 128>}, {pipeline_mode = #tpu.pipeline_mode<synchronous>, transform_indices = @transform_5, window_bounds = array<i64: 128, 128>}, {pipeline_mode = #tpu.pipeline_mode<synchronous>, transform_indices = @transform_6, window_bounds = array<i64: 1, 128>}, {pipeline_mode = #tpu.pipeline_mode<synchronous>, transform_indices = @transform_7, window_bounds = array<i64: 1, 128>}, {pipeline_mode = #tpu.pipeline_mode<synchronous>, transform_indices = @transform_8, window_bounds = array<i64: 128, 128>}, {pipeline_mode = #tpu.pipeline_mode<synchronous>, transform_indices = @transform_9, window_bounds = array<i64: 1, 128>}, {pipeline_mode = #tpu.pipeline_mode<synchronous>, transform_indices = @transform_10, window_bounds = array<i64: 128, 512>}, {pipeline_mode = #tpu.pipeline_mode<synchronous>, transform_indices = @transform_11, window_bounds = array<i64: 128, 512>}, {pipeline_mode = #tpu.pipeline_mode<synchronous>, transform_indices = @transform_12, window_bounds = array<i64: 128, 512>}, {pipeline_mode = #tpu.pipeline_mode<synchronous>, transform_indices = @transform_13, window_bounds = array<i64: 1, 512>}, {transform_indices = @transform_14, window_bounds = array<i64: 1, 8, 128>}, {transform_indices = @transform_15, window_bounds = array<i64: 1, 8, 128>}]} {
    %c0_i32 = arith.constant 0 : i32
    %0 = arith.cmpi eq, %arg0, %c0_i32 : i32
    %1 = arith.extui %0 : i1 to i32
    %c0_i32_0 = arith.constant 0 : i32
    %2 = arith.cmpi ne, %1, %c0_i32_0 : i32
    scf.if %2 {
      %c0_57 = arith.constant 0 : index
      %c0_58 = arith.constant 0 : index
      %122 = vector.load %arg5[%c0_57, %c0_58] : memref<8x128xf32, #tpu.memory_space<vmem>>, vector<8x128xf32>
      %c0_59 = arith.constant 0 : index
      %c0_60 = arith.constant 0 : index
      %123 = vector.load %arg18[%c0_59, %c0_60] : memref<8x128xf32, #tpu.memory_space<vmem>>, vector<8x128xf32>
      tpu.vector_store %arg18[%c0_59, %c0_60], %122 {strides = array<i32>} : memref<8x128xf32, #tpu.memory_space<vmem>>, vector<8x128xf32>,
      %c0_61 = arith.constant 0 : index
      %c0_62 = arith.constant 0 : index
      %124 = vector.load %arg6[%c0_61, %c0_62] : memref<8x128xf32, #tpu.memory_space<vmem>>, vector<8x128xf32>
      %c0_63 = arith.constant 0 : index
      %c0_64 = arith.constant 0 : index
      %125 = vector.load %arg19[%c0_63, %c0_64] : memref<8x128xf32, #tpu.memory_space<vmem>>, vector<8x128xf32>
      tpu.vector_store %arg19[%c0_63, %c0_64], %124 {strides = array<i32>} : memref<8x128xf32, #tpu.memory_space<vmem>>, vector<8x128xf32>,
    } else {
    }
    %c0 = arith.constant 0 : index
    %c0_1 = arith.constant 0 : index
    %3 = vector.load %arg18[%c0, %c0_1] : memref<8x128xf32, #tpu.memory_space<vmem>>, vector<8x128xf32>
    %c0_2 = arith.constant 0 : index
    %c0_3 = arith.constant 0 : index
    %4 = vector.load %arg19[%c0_2, %c0_3] : memref<8x128xf32, #tpu.memory_space<vmem>>, vector<8x128xf32>
    %5 = arith.truncf %3 : vector<8x128xf32> to vector<8x128xbf16>
    %c0_4 = arith.constant 0 : index
    %c0_5 = arith.constant 0 : index
    %6 = vector.load %arg7[%c0_4, %c0_5] : memref<128x128xbf16, #tpu.memory_space<vmem>>, vector<128x128xbf16>
    %cst = arith.constant dense<0.000000e+00> : vector<8x128xf32>
    %7 = tpu.matmul %5, %6, %cst {dimension_numbers = #tpu.dot_dimension_numbers<[1], [0], [0], [1], [0, 0, 1, 1], [], []>} : vector<8x128xbf16>, vector<128x128xbf16>, vector<8x128xf32> -> vector<8x128xf32>
    %c0_6 = arith.constant 0 : index
    %c0_7 = arith.constant 0 : index
    %8 = vector.load %arg8[%c0_6, %c0_7] : memref<1x128xf32, #tpu.memory_space<vmem>>, vector<1x128xf32>
    %9 = vector.broadcast %8 : vector<1x128xf32> to vector<8x128xf32>
    %10 = arith.addf %7, %9 : vector<8x128xf32>
    %c0_8 = arith.constant 0 : index
    %c0_9 = arith.constant 0 : index
    %c0_10 = arith.constant 0 : index
    %11 = vector.load %arg2[%c0_8, %c0_9, %c0_10] : memref<8x128x128xf32, #tpu.memory_space<vmem>>, vector<8x128x128xf32>
    %12 = vector.shape_cast %10 : vector<8x128xf32> to vector<8x1x128xf32>
    %13 = vector.broadcast %12 : vector<8x1x128xf32> to vector<8x128x128xf32>
    %14 = arith.addf %11, %13 : vector<8x128x128xf32>
    %cst_11 = arith.constant 0.000000e+00 : f32
    %15 = vector.broadcast %cst_11 : f32 to vector<8x128x128xf32>
    %16 = arith.maximumf %14, %15 : vector<8x128x128xf32>
    %c0_12 = arith.constant 0 : index
    %c0_13 = arith.constant 0 : index
    %17 = vector.load %arg9[%c0_12, %c0_13] : memref<1x128xf32, #tpu.memory_space<vmem>>, vector<1x128xf32>
    %18 = vector.shape_cast %17 : vector<1x128xf32> to vector<1x1x128xf32>
    %19 = vector.broadcast %18 : vector<1x1x128xf32> to vector<8x128x128xf32>
    %20 = arith.mulf %16, %19 : vector<8x128x128xf32>
    %cst_14 = arith.constant dense<0.000000e+00> : vector<8x128xf32>
    %21 = vector.multi_reduction <add>, %20, %cst_14 [2] : vector<8x128x128xf32> to vector<8x128xf32>
    %22 = tpu.iota {dimensions = array<i32: 1>} : vector<8x128xi32>
    %c16_i32 = arith.constant 16 : i32
    %23 = vector.broadcast %c16_i32 : i32 to vector<8x128xi32>
    %24 = arith.cmpi slt, %22, %23 : vector<8x128xi32>
    %cst_15 = arith.constant -1.000000e+30 : f32
    %25 = vector.broadcast %cst_15 : f32 to vector<8x128xf32>
    %26 = arith.select %24, %21, %25 : vector<8x128xi1>, vector<8x128xf32>
    %cst_16 = arith.constant dense<0xFF800000> : vector<8xf32>
    %27 = vector.multi_reduction <maximumf>, %26, %cst_16 [1] : vector<8x128xf32> to vector<8xf32>
    %28 = vector.shape_cast %27 : vector<8xf32> to vector<8x1xf32>
    %29 = vector.broadcast %28 : vector<8x1xf32> to vector<8x128xf32>
    %30 = arith.subf %26, %29 : vector<8x128xf32>
    %31 = math.exp %30 : vector<8x128xf32>
    %cst_17 = arith.constant dense<0.000000e+00> : vector<8xf32>
    %32 = vector.multi_reduction <add>, %31, %cst_17 [1] : vector<8x128xf32> to vector<8xf32>
    %33 = vector.shape_cast %32 : vector<8xf32> to vector<8x1xf32>
    %34 = vector.broadcast %33 : vector<8x1xf32> to vector<8x128xf32>
    %35 = arith.divf %31, %34 : vector<8x128xf32>
    %36 = vector.shape_cast %35 : vector<8x128xf32> to vector<8x1x128xf32>
    %37 = arith.truncf %36 : vector<8x1x128xf32> to vector<8x1x128xbf16>
    %c0_18 = arith.constant 0 : index
    %c0_19 = arith.constant 0 : index
    %c0_20 = arith.constant 0 : index
    %38 = vector.load %arg3[%c0_18, %c0_19, %c0_20] : memref<8x128x128xbf16, #tpu.memory_space<vmem>>, vector<8x128x128xbf16>
    "tpu.trace_start"() <{level = 10 : i32, message = "bqp,bpe->bqe"}> : () -> ()
    %cst_21 = arith.constant dense<0.000000e+00> : vector<8x1x128xf32>
    %39 = tpu.matmul %37, %38, %cst_21 {dimension_numbers = #tpu.dot_dimension_numbers<[2], [1], [1], [2], [0, 0, 0, 1, 1, 2], [0], [0]>} : vector<8x1x128xbf16>, vector<8x128x128xbf16>, vector<8x1x128xf32> -> vector<8x1x128xf32>
    "tpu.trace_stop"() : () -> ()
    %40 = vector.shape_cast %39 : vector<8x1x128xf32> to vector<8x128xf32>
    %c0_22 = arith.constant 0 : index
    %c0_23 = arith.constant 0 : index
    %41 = vector.load %arg10[%c0_22, %c0_23] : memref<128x128xbf16, #tpu.memory_space<vmem>>, vector<128x128xbf16>
    %cst_24 = arith.constant dense<0.000000e+00> : vector<8x128xf32>
    %42 = tpu.matmul %5, %41, %cst_24 {dimension_numbers = #tpu.dot_dimension_numbers<[1], [0], [0], [1], [0, 0, 1, 1], [], []>} : vector<8x128xbf16>, vector<128x128xbf16>, vector<8x128xf32> -> vector<8x128xf32>
    %c0_25 = arith.constant 0 : index
    %c0_26 = arith.constant 0 : index
    %43 = vector.load %arg11[%c0_25, %c0_26] : memref<1x128xf32, #tpu.memory_space<vmem>>, vector<1x128xf32>
    %44 = vector.broadcast %43 : vector<1x128xf32> to vector<8x128xf32>
    %45 = arith.addf %42, %44 : vector<8x128xf32>
    %46 = arith.negf %45 : vector<8x128xf32>
    %47 = math.exp %46 : vector<8x128xf32>
    %cst_27 = arith.constant 1.000000e+00 : f32
    %48 = vector.broadcast %cst_27 : f32 to vector<8x128xf32>
    %49 = arith.addf %48, %47 : vector<8x128xf32>
    %50 = arith.divf %48, %49 : vector<8x128xf32>
    %51 = arith.mulf %50, %40 : vector<8x128xf32>
    %c0_28 = arith.constant 0 : index
    %c0_29 = arith.constant 0 : index
    %c0_30 = arith.constant 0 : index
    %52 = vector.load %arg4[%c0_28, %c0_29, %c0_30] : memref<1x8x128xbf16, #tpu.memory_space<vmem>>, vector<1x8x128xbf16>
    %53 = vector.shape_cast %52 : vector<1x8x128xbf16> to vector<8x128xbf16>
    %c0_31 = arith.constant 0 : index
    %c0_32 = arith.constant 0 : index
    %54 = vector.load %arg12[%c0_31, %c0_32] : memref<128x512xbf16, #tpu.memory_space<vmem>>, vector<128x512xbf16>
    %cst_33 = arith.constant dense<0.000000e+00> : vector<8x512xf32>
    %55 = tpu.matmul %53, %54, %cst_33 {dimension_numbers = #tpu.dot_dimension_numbers<[1], [0], [0], [1], [0, 0, 1, 1], [], []>} : vector<8x128xbf16>, vector<128x512xbf16>, vector<8x512xf32> -> vector<8x512xf32>
    %56 = arith.truncf %51 : vector<8x128xf32> to vector<8x128xbf16>
    %c0_34 = arith.constant 0 : index
    %c0_35 = arith.constant 0 : index
    %57 = vector.load %arg13[%c0_34, %c0_35] : memref<128x512xbf16, #tpu.memory_space<vmem>>, vector<128x512xbf16>
    %cst_36 = arith.constant dense<0.000000e+00> : vector<8x512xf32>
    %58 = tpu.matmul %56, %57, %cst_36 {dimension_numbers = #tpu.dot_dimension_numbers<[1], [0], [0], [1], [0, 0, 1, 1], [], []>} : vector<8x128xbf16>, vector<128x512xbf16>, vector<8x512xf32> -> vector<8x512xf32>
    %59 = arith.addf %55, %58 : vector<8x512xf32>
    %c0_37 = arith.constant 0 : index
    %c0_38 = arith.constant 0 : index
    %60 = vector.load %arg14[%c0_37, %c0_38] : memref<128x512xbf16, #tpu.memory_space<vmem>>, vector<128x512xbf16>
    %cst_39 = arith.constant dense<0.000000e+00> : vector<8x512xf32>
    %61 = tpu.matmul %5, %60, %cst_39 {dimension_numbers = #tpu.dot_dimension_numbers<[1], [0], [0], [1], [0, 0, 1, 1], [], []>} : vector<8x128xbf16>, vector<128x512xbf16>, vector<8x512xf32> -> vector<8x512xf32>
    %62 = arith.addf %59, %61 : vector<8x512xf32>
    %c0_40 = arith.constant 0 : index
    %c0_41 = arith.constant 0 : index
    %63 = vector.load %arg15[%c0_40, %c0_41] : memref<1x512xf32, #tpu.memory_space<vmem>>, vector<1x512xf32>
    %64 = vector.broadcast %63 : vector<1x512xf32> to vector<8x512xf32>
    %65 = arith.addf %62, %64 : vector<8x512xf32>
    %66 = vector.extract_strided_slice %65 {offsets = [0, 0], sizes = [8, 128], strides = [1, 1]} : vector<8x512xf32> to vector<8x128xf32>
    %67 = arith.negf %66 : vector<8x128xf32>
    %68 = math.exp %67 : vector<8x128xf32>
    %cst_42 = arith.constant 1.000000e+00 : f32
    %69 = vector.broadcast %cst_42 : f32 to vector<8x128xf32>
    %70 = arith.addf %69, %68 : vector<8x128xf32>
    %71 = arith.divf %69, %70 : vector<8x128xf32>
    %72 = vector.extract_strided_slice %65 {offsets = [0, 128], sizes = [8, 128], strides = [1, 1]} : vector<8x512xf32> to vector<8x128xf32>
    %73 = arith.negf %72 : vector<8x128xf32>
    %74 = math.exp %73 : vector<8x128xf32>
    %cst_43 = arith.constant 1.000000e+00 : f32
    %75 = vector.broadcast %cst_43 : f32 to vector<8x128xf32>
    %76 = arith.addf %75, %74 : vector<8x128xf32>
    %77 = arith.divf %75, %76 : vector<8x128xf32>
    %78 = vector.extract_strided_slice %65 {offsets = [0, 256], sizes = [8, 128], strides = [1, 1]} : vector<8x512xf32> to vector<8x128xf32>
    %79 = math.tanh %78 : vector<8x128xf32>
    %80 = vector.extract_strided_slice %65 {offsets = [0, 384], sizes = [8, 128], strides = [1, 1]} : vector<8x512xf32> to vector<8x128xf32>
    %81 = arith.negf %80 : vector<8x128xf32>
    %82 = math.exp %81 : vector<8x128xf32>
    %cst_44 = arith.constant 1.000000e+00 : f32
    %83 = vector.broadcast %cst_44 : f32 to vector<8x128xf32>
    %84 = arith.addf %83, %82 : vector<8x128xf32>
    %85 = arith.divf %83, %84 : vector<8x128xf32>
    %86 = arith.mulf %77, %4 : vector<8x128xf32>
    %87 = arith.mulf %71, %79 : vector<8x128xf32>
    %88 = arith.addf %86, %87 : vector<8x128xf32>
    %89 = math.tanh %88 : vector<8x128xf32>
    %90 = arith.mulf %85, %89 : vector<8x128xf32>
    %91 = arith.index_cast %arg0 : i32 to index
    %92 = memref.load %arg1[%91] : memref<7xi32, #tpu.memory_space<smem>>
    %93 = tpu.iota {dimensions = array<i32: 0>} : vector<8x1xi32>
    %94 = vector.broadcast %92 : i32 to vector<8x1xi32>
    %95 = arith.cmpi slt, %93, %94 : vector<8x1xi32>
    %96 = arith.extui %95 : vector<8x1xi1> to vector<8x1xi32>
    %97 = arith.sitofp %96 : vector<8x1xi32> to vector<8x1xf32>
    %98 = vector.broadcast %97 : vector<8x1xf32> to vector<8x128xf32>
    %99 = arith.mulf %98, %90 : vector<8x128xf32>
    %cst_45 = arith.constant 1.000000e+00 : f32
    %100 = vector.broadcast %cst_45 : f32 to vector<8x1xf32>
    %101 = arith.subf %100, %97 : vector<8x1xf32>
    %102 = vector.broadcast %101 : vector<8x1xf32> to vector<8x128xf32>
    %103 = arith.mulf %102, %3 : vector<8x128xf32>
    %104 = arith.addf %99, %103 : vector<8x128xf32>
    %105 = vector.broadcast %97 : vector<8x1xf32> to vector<8x128xf32>
    %106 = arith.mulf %105, %88 : vector<8x128xf32>
    %cst_46 = arith.constant 1.000000e+00 : f32
    %107 = vector.broadcast %cst_46 : f32 to vector<8x1xf32>
    %108 = arith.subf %107, %97 : vector<8x1xf32>
    %109 = vector.broadcast %108 : vector<8x1xf32> to vector<8x128xf32>
    %110 = arith.mulf %109, %4 : vector<8x128xf32>
    %111 = arith.addf %106, %110 : vector<8x128xf32>
    %c0_47 = arith.constant 0 : index
    %c0_48 = arith.constant 0 : index
    %112 = vector.load %arg18[%c0_47, %c0_48] : memref<8x128xf32, #tpu.memory_space<vmem>>, vector<8x128xf32>
    tpu.vector_store %arg18[%c0_47, %c0_48], %104 {strides = array<i32>} : memref<8x128xf32, #tpu.memory_space<vmem>>, vector<8x128xf32>,
    %c0_49 = arith.constant 0 : index
    %c0_50 = arith.constant 0 : index
    %113 = vector.load %arg19[%c0_49, %c0_50] : memref<8x128xf32, #tpu.memory_space<vmem>>, vector<8x128xf32>
    tpu.vector_store %arg19[%c0_49, %c0_50], %111 {strides = array<i32>} : memref<8x128xf32, #tpu.memory_space<vmem>>, vector<8x128xf32>,
    %c0_51 = arith.constant 0 : index
    %c0_52 = arith.constant 0 : index
    %c0_53 = arith.constant 0 : index
    %114 = vector.load %arg16[%c0_51, %c0_52, %c0_53] : memref<1x8x128xf32, #tpu.memory_space<vmem>>, vector<1x8x128xf32>
    %115 = vector.shape_cast %114 : vector<1x8x128xf32> to vector<8x128xf32>
    %116 = vector.shape_cast %104 : vector<8x128xf32> to vector<1x8x128xf32>
    tpu.vector_store %arg16[%c0_51, %c0_52, %c0_53], %116 {strides = array<i32>} : memref<1x8x128xf32, #tpu.memory_space<vmem>>, vector<1x8x128xf32>,
    %117 = vector.broadcast %97 : vector<8x1xf32> to vector<8x128xf32>
    %118 = arith.mulf %117, %35 : vector<8x128xf32>
    %c0_54 = arith.constant 0 : index
    %c0_55 = arith.constant 0 : index
    %c0_56 = arith.constant 0 : index
    %119 = vector.load %arg17[%c0_54, %c0_55, %c0_56] : memref<1x8x128xf32, #tpu.memory_space<vmem>>, vector<1x8x128xf32>
    %120 = vector.shape_cast %119 : vector<1x8x128xf32> to vector<8x128xf32>
    %121 = vector.shape_cast %118 : vector<8x128xf32> to vector<1x8x128xf32>
    tpu.vector_store %arg17[%c0_54, %c0_55, %c0_56], %121 {strides = array<i32>} : memref<1x8x128xf32, #tpu.memory_space<vmem>>, vector<1x8x128xf32>,
    return
  }
  func.func @transform_0(%arg0: i32, %arg1: memref<7xi32, #tpu.memory_space<smem>>) -> (i32, i32, i32) {
    %c0_i32 = arith.constant 0 : i32
    %c0_i32_0 = arith.constant 0 : i32
    %c0_i32_1 = arith.constant 0 : i32
    %c0_i32_2 = arith.constant 0 : i32
    return %c0_i32, %c0_i32_0, %c0_i32_1 : i32, i32, i32
  }
  func.func @transform_1(%arg0: i32, %arg1: memref<7xi32, #tpu.memory_space<smem>>) -> (i32, i32, i32) {
    %c0_i32 = arith.constant 0 : i32
    %c0_i32_0 = arith.constant 0 : i32
    %c0_i32_1 = arith.constant 0 : i32
    %c0_i32_2 = arith.constant 0 : i32
    return %c0_i32, %c0_i32_0, %c0_i32_1 : i32, i32, i32
  }
  func.func @transform_2(%arg0: i32, %arg1: memref<7xi32, #tpu.memory_space<smem>>) -> (i32, i32, i32) {
    %c0_i32 = arith.constant 0 : i32
    %c0_i32_0 = arith.constant 0 : i32
    %c0_i32_1 = arith.constant 0 : i32
    return %arg0, %c0_i32, %c0_i32_0 : i32, i32, i32
  }
  func.func @transform_3(%arg0: i32, %arg1: memref<7xi32, #tpu.memory_space<smem>>) -> (i32, i32) {
    %c0_i32 = arith.constant 0 : i32
    %c0_i32_0 = arith.constant 0 : i32
    %c0_i32_1 = arith.constant 0 : i32
    return %c0_i32, %c0_i32_0 : i32, i32
  }
  func.func @transform_4(%arg0: i32, %arg1: memref<7xi32, #tpu.memory_space<smem>>) -> (i32, i32) {
    %c0_i32 = arith.constant 0 : i32
    %c0_i32_0 = arith.constant 0 : i32
    %c0_i32_1 = arith.constant 0 : i32
    return %c0_i32, %c0_i32_0 : i32, i32
  }
  func.func @transform_5(%arg0: i32, %arg1: memref<7xi32, #tpu.memory_space<smem>>) -> (i32, i32) {
    %c0_i32 = arith.constant 0 : i32
    %c0_i32_0 = arith.constant 0 : i32
    %c0_i32_1 = arith.constant 0 : i32
    return %c0_i32, %c0_i32_0 : i32, i32
  }
  func.func @transform_6(%arg0: i32, %arg1: memref<7xi32, #tpu.memory_space<smem>>) -> (i32, i32) {
    %c0_i32 = arith.constant 0 : i32
    %c0_i32_0 = arith.constant 0 : i32
    %c0_i32_1 = arith.constant 0 : i32
    return %c0_i32, %c0_i32_0 : i32, i32
  }
  func.func @transform_7(%arg0: i32, %arg1: memref<7xi32, #tpu.memory_space<smem>>) -> (i32, i32) {
    %c0_i32 = arith.constant 0 : i32
    %c0_i32_0 = arith.constant 0 : i32
    %c0_i32_1 = arith.constant 0 : i32
    return %c0_i32, %c0_i32_0 : i32, i32
  }
  func.func @transform_8(%arg0: i32, %arg1: memref<7xi32, #tpu.memory_space<smem>>) -> (i32, i32) {
    %c0_i32 = arith.constant 0 : i32
    %c0_i32_0 = arith.constant 0 : i32
    %c0_i32_1 = arith.constant 0 : i32
    return %c0_i32, %c0_i32_0 : i32, i32
  }
  func.func @transform_9(%arg0: i32, %arg1: memref<7xi32, #tpu.memory_space<smem>>) -> (i32, i32) {
    %c0_i32 = arith.constant 0 : i32
    %c0_i32_0 = arith.constant 0 : i32
    %c0_i32_1 = arith.constant 0 : i32
    return %c0_i32, %c0_i32_0 : i32, i32
  }
  func.func @transform_10(%arg0: i32, %arg1: memref<7xi32, #tpu.memory_space<smem>>) -> (i32, i32) {
    %c0_i32 = arith.constant 0 : i32
    %c0_i32_0 = arith.constant 0 : i32
    %c0_i32_1 = arith.constant 0 : i32
    return %c0_i32, %c0_i32_0 : i32, i32
  }
  func.func @transform_11(%arg0: i32, %arg1: memref<7xi32, #tpu.memory_space<smem>>) -> (i32, i32) {
    %c0_i32 = arith.constant 0 : i32
    %c0_i32_0 = arith.constant 0 : i32
    %c0_i32_1 = arith.constant 0 : i32
    return %c0_i32, %c0_i32_0 : i32, i32
  }
  func.func @transform_12(%arg0: i32, %arg1: memref<7xi32, #tpu.memory_space<smem>>) -> (i32, i32) {
    %c0_i32 = arith.constant 0 : i32
    %c0_i32_0 = arith.constant 0 : i32
    %c0_i32_1 = arith.constant 0 : i32
    return %c0_i32, %c0_i32_0 : i32, i32
  }
  func.func @transform_13(%arg0: i32, %arg1: memref<7xi32, #tpu.memory_space<smem>>) -> (i32, i32) {
    %c0_i32 = arith.constant 0 : i32
    %c0_i32_0 = arith.constant 0 : i32
    %c0_i32_1 = arith.constant 0 : i32
    return %c0_i32, %c0_i32_0 : i32, i32
  }
  func.func @transform_14(%arg0: i32, %arg1: memref<7xi32, #tpu.memory_space<smem>>) -> (i32, i32, i32) {
    %c0_i32 = arith.constant 0 : i32
    %c0_i32_0 = arith.constant 0 : i32
    %c0_i32_1 = arith.constant 0 : i32
    return %arg0, %c0_i32, %c0_i32_0 : i32, i32, i32
  }
  func.func @transform_15(%arg0: i32, %arg1: memref<7xi32, #tpu.memory_space<smem>>) -> (i32, i32, i32) {
    %c0_i32 = arith.constant 0 : i32
    %c0_i32_0 = arith.constant 0 : i32
    %c0_i32_1 = arith.constant 0 : i32
    return %arg0, %c0_i32, %c0_i32_0 : i32, i32, i32
  }
}

module attributes {stable_mosaic.version = 11 : i64} {
  func.func @_decoder_step_kernel(%arg0: i32, %arg1: memref<7xi32, #tpu.memory_space<smem>>, %arg2: memref<8x128x128xf32, #tpu.memory_space<vmem>>, %arg3: memref<8x128x128xbf16, #tpu.memory_space<vmem>>, %arg4: memref<1x8x128xbf16, #tpu.memory_space<vmem>>, %arg5: memref<8x128xf32, #tpu.memory_space<vmem>>, %arg6: memref<8x128xf32, #tpu.memory_space<vmem>>, %arg7: memref<128x128xbf16, #tpu.memory_space<vmem>>, %arg8: memref<1x128xf32, #tpu.memory_space<vmem>>, %arg9: memref<1x128xf32, #tpu.memory_space<vmem>>, %arg10: memref<128x128xbf16, #tpu.memory_space<vmem>>, %arg11: memref<1x128xf32, #tpu.memory_space<vmem>>, %arg12: memref<128x512xbf16, #tpu.memory_space<vmem>>, %arg13: memref<128x512xbf16, #tpu.memory_space<vmem>>, %arg14: memref<128x512xbf16, #tpu.memory_space<vmem>>, %arg15: memref<1x512xf32, #tpu.memory_space<vmem>>, %arg16: memref<1x8x128xf32, #tpu.memory_space<vmem>>, %arg17: memref<1x8x128xf32, #tpu.memory_space<vmem>>, %arg18: memref<8x128xf32, #tpu.memory_space<vmem>>, %arg19: memref<8x128xf32, #tpu.memory_space<vmem>>) attributes {dimension_semantics = [#tpu.dimension_semantics<arbitrary>], iteration_bounds = array<i64: 7>, scalar_prefetch = 1 : i64, scratch_operands = 2 : i64, tpu.core_type = #tpu.core_type<tc>, window_params = [{pipeline_mode = #tpu.pipeline_mode<synchronous>, transform_indices = @transform_0, window_bounds = array<i64: 8, 128, 128>}, {pipeline_mode = #tpu.pipeline_mode<synchronous>, transform_indices = @transform_1, window_bounds = array<i64: 8, 128, 128>}, {transform_indices = @transform_2, window_bounds = array<i64: 1, 8, 128>}, {pipeline_mode = #tpu.pipeline_mode<synchronous>, transform_indices = @transform_3, window_bounds = array<i64: 8, 128>}, {pipeline_mode = #tpu.pipeline_mode<synchronous>, transform_indices = @transform_4, window_bounds = array<i64: 8, 128>}, {pipeline_mode = #tpu.pipeline_mode<synchronous>, transform_indices = @transform_5, window_bounds = array<i64: 128, 128>}, {pipeline_mode = #tpu.pipeline_mode<synchronous>, transform_indices = @transform_6, window_bounds = array<i64: 1, 128>}, {pipeline_mode = #tpu.pipeline_mode<synchronous>, transform_indices = @transform_7, window_bounds = array<i64: 1, 128>}, {pipeline_mode = #tpu.pipeline_mode<synchronous>, transform_indices = @transform_8, window_bounds = array<i64: 128, 128>}, {pipeline_mode = #tpu.pipeline_mode<synchronous>, transform_indices = @transform_9, window_bounds = array<i64: 1, 128>}, {pipeline_mode = #tpu.pipeline_mode<synchronous>, transform_indices = @transform_10, window_bounds = array<i64: 128, 512>}, {pipeline_mode = #tpu.pipeline_mode<synchronous>, transform_indices = @transform_11, window_bounds = array<i64: 128, 512>}, {pipeline_mode = #tpu.pipeline_mode<synchronous>, transform_indices = @transform_12, window_bounds = array<i64: 128, 512>}, {pipeline_mode = #tpu.pipeline_mode<synchronous>, transform_indices = @transform_13, window_bounds = array<i64: 1, 512>}, {transform_indices = @transform_14, window_bounds = array<i64: 1, 8, 128>}, {transform_indices = @transform_15, window_bounds = array<i64: 1, 8, 128>}]} {
    %c0_i32 = arith.constant 0 : i32
    %0 = arith.cmpi eq, %arg0, %c0_i32 : i32
    %1 = arith.extui %0 : i1 to i32
    %c0_i32_0 = arith.constant 0 : i32
    %2 = arith.cmpi ne, %1, %c0_i32_0 : i32
    scf.if %2 {
      %c0_57 = arith.constant 0 : index
      %c0_58 = arith.constant 0 : index
      %122 = vector.load %arg5[%c0_57, %c0_58] : memref<8x128xf32, #tpu.memory_space<vmem>>, vector<8x128xf32>
      %c0_59 = arith.constant 0 : index
      %c0_60 = arith.constant 0 : index
      %123 = vector.load %arg18[%c0_59, %c0_60] : memref<8x128xf32, #tpu.memory_space<vmem>>, vector<8x128xf32>
      tpu.vector_store %arg18[%c0_59, %c0_60], %122 {strides = array<i32>} : memref<8x128xf32, #tpu.memory_space<vmem>>, vector<8x128xf32>,
      %c0_61 = arith.constant 0 : index
      %c0_62 = arith.constant 0 : index
      %124 = vector.load %arg6[%c0_61, %c0_62] : memref<8x128xf32, #tpu.memory_space<vmem>>, vector<8x128xf32>
      %c0_63 = arith.constant 0 : index
      %c0_64 = arith.constant 0 : index
      %125 = vector.load %arg19[%c0_63, %c0_64] : memref<8x128xf32, #tpu.memory_space<vmem>>, vector<8x128xf32>
      tpu.vector_store %arg19[%c0_63, %c0_64], %124 {strides = array<i32>} : memref<8x128xf32, #tpu.memory_space<vmem>>, vector<8x128xf32>,
    } else {
    }
    %c0 = arith.constant 0 : index
    %c0_1 = arith.constant 0 : index
    %3 = vector.load %arg18[%c0, %c0_1] : memref<8x128xf32, #tpu.memory_space<vmem>>, vector<8x128xf32>
    %c0_2 = arith.constant 0 : index
    %c0_3 = arith.constant 0 : index
    %4 = vector.load %arg19[%c0_2, %c0_3] : memref<8x128xf32, #tpu.memory_space<vmem>>, vector<8x128xf32>
    %5 = arith.truncf %3 : vector<8x128xf32> to vector<8x128xbf16>
    %c0_4 = arith.constant 0 : index
    %c0_5 = arith.constant 0 : index
    %6 = vector.load %arg7[%c0_4, %c0_5] : memref<128x128xbf16, #tpu.memory_space<vmem>>, vector<128x128xbf16>
    %cst = arith.constant dense<0.000000e+00> : vector<8x128xf32>
    %7 = tpu.matmul %5, %6, %cst {dimension_numbers = #tpu.dot_dimension_numbers<[1], [0], [0], [1], [0, 0, 1, 1], [], []>} : vector<8x128xbf16>, vector<128x128xbf16>, vector<8x128xf32> -> vector<8x128xf32>
    %c0_6 = arith.constant 0 : index
    %c0_7 = arith.constant 0 : index
    %8 = vector.load %arg8[%c0_6, %c0_7] : memref<1x128xf32, #tpu.memory_space<vmem>>, vector<1x128xf32>
    %9 = vector.broadcast %8 : vector<1x128xf32> to vector<8x128xf32>
    %10 = arith.addf %7, %9 : vector<8x128xf32>
    %c0_8 = arith.constant 0 : index
    %c0_9 = arith.constant 0 : index
    %c0_10 = arith.constant 0 : index
    %11 = vector.load %arg2[%c0_8, %c0_9, %c0_10] : memref<8x128x128xf32, #tpu.memory_space<vmem>>, vector<8x128x128xf32>
    %12 = vector.shape_cast %10 : vector<8x128xf32> to vector<8x1x128xf32>
    %13 = vector.broadcast %12 : vector<8x1x128xf32> to vector<8x128x128xf32>
    %14 = arith.addf %11, %13 : vector<8x128x128xf32>
    %cst_11 = arith.constant 0.000000e+00 : f32
    %15 = vector.broadcast %cst_11 : f32 to vector<8x128x128xf32>
    %16 = arith.maximumf %14, %15 : vector<8x128x128xf32>
    %c0_12 = arith.constant 0 : index
    %c0_13 = arith.constant 0 : index
    %17 = vector.load %arg9[%c0_12, %c0_13] : memref<1x128xf32, #tpu.memory_space<vmem>>, vector<1x128xf32>
    %18 = vector.shape_cast %17 : vector<1x128xf32> to vector<1x1x128xf32>
    %19 = vector.broadcast %18 : vector<1x1x128xf32> to vector<8x128x128xf32>
    %20 = arith.mulf %16, %19 : vector<8x128x128xf32>
    %cst_14 = arith.constant dense<0.000000e+00> : vector<8x128xf32>
    %21 = vector.multi_reduction <add>, %20, %cst_14 [2] : vector<8x128x128xf32> to vector<8x128xf32>
    %22 = tpu.iota {dimensions = array<i32: 1>} : vector<8x128xi32>
    %c16_i32 = arith.constant 16 : i32
    %23 = vector.broadcast %c16_i32 : i32 to vector<8x128xi32>
    %24 = arith.cmpi slt, %22, %23 : vector<8x128xi32>
    %cst_15 = arith.constant -1.000000e+30 : f32
    %25 = vector.broadcast %cst_15 : f32 to vector<8x128xf32>
    %26 = arith.select %24, %21, %25 : vector<8x128xi1>, vector<8x128xf32>
    %cst_16 = arith.constant dense<0xFF800000> : vector<8xf32>
    %27 = vector.multi_reduction <maximumf>, %26, %cst_16 [1] : vector<8x128xf32> to vector<8xf32>
    %28 = vector.shape_cast %27 : vector<8xf32> to vector<8x1xf32>
    %29 = vector.broadcast %28 : vector<8x1xf32> to vector<8x128xf32>
    %30 = arith.subf %26, %29 : vector<8x128xf32>
    %31 = math.exp %30 : vector<8x128xf32>
    %cst_17 = arith.constant dense<0.000000e+00> : vector<8xf32>
    %32 = vector.multi_reduction <add>, %31, %cst_17 [1] : vector<8x128xf32> to vector<8xf32>
    %33 = vector.shape_cast %32 : vector<8xf32> to vector<8x1xf32>
    %34 = vector.broadcast %33 : vector<8x1xf32> to vector<8x128xf32>
    %35 = arith.divf %31, %34 : vector<8x128xf32>
    %36 = vector.shape_cast %35 : vector<8x128xf32> to vector<8x1x128xf32>
    %37 = arith.truncf %36 : vector<8x1x128xf32> to vector<8x1x128xbf16>
    %c0_18 = arith.constant 0 : index
    %c0_19 = arith.constant 0 : index
    %c0_20 = arith.constant 0 : index
    %38 = vector.load %arg3[%c0_18, %c0_19, %c0_20] : memref<8x128x128xbf16, #tpu.memory_space<vmem>>, vector<8x128x128xbf16>
    "tpu.trace_start"() <{level = 10 : i32, message = "bqp,bpe->bqe"}> : () -> ()
    %cst_21 = arith.constant dense<0.000000e+00> : vector<8x1x128xf32>
    %39 = tpu.matmul %37, %38, %cst_21 {dimension_numbers = #tpu.dot_dimension_numbers<[2], [1], [1], [2], [0, 0, 0, 1, 1, 2], [0], [0]>} : vector<8x1x128xbf16>, vector<8x128x128xbf16>, vector<8x1x128xf32> -> vector<8x1x128xf32>
    "tpu.trace_stop"() : () -> ()
    %40 = vector.shape_cast %39 : vector<8x1x128xf32> to vector<8x128xf32>
    %c0_22 = arith.constant 0 : index
    %c0_23 = arith.constant 0 : index
    %41 = vector.load %arg10[%c0_22, %c0_23] : memref<128x128xbf16, #tpu.memory_space<vmem>>, vector<128x128xbf16>
    %cst_24 = arith.constant dense<0.000000e+00> : vector<8x128xf32>
    %42 = tpu.matmul %5, %41, %cst_24 {dimension_numbers = #tpu.dot_dimension_numbers<[1], [0], [0], [1], [0, 0, 1, 1], [], []>} : vector<8x128xbf16>, vector<128x128xbf16>, vector<8x128xf32> -> vector<8x128xf32>
    %c0_25 = arith.constant 0 : index
    %c0_26 = arith.constant 0 : index
    %43 = vector.load %arg11[%c0_25, %c0_26] : memref<1x128xf32, #tpu.memory_space<vmem>>, vector<1x128xf32>
    %44 = vector.broadcast %43 : vector<1x128xf32> to vector<8x128xf32>
    %45 = arith.addf %42, %44 : vector<8x128xf32>
    %46 = arith.negf %45 : vector<8x128xf32>
    %47 = math.exp %46 : vector<8x128xf32>
    %cst_27 = arith.constant 1.000000e+00 : f32
    %48 = vector.broadcast %cst_27 : f32 to vector<8x128xf32>
    %49 = arith.addf %48, %47 : vector<8x128xf32>
    %50 = arith.divf %48, %49 : vector<8x128xf32>
    %51 = arith.mulf %50, %40 : vector<8x128xf32>
    %c0_28 = arith.constant 0 : index
    %c0_29 = arith.constant 0 : index
    %c0_30 = arith.constant 0 : index
    %52 = vector.load %arg4[%c0_28, %c0_29, %c0_30] : memref<1x8x128xbf16, #tpu.memory_space<vmem>>, vector<1x8x128xbf16>
    %53 = vector.shape_cast %52 : vector<1x8x128xbf16> to vector<8x128xbf16>
    %c0_31 = arith.constant 0 : index
    %c0_32 = arith.constant 0 : index
    %54 = vector.load %arg12[%c0_31, %c0_32] : memref<128x512xbf16, #tpu.memory_space<vmem>>, vector<128x512xbf16>
    %cst_33 = arith.constant dense<0.000000e+00> : vector<8x512xf32>
    %55 = tpu.matmul %53, %54, %cst_33 {dimension_numbers = #tpu.dot_dimension_numbers<[1], [0], [0], [1], [0, 0, 1, 1], [], []>} : vector<8x128xbf16>, vector<128x512xbf16>, vector<8x512xf32> -> vector<8x512xf32>
    %56 = arith.truncf %51 : vector<8x128xf32> to vector<8x128xbf16>
    %c0_34 = arith.constant 0 : index
    %c0_35 = arith.constant 0 : index
    %57 = vector.load %arg13[%c0_34, %c0_35] : memref<128x512xbf16, #tpu.memory_space<vmem>>, vector<128x512xbf16>
    %cst_36 = arith.constant dense<0.000000e+00> : vector<8x512xf32>
    %58 = tpu.matmul %56, %57, %cst_36 {dimension_numbers = #tpu.dot_dimension_numbers<[1], [0], [0], [1], [0, 0, 1, 1], [], []>} : vector<8x128xbf16>, vector<128x512xbf16>, vector<8x512xf32> -> vector<8x512xf32>
    %59 = arith.addf %55, %58 : vector<8x512xf32>
    %c0_37 = arith.constant 0 : index
    %c0_38 = arith.constant 0 : index
    %60 = vector.load %arg14[%c0_37, %c0_38] : memref<128x512xbf16, #tpu.memory_space<vmem>>, vector<128x512xbf16>
    %cst_39 = arith.constant dense<0.000000e+00> : vector<8x512xf32>
    %61 = tpu.matmul %5, %60, %cst_39 {dimension_numbers = #tpu.dot_dimension_numbers<[1], [0], [0], [1], [0, 0, 1, 1], [], []>} : vector<8x128xbf16>, vector<128x512xbf16>, vector<8x512xf32> -> vector<8x512xf32>
    %62 = arith.addf %59, %61 : vector<8x512xf32>
    %c0_40 = arith.constant 0 : index
    %c0_41 = arith.constant 0 : index
    %63 = vector.load %arg15[%c0_40, %c0_41] : memref<1x512xf32, #tpu.memory_space<vmem>>, vector<1x512xf32>
    %64 = vector.broadcast %63 : vector<1x512xf32> to vector<8x512xf32>
    %65 = arith.addf %62, %64 : vector<8x512xf32>
    %66 = vector.extract_strided_slice %65 {offsets = [0, 0], sizes = [8, 128], strides = [1, 1]} : vector<8x512xf32> to vector<8x128xf32>
    %67 = arith.negf %66 : vector<8x128xf32>
    %68 = math.exp %67 : vector<8x128xf32>
    %cst_42 = arith.constant 1.000000e+00 : f32
    %69 = vector.broadcast %cst_42 : f32 to vector<8x128xf32>
    %70 = arith.addf %69, %68 : vector<8x128xf32>
    %71 = arith.divf %69, %70 : vector<8x128xf32>
    %72 = vector.extract_strided_slice %65 {offsets = [0, 128], sizes = [8, 128], strides = [1, 1]} : vector<8x512xf32> to vector<8x128xf32>
    %73 = arith.negf %72 : vector<8x128xf32>
    %74 = math.exp %73 : vector<8x128xf32>
    %cst_43 = arith.constant 1.000000e+00 : f32
    %75 = vector.broadcast %cst_43 : f32 to vector<8x128xf32>
    %76 = arith.addf %75, %74 : vector<8x128xf32>
    %77 = arith.divf %75, %76 : vector<8x128xf32>
    %78 = vector.extract_strided_slice %65 {offsets = [0, 256], sizes = [8, 128], strides = [1, 1]} : vector<8x512xf32> to vector<8x128xf32>
    %79 = math.tanh %78 : vector<8x128xf32>
    %80 = vector.extract_strided_slice %65 {offsets = [0, 384], sizes = [8, 128], strides = [1, 1]} : vector<8x512xf32> to vector<8x128xf32>
    %81 = arith.negf %80 : vector<8x128xf32>
    %82 = math.exp %81 : vector<8x128xf32>
    %cst_44 = arith.constant 1.000000e+00 : f32
    %83 = vector.broadcast %cst_44 : f32 to vector<8x128xf32>
    %84 = arith.addf %83, %82 : vector<8x128xf32>
    %85 = arith.divf %83, %84 : vector<8x128xf32>
    %86 = arith.mulf %77, %4 : vector<8x128xf32>
    %87 = arith.mulf %71, %79 : vector<8x128xf32>
    %88 = arith.addf %86, %87 : vector<8x128xf32>
    %89 = math.tanh %88 : vector<8x128xf32>
    %90 = arith.mulf %85, %89 : vector<8x128xf32>
    %91 = arith.index_cast %arg0 : i32 to index
    %92 = memref.load %arg1[%91] : memref<7xi32, #tpu.memory_space<smem>>
    %93 = tpu.iota {dimensions = array<i32: 0>} : vector<8x1xi32>
    %94 = vector.broadcast %92 : i32 to vector<8x1xi32>
    %95 = arith.cmpi slt, %93, %94 : vector<8x1xi32>
    %96 = arith.extui %95 : vector<8x1xi1> to vector<8x1xi32>
    %97 = arith.sitofp %96 : vector<8x1xi32> to vector<8x1xf32>
    %98 = vector.broadcast %97 : vector<8x1xf32> to vector<8x128xf32>
    %99 = arith.mulf %98, %90 : vector<8x128xf32>
    %cst_45 = arith.constant 1.000000e+00 : f32
    %100 = vector.broadcast %cst_45 : f32 to vector<8x1xf32>
    %101 = arith.subf %100, %97 : vector<8x1xf32>
    %102 = vector.broadcast %101 : vector<8x1xf32> to vector<8x128xf32>
    %103 = arith.mulf %102, %3 : vector<8x128xf32>
    %104 = arith.addf %99, %103 : vector<8x128xf32>
    %105 = vector.broadcast %97 : vector<8x1xf32> to vector<8x128xf32>
    %106 = arith.mulf %105, %88 : vector<8x128xf32>
    %cst_46 = arith.constant 1.000000e+00 : f32
    %107 = vector.broadcast %cst_46 : f32 to vector<8x1xf32>
    %108 = arith.subf %107, %97 : vector<8x1xf32>
    %109 = vector.broadcast %108 : vector<8x1xf32> to vector<8x128xf32>
    %110 = arith.mulf %109, %4 : vector<8x128xf32>
    %111 = arith.addf %106, %110 : vector<8x128xf32>
    %c0_47 = arith.constant 0 : index
    %c0_48 = arith.constant 0 : index
    %112 = vector.load %arg18[%c0_47, %c0_48] : memref<8x128xf32, #tpu.memory_space<vmem>>, vector<8x128xf32>
    tpu.vector_store %arg18[%c0_47, %c0_48], %104 {strides = array<i32>} : memref<8x128xf32, #tpu.memory_space<vmem>>, vector<8x128xf32>,
    %c0_49 = arith.constant 0 : index
    %c0_50 = arith.constant 0 : index
    %113 = vector.load %arg19[%c0_49, %c0_50] : memref<8x128xf32, #tpu.memory_space<vmem>>, vector<8x128xf32>
    tpu.vector_store %arg19[%c0_49, %c0_50], %111 {strides = array<i32>} : memref<8x128xf32, #tpu.memory_space<vmem>>, vector<8x128xf32>,
    %c0_51 = arith.constant 0 : index
    %c0_52 = arith.constant 0 : index
    %c0_53 = arith.constant 0 : index
    %114 = vector.load %arg16[%c0_51, %c0_52, %c0_53] : memref<1x8x128xf32, #tpu.memory_space<vmem>>, vector<1x8x128xf32>
    %115 = vector.shape_cast %114 : vector<1x8x128xf32> to vector<8x128xf32>
    %116 = vector.shape_cast %104 : vector<8x128xf32> to vector<1x8x128xf32>
    tpu.vector_store %arg16[%c0_51, %c0_52, %c0_53], %116 {strides = array<i32>} : memref<1x8x128xf32, #tpu.memory_space<vmem>>, vector<1x8x128xf32>,
    %117 = vector.broadcast %97 : vector<8x1xf32> to vector<8x128xf32>
    %118 = arith.mulf %117, %35 : vector<8x128xf32>
    %c0_54 = arith.constant 0 : index
    %c0_55 = arith.constant 0 : index
    %c0_56 = arith.constant 0 : index
    %119 = vector.load %arg17[%c0_54, %c0_55, %c0_56] : memref<1x8x128xf32, #tpu.memory_space<vmem>>, vector<1x8x128xf32>
    %120 = vector.shape_cast %119 : vector<1x8x128xf32> to vector<8x128xf32>
    %121 = vector.shape_cast %118 : vector<8x128xf32> to vector<1x8x128xf32>
    tpu.vector_store %arg17[%c0_54, %c0_55, %c0_56], %121 {strides = array<i32>} : memref<1x8x128xf32, #tpu.memory_space<vmem>>, vector<1x8x128xf32>,
    return
  }
  func.func @transform_0(%arg0: i32, %arg1: memref<7xi32, #tpu.memory_space<smem>>) -> (i32, i32, i32) {
    %c0_i32 = arith.constant 0 : i32
    %c0_i32_0 = arith.constant 0 : i32
    %c0_i32_1 = arith.constant 0 : i32
    %c0_i32_2 = arith.constant 0 : i32
    return %c0_i32, %c0_i32_0, %c0_i32_1 : i32, i32, i32
  }
  func.func @transform_1(%arg0: i32, %arg1: memref<7xi32, #tpu.memory_space<smem>>) -> (i32, i32, i32) {
    %c0_i32 = arith.constant 0 : i32
    %c0_i32_0 = arith.constant 0 : i32
    %c0_i32_1 = arith.constant 0 : i32
    %c0_i32_2 = arith.constant 0 : i32
    return %c0_i32, %c0_i32_0, %c0_i32_1 : i32, i32, i32
  }
  func.func @transform_2(%arg0: i32, %arg1: memref<7xi32, #tpu.memory_space<smem>>) -> (i32, i32, i32) {
    %c0_i32 = arith.constant 0 : i32
    %c0_i32_0 = arith.constant 0 : i32
    %c0_i32_1 = arith.constant 0 : i32
    return %arg0, %c0_i32, %c0_i32_0 : i32, i32, i32
  }
  func.func @transform_3(%arg0: i32, %arg1: memref<7xi32, #tpu.memory_space<smem>>) -> (i32, i32) {
    %c0_i32 = arith.constant 0 : i32
    %c0_i32_0 = arith.constant 0 : i32
    %c0_i32_1 = arith.constant 0 : i32
    return %c0_i32, %c0_i32_0 : i32, i32
  }
  func.func @transform_4(%arg0: i32, %arg1: memref<7xi32, #tpu.memory_space<smem>>) -> (i32, i32) {
    %c0_i32 = arith.constant 0 : i32
    %c0_i32_0 = arith.constant 0 : i32
    %c0_i32_1 = arith.constant 0 : i32
    return %c0_i32, %c0_i32_0 : i32, i32
  }
  func.func @transform_5(%arg0: i32, %arg1: memref<7xi32, #tpu.memory_space<smem>>) -> (i32, i32) {
    %c0_i32 = arith.constant 0 : i32
    %c0_i32_0 = arith.constant 0 : i32
    %c0_i32_1 = arith.constant 0 : i32
    return %c0_i32, %c0_i32_0 : i32, i32
  }
  func.func @transform_6(%arg0: i32, %arg1: memref<7xi32, #tpu.memory_space<smem>>) -> (i32, i32) {
    %c0_i32 = arith.constant 0 : i32
    %c0_i32_0 = arith.constant 0 : i32
    %c0_i32_1 = arith.constant 0 : i32
    return %c0_i32, %c0_i32_0 : i32, i32
  }
  func.func @transform_7(%arg0: i32, %arg1: memref<7xi32, #tpu.memory_space<smem>>) -> (i32, i32) {
    %c0_i32 = arith.constant 0 : i32
    %c0_i32_0 = arith.constant 0 : i32
    %c0_i32_1 = arith.constant 0 : i32
    return %c0_i32, %c0_i32_0 : i32, i32
  }
  func.func @transform_8(%arg0: i32, %arg1: memref<7xi32, #tpu.memory_space<smem>>) -> (i32, i32) {
    %c0_i32 = arith.constant 0 : i32
    %c0_i32_0 = arith.constant 0 : i32
    %c0_i32_1 = arith.constant 0 : i32
    return %c0_i32, %c0_i32_0 : i32, i32
  }
  func.func @transform_9(%arg0: i32, %arg1: memref<7xi32, #tpu.memory_space<smem>>) -> (i32, i32) {
    %c0_i32 = arith.constant 0 : i32
    %c0_i32_0 = arith.constant 0 : i32
    %c0_i32_1 = arith.constant 0 : i32
    return %c0_i32, %c0_i32_0 : i32, i32
  }
  func.func @transform_10(%arg0: i32, %arg1: memref<7xi32, #tpu.memory_space<smem>>) -> (i32, i32) {
    %c0_i32 = arith.constant 0 : i32
    %c0_i32_0 = arith.constant 0 : i32
    %c0_i32_1 = arith.constant 0 : i32
    return %c0_i32, %c0_i32_0 : i32, i32
  }
  func.func @transform_11(%arg0: i32, %arg1: memref<7xi32, #tpu.memory_space<smem>>) -> (i32, i32) {
    %c0_i32 = arith.constant 0 : i32
    %c0_i32_0 = arith.constant 0 : i32
    %c0_i32_1 = arith.constant 0 : i32
    return %c0_i32, %c0_i32_0 : i32, i32
  }
  func.func @transform_12(%arg0: i32, %arg1: memref<7xi32, #tpu.memory_space<smem>>) -> (i32, i32) {
    %c0_i32 = arith.constant 0 : i32
    %c0_i32_0 = arith.constant 0 : i32
    %c0_i32_1 = arith.constant 0 : i32
    return %c0_i32, %c0_i32_0 : i32, i32
  }
  func.func @transform_13(%arg0: i32, %arg1: memref<7xi32, #tpu.memory_space<smem>>) -> (i32, i32) {
    %c0_i32 = arith.constant 0 : i32
    %c0_i32_0 = arith.constant 0 : i32
    %c0_i32_1 = arith.constant 0 : i32
    return %c0_i32, %c0_i32_0 : i32, i32
  }
  func.func @transform_14(%arg0: i32, %arg1: memref<7xi32, #tpu.memory_space<smem>>) -> (i32, i32, i32) {
    %c0_i32 = arith.constant 0 : i32
    %c0_i32_0 = arith.constant 0 : i32
    %c0_i32_1 = arith.constant 0 : i32
    return %arg0, %c0_i32, %c0_i32_0 : i32, i32, i32
  }
  func.func @transform_15(%arg0: i32, %arg1: memref<7xi32, #tpu.memory_space<smem>>) -> (i32, i32, i32) {
    %c0_i32 = arith.constant 0 : i32
    %c0_i32_0 = arith.constant 0 : i32
    %c0_i32_1 = arith.constant 0 : i32
    return %arg0, %c0_i32, %c0_i32_0 : i32, i32, i32
  }
}

</mosaic_0001>

<bundles_post_ra>
// kernel: tpu_custom_call.1
= control target key start
LH: loop header
LB: loop body
LE: loop exit
PB: predicated region body
PF: predicated region fallthrough
CT: control target
= control target key end

     0   :  { %s7791_s0 = inlined_call_operand.hbm [shape: s32[7], index: 0, kind: input, shape index: {}]   ;;  %s7792_s1 = inlined_call_operand.hbm [shape: f32[8,128,128], index: 1, kind: input, shape index: {}]   ;;  %s7793_s2 = inlined_call_operand.hbm [shape: bf16[8,128,128], index: 2, kind: input, shape index: {}]   ;;  %s7794_s3 = inlined_call_operand.hbm [shape: bf16[7,8,128], index: 3, kind: input, shape index: {}]   ;;  %s7795_s4 = inlined_call_operand.hbm [shape: f32[8,128], index: 4, kind: input, shape index: {}]   ;;  %s7796_s5 = inlined_call_operand.hbm [shape: f32[8,128], index: 5, kind: input, shape index: {}]   ;;  %s7797_s6 = inlined_call_operand.hbm [shape: bf16[128,128], index: 6, kind: input, shape index: {}]   ;;  %s7798_s7 = inlined_call_operand.hbm [shape: f32[1,128], index: 7, kind: input, shape index: {}]   ;;  %s7799_s8 = inlined_call_operand.hbm [shape: f32[1,128], index: 8, kind: input, shape index: {}]   ;;  %s7800_s9 = inlined_call_operand.hbm [shape: bf16[128,128], index: 9, kind: input, shape index: {}]   ;;  %s7801_s10 = inlined_call_operand.hbm [shape: f32[1,128], index: 10, kind: input, shape index: {}]   ;;  %s7802_s11 = inlined_call_operand.hbm [shape: bf16[128,512], index: 11, kind: input, shape index: {}]   ;;  %s7803_s12 = inlined_call_operand.hbm [shape: bf16[128,512], index: 12, kind: input, shape index: {}]   ;;  %s7804_s13 = inlined_call_operand.hbm [shape: bf16[128,512], index: 13, kind: input, shape index: {}]   ;;  %s7805_s14 = inlined_call_operand.hbm [shape: f32[1,512], index: 14, kind: input, shape index: {}]   ;;  %s7806_s15 = inlined_call_operand.hbm [shape: f32[7,8,128], index: 15, kind: output, shape index: {0}]   ;;  %s7807_s16 = inlined_call_operand.hbm [shape: f32[7,8,128], index: 16, kind: output, shape index: {1}]  }
   0x1   :  { %7832 = sst [smem:[#allocation47_spill]] %s7791_s0 }
   0x2   :  { %7833 = sst [smem:[#allocation48_spill]] %s7792_s1  ;;  %s7841_s23 = sld [smem:[#allocation47_spill]] }
   0x3   :  { %7834 = sst [smem:[#allocation49_spill]] %s7793_s2 }
   0x4   :  { %7835 = sst [smem:[#allocation50_spill]] %s7794_s3 }
   0x5   :  { %7836 = sst [smem:[#allocation51_spill]] %s7795_s4 }
   0x6   :  { %7837 = sst [smem:[#allocation52_spill]] %s7796_s5 }
   0x7   :  { %7838 = sst [smem:[#allocation53_spill]] %s7797_s6 }
   0x8   :  { %7839 = sst [smem:[#allocation54_spill]] %s7806_s15  ;;  %s5658_s3 = scalar_lea.hbm %s7841_s23, 16 }
   0x9   :  { %7840 = sst [smem:[#allocation55_spill]] %s7807_s16  ;;  %p5659_p0 = scmp.ne.s32.totalorder %s7841_s23, %s5658_s3 }
   0xa   :  { %p5662_p1 = scmp.lt.u32.totalorder %s5658_s3, %s7841_s23 }
   0xc   :  { %p5664_p2 = pnand %p5662_p1, %p5659_p0 }
   0xe   :  { %5667 = shalt.err (!%p5664_p2)  }
   0xf   :  { %s6196_s28 = smov [#allocation5]  }
  0x10   :  { %23 = dma.hbm_to_smem %s7841_s23, 16, %s6196_s28, [#allocation4] }
  0x11   :  { %6134 = dma.done.wait [#allocation4], 16 }
  0x12   :  { %6135 = vsyncadd [#allocation4], 4294967280 }
  0x13   :  { %25 = sfence }
  0x14   :  { %26 = vsyncpa [#allocation7], 0 }
  0x15   :  { %27 = vsyncpa [#allocation10], 0 }
  0x16   :  { %28 = vsyncpa [#allocation14], 0 }
  0x17   :  { %29 = vsyncpa [#allocation17], 0 }
  0x18   :  { %30 = vsyncpa [#allocation20], 0 }
  0x19   :  { %31 = vsyncpa [#allocation23], 0 }
  0x1a   :  { %32 = vsyncpa [#allocation26], 0 }
  0x1b   :  { %33 = vsyncpa [#allocation8], 0 }
  0x1c   :  { %35 = vsyncpa [#allocation8 + $0x1], 0 }
  0x1d   :  { %36 = vsyncpa [#allocation30], 0 }
  0x1e   :  { %38 = vsyncpa [#allocation30 + $0x1], 0  ;;  %s6320_s3 = smov 0   ;;  %s6322_s0 = smov 0  }
  0x1f   :  { %s6324_s17 = smov 0   ;;  %s6326_s18 = smov 0  }
  0x20 LB: > { %7842 = sst [smem:[#allocation43_spill]] %s6182_s3  ;;  %s6197_s19 = smov [#allocation6]   ;;  %s6194_s18 = sphi %s6326_s18, %s7903_s18   ;;  %s6190_s17 = sphi %s6324_s17, %s7902_s17   ;;  %s6186_s0 = sphi %s6322_s0, %s7901_s0   ;;  %s6182_s3 = sphi %s6320_s3, %s7900_s3  }
  0x21   : > { %7843 = sst [smem:[#allocation44_spill]] %s6186_s0  ;;  %s412_s20 = sshll.u32 %s6197_s19, 4  ;;  %s6347_s20 = int_to_ptr.vmem [resolvable:$true] %s412_s20 }
  0x22   : > { %s6341_s21 = sadd.s32 4294967295, %s6194_s18   ;;  %p4700_p3 = scmp.ge.s32.totalorder %s6194_s18, 1 }
  0x23   : > { %7844 = sst [smem:[#allocation45_spill]] %s6341_s21  ;;  %p7818_p4 = scmp.eq.s32.totalorder %s6341_s21, 0 }
  0x24   : > { %p400_p5 = scmp.lt.s32.totalorder %s6194_s18, 8  ;;  %s6198_s23 = smov [#allocation9]  }
  0x25   : > { %s425_s24 = sshll.u32 %s6198_s23, 4  ;;  %s6199_s26 = smov [#allocation13]   ;;  %s6361_s24 = int_to_ptr.vmem [resolvable:$true] %s425_s24 }
  0x26   : > { %p6349_p7 = pnand %p4700_p3, %p400_p5  ;;  %s6363_s27 = sshll.u32 %s6199_s26, 4  ;;  %s451_s27 = int_to_ptr.vmem [resolvable:$true] %s6363_s27 }
  0x27   : > { %s7848_s1 = sld [smem:[#allocation48_spill]] }
  0x28   : > { %s7845_s22 = scalar_select %p6349_p7, 1, 0 }
  0x29   : > { %p5273_p8 = pneg %p6349_p7 }
  0x2a   : > { %7846 = sst [smem:[#allocation46_spill]] %s7845_s22 }
  0x2b   : > { %p6357_p9 = pnand %p5273_p8, %p7818_p4 }
  0x2d   : > { %s5668_s30 = scalar_lea.hbm %s7848_s1, 16384  ;;  %p6373_p11 = pneg %p6357_p9 }
  0x2e   : > { %p5669_p10 = scmp.ne.s32.totalorder %s7848_s1, %s5668_s30  ;;  %p5675_p0 = scmp.lt.u32.totalorder %s5668_s30, %s7848_s1 }
  0x30   : > { %p5671_p12 = pnand %p6373_p11, %p5669_p10 }
  0x32   : > { %p5672_p13 = pneg %p5671_p12 }
  0x34   : > { %p5677_p1 = pnand %p5675_p0, %p5672_p13 }
  0x36   : > { %5680 = shalt.err (!%p5677_p1)
}
  0x37   : > { %s5681_s15 = scalar_lea.vmem %s6347_s20, 16384  ;;  %p5689_p8 = scmp.lt.s32.totalorder %s6347_s20, %s6347_s20 }
  0x38   : > { %p5682_p2 = scmp.ne.s32.totalorder %s6347_s20, %s5681_s15  ;;  %p5690_p6 = scmp.lt.s32.totalorder %s5681_s15, %s5681_s15 }
  0x3a   : > { %p5684_p3 = pnand %p5682_p2, %p6373_p11  ;;  %p5691_p10 = por %p5690_p6, %p5689_p8 }
  0x3c   : > { %p5685_p5 = pneg %p5684_p3 }
  0x3e   : > { %p5692_p12 = pnand %p5691_p10, %p5685_p5 }
  0x40   : > { %5695 = shalt.err (!%p5692_p12)
}
  0x41   : > { %s6200_s28 = smov 128   ;;  %s6201_s16 = smov 8  }
  0x42   : > { %5276 = dma.hbm_to_vmem [thread:$0]  (!%p6357_p9), %s7848_s1, 16384, %s6347_s20, [#allocation7], %s6200_s28, %s6200_s28, %s6201_s16  }
  0x43   : > { %s7850_s2 = sld [smem:[#allocation49_spill]] }
  0x49   : > { %s5696_s22 = scalar_lea.hbm %s7850_s2, 8192 }
  0x4a   : > { %p5697_p6 = scmp.ne.s32.totalorder %s7850_s2, %s5696_s22  ;;  %p5703_p1 = scmp.lt.u32.totalorder %s5696_s22, %s7850_s2 }
  0x4c   : > { %p5699_p13 = pnand %p5697_p6, %p6373_p11 }
  0x4e   : > { %p5700_p0 = pneg %p5699_p13 }
  0x50   : > { %p5705_p2 = pnand %p5703_p1, %p5700_p0 }
  0x52   : > { %5708 = shalt.err (!%p5705_p2)
}
  0x53   : > { %s5709_s20 = scalar_lea.vmem %s6361_s24, 8192  ;;  %p5717_p10 = scmp.lt.s32.totalorder %s6361_s24, %s6361_s24 }
  0x54   : > { %p5710_p3 = scmp.ne.s32.totalorder %s6361_s24, %s5709_s20  ;;  %p5718_p12 = scmp.lt.s32.totalorder %s5709_s20, %s5709_s20 }
  0x56   : > { %p5712_p5 = pnand %p5710_p3, %p6373_p11  ;;  %p5719_p6 = por %p5718_p12, %p5717_p10 }
  0x58   : > { %p5713_p8 = pneg %p5712_p5 }
  0x5a   : > { %p5720_p13 = pnand %p5719_p6, %p5713_p8 }
  0x5c   : > { %5723 = shalt.err (!%p5720_p13)
}
  0x5d   : > { %s7820_s3 = smov 64   ;;  %s7822_s0 = smov 4  }
  0x5e   : > { %5279 = dma.hbm_to_vmem [thread:$0]  (!%p6357_p9), %s7850_s2, 8192, %s6361_s24, [#allocation10], %s7820_s3, %s7820_s3, %s7822_s0  }
  0x5f   : > { %s7851_s5 = sld [smem:[#allocation52_spill]] }
  0x65   : > { %s5724_s29 = scalar_lea.hbm %s7851_s5, 128 }
  0x66   : > { %p5725_p0 = scmp.ne.s32.totalorder %s7851_s5, %s5724_s29  ;;  %p5731_p3 = scmp.lt.u32.totalorder %s5724_s29, %s7851_s5 }
  0x68   : > { %p5727_p1 = pnand %p5725_p0, %p6373_p11 }
  0x6a   : > { %p5728_p2 = pneg %p5727_p1 }
  0x6c   : > { %p5733_p5 = pnand %p5731_p3, %p5728_p2 }
  0x6e   : > { %5736 = shalt.err (!%p5733_p5)
}
  0x6f   : > { %s5737_s20 = scalar_lea.vmem %s451_s27, 128  ;;  %p5745_p6 = scmp.lt.s32.totalorder %s451_s27, %s451_s27 }
  0x70   : > { %p5738_p8 = scmp.ne.s32.totalorder %s451_s27, %s5737_s20  ;;  %p5746_p13 = scmp.lt.s32.totalorder %s5737_s20, %s5737_s20 }
  0x72   : > { %p5740_p10 = pnand %p5738_p8, %p6373_p11  ;;  %p5747_p4 = por %p5746_p13, %p5745_p6 }
  0x74   : > { %p5741_p12 = pneg %p5740_p10 }
  0x76   : > { %p5748_p7 = pnand %p5747_p4, %p5741_p12 }
  0x78   : > { %5751 = shalt.err (!%p5748_p7)
}
  0x79   : > { %5285 = dma.hbm_to_vmem [thread:$0]  (!%p6357_p9), %s7851_s5, 128, %s451_s27, [#allocation14]  }
  0x7a   : > { %s6204_s22 = smov [#allocation16]   ;;  %s6205_s16 = smov [#allocation19]  }
  0x7b   : > { %s474_s28 = sshll.u32 %s6204_s22, 4  ;;  %s495_s29 = sshll.u32 %s6205_s16, 4  ;;  %s475_s28 = int_to_ptr.vmem [resolvable:$true] %s474_s28  ;;  %s496_s29 = int_to_ptr.vmem [resolvable:$true] %s495_s29 }
  0x7c   : > { %s5752_s26 = scalar_lea.hbm %s7798_s7, 16 }
  0x7d   : > { %p5753_p4 = scmp.ne.s32.totalorder %s7798_s7, %s5752_s26  ;;  %p5759_p1 = scmp.lt.u32.totalorder %s5752_s26, %s7798_s7 }
  0x7f   : > { %p5755_p7 = pnand %p5753_p4, %p6373_p11 }
  0x81   : > { %p5756_p0 = pneg %p5755_p7 }
  0x83   : > { %p5761_p2 = pnand %p5759_p1, %p5756_p0 }
  0x85   : > { %5764 = shalt.err (!%p5761_p2)
}
  0x86   : > { %s5765_s27 = scalar_lea.vmem %s475_s28, 16  ;;  %s5772_s21 = scalar_lea.vmem %s475_s28, 32 }
  0x87   : > { %p5766_p3 = scmp.ne.s32.totalorder %s475_s28, %s5765_s27  ;;  %p5773_p10 = scmp.lt.s32.totalorder %s475_s28, %s475_s28 }
  0x88   : > { %p5774_p12 = scmp.lt.s32.totalorder %s5772_s21, %s5765_s27 }
  0x89   : > { %p5768_p5 = pnand %p5766_p3, %p6373_p11 }
  0x8a   : > { %p5775_p6 = por %p5774_p12, %p5773_p10 }
  0x8b   : > { %p5769_p8 = pneg %p5768_p5 }
  0x8d   : > { %p5776_p13 = pnand %p5775_p6, %p5769_p8 }
  0x8f   : > { %5779 = shalt.err (!%p5776_p13)
}
  0x90   : > { %5291 = dma.hbm_to_vmem [thread:$0]  (!%p6357_p9), %s7798_s7, 16, %s475_s28, [#allocation17]  }
  0x91   : > { %s5780_s19 = scalar_lea.hbm %s7800_s9, 1024 }
  0x92   : > { %p5781_p4 = scmp.ne.s32.totalorder %s7800_s9, %s5780_s19  ;;  %p5787_p1 = scmp.lt.u32.totalorder %s5780_s19, %s7800_s9 }
  0x94   : > { %p5783_p7 = pnand %p5781_p4, %p6373_p11 }
  0x96   : > { %p5784_p0 = pneg %p5783_p7 }
  0x98   : > { %p5789_p2 = pnand %p5787_p1, %p5784_p0 }
  0x9a   : > { %5792 = shalt.err (!%p5789_p2)
}
  0x9b   : > { %s5793_s27 = scalar_lea.vmem %s496_s29, 1024  ;;  %p5801_p10 = scmp.lt.s32.totalorder %s496_s29, %s496_s29 }
  0x9c   : > { %p5794_p3 = scmp.ne.s32.totalorder %s496_s29, %s5793_s27  ;;  %p5802_p12 = scmp.lt.s32.totalorder %s5793_s27, %s5793_s27 }
  0x9e   : > { %p5796_p5 = pnand %p5794_p3, %p6373_p11  ;;  %p5803_p6 = por %p5802_p12, %p5801_p10 }
  0xa0   : > { %p5797_p8 = pneg %p5796_p5 }
  0xa2   : > { %p5804_p13 = pnand %p5803_p6, %p5797_p8 }
  0xa4   : > { %5807 = shalt.err (!%p5804_p13)
}
  0xa5   : > { %s7852_s28 = smov 64   ;;  %s6206_s16 = smov [#allocation22]  }
  0xa6   : > { %5297 = dma.hbm_to_vmem [thread:$0]  (!%p6357_p9), %s7800_s9, 1024, %s496_s29, [#allocation20], %s7852_s28, %s7852_s28, %s7822_s0  }
  0xa7   : > { %s519_s3 = sshll.u32 %s6206_s16, 4  ;;  %s5808_s26 = scalar_lea.hbm %s7802_s11, 4096  ;;  %s520_s3 = int_to_ptr.vmem [resolvable:$true] %s519_s3 }
  0xa8   : > { %p5809_p4 = scmp.ne.s32.totalorder %s7802_s11, %s5808_s26  ;;  %p5815_p1 = scmp.lt.u32.totalorder %s5808_s26, %s7802_s11 }
  0xaa   : > { %p5811_p7 = pnand %p5809_p4, %p6373_p11 }
  0xac   : > { %p5812_p0 = pneg %p5811_p7 }
  0xae   : > { %p5817_p2 = pnand %p5815_p1, %p5812_p0 }
  0xb0   : > { %5820 = shalt.err (!%p5817_p2)
}
  0xb1   : > { %s5821_s29 = scalar_lea.vmem %s520_s3, 4096  ;;  %p5829_p10 = scmp.lt.s32.totalorder %s520_s3, %s520_s3 }
  0xb2   : > { %p5822_p3 = scmp.ne.s32.totalorder %s520_s3, %s5821_s29  ;;  %p5830_p12 = scmp.lt.s32.totalorder %s5821_s29, %s5821_s29 }
  0xb4   : > { %p5824_p5 = pnand %p5822_p3, %p6373_p11  ;;  %p5831_p6 = por %p5830_p12, %p5829_p10 }
  0xb6   : > { %p5825_p8 = pneg %p5824_p5 }
  0xb8   : > { %p5832_p13 = pnand %p5831_p6, %p5825_p8 }
  0xba   : > { %5835 = shalt.err (!%p5832_p13)
}
  0xbb   : > { %s6207_s21 = smov 256   ;;  %s6208_s22 = smov 16  }
  0xbc   : > { %5303 = dma.hbm_to_vmem [thread:$0]  (!%p6357_p9), %s7802_s11, 4096, %s520_s3, [#allocation23], %s6207_s21, %s6207_s21, %s6208_s22  }
  0xbd   : > { %s6209_s19 = smov [#allocation25]   ;;  %s6210_s15 = smov [#allocation12]  }
  0xbe   : > { %s545_s26 = sshll.u32 %s6209_s19, 4  ;;  %s439_s20 = sshll.u32 %s6210_s15, 4  ;;  %s546_s26 = int_to_ptr.vmem [resolvable:$true] %s545_s26  ;;  %s6499_s20 = int_to_ptr.vmem [resolvable:$true] %s439_s20 }
  0xbf   : > { %s5836_s29 = scalar_lea.hbm %s7804_s13, 4096 }
  0xc0   : > { %p5837_p4 = scmp.ne.s32.totalorder %s7804_s13, %s5836_s29  ;;  %p5843_p1 = scmp.lt.u32.totalorder %s5836_s29, %s7804_s13 }
  0xc2   : > { %p5839_p7 = pnand %p5837_p4, %p6373_p11 }
  0xc4   : > { %p5840_p0 = pneg %p5839_p7 }
  0xc6   : > { %p5845_p2 = pnand %p5843_p1, %p5840_p0 }
  0xc8   : > { %5848 = shalt.err (!%p5845_p2)
}
  0xc9   : > { %s5849_s30 = scalar_lea.vmem %s546_s26, 4096  ;;  %p5857_p10 = scmp.lt.s32.totalorder %s546_s26, %s546_s26 }
  0xca   : > { %p5850_p3 = scmp.ne.s32.totalorder %s546_s26, %s5849_s30  ;;  %p5858_p12 = scmp.lt.s32.totalorder %s5849_s30, %s5849_s30 }
  0xcc   : > { %p5852_p5 = pnand %p5850_p3, %p6373_p11  ;;  %p5859_p6 = por %p5858_p12, %p5857_p10 }
  0xce   : > { %p5853_p8 = pneg %p5852_p5 }
  0xd0   : > { %p5860_p13 = pnand %p5859_p6, %p5853_p8 }
  0xd2   : > { %5863 = shalt.err (!%p5860_p13)
}
  0xd3   : > { %5309 = dma.hbm_to_vmem [thread:$0]  (!%p6357_p9), %s7804_s13, 4096, %s546_s26, [#allocation26], %s6207_s21, %s6207_s21, %s6208_s22  }
  0xd4   : > { %s7853_s4 = sld [smem:[#allocation51_spill]] }
  0xda   : > { %s5864_s24 = scalar_lea.hbm %s7853_s4, 128 }
  0xdb   : > { %p5865_p4 = scmp.ne.s32.totalorder %s7853_s4, %s5864_s24  ;;  %p5871_p1 = scmp.lt.u32.totalorder %s5864_s24, %s7853_s4 }
  0xdd   : > { %p5867_p7 = pnand %p5865_p4, %p6373_p11 }
  0xdf   : > { %p5868_p0 = pneg %p5867_p7 }
  0xe1   : > { %p5873_p2 = pnand %p5871_p1, %p5868_p0 }
  0xe3   : > { %5876 = shalt.err (!%p5873_p2)
}
  0xe4   : > { %s5877_s26 = scalar_lea.vmem %s6499_s20, 128  ;;  %p5885_p10 = scmp.lt.s32.totalorder %s6499_s20, %s6499_s20 }
  0xe5   : > { %p5878_p3 = scmp.ne.s32.totalorder %s6499_s20, %s5877_s26  ;;  %p5886_p12 = scmp.lt.s32.totalorder %s5877_s26, %s5877_s26 }
  0xe7   : > { %p5880_p5 = pnand %p5878_p3, %p6373_p11  ;;  %p5887_p6 = por %p5886_p12, %p5885_p10 }
  0xe9   : > { %p5881_p8 = pneg %p5880_p5 }
  0xeb   : > { %p5888_p13 = pnand %p5887_p6, %p5881_p8 }
  0xed   : > { %5891 = shalt.err (!%p5888_p13)
}
  0xee   : > { %5282 = dma.hbm_to_vmem [thread:$0]  (!%p6357_p9), %s7853_s4, 128, %s6499_s20, [#allocation10]  }
  0xef   : > { %s6211_s0 = smov [#allocation15]   ;;  %s6212_s15 = smov [#allocation18]  }
  0xf0   : > { %s460_s19 = sshll.u32 %s6211_s0, 4  ;;  %s485_s24 = sshll.u32 %s6212_s15, 4  ;;  %s461_s19 = int_to_ptr.vmem [resolvable:$true] %s460_s19  ;;  %s6545_s24 = int_to_ptr.vmem [resolvable:$true] %s485_s24 }
  0xf1   : > { %s7854_s6 = sld [smem:[#allocation53_spill]] }
  0xf7   : > { %s5892_s16 = scalar_lea.hbm %s7854_s6, 1024 }
  0xf8   : > { %p5893_p4 = scmp.ne.s32.totalorder %s7854_s6, %s5892_s16  ;;  %p5899_p1 = scmp.lt.u32.totalorder %s5892_s16, %s7854_s6 }
  0xfa   : > { %p5895_p7 = pnand %p5893_p4, %p6373_p11 }
  0xfc   : > { %p5896_p0 = pneg %p5895_p7 }
  0xfe   : > { %p5901_p2 = pnand %p5899_p1, %p5896_p0 }
 0x100   : > { %5904 = shalt.err (!%p5901_p2)
}
 0x101   : > { %s5905_s1 = scalar_lea.vmem %s461_s19, 1024  ;;  %p5913_p10 = scmp.lt.s32.totalorder %s461_s19, %s461_s19 }
 0x102   : > { %p5906_p3 = scmp.ne.s32.totalorder %s461_s19, %s5905_s1  ;;  %p5914_p12 = scmp.lt.s32.totalorder %s5905_s1, %s5905_s1 }
 0x104   : > { %p5908_p5 = pnand %p5906_p3, %p6373_p11  ;;  %p5915_p6 = por %p5914_p12, %p5913_p10 }
 0x106   : > { %p5909_p8 = pneg %p5908_p5 }
 0x108   : > { %p5916_p13 = pnand %p5915_p6, %p5909_p8 }
 0x10a   : > { %5919 = shalt.err (!%p5916_p13)
}
 0x10b   : > { %s7855_s0 = smov 4   ;;  %s5920_s3 = scalar_lea.hbm %s7799_s8, 16 }
 0x10c   : > { %5288 = dma.hbm_to_vmem [thread:$0]  (!%p6357_p9), %s7854_s6, 1024, %s461_s19, [#allocation14], %s7852_s28, %s7852_s28, %s7855_s0  }
 0x10d   : > { %p5921_p4 = scmp.ne.s32.totalorder %s7799_s8, %s5920_s3  ;;  %p5927_p1 = scmp.lt.u32.totalorder %s5920_s3, %s7799_s8 }
 0x10f   : > { %p5923_p7 = pnand %p5921_p4, %p6373_p11 }
 0x111   : > { %p5924_p0 = pneg %p5923_p7 }
 0x113   : > { %p5929_p2 = pnand %p5927_p1, %p5924_p0 }
 0x115   : > { %5932 = shalt.err (!%p5929_p2)
}
 0x116   : > { %s5933_s28 = scalar_lea.vmem %s6545_s24, 16  ;;  %s5940_s19 = scalar_lea.vmem %s6545_s24, 32 }
 0x117   : > { %p5934_p3 = scmp.ne.s32.totalorder %s6545_s24, %s5933_s28  ;;  %p5941_p10 = scmp.lt.s32.totalorder %s6545_s24, %s6545_s24 }
 0x118   : > { %p5942_p12 = scmp.lt.s32.totalorder %s5940_s19, %s5933_s28 }
 0x119   : > { %p5936_p5 = pnand %p5934_p3, %p6373_p11 }
 0x11a   : > { %p5943_p6 = por %p5942_p12, %p5941_p10 }
 0x11b   : > { %p5937_p8 = pneg %p5936_p5 }
 0x11d   : > { %p5944_p13 = pnand %p5943_p6, %p5937_p8 }
 0x11f   : > { %5947 = shalt.err (!%p5944_p13)
}
 0x120   : > { %5294 = dma.hbm_to_vmem [thread:$0]  (!%p6357_p9), %s7799_s8, 16, %s6545_s24, [#allocation17]  }
 0x121   : > { %s6213_s27 = smov [#allocation21]   ;;  %s6214_s16 = smov [#allocation24]  }
 0x122   : > { %s509_s29 = sshll.u32 %s6213_s27, 4  ;;  %s532_s3 = sshll.u32 %s6214_s16, 4  ;;  %s510_s29 = int_to_ptr.vmem [resolvable:$true] %s509_s29  ;;  %s6592_s3 = int_to_ptr.vmem [resolvable:$true] %s532_s3 }
 0x123   : > { %s5948_s20 = scalar_lea.hbm %s7801_s10, 16 }
 0x124   : > { %p5949_p4 = scmp.ne.s32.totalorder %s7801_s10, %s5948_s20  ;;  %p5955_p1 = scmp.lt.u32.totalorder %s5948_s20, %s7801_s10 }
 0x126   : > { %p5951_p7 = pnand %p5949_p4, %p6373_p11 }
 0x128   : > { %p5952_p0 = pneg %p5951_p7 }
 0x12a   : > { %p5957_p2 = pnand %p5955_p1, %p5952_p0 }
 0x12c   : > { %5960 = shalt.err (!%p5957_p2)
}
 0x12d   : > { %s5961_s0 = scalar_lea.vmem %s510_s29, 16  ;;  %s5968_s15 = scalar_lea.vmem %s510_s29, 32 }
 0x12e   : > { %p5962_p3 = scmp.ne.s32.totalorder %s510_s29, %s5961_s0  ;;  %p5969_p10 = scmp.lt.s32.totalorder %s510_s29, %s510_s29 }
 0x12f   : > { %p5970_p12 = scmp.lt.s32.totalorder %s5968_s15, %s5961_s0 }
 0x130   : > { %p5964_p5 = pnand %p5962_p3, %p6373_p11 }
 0x131   : > { %p5971_p6 = por %p5970_p12, %p5969_p10 }
 0x132   : > { %p5965_p8 = pneg %p5964_p5 }
 0x134   : > { %p5972_p13 = pnand %p5971_p6, %p5965_p8 }
 0x136   : > { %5975 = shalt.err (!%p5972_p13)
}
 0x137   : > { %5300 = dma.hbm_to_vmem [thread:$0]  (!%p6357_p9), %s7801_s10, 16, %s510_s29, [#allocation20]  }
 0x138   : > { %s5976_s20 = scalar_lea.hbm %s7803_s12, 4096 }
 0x139   : > { %p5977_p4 = scmp.ne.s32.totalorder %s7803_s12, %s5976_s20  ;;  %p5983_p1 = scmp.lt.u32.totalorder %s5976_s20, %s7803_s12 }
 0x13b   : > { %p5979_p7 = pnand %p5977_p4, %p6373_p11 }
 0x13d   : > { %p5980_p0 = pneg %p5979_p7 }
 0x13f   : > { %p5985_p2 = pnand %p5983_p1, %p5980_p0 }
 0x141   : > { %5988 = shalt.err (!%p5985_p2)
}
 0x142   : > { %s5989_s29 = scalar_lea.vmem %s6592_s3, 4096  ;;  %p5997_p10 = scmp.lt.s32.totalorder %s6592_s3, %s6592_s3 }
 0x143   : > { %p5990_p3 = scmp.ne.s32.totalorder %s6592_s3, %s5989_s29  ;;  %p5998_p12 = scmp.lt.s32.totalorder %s5989_s29, %s5989_s29 }
 0x145   : > { %p5992_p5 = pnand %p5990_p3, %p6373_p11  ;;  %p5999_p6 = por %p5998_p12, %p5997_p10 }
 0x147   : > { %p5993_p8 = pneg %p5992_p5 }
 0x149   : > { %p6000_p13 = pnand %p5999_p6, %p5993_p8 }
 0x14b   : > { %6003 = shalt.err (!%p6000_p13)
}
 0x14c   : > { %5306 = dma.hbm_to_vmem [thread:$0]  (!%p6357_p9), %s7803_s12, 4096, %s6592_s3, [#allocation23], %s6207_s21, %s6207_s21, %s6208_s22  }
 0x14d   : > { %s6215_s27 = smov [#allocation27]   ;;  %s6004_s20 = scalar_lea.hbm %s7805_s14, 64 }
 0x14e   : > { %s559_s16 = sshll.u32 %s6215_s27, 4  ;;  %p6005_p4 = scmp.ne.s32.totalorder %s7805_s14, %s6004_s20  ;;  %s560_s16 = int_to_ptr.vmem [resolvable:$true] %s559_s16 }
 0x14f   : > { %p6011_p1 = scmp.lt.u32.totalorder %s6004_s20, %s7805_s14 }
 0x150   : > { %p6007_p7 = pnand %p6005_p4, %p6373_p11 }
 0x152   : > { %p6008_p0 = pneg %p6007_p7 }
 0x154   : > { %p6013_p2 = pnand %p6011_p1, %p6008_p0 }
 0x156   : > { %6016 = shalt.err (!%p6013_p2)
}
 0x157   : > { %s6017_s21 = scalar_lea.vmem %s560_s16, 64  ;;  %p6025_p10 = scmp.lt.s32.totalorder %s560_s16, %s560_s16 }
 0x158   : > { %p6018_p3 = scmp.ne.s32.totalorder %s560_s16, %s6017_s21  ;;  %p6026_p12 = scmp.lt.s32.totalorder %s6017_s21, %s6017_s21 }
 0x15a   : > { %p6020_p5 = pnand %p6018_p3, %p6373_p11  ;;  %p6027_p6 = por %p6026_p12, %p6025_p10 }
 0x15c   : > { %p6021_p8 = pneg %p6020_p5 }
 0x15e   : > { %p6028_p13 = pnand %p6027_p6, %p6021_p8 }
 0x160   : > { %6031 = shalt.err (!%p6028_p13)
}
 0x161   : > { %s7856_s29 = sld [smem:[#allocation44_spill]]  ;;  %s7857_s23 = sld [smem:[#allocation43_spill]] }
 0x162   : > { %s7858_s0 = sld [smem:[#allocation45_spill]]  ;;  %s4699_s15 = sadd.s32 4294967294, %s6194_s18  }
 0x163   : > { %5312 = dma.hbm_to_vmem [thread:$0]  (!%p6357_p9), %s7805_s14, 64, %s560_s16, [#allocation26]  }
 0x164   : > { %s6658_s25 = sadd.s32 1, %s6194_s18   ;;  %s93_s27 = sadd.s32 1, %s6190_s17 }
 0x165   : > { %s90_s26 = ssub.s32 %s6194_s18, %s6658_s25  ;;  %p101_p7 = scmp.eq.s32.totalorder %s6194_s18, 0 }
 0x166   : > { %p91_p4 = scmp.eq.s32.totalorder %s90_s26, 0  ;;  %p367_p8 = scmp.eq.s32.totalorder %s4699_s15, 6 }
 0x167   : > { %p100_p11 = scmp.ne.s32.totalorder %s6190_s17, %s7856_s29  ;;  %p106_p0 = scmp.ne.s32.totalorder %s7856_s29, %s7857_s23 }
 0x168   : > { %p361_p1 = scmp.eq.s32.totalorder %s7858_s0, 6  ;;  %p7859_p3 = scmp.eq.s32.totalorder %s7858_s0, 0 }
 0x169   : > { %s6670_s30 = scalar_select %p91_p4, %s6190_s17, %s93_s27  }
 0x16a   : > { %p102_p2 = por %p101_p7, %p100_p11  ;;  %p6674_p5 = por %p7859_p3, %p106_p0 }
 0x16b   : > { %p6678_p9 = por %p361_p1, %p100_p11  ;;  %p5337_p10 = scmp.lt.s32.totalorder %s6194_s18, 7 }
 0x16c   : > { %s570_s1 = sand.u32 1, %s6194_s18   ;;  %p6684_p12 = por %p367_p8, %p106_p0 }
 0x16d   : > { %s7861_s20 = scalar_select %p6678_p9, 1, 0 }
 0x16e   : > { %s7862_s28 = scalar_select %p6684_p12, 1, 0 }
 0x16f   : > { %s572_s19 = sand.u32 1, %s6190_s17   ;;  %s4716_s24 = sshll.u32 %s6194_s18, 6 }
 0x170   : > { %s4715_s21 = sshll.u32 %s572_s19, 2  ;;  %s7863_s29 = sld [smem:[#allocation50_spill]] }
 0x171   : > { %p6695_p6 = pnand %p5337_p10, %p102_p2  ;;  %s574_s15 = scalar_lea.vmem [#allocation11], %s4715_s21 }
 0x172   : > { %s581_s27 = sshll.u32 %s574_s15, 4  ;;  %s571_s26 = scalar_lea.sflag [#allocation7], %s570_s1  ;;  %s6699_s27 = int_to_ptr.vmem [resolvable:$true] %s581_s27 }
 0x173   : > { %p6034_p11 = pneg %p6695_p6 }
 0x176   : > { %s6693_s23 = scalar_lea.hbm %s7863_s29, %s4716_s24  ;;  %s6037_s3 = scalar_lea.hbm %s7863_s29, 448 }
 0x177   : > { %s6032_s19 = scalar_lea.hbm %s6693_s23, 64  ;;  %p6038_p0 = scmp.lt.u32.totalorder %s6693_s23, %s7863_s29 }
 0x178   : > { %p6033_p13 = scmp.ne.s32.totalorder %s6693_s23, %s6032_s19  ;;  %p6039_p1 = scmp.lt.u32.totalorder %s6037_s3, %s6032_s19 }
 0x179   : > { %p6041_p3 = scmp.lt.u32.totalorder %s6032_s19, %s6693_s23 }
 0x17a   : > { %p6035_p4 = pnand %p6034_p11, %p6033_p13  ;;  %p6040_p2 = por %p6039_p1, %p6038_p0 }
 0x17c   : > { %p6036_p7 = pneg %p6035_p4  ;;  %p6042_p8 = por %p6041_p3, %p6040_p2 }
 0x17e   : > { %p6043_p10 = pnand %p6042_p8, %p6036_p7 }
 0x180   : > { %6046 = shalt.err (!%p6043_p10)
}
 0x181   : > { %s6047_s1 = scalar_lea.vmem %s6699_s27, 64  ;;  %s6216_s21 = smov [#allocation11]  }
 0x182   : > { %p6048_p13 = scmp.ne.s32.totalorder %s6699_s27, %s6047_s1  ;;  %s6052_s15 = sshll.u32 %s6216_s21, 4  ;;  %s6053_s15 = int_to_ptr.vmem [resolvable:$false] %s6052_s15 }
 0x183   : > { %s6054_s2 = scalar_lea.vmem %s6053_s15, 128  ;;  %p6055_p9 = scmp.lt.s32.totalorder %s6699_s27, %s6053_s15 }
 0x184   : > { %p6050_p4 = pnand %p6048_p13, %p6034_p11  ;;  %p6056_p0 = scmp.lt.s32.totalorder %s6054_s2, %s6047_s1 }
 0x186   : > { %p6051_p12 = pneg %p6050_p4  ;;  %p6057_p1 = por %p6056_p0, %p6055_p9 }
 0x188   : > { %p6058_p2 = pnand %p6057_p1, %p6051_p12 }
 0x18a   : > { %6061 = shalt.err (!%p6058_p2)
}
 0x18b   : > { %5316 = dma.hbm_to_vmem [thread:$0]  (!%p6695_p6), %s6693_s23, 64, %s6699_s27, %s571_s26  }
 0x18c   : > { %s7865_s4 = sld [smem:[#allocation46_spill]] }
 0x192   : > { %p7866_p7 = scmp.ne.s32.totalorder %s7865_s4, 0 }
 0x193   : > { %s7867_s19 = sld [smem:[#allocation45_spill]] (!%p7866_p7) }
 0x194   : > { %590 = sbr.rel (%p7866_p7) target bundleno = 2144 (0x860), region = 76 }
 0x199   : > { %p7868_p11 = scmp.eq.s32.totalorder (!%p7866_p7), %s7867_s19, 0 }
 0x19b   : > { %6137 = dma.done.wait (%p7868_p11), [#allocation7], 16384   ;;  %p7869_p3 = pmov %p7868_p11 }
 0x19d   : > { %6139 = vsyncadd (%p7869_p3), [#allocation7], 4294950912  ;;  %p7870_p8 = pmov %p7869_p3 }
 0x19e   : > { %p7871_p9 = pmov %p7869_p3 }
 0x19f   : > { %6141 = dma.done.wait (%p7870_p8), [#allocation10], 8192  }
 0x1a0   : > { %6143 = vsyncadd (%p7871_p9), [#allocation10], 4294959104  ;;  %s7872_s0 = sld [smem:[#allocation44_spill]]  ;;  %s600_s24 = sand.u32 1, %s7867_s19  }
 0x1a1   : > { %s601_s26 = scalar_lea.sflag [#allocation7], %s600_s24 }
 0x1a6   : > { %s6738_s23 = sand.u32 1, %s7872_s0  }
 0x1a7   : > { %s4720_s27 = sshll.u32 %s6738_s23, 2 }
 0x1a8   : > { %s6741_s22 = scalar_lea.vmem [#allocation11], %s4720_s27 }
 0x1a9   : > { %6145 = dma.done.wait (%p6674_p5), %s601_s26, 64  }
 0x1aa   : > { %6147 = vsyncadd (%p6674_p5), %s601_s26, 4294967232  ;;  %p7873_p12 = pmov %p7869_p3 }
 0x1ab   : > { %p7874_p6 = pmov %p7869_p3 }
 0x1ac   : > { %6149 = dma.done.wait (%p7873_p12), [#allocation10], 128  }
 0x1ad   : > { %6151 = vsyncadd (%p7874_p6), [#allocation10], 4294967168  ;;  %p7875_p10 = pmov %p7869_p3 }
 0x1ae   : > { %p7876_p13 = pmov %p7869_p3 }
 0x1af   : > { %6153 = dma.done.wait (%p7875_p10), [#allocation14], 1152  }
 0x1b0   : > { %6155 = vsyncadd (%p7876_p13), [#allocation14], 4294966144  ;;  %p7877_p4 = pmov %p7869_p3 }
 0x1b1   : > { %p7878_p0 = pmov %p7869_p3 }
 0x1b2   : > { %6157 = dma.done.wait (%p7877_p4), [#allocation17], 32  }
 0x1b3   : > { %6159 = vsyncadd (%p7878_p0), [#allocation17], 4294967264  ;;  %p7879_p5 = pmov %p7878_p0 }
 0x1b4   : > { %p7880_p1 = pmov %p7878_p0 }
 0x1b5   : > { %6161 = dma.done.wait (%p7879_p5), [#allocation20], 1040  }
 0x1b6   : > { %6163 = vsyncadd (%p7880_p1), [#allocation20], 4294966256  ;;  %p7881_p2 = pmov %p7878_p0 }
 0x1b7   : > { %p7882_p7 = pmov %p7878_p0 }
 0x1b8   : > { %6165 = dma.done.wait (%p7881_p2), [#allocation23], 8192  }
 0x1b9   : > { %6167 = vsyncadd (%p7882_p7), [#allocation23], 4294959104  ;;  %p7883_p11 = pmov %p7878_p0 }
 0x1ba   : > { %p7884_p3 = pmov %p7878_p0 }
 0x1bb   : > { %6169 = dma.done.wait (%p7883_p11), [#allocation26], 4160  }
 0x1bc   : > { %6171 = vsyncadd (%p7884_p3), [#allocation26], 4294963136  ;;  %s4732_s16 = sshll.u32 %s6738_s23, 3  ;;  %p7885_p8 = scmp.ne.s32.totalorder %s7867_s19, 0 }
 0x1bd   : > { %s6772_s3 = scalar_lea.vmem [#allocation28], %s4732_s16  ;;  %s6774_s1 = scalar_lea.vmem [#allocation29], %s4732_s16  ;;  %v705_v0 = vld [vmem:[#allocation12] sm:$0xff] (!%p7885_p8)  ;;  %v707_v1 = vld [vmem:[#allocation13] sm:$0xff] (!%p7885_p8) }
 0x1be   : > { %704 = sbr.rel (%p7885_p8) target bundleno = 453 (0x1c5), region = 136  ;;  %706 = vst [vmem:[#allocation2] sm:$0xff] (!%p7885_p8), %v705_v0  ;;  %708 = vst [vmem:[#allocation3] sm:$0xff] (!%p7885_p8), %v707_v1 }
 0x1c5 PF: > { %v5408_v2 = vld [vmem:[#allocation15] sm:$0xff]   ;;  %v6217_v3 = vmov 0.0   ;;  %v5409_v4 = vld [vmem:[#allocation15 + $0x8] sm:$0xff]   ;;  %vm7824_vm0 = vmmov 0   ;;  %v5410_v5 = vld [vmem:[#allocation15 + $0x10] sm:$0xff]   ;;  %v956_v15 = vlaneseq  ;;  %vm1828_vm1 = vcmask 130112  }
 0x1c6   : > { %5015 = vmatprep.subr.bf16.mxu0 %v6217_v3  ;;  %5035 = vmatprep.subr.bf16.mxu1 %v6217_v3  ;;  %v5411_v6 = vld [vmem:[#allocation15 + $0x18] sm:$0xff]   ;;  %v5412_v7 = vld [vmem:[#allocation15 + $0x20] sm:$0xff]   ;;  %v5413_v8 = vld [vmem:[#allocation15 + $0x28] sm:$0xff]   ;;  %v6219_v13 = vmov 1966171168   ;;  %vm7828_vm2 = vcmask 195712  }
 0x1c7   : > { %5016 = vmatpush3.bf16.msra.mxu0 %v5408_v2  ;;  %5031 = vmatprep.mubr.msk.bf16.mxu0 %vm7824_vm0, %v6217_v3  ;;  %v5414_v9 = vld [vmem:[#allocation15 + $0x30] sm:$0xff]   ;;  %v5415_v10 = vld [vmem:[#allocation15 + $0x38] sm:$0xff]   ;;  %v954_v14 = vunpack.c.l.s4 %v6219_v13  ;;  %v6798_v17 = vshrl.u32 %v956_v15, 7  ;;  %v4735_v18 = vld [vmem:[#allocation16] ss:$0 sm:$0xff]  ;;  %vm1842_vm3 = vcmask 261312  }
 0x1c8   : > { %5017 = vmatprep.subr.bf16.mxu0 %v6217_v3  ;;  %5051 = vmatprep.mubr.msk.bf16.mxu1 %vm7824_vm0, %v6217_v3  ;;  %v709_v11 = vld [vmem:[#allocation2] sm:$0xff]  ;;  %v827_v28 = vld [vmem:[#allocation6 + $0x20] sm:$0xff]  ;;  %v828_v31 = vld [vmem:[#allocation6 + $0x28] sm:$0xff]  ;;  %vm1849_vm4 = vcmask 326912   ;;  %vm1856_vm5 = vcmask 392512   ;;  %vm1863_vm6 = vcmask 458112  }
 0x1c9   : > { %v6791_v12 = vpack.c.bf16 %v709_v11, %v709_v11  ;;  %v955_v16 = vunpack.c.0.s8 %v954_v14  ;;  %v6810_v26 = vsub.s32 0, %v6798_v17  ;;  %v823_v29 = vld [vmem:[#allocation6] sm:$0xff]  ;;  %v824_v32 = vld [vmem:[#allocation6 + $0x8] sm:$0xff]  ;;  %v825_v36 = vld [vmem:[#allocation6 + $0x10] sm:$0xff]  ;;  %vm1870_vm7 = vcmask 523712   ;;  %s7887_s21 = sld [smem:[#allocation45_spill]] }
 0x1ca   : > { %v831_v35 = vld [vmem:[#allocation6 + $0x40] sm:$0xff]  ;;  %v6819_v37 = vld [vmem:[#allocation18] ss:$0 sm:$0xff]  ;;  %v832_v48 = vld [vmem:[#allocation6 + $0x48] sm:$0xff]  ;;  %vm1877_vm8 = vcmask 589312   ;;  %vm1884_vm9 = vcmask 654912  }
 0x1cb   : > { %5018 = vmatpush3.bf16.msra.mxu0 %v5409_v4  ;;  %v6801_v19 = vsub.s32 %v955_v16, %v6798_v17  ;;  %v826_v49 = vld [vmem:[#allocation6 + $0x18] sm:$0xff]  ;;  %v833_v56 = vld [vmem:[#allocation6 + $0x50] sm:$0xff]  ;;  %v835_v14 = vld [vmem:[#allocation6 + $0x60] sm:$0xff]  ;;  %vm1891_vm10 = vcmask 720512   ;;  %vm1898_vm11 = vcmask 786112   ;;  %vm1905_vm12 = vcmask 851712  }
 0x1cc   : > { %5019 = vmatprep.subr.bf16.mxu0 %v6217_v3  ;;  %v829_v57 = vld [vmem:[#allocation6 + $0x30] sm:$0xff]  ;;  %v834_v1 = vld [vmem:[#allocation6 + $0x58] sm:$0xff]  ;;  %v855_v16 = vld [vmem:[#allocation6 + $0x100] sm:$0xff]  ;;  %vm1912_vm13 = vcmask 917312   ;;  %vm1919_vm14 = vcmask 982912   ;;  %vm1926_vm15 = vcmask 1048512  }
 0x1cd   : > { %v830_v2 = vld [vmem:[#allocation6 + $0x38] sm:$0xff]  ;;  %s7894_s0 = sld [smem:[#allocation55_spill]]  ;;  %s4474_s26 = sshll.u32 %s6774_s1, 4  ;;  %s4475_s26 = int_to_ptr.vmem [resolvable:$true] %s4474_s26 }
 0x1ce   : > { %s6062_s16 = scalar_lea.vmem %s4475_s26, 128  ;;  %p7896_p12 = scmp.ne.s32.totalorder %s7861_s20, 0 }
 0x1cf   : > { %5020 = vmatpush3.bf16.msra.mxu0 %v5410_v5  ;;  %s4423_s15 = sld [smem:[#allocation5 + %s7887_s21]]  ;;  %s4921_s2 = sshll.u32 %s7887_s21, 7 }
 0x1d0   : > { %5021 = vmatprep.subr.bf16.mxu0 %v6217_v3  ;;  %p6063_p9 = scmp.ne.s32.totalorder %s4475_s26, %s6062_s16 }
 0x1d2   : > { %p6064_p6 = pnand %p6063_p9, %p7896_p12 }
 0x1d3   : > { %5022 = vmatpush3.bf16.msra.mxu0 %v5411_v6  ;;  %s7895_s24 = smov %s7894_s0  ;;  %s7713_s27 = scalar_lea.hbm %s7894_s0, %s4921_s2 }
 0x1d4   : > { %5023 = vmatprep.subr.bf16.mxu0 %v6217_v3  ;;  %p6065_p10 = pneg %p6064_p6 }
 0x1d7   : > { %5024 = vmatpush3.bf16.msra.mxu0 %v5412_v7 }
 0x1d8   : > { %5025 = vmatprep.subr.bf16.mxu0 %v6217_v3 }
 0x1db   : > { %5026 = vmatpush3.bf16.msra.mxu0 %v5413_v8 }
 0x1dc   : > { %5027 = vmatprep.subr.bf16.mxu0 %v6217_v3 }
 0x1df   : > { %5028 = vmatpush3.bf16.msra.mxu0 %v5414_v9 }
 0x1e0   : > { %5029 = vmatprep.subr.bf16.mxu0 %v6217_v3 }
 0x1e3   : > { %5030 = vmatpush3.bf16.msra.mxu0 %v5415_v10 }
 0x1e4   : > { %5055 = vmatprep.subr.bf16.mxu0 %v6217_v3 }
 0x1e6   : > { %5032 = vmatmul.mubr.bf16.vlgmr.msra.gmra.mrb[0].mxu0 %v6791_v12 }
 0x1e7   : > { %5071 = vmatprep.mubr.msk.bf16.mxu0 %vm7824_vm0, %v6217_v3  ;;  %vm7826_vm0 = vcmask 1041409  }
 0x2b9   : > { %v817_v20 = vpop.f32.mrb[0].mxu0 }
 0x2ba   : > { %v6803_v21 = vadd.f32 %v4735_v18, %v817_v20  ;;  %v5033_v22 = vpop.f32.mrb[1].mxu0 }
 0x2bb   : > { %v820_v23 = vpop.f32.mrb[2].mxu0 }
 0x2bc   : > { %v6807_v24 = vrot.slane %v6803_v21, %v6801_v19  ;;  %v5034_v25 = vpop.f32.mrb[3].mxu0  ;;  %v952_v4 = vcombine.high %v6803_v21, %v6803_v21 }
 0x2be   : > { %v975_v27 = vrot.slane %v6807_v24, %v6801_v19  ;;  %v967_v5 = vcombine.high %v6807_v24, %v6807_v24  ;;  %v6847_v18 = vrot.slane %v952_v4, %v6801_v19 }
 0x2c0   : > { %v6815_v30 = vrot.slane %v975_v27, %v6810_v26  ;;  %v997_v58 = vcombine.high %v975_v27, %v975_v27  ;;  %v6850_v20 = vrot.slane %v967_v5, %v6801_v19 }
 0x2c2   : > { %v1045_v33 = vadd.f32 %v6815_v30, %v827_v28  ;;  %v1041_v34 = vadd.f32 %v6815_v30, %v823_v29  ;;  %v1046_v40 = vadd.f32 %v6815_v30, %v828_v31  ;;  %v1042_v41 = vadd.f32 %v6815_v30, %v824_v32  ;;  %v836_v28 = vld [vmem:[#allocation6 + $0x68] sm:$0xff]  ;;  %v857_v29 = vld [vmem:[#allocation6 + $0x110] sm:$0xff] }
 0x2c3   : > { %v1049_v42 = vadd.f32 %v6815_v30, %v831_v35  ;;  %v1043_v43 = vadd.f32 %v6815_v30, %v825_v36  ;;  %v1050_v51 = vadd.f32 %v6815_v30, %v832_v48  ;;  %v1044_v55 = vadd.f32 %v6815_v30, %v826_v49  ;;  %v838_v49 = vld [vmem:[#allocation6 + $0x78] sm:$0xff] }
 0x2c4   : > { %v1173_v38 = vmax.f32 %v1045_v33, 0.0  ;;  %v1169_v39 = vmax.f32 %v1041_v34, 0.0  ;;  %v1174_v46 = vmax.f32 %v1046_v40, 0.0  ;;  %v1170_v47 = vmax.f32 %v1042_v41, 0.0  ;;  %v837_v40 = vld [vmem:[#allocation6 + $0x70] sm:$0xff]  ;;  %v843_v41 = vld [vmem:[#allocation6 + $0xa0] sm:$0xff] }
 0x2c5   : > { %v1177_v50 = vmax.f32 %v1049_v42, 0.0  ;;  %v1171_v54 = vmax.f32 %v1043_v43, 0.0  ;;  %v1178_v59 = vmax.f32 %v1050_v51, 0.0  ;;  %v1051_v60 = vadd.f32 %v6815_v30, %v833_v56 }
 0x2c6   : > { %v1308_v44 = vmul.f32 %v6819_v37, %v1173_v38  ;;  %v1304_v45 = vmul.f32 %v6819_v37, %v1169_v39  ;;  %v1309_v52 = vmul.f32 %v6819_v37, %v1174_v46  ;;  %v1305_v53 = vmul.f32 %v6819_v37, %v1170_v47 }
 0x2c7   : > { %v1312_v61 = vmul.f32 %v6819_v37, %v1177_v50  ;;  %v1306_v62 = vmul.f32 %v6819_v37, %v1171_v54  ;;  %v1172_v63 = vmax.f32 %v1044_v55, 0.0  ;;  %v1047_v0 = vadd.f32 %v6815_v30, %v829_v57  ;;  %v888_v50 = vld [vmem:[#allocation6 + $0x208] sm:$0xff]  ;;  %v839_v57 = vld [vmem:[#allocation6 + $0x80] sm:$0xff] }
 0x2c8   : > { %1440 = vadd.xlane.f32.xlu1 %v1308_v44  ;;  %1432 = vadd.xlane.f32.xlu0 %v1304_v45  ;;  %v6840_v6 = vrot.slane %v997_v58, %v6810_v26  ;;  %v1313_v7 = vmul.f32 %v6819_v37, %v1178_v59  ;;  %v1179_v8 = vmax.f32 %v1051_v60, 0.0  ;;  %v1052_v11 = vadd.f32 %v6815_v30, %v834_v1  ;;  %v844_v58 = vld [vmem:[#allocation6 + $0xa8] sm:$0xff] }
 0x2c9   : > { %v1307_v9 = vmul.f32 %v6819_v37, %v1172_v63  ;;  %v1175_v10 = vmax.f32 %v1047_v0, 0.0  ;;  %v1048_v13 = vadd.f32 %v6815_v30, %v830_v2  ;;  %v1053_v21 = vadd.f32 %v6815_v30, %v835_v14  ;;  %v840_v1 = vld [vmem:[#allocation6 + $0x88] sm:$0xff] }
 0x2ca   : > { %v1073_v22 = vadd.f32 %v6840_v6, %v855_v16  ;;  %v1314_v23 = vmul.f32 %v6819_v37, %v1179_v8  ;;  %v1180_v25 = vmax.f32 %v1052_v11, 0.0  ;;  %v6858_v31 = vrot.slane %v6847_v18, %v6801_v19  ;;  %v860_v2 = vld [vmem:[#allocation6 + $0x128] sm:$0xff]  ;;  %v890_v11 = vld [vmem:[#allocation6 + $0x218] sm:$0xff] }
 0x2cb   : > { %v1310_v24 = vmul.f32 %v6819_v37, %v1175_v10  ;;  %v1176_v27 = vmax.f32 %v1048_v13, 0.0  ;;  %v6862_v32 = vrot.slane %v6850_v20, %v6810_v26  ;;  %v1181_v33 = vmax.f32 %v1053_v21, 0.0  ;;  %v841_v10 = vld [vmem:[#allocation6 + $0x90] sm:$0xff] }
 0x2cc   : > { %1442 = vadd.xlane.f32.xlu1 %v1309_v52  ;;  %1434 = vadd.xlane.f32.xlu0 %v1305_v53  ;;  %v1054_v34 = vadd.f32 %v6815_v30, %v836_v28  ;;  %v1315_v35 = vmul.f32 %v6819_v37, %v1180_v25  ;;  %v1201_v38 = vmax.f32 %v1073_v22, 0.0  ;;  %v1075_v39 = vadd.f32 %v6840_v6, %v857_v29  ;;  %v861_v25 = vld [vmem:[#allocation6 + $0x130] sm:$0xff] }
 0x2cd   : > { %v1311_v36 = vmul.f32 %v6819_v37, %v1176_v27  ;;  %v6870_v42 = vrot.slane %v6858_v31, %v6810_v26  ;;  %v1055_v44 = vadd.f32 %v6815_v30, %v837_v40  ;;  %v1316_v45 = vmul.f32 %v6819_v37, %v1181_v33 }
 0x2ce   : > { %v1182_v43 = vmax.f32 %v1054_v34, 0.0  ;;  %v1336_v46 = vmul.f32 %v6819_v37, %v1201_v38  ;;  %v1203_v47 = vmax.f32 %v1075_v39, 0.0  ;;  %v1061_v48 = vadd.f32 %v6862_v32, %v843_v41  ;;  %v891_v38 = vld [vmem:[#allocation6 + $0x220] sm:$0xff] }
 0x2cf   : > { %v1183_v52 = vmax.f32 %v1055_v44, 0.0  ;;  %v1056_v55 = vadd.f32 %v6815_v30, %v838_v49  ;;  %v1106_v56 = vadd.f32 %v6870_v42, %v888_v50  ;;  %v1057_v59 = vadd.f32 %v6862_v32, %v839_v57 }
 0x2d0   : > { %1448 = vadd.xlane.f32.xlu1 %v1312_v61  ;;  %1436 = vadd.xlane.f32.xlu0 %v1306_v62  ;;  %v1317_v51 = vmul.f32 %v6819_v37, %v1182_v43  ;;  %v1338_v53 = vmul.f32 %v6819_v37, %v1203_v47  ;;  %v1189_v54 = vmax.f32 %v1061_v48, 0.0  ;;  %v1062_v60 = vadd.f32 %v6862_v32, %v844_v58  ;;  %v847_v47 = vld [vmem:[#allocation6 + $0xc0] sm:$0xff] }
 0x2d1   : > { %v1318_v61 = vmul.f32 %v6819_v37, %v1183_v52  ;;  %v1184_v63 = vmax.f32 %v1056_v55, 0.0  ;;  %v1234_v0 = vmax.f32 %v1106_v56, 0.0  ;;  %v1185_v30 = vmax.f32 %v1057_v59, 0.0  ;;  %v887_v55 = vld [vmem:[#allocation6 + $0x200] sm:$0xff] }
 0x2d2   : > { %v1324_v62 = vmul.f32 %v6819_v37, %v1189_v54  ;;  %v1058_v4 = vadd.f32 %v6862_v32, %v840_v1  ;;  %v1190_v8 = vmax.f32 %v1062_v60, 0.0  ;;  %v1059_v22 = vadd.f32 %v6862_v32, %v841_v10  ;;  %v848_v54 = vld [vmem:[#allocation6 + $0xc8] sm:$0xff] }
 0x2d3   : > { %v1319_v5 = vmul.f32 %v6819_v37, %v1184_v63  ;;  %v1320_v13 = vmul.f32 %v6819_v37, %v1185_v30  ;;  %v1109_v40 = vadd.f32 %v6870_v42, %v891_v38  ;;  %v1066_v60 = vadd.f32 %v6862_v32, %v848_v54  ;;  %v859_v63 = vld [vmem:[#allocation6 + $0x120] sm:$0xff] }
 0x2d4   : > { %1450 = vadd.xlane.f32.xlu1 %v1313_v7  ;;  %1438 = vadd.xlane.f32.xlu0 %v1307_v9  ;;  %v1369_v7 = vmul.f32 %v6819_v37, %v1234_v0  ;;  %v1078_v9 = vadd.f32 %v6840_v6, %v860_v2  ;;  %v1186_v14 = vmax.f32 %v1058_v4, 0.0  ;;  %v1325_v16 = vmul.f32 %v6819_v37, %v1190_v8  ;;  %v889_v8 = vld [vmem:[#allocation6 + $0x210] sm:$0xff] }
 0x2d5   : > { %v1187_v33 = vmax.f32 %v1059_v22, 0.0  ;;  %v1237_v52 = vmax.f32 %v1109_v40, 0.0  ;;  %v1194_v30 = vmax.f32 %v1066_v60, 0.0  ;;  %v1107_v10 = vadd.f32 %v6870_v42, %v889_v8  ;;  %v845_v22 = vld [vmem:[#allocation6 + $0xb0] sm:$0xff]  ;;  %v863_v60 = vld [vmem:[#allocation6 + $0x140] sm:$0xff] }
 0x2d6   : > { %v1206_v21 = vmax.f32 %v1078_v9, 0.0  ;;  %v1321_v27 = vmul.f32 %v6819_v37, %v1186_v14 }
 0x2d7   : > { %v1322_v41 = vmul.f32 %v6819_v37, %v1187_v33  ;;  %v1372_v58 = vmul.f32 %v6819_v37, %v1237_v52  ;;  %v852_v33 = vld [vmem:[#allocation6 + $0xe8] sm:$0xff] }
 0x2d8   : > { %1452 = vadd.xlane.f32.xlu1 %v1314_v23  ;;  %1444 = vadd.xlane.f32.xlu0 %v1310_v24  ;;  %v1108_v23 = vadd.f32 %v6870_v42, %v890_v11  ;;  %v856_v24 = vld [vmem:[#allocation6 + $0x108] sm:$0xff]  ;;  %v1341_v29 = vmul.f32 %v6819_v37, %v1206_v21  ;;  %v1329_v11 = vmul.f32 %v6819_v37, %v1194_v30  ;;  %v851_v21 = vld [vmem:[#allocation6 + $0xe0] sm:$0xff]  ;;  %v902_v30 = vld [vmem:[#allocation6 + $0x278] sm:$0xff] }
 0x2d9   : > { %v1074_v28 = vadd.f32 %v6840_v6, %v856_v24  ;;  %v1069_v24 = vadd.f32 %v6862_v32, %v851_v21  ;;  %v1070_v40 = vadd.f32 %v6862_v32, %v852_v33  ;;  %v892_v52 = vld [vmem:[#allocation6 + $0x228] sm:$0xff] }
 0x2da   : > { %v1236_v34 = vmax.f32 %v1108_v23, 0.0  ;;  %v1110_v54 = vadd.f32 %v6870_v42, %v892_v52  ;;  %v903_v52 = vld [vmem:[#allocation6 + $0x280] sm:$0xff] }
 0x2db   : > { %v1202_v44 = vmax.f32 %v1074_v28, 0.0  ;;  %v1235_v28 = vmax.f32 %v1107_v10, 0.0  ;;  %v1120_v10 = vadd.f32 %v6870_v42, %v902_v30  ;;  %v921_v30 = vld [vmem:[#allocation6 + $0x310] sm:$0xff] }
 0x2dc   : > { %1454 = vadd.xlane.f32.xlu1 %v1315_v35  ;;  %1446 = vadd.xlane.f32.xlu0 %v1311_v36  ;;  %v1079_v35 = vadd.f32 %v6840_v6, %v861_v25  ;;  %v842_v36 = vld [vmem:[#allocation6 + $0x98] sm:$0xff]  ;;  %v1371_v43 = vmul.f32 %v6819_v37, %v1236_v34 }
 0x2dd   : > { %v1060_v39 = vadd.f32 %v6862_v32, %v842_v36  ;;  %v1337_v50 = vmul.f32 %v6819_v37, %v1202_v44  ;;  %v846_v34 = vld [vmem:[#allocation6 + $0xb8] sm:$0xff]  ;;  %v1197_v36 = vmax.f32 %v1069_v24, 0.0  ;;  %v1370_v38 = vmul.f32 %v6819_v37, %v1235_v28  ;;  %v873_v28 = vld [vmem:[#allocation6 + $0x190] sm:$0xff] }
 0x2de   : > { %v862_v44 = vld [vmem:[#allocation6 + $0x138] sm:$0xff] }
 0x2df   : > { %v1188_v48 = vmax.f32 %v1060_v39, 0.0 }
 0x2e0   : > { %1456 = vadd.xlane.f32.xlu1 %v1316_v45  ;;  %1496 = vadd.xlane.f32.xlu0 %v1336_v46  ;;  %v1207_v45 = vmax.f32 %v1079_v35, 0.0  ;;  %v858_v46 = vld [vmem:[#allocation6 + $0x118] sm:$0xff] }
 0x2e1   : > { %v1076_v49 = vadd.f32 %v6840_v6, %v858_v46  ;;  %v1323_v56 = vmul.f32 %v6819_v37, %v1188_v48  ;;  %v1198_v48 = vmax.f32 %v1070_v40, 0.0  ;;  %v874_v40 = vld [vmem:[#allocation6 + $0x198] sm:$0xff] }
 0x2e3   : > { %v1204_v57 = vmax.f32 %v1076_v49, 0.0 }
 0x2e4   : > { %1458 = vadd.xlane.f32.xlu1 %v1317_v51  ;;  %1500 = vadd.xlane.f32.xlu0 %v1338_v53  ;;  %v1342_v51 = vmul.f32 %v6819_v37, %v1207_v45  ;;  %v1065_v53 = vadd.f32 %v6862_v32, %v847_v47  ;;  %v1332_v45 = vmul.f32 %v6819_v37, %v1197_v36 }
 0x2e5   : > { %v1339_v0 = vmul.f32 %v6819_v37, %v1204_v57 }
 0x2e6   : > { %v1193_v59 = vmax.f32 %v1065_v53, 0.0 }
 0x2e8   : > { %1460 = vadd.xlane.f32.xlu1 %v1318_v61  ;;  %1472 = vadd.xlane.f32.xlu0 %v1324_v62  ;;  %v1105_v61 = vadd.f32 %v6870_v42, %v887_v55  ;;  %v849_v62 = vld [vmem:[#allocation6 + $0xd0] sm:$0xff]  ;;  %v1328_v2 = vmul.f32 %v6819_v37, %v1193_v59  ;;  %v1333_v55 = vmul.f32 %v6819_v37, %v1198_v48 }
 0x2e9   : > { %v1067_v1 = vadd.f32 %v6862_v32, %v849_v62  ;;  %v901_v59 = vld [vmem:[#allocation6 + $0x270] sm:$0xff] }
 0x2ea   : > { %v1233_v4 = vmax.f32 %v1105_v61, 0.0  ;;  %v999_v61 = vcombine.high %v6850_v20, %v6850_v20  ;;  %v1119_v62 = vadd.f32 %v6870_v42, %v901_v59  ;;  %v866_v59 = vld [vmem:[#allocation6 + $0x158] sm:$0xff] }
 0x2eb   : > { %v1195_v14 = vmax.f32 %v1067_v1, 0.0 }
 0x2ec   : > { %1462 = vadd.xlane.f32.xlu1 %v1319_v5  ;;  %1562 = vadd.xlane.f32.xlu0 %v1369_v7  ;;  %v1077_v5 = vadd.f32 %v6840_v6, %v859_v63  ;;  %v850_v7 = vld [vmem:[#allocation6 + $0xd8] sm:$0xff]  ;;  %v1081_v63 = vadd.f32 %v6840_v6, %v863_v60  ;;  %v919_v60 = vld [vmem:[#allocation6 + $0x300] sm:$0xff] }
 0x2ed   : > { %v1068_v9 = vadd.f32 %v6862_v32, %v850_v7  ;;  %v1330_v25 = vmul.f32 %v6819_v37, %v1195_v14  ;;  %v1247_v7 = vmax.f32 %v1119_v62, 0.0  ;;  %v864_v14 = vld [vmem:[#allocation6 + $0x148] sm:$0xff] }
 0x2ee   : > { %v1209_v8 = vmax.f32 %v1081_v63, 0.0 }
 0x2ef   : > { %v1196_v23 = vmax.f32 %v1068_v9, 0.0  ;;  %v1382_v21 = vmul.f32 %v6819_v37, %v1247_v7 }
 0x2f0   : > { %1464 = vadd.xlane.f32.xlu1 %v1320_v13  ;;  %1474 = vadd.xlane.f32.xlu0 %v1325_v16  ;;  %v1368_v13 = vmul.f32 %v6819_v37, %v1233_v4  ;;  %v1205_v16 = vmax.f32 %v1077_v5, 0.0  ;;  %v893_v4 = vld [vmem:[#allocation6 + $0x230] sm:$0xff]  ;;  %v6939_v5 = vrot.slane %v999_v61, %v6810_v26 }
 0x2f1   : > { %v1331_v35 = vmul.f32 %v6819_v37, %v1196_v23  ;;  %v1248_v23 = vmax.f32 %v1120_v10, 0.0 }
 0x2f4   : > { %1466 = vadd.xlane.f32.xlu1 %v1321_v27  ;;  %1506 = vadd.xlane.f32.xlu0 %v1341_v29  ;;  %v1340_v27 = vmul.f32 %v6819_v37, %v1205_v16  ;;  %v1063_v29 = vadd.f32 %v6862_v32, %v845_v22  ;;  %v968_v16 = vcombine.high %v6847_v18, %v6847_v18 }
 0x2f5   : > { %v1344_v22 = vmul.f32 %v6819_v37, %v1209_v8 }
 0x2f6   : > { %v1191_v39 = vmax.f32 %v1063_v29, 0.0  ;;  %v894_v29 = vld [vmem:[#allocation6 + $0x238] sm:$0xff]  ;;  %v6952_v33 = vrot.slane %v968_v16, %v6801_v19 }
 0x2f7   : > { %v1112_v18 = vadd.f32 %v6870_v42, %v894_v29 }
 0x2f8   : > { %1468 = vadd.xlane.f32.xlu1 %v1322_v41  ;;  %1566 = vadd.xlane.f32.xlu0 %v1371_v43  ;;  %v1064_v41 = vadd.f32 %v6862_v32, %v846_v34  ;;  %v853_v43 = vld [vmem:[#allocation6 + $0xf0] sm:$0xff]  ;;  %v1326_v47 = vmul.f32 %v6819_v37, %v1191_v39  ;;  %v1091_v34 = vadd.f32 %v6939_v5, %v873_v28 }
 0x2f9   : > { %v1071_v46 = vadd.f32 %v6862_v32, %v853_v43  ;;  %v998_v43 = vcombine.high %v6858_v31, %v6858_v31 }
 0x2fa   : > { %v1192_v49 = vmax.f32 %v1064_v41, 0.0  ;;  %v865_v41 = vld [vmem:[#allocation6 + $0x150] sm:$0xff] }
 0x2fb   : > { %v1199_v57 = vmax.f32 %v1071_v46, 0.0  ;;  %v1083_v46 = vadd.f32 %v6840_v6, %v865_v41  ;;  %v6969_v31 = vrot.slane %v998_v43, %v6810_v26 }
 0x2fc   : > { %1498 = vadd.xlane.f32.xlu1 %v1337_v50  ;;  %1508 = vadd.xlane.f32.xlu0 %v1342_v51  ;;  %v1080_v50 = vadd.f32 %v6840_v6, %v862_v44  ;;  %v854_v51 = vld [vmem:[#allocation6 + $0xf8] sm:$0xff]  ;;  %v6962_v44 = vrot.slane %v6952_v33, %v6810_v26 }
 0x2fd   : > { %v1072_v53 = vadd.f32 %v6862_v32, %v854_v51  ;;  %v1334_v32 = vmul.f32 %v6819_v37, %v1199_v57  ;;  %v895_v51 = vld [vmem:[#allocation6 + $0x240] sm:$0xff]  ;;  %v1139_v7 = vadd.f32 %v6969_v31, %v921_v30  ;;  %v870_v30 = vld [vmem:[#allocation6 + $0x178] sm:$0xff] }
 0x2fe   : > { %v1113_v57 = vadd.f32 %v6870_v42, %v895_v51 }
 0x2ff   : > { %v1200_v1 = vmax.f32 %v1072_v53, 0.0 }
 0x300   : > { %1470 = vadd.xlane.f32.xlu1 %v1323_v56  ;;  %1568 = vadd.xlane.f32.xlu0 %v1372_v58  ;;  %v1327_v56 = vmul.f32 %v6819_v37, %v1192_v49  ;;  %v1208_v58 = vmax.f32 %v1080_v50, 0.0  ;;  %v1219_v49 = vmax.f32 %v1091_v34, 0.0  ;;  %v1240_v50 = vmax.f32 %v1112_v18, 0.0 }
 0x301   : > { %v1335_v20 = vmul.f32 %v6819_v37, %v1200_v1  ;;  %v1241_v63 = vmax.f32 %v1113_v57, 0.0  ;;  %v1137_v1 = vadd.f32 %v6969_v31, %v919_v60  ;;  %v879_v57 = vld [vmem:[#allocation6 + $0x1c0] sm:$0xff] }
 0x303   : > { %v1376_v8 = vmul.f32 %v6819_v37, %v1241_v63  ;;  %v1265_v10 = vmax.f32 %v1137_v1, 0.0 }
 0x304   : > { %1502 = vadd.xlane.f32.xlu1 %v1339_v0  ;;  %1480 = vadd.xlane.f32.xlu0 %v1328_v2  ;;  %v1343_v0 = vmul.f32 %v6819_v37, %v1208_v58  ;;  %v1238_v2 = vmax.f32 %v1110_v54, 0.0  ;;  %v1211_v54 = vmax.f32 %v1083_v46, 0.0  ;;  %v1121_v58 = vadd.f32 %v6962_v44, %v903_v52 }
 0x306   : > { %v1373_v9 = vmul.f32 %v6819_v37, %v1238_v2  ;;  %v1346_v62 = vmul.f32 %v6819_v37, %v1211_v54  ;;  %v896_v2 = vld [vmem:[#allocation6 + $0x248] sm:$0xff] }
 0x308   : > { %1482 = vadd.xlane.f32.xlu0 %v1329_v11  ;;  %1560 = vadd.xlane.f32.xlu1 %v1368_v13  ;;  %v1111_v11 = vadd.f32 %v6870_v42, %v893_v4  ;;  %v872_v13 = vld [vmem:[#allocation6 + $0x188] sm:$0xff]  ;;  %v1114_v4 = vadd.f32 %v6870_v42, %v896_v2 }
 0x30a   : > { %v1239_v24 = vmax.f32 %v1111_v11, 0.0  ;;  %v867_v11 = vld [vmem:[#allocation6 + $0x160] sm:$0xff] }
 0x30c   : > { %1484 = vadd.xlane.f32.xlu0 %v1330_v25  ;;  %1504 = vadd.xlane.f32.xlu1 %v1340_v27  ;;  %v1090_v25 = vadd.f32 %v6939_v5, %v872_v13  ;;  %v1082_v27 = vadd.f32 %v6840_v6, %v864_v14  ;;  %v1374_v36 = vmul.f32 %v6819_v37, %v1239_v24  ;;  %v877_v13 = vld [vmem:[#allocation6 + $0x1b0] sm:$0xff]  ;;  %v1267_v24 = vmax.f32 %v1139_v7, 0.0 }
 0x30d   : > { %v1085_v14 = vadd.f32 %v6840_v6, %v867_v11  ;;  %v1095_v16 = vadd.f32 %v6939_v5, %v877_v13  ;;  %v1088_v11 = vadd.f32 %v6840_v6, %v870_v30 }
 0x30e   : > { %v1210_v39 = vmax.f32 %v1082_v27, 0.0  ;;  %v907_v27 = vld [vmem:[#allocation6 + $0x2a0] sm:$0xff]  ;;  %v1402_v18 = vmul.f32 %v6819_v37, %v1267_v24  ;;  %v900_v24 = vld [vmem:[#allocation6 + $0x268] sm:$0xff] }
 0x30f   : > { %v1213_v28 = vmax.f32 %v1085_v14, 0.0  ;;  %v1223_v29 = vmax.f32 %v1095_v16, 0.0 }
 0x310   : > { %1486 = vadd.xlane.f32.xlu0 %v1331_v35  ;;  %1564 = vadd.xlane.f32.xlu1 %v1370_v38  ;;  %v1383_v35 = vmul.f32 %v6819_v37, %v1248_v23  ;;  %v1218_v38 = vmax.f32 %v1090_v25, 0.0  ;;  %v1345_v48 = vmul.f32 %v6819_v37, %v1210_v39  ;;  %v1242_v23 = vmax.f32 %v1114_v4, 0.0  ;;  %v897_v25 = vld [vmem:[#allocation6 + $0x250] sm:$0xff]  ;;  %v878_v39 = vld [vmem:[#allocation6 + $0x1b8] sm:$0xff] }
 0x311   : > { %v1358_v41 = vmul.f32 %v6819_v37, %v1223_v29 }
 0x312   : > { %v1377_v34 = vmul.f32 %v6819_v37, %v1242_v23 }
 0x314   : > { %1488 = vadd.xlane.f32.xlu0 %v1332_v45  ;;  %1476 = vadd.xlane.f32.xlu1 %v1326_v47  ;;  %v1092_v45 = vadd.f32 %v6939_v5, %v874_v40  ;;  %v1353_v47 = vmul.f32 %v6819_v37, %v1218_v38  ;;  %v868_v38 = vld [vmem:[#allocation6 + $0x168] sm:$0xff]  ;;  %v1348_v40 = vmul.f32 %v6819_v37, %v1213_v28 }
 0x315   : > { %v1086_v46 = vadd.f32 %v6840_v6, %v868_v38 }
 0x316   : > { %v1220_v53 = vmax.f32 %v1092_v45, 0.0 }
 0x317   : > { %v1214_v54 = vmax.f32 %v1086_v46, 0.0 }
 0x318   : > { %1490 = vadd.xlane.f32.xlu0 %v1333_v55  ;;  %1478 = vadd.xlane.f32.xlu1 %v1327_v56  ;;  %v1354_v55 = vmul.f32 %v6819_v37, %v1219_v49  ;;  %v1375_v56 = vmul.f32 %v6819_v37, %v1240_v50  ;;  %v1355_v61 = vmul.f32 %v6819_v37, %v1220_v53  ;;  %v908_v49 = vld [vmem:[#allocation6 + $0x2a8] sm:$0xff] }
 0x319   : > { %v1126_v51 = vadd.f32 %v6962_v44, %v908_v49  ;;  %v1349_v60 = vmul.f32 %v6819_v37, %v1214_v54 }
 0x31b   : > { %v1254_v63 = vmax.f32 %v1126_v51, 0.0 }
 0x31c   : > { %1492 = vadd.xlane.f32.xlu0 %v1334_v32  ;;  %1510 = vadd.xlane.f32.xlu1 %v1343_v0  ;;  %v1249_v32 = vmax.f32 %v1121_v58, 0.0  ;;  %v1084_v0 = vadd.f32 %v6840_v6, %v866_v59  ;;  %v1097_v59 = vadd.f32 %v6939_v5, %v879_v57 }
 0x31d   : > { %v1389_v7 = vmul.f32 %v6819_v37, %v1254_v63 }
 0x31e   : > { %v1225_v2 = vmax.f32 %v1097_v59, 0.0  ;;  %v911_v59 = vld [vmem:[#allocation6 + $0x2c0] sm:$0xff] }
 0x320   : > { %1494 = vadd.xlane.f32.xlu0 %v1335_v20  ;;  %1570 = vadd.xlane.f32.xlu1 %v1373_v9  ;;  %v1384_v20 = vmul.f32 %v6819_v37, %v1249_v32  ;;  %v1212_v9 = vmax.f32 %v1084_v0, 0.0  ;;  %v899_v32 = vld [vmem:[#allocation6 + $0x260] sm:$0xff]  ;;  %v909_v0 = vld [vmem:[#allocation6 + $0x2b0] sm:$0xff] }
 0x324   : > { %1588 = vadd.xlane.f32.xlu0 %v1382_v21  ;;  %1512 = vadd.xlane.f32.xlu1 %v1344_v22  ;;  %v1347_v21 = vmul.f32 %v6819_v37, %v1212_v9  ;;  %v1400_v22 = vmul.f32 %v6819_v37, %v1265_v10  ;;  %v880_v9 = vld [vmem:[#allocation6 + $0x1c8] sm:$0xff]  ;;  %v7008_v10 = vand.u32 127, %v956_v15  ;;  %v1216_v15 = vmax.f32 %v1088_v11, 0.0 }
 0x325   : > { %v1098_v14 = vadd.f32 %v6939_v5, %v880_v9 }
 0x326   : > { %v1823_v13 = vadd.s32 4294967288, %v7008_v10  ;;  %v1872_v46 = vadd.s32 4294967232, %v7008_v10 }
 0x328   : > { %1590 = vadd.xlane.f32.xlu0 %v1383_v35  ;;  %1572 = vadd.xlane.f32.xlu1 %v1374_v36  ;;  %v1115_v35 = vadd.f32 %v6870_v42, %v897_v25  ;;  %v1125_v36 = vadd.f32 %v6962_v44, %v907_v27  ;;  %v910_v25 = vld [vmem:[#allocation6 + $0x2b8] sm:$0xff]  ;;  %v1830_v27 = vadd.s32 4294967280, %v7008_v10  ;;  %v7026_v38 = vsub.s32 %v1823_v13, %v6798_v17 }
 0x32a   : > { %v1243_v43 = vmax.f32 %v1115_v35, 0.0  ;;  %v1253_v45 = vmax.f32 %v1125_v36, 0.0 }
 0x32c   : > { %1530 = vadd.xlane.f32.xlu0 %v1353_v47  ;;  %1514 = vadd.xlane.f32.xlu1 %v1345_v48  ;;  %v1096_v47 = vadd.f32 %v6939_v5, %v878_v39  ;;  %v898_v48 = vld [vmem:[#allocation6 + $0x258] sm:$0xff]  ;;  %v1378_v52 = vmul.f32 %v6819_v37, %v1243_v43  ;;  %v1388_v53 = vmul.f32 %v6819_v37, %v1253_v45  ;;  %v1851_v43 = vadd.s32 4294967256, %v7008_v10  ;;  %v881_v45 = vld [vmem:[#allocation6 + $0x1d0] sm:$0xff] }
 0x32d   : > { %v1116_v50 = vadd.f32 %v6870_v42, %v898_v48  ;;  %v1128_v39 = vadd.f32 %v6962_v44, %v910_v25  ;;  %v904_v48 = vld [vmem:[#allocation6 + $0x288] sm:$0xff] }
 0x32e   : > { %v1122_v63 = vadd.f32 %v6962_v44, %v904_v48  ;;  %v1893_v48 = vadd.s32 4294967208, %v7008_v10 }
 0x32f   : > { %v1256_v57 = vmax.f32 %v1128_v39, 0.0 }
 0x330   : > { %1532 = vadd.xlane.f32.xlu0 %v1354_v55  ;;  %1574 = vadd.xlane.f32.xlu1 %v1375_v56  ;;  %v1224_v55 = vmax.f32 %v1096_v47, 0.0  ;;  %v869_v56 = vld [vmem:[#allocation6 + $0x170] sm:$0xff]  ;;  %v7034_v47 = vsub.s32 %v1830_v27, %v6798_v17 }
 0x331   : > { %v1087_v58 = vadd.f32 %v6840_v6, %v869_v56  ;;  %v7020_v6 = vsub.s32 %v7008_v10, %v6798_v17  ;;  %v1391_v11 = vmul.f32 %v6819_v37, %v1256_v57  ;;  %v905_v27 = vld [vmem:[#allocation6 + $0x290] sm:$0xff]  ;;  %v1900_v57 = vadd.s32 4294967200, %v7008_v10 }
 0x333   : > { %v1215_v1 = vmax.f32 %v1087_v58, 0.0  ;;  %v1099_v58 = vadd.f32 %v6939_v5, %v881_v45  ;;  %v912_v45 = vld [vmem:[#allocation6 + $0x2c8] sm:$0xff] }
 0x334   : > { %1534 = vadd.xlane.f32.xlu0 %v1355_v61  ;;  %1516 = vadd.xlane.f32.xlu1 %v1346_v62  ;;  %v1359_v61 = vmul.f32 %v6819_v37, %v1224_v55  ;;  %v1244_v62 = vmax.f32 %v1116_v50, 0.0 }
 0x335   : > { %v1350_v16 = vmul.f32 %v6819_v37, %v1215_v1  ;;  %v1886_v1 = vadd.s32 4294967216, %v7008_v10 }
 0x336   : > { %v1379_v4 = vmul.f32 %v6819_v37, %v1244_v62  ;;  %v1879_v62 = vadd.s32 4294967224, %v7008_v10 }
 0x337   : > { %v7072_v25 = vsub.s32 %v1886_v1, %v6798_v17  ;;  %v883_v1 = vld [vmem:[#allocation6 + $0x1e0] sm:$0xff] }
 0x338   : > { %1576 = vadd.xlane.f32.xlu1 %v1376_v8  ;;  %1592 = vadd.xlane.f32.xlu0 %v1384_v20  ;;  %v1117_v8 = vadd.f32 %v6870_v42, %v899_v32  ;;  %v1127_v20 = vadd.f32 %v6962_v44, %v909_v0  ;;  %v7054_v0 = vsub.s32 %v1872_v46, %v6798_v17 }
 0x33a   : > { %v1255_v23 = vmax.f32 %v1127_v20, 0.0  ;;  %v1129_v20 = vadd.f32 %v6962_v44, %v911_v59  ;;  %v920_v59 = vld [vmem:[#allocation6 + $0x308] sm:$0xff] }
 0x33c   : > { %1518 = vadd.xlane.f32.xlu1 %v1347_v21  ;;  %1624 = vadd.xlane.f32.xlu0 %v1400_v22  ;;  %v1360_v21 = vmul.f32 %v6819_v37, %v1225_v2  ;;  %v1245_v22 = vmax.f32 %v1117_v8, 0.0  ;;  %v1390_v36 = vmul.f32 %v6819_v37, %v1255_v23  ;;  %v1858_v8 = vadd.s32 4294967248, %v7008_v10  ;;  %v882_v23 = vld [vmem:[#allocation6 + $0x1d8] sm:$0xff] }
 0x33e   : > { %v1380_v35 = vmul.f32 %v6819_v37, %v1245_v22  ;;  %v875_v22 = vld [vmem:[#allocation6 + $0x1a0] sm:$0xff] }
 0x340   : > { %1578 = vadd.xlane.f32.xlu1 %v1377_v34  ;;  %1628 = vadd.xlane.f32.xlu0 %v1402_v18  ;;  %v1226_v34 = vmax.f32 %v1098_v14, 0.0  ;;  %v1118_v18 = vadd.f32 %v6870_v42, %v900_v24  ;;  %v1351_v42 = vmul.f32 %v6819_v37, %v1216_v15  ;;  %v1227_v14 = vmax.f32 %v1099_v58, 0.0 }
 0x341   : > { %v1865_v15 = vadd.s32 4294967240, %v7008_v10  ;;  %v1130_v58 = vadd.f32 %v6962_v44, %v912_v45 }
 0x342   : > { %v1361_v51 = vmul.f32 %v6819_v37, %v1226_v34 }
 0x344   : > { %1520 = vadd.xlane.f32.xlu1 %v1348_v40  ;;  %1540 = vadd.xlane.f32.xlu0 %v1358_v41  ;;  %v871_v40 = vld [vmem:[#allocation6 + $0x180] sm:$0xff]  ;;  %v1844_v41 = vadd.s32 4294967264, %v7008_v10 }
 0x345   : > { %v1089_v54 = vadd.f32 %v6939_v5, %v871_v40  ;;  %v1362_v40 = vmul.f32 %v6819_v37, %v1227_v14  ;;  %v1258_v14 = vmax.f32 %v1130_v58, 0.0  ;;  %v884_v58 = vld [vmem:[#allocation6 + $0x1e8] sm:$0xff] }
 0x348   : > { %1580 = vadd.xlane.f32.xlu1 %v1378_v52  ;;  %1600 = vadd.xlane.f32.xlu0 %v1388_v53  ;;  %v1246_v52 = vmax.f32 %v1118_v18, 0.0  ;;  %v1837_v53 = vadd.s32 4294967272, %v7008_v10 }
 0x34a   : > { %v7065_v13 = vsub.s32 %v1837_v53, %v6798_v17  ;;  %v7094_v53 = vsub.s32 %v1865_v15, %v6798_v17 }
 0x34c   : > { %1522 = vadd.xlane.f32.xlu1 %v1349_v60  ;;  %1542 = vadd.xlane.f32.xlu0 %v1359_v61  ;;  %v7045_v60 = vsub.s32 %v1844_v41, %v6798_v17  ;;  %v7048_v61 = vsub.s32 %v1851_v43, %v6798_v17  ;;  %v1093_v41 = vadd.f32 %v6939_v5, %v875_v22  ;;  %v876_v22 = vld [vmem:[#allocation6 + $0x1a8] sm:$0xff] }
 0x34d   : > { %v1100_v43 = vadd.f32 %v6939_v5, %v882_v23 }
 0x350   : > { %1582 = vadd.xlane.f32.xlu1 %v1379_v4  ;;  %1602 = vadd.xlane.f32.xlu0 %v1389_v7  ;;  %v1381_v4 = vmul.f32 %v6819_v37, %v1246_v52  ;;  %v1217_v7 = vmax.f32 %v1089_v54, 0.0 }
 0x352   : > { %v1352_v18 = vmul.f32 %v6819_v37, %v1217_v7  ;;  %v1907_v7 = vadd.s32 4294967192, %v7008_v10 }
 0x354   : > { %1524 = vadd.xlane.f32.xlu1 %v1350_v16  ;;  %1544 = vadd.xlane.f32.xlu0 %v1360_v21  ;;  %v7068_v16 = vsub.s32 %v1879_v62, %v6798_v17  ;;  %v1250_v21 = vmax.f32 %v1122_v63, 0.0  ;;  %v1221_v63 = vmax.f32 %v1093_v41, 0.0 }
 0x355   : > { %v7016_v28 = vpop.xlane.xlu1 %1440  ;;  %v1433_v29 = vpop.xlane.xlu0 %1432 }
 0x356   : > { %v1822_v55 = vrot.slane %v1433_v29, %v7020_v6  ;;  %v1385_v46 = vmul.f32 %v6819_v37, %v1250_v21  ;;  %v1101_v21 = vadd.f32 %v6939_v5, %v883_v1 }
 0x358   : > { %1584 = vadd.xlane.f32.xlu1 %v1380_v35  ;;  %1604 = vadd.xlane.f32.xlu0 %v1390_v36  ;;  %v7079_v35 = vsub.s32 %v1858_v8, %v6798_v17  ;;  %v1257_v36 = vmax.f32 %v1129_v20, 0.0  ;;  %v1138_v20 = vadd.f32 %v6969_v31, %v920_v59 }
 0x359   : > { %v7036_v49 = vpop.xlane.xlu1 %1442  ;;  %v1435_v50 = vpop.xlane.xlu0 %1434 }
 0x35a   : > { %v1827_v56 = vrot.slane %v1435_v50, %v7026_v38  ;;  %v1123_v50 = vadd.f32 %v6962_v44, %v905_v27  ;;  %v7113_v27 = vsub.s32 %v1900_v57, %v6798_v17  ;;  %v1266_v45 = vmax.f32 %v1138_v20, 0.0  ;;  %v906_v57 = vld [vmem:[#allocation6 + $0x298] sm:$0xff] }
 0x35c   : > { %v1829_v32 = vsel %vm1828_vm1, %v1827_v56, %v1822_v55  ;;  %1526 = vadd.xlane.f32.xlu1 %v1351_v42  ;;  %1546 = vadd.xlane.f32.xlu0 %v1361_v51  ;;  %v1848_v42 = vrot.slane %v7016_v28, %v7045_v60  ;;  %v1855_v51 = vrot.slane %v7036_v49, %v7048_v61 }
 0x35d   : > { %v7057_v2 = vpop.xlane.xlu1 %1448  ;;  %v1437_v30 = vpop.xlane.xlu0 %1436  ;;  %v1392_v56 = vmul.f32 %v6819_v37, %v1257_v36  ;;  %v7119_v36 = vsub.s32 %v1907_v7, %v6798_v17 }
 0x35e   : > { %v1834_v9 = vrot.slane %v1437_v30, %v7034_v47  ;;  %v7103_v30 = vsub.s32 %v1893_v48, %v6798_v17 }
 0x360   : > { %v1836_v24 = vsel %vm7828_vm2, %v1834_v9, %v1829_v32  ;;  %1586 = vadd.xlane.f32.xlu1 %v1381_v4  ;;  %1606 = vadd.xlane.f32.xlu0 %v1391_v11  ;;  %v1228_v32 = vmax.f32 %v1100_v43, 0.0  ;;  %v1251_v4 = vmax.f32 %v1123_v50, 0.0  ;;  %v7130_v50 = vld [vmem:[#allocation18] ss:$0 sm:$0xff] }
 0x361   : > { %v7075_v29 = vpop.xlane.xlu1 %1450  ;;  %v1439_v34 = vpop.xlane.xlu0 %1438 }
 0x362   : > { %v1841_v39 = vrot.slane %v1439_v34, %v7065_v13  ;;  %v1363_v15 = vmul.f32 %v6819_v37, %v1228_v32  ;;  %v1876_v34 = vrot.slane %v7057_v2, %v7054_v0  ;;  %v1883_v41 = vrot.slane %v7075_v29, %v7068_v16 }
 0x364   : > { %v1843_v52 = vsel %vm1842_vm3, %v1841_v39, %v1836_v24  ;;  %1528 = vadd.xlane.f32.xlu1 %v1352_v18  ;;  %1548 = vadd.xlane.f32.xlu0 %v1362_v40  ;;  %v1356_v24 = vmul.f32 %v6819_v37, %v1221_v63  ;;  %v1386_v18 = vmul.f32 %v6819_v37, %v1251_v4  ;;  %v1914_v39 = vadd.s32 4294967184, %v7008_v10  ;;  %v913_v40 = vld [vmem:[#allocation6 + $0x2d0] sm:$0xff] }
 0x365   : > { %v1850_v54 = vsel %vm1849_vm4, %v1848_v42, %v1843_v52  ;;  %v1453_v28 = vpop.xlane.xlu1 %1452  ;;  %v1445_v55 = vpop.xlane.xlu0 %1444  ;;  %v1094_v42 = vadd.f32 %v6939_v5, %v876_v22  ;;  %v1229_v52 = vmax.f32 %v1101_v21, 0.0  ;;  %v922_v21 = vld [vmem:[#allocation6 + $0x318] sm:$0xff] }
 0x366   : > { %v1857_v49 = vsel %vm1856_vm5, %v1855_v51, %v1850_v54  ;;  %v1862_v62 = vrot.slane %v1445_v55, %v7079_v35  ;;  %v1890_v2 = vrot.slane %v1453_v28, %v7072_v25  ;;  %v1393_v51 = vmul.f32 %v7130_v50, %v1258_v14  ;;  %v914_v22 = vld [vmem:[#allocation6 + $0x2d8] sm:$0xff] }
 0x367   : > { %v1364_v4 = vmul.f32 %v7130_v50, %v1229_v52  ;;  %v1222_v7 = vmax.f32 %v1094_v42, 0.0  ;;  %v1102_v14 = vadd.f32 %v6939_v5, %v884_v58 }
 0x368   : > { %v1864_v8 = vsel %vm1863_vm6, %v1862_v62, %v1857_v49  ;;  %1594 = vadd.xlane.f32.xlu1 %v1385_v46  ;;  %1608 = vadd.xlane.f32.xlu0 %v1392_v56  ;;  %v1131_v56 = vadd.f32 %v6962_v44, %v913_v40  ;;  %v1401_v49 = vmul.f32 %v7130_v50, %v1266_v45 }
 0x369   : > { %v1455_v9 = vpop.xlane.xlu1 %1454  ;;  %v1447_v11 = vpop.xlane.xlu0 %1446  ;;  %v7141_v62 = vsub.s32 %v1914_v39, %v6798_v17  ;;  %v1140_v39 = vadd.f32 %v6969_v31, %v922_v21  ;;  %v1132_v40 = vadd.f32 %v6962_v44, %v914_v22  ;;  %v1230_v42 = vmax.f32 %v1102_v14, 0.0  ;;  %v925_v21 = vld [vmem:[#allocation6 + $0x330] sm:$0xff]  ;;  %v931_v22 = vld [vmem:[#allocation6 + $0x360] sm:$0xff] }
 0x36a   : > { %v1869_v23 = vrot.slane %v1447_v11, %v7094_v53  ;;  %v1897_v29 = vrot.slane %v1455_v9, %v7103_v30  ;;  %v1259_v9 = vmax.f32 %v1131_v56, 0.0  ;;  %v1124_v11 = vadd.f32 %v6962_v44, %v906_v57 }
 0x36b   : > { %v1365_v57 = vmul.f32 %v7130_v50, %v1230_v42 }
 0x36c   : > { %v1871_v43 = vsel %vm1870_vm7, %v1869_v23, %v1864_v8  ;;  %1536 = vadd.xlane.f32.xlu1 %v1356_v24  ;;  %1550 = vadd.xlane.f32.xlu0 %v1363_v15  ;;  %v1921_v8 = vadd.s32 4294967176, %v7008_v10  ;;  %v1252_v45 = vmax.f32 %v1124_v11, 0.0 }
 0x36d   : > { %v1878_v37 = vsel %vm1877_vm8, %v1876_v34, %v1871_v43  ;;  %v1457_v46 = vpop.xlane.xlu1 %1456  ;;  %v7128_v48 = vpop.xlane.xlu0 %1496  ;;  %v1357_v34 = vmul.f32 %v7130_v50, %v1222_v7  ;;  %v1394_v43 = vmul.f32 %v7130_v50, %v1259_v9 }
 0x36e   : > { %v1885_v54 = vsel %vm1884_vm9, %v1883_v41, %v1878_v37  ;;  %v1904_v55 = vrot.slane %v1457_v46, %v7113_v27  ;;  %v885_v37 = vld [vmem:[#allocation6 + $0x1f0] sm:$0xff] }
 0x36f   : > { %v1892_v28 = vsel %vm1891_vm10, %v1890_v2, %v1885_v54  ;;  %v923_v2 = vld [vmem:[#allocation6 + $0x320] sm:$0xff]  ;;  %v1260_v54 = vmax.f32 %v1132_v40, 0.0  ;;  %v1103_v58 = vadd.f32 %v6939_v5, %v885_v37  ;;  %v926_v37 = vld [vmem:[#allocation6 + $0x338] sm:$0xff] }
 0x370   : > { %v1899_v59 = vsel %vm1898_vm11, %v1897_v29, %v1892_v28  ;;  %1596 = vadd.xlane.f32.xlu1 %v1386_v18  ;;  %1610 = vadd.xlane.f32.xlu0 %v1393_v51  ;;  %v7156_v18 = vsub.s32 %v1921_v8, %v6798_v17  ;;  %v1268_v29 = vmax.f32 %v1140_v39, 0.0  ;;  %v1387_v28 = vmul.f32 %v7130_v50, %v1252_v45 }
 0x371   : > { %v1906_v63 = vsel %vm1905_vm12, %v1904_v55, %v1899_v59  ;;  %v1459_v32 = vpop.xlane.xlu1 %1458  ;;  %v7144_v1 = vpop.xlane.xlu0 %1500  ;;  %v1141_v55 = vadd.f32 %v6969_v31, %v923_v2  ;;  %v924_v59 = vld [vmem:[#allocation6 + $0x328] sm:$0xff]  ;;  %v1395_v11 = vmul.f32 %v7130_v50, %v1260_v54  ;;  %v1231_v14 = vmax.f32 %v1103_v58, 0.0 }
 0x372   : > { %v1911_v20 = vrot.slane %v1459_v32, %v7119_v36  ;;  %v1142_v8 = vadd.f32 %v6969_v31, %v924_v59  ;;  %v1403_v9 = vmul.f32 %v7130_v50, %v1268_v29  ;;  %v1149_v2 = vadd.f32 %v6969_v31, %v931_v22 }
 0x373   : > { %v1269_v7 = vmax.f32 %v1141_v55, 0.0  ;;  %v1366_v42 = vmul.f32 %v7130_v50, %v1231_v14 }
 0x374   : > { %v1913_v23 = vsel %vm1912_vm13, %v1911_v20, %v1906_v63  ;;  %1626 = vadd.xlane.f32.xlu1 %v1401_v49  ;;  %1552 = vadd.xlane.f32.xlu0 %v1364_v4  ;;  %v915_v49 = vld [vmem:[#allocation6 + $0x2e0] sm:$0xff]  ;;  %v1270_v39 = vmax.f32 %v1142_v8, 0.0 }
 0x375   : > { %v1461_v24 = vpop.xlane.xlu1 %1460  ;;  %v7152_v15 = vpop.xlane.xlu0 %1472  ;;  %v1133_v20 = vadd.f32 %v6962_v44, %v915_v49 }
 0x376   : > { %v1918_v41 = vrot.slane %v1461_v24, %v7141_v62 }
 0x377   : > { %v1261_v40 = vmax.f32 %v1133_v20, 0.0 }
 0x378   : > { %v1920_v46 = vsel %vm1919_vm14, %v1918_v41, %v1913_v23  ;;  %1538 = vadd.xlane.f32.xlu1 %v1357_v34  ;;  %1612 = vadd.xlane.f32.xlu0 %v1394_v43  ;;  %v1404_v34 = vmul.f32 %v7130_v50, %v1269_v7  ;;  %v1143_v41 = vadd.f32 %v6969_v31, %v925_v21  ;;  %v918_v7 = vld [vmem:[#allocation6 + $0x2f8] sm:$0xff] }
 0x379   : > { %v1463_v51 = vpop.xlane.xlu1 %1462  ;;  %v7163_v52 = vpop.xlane.xlu0 %1562  ;;  %v1396_v59 = vmul.f32 %v7130_v50, %v1261_v40 }
 0x37a   : > { %v1925_v56 = vrot.slane %v1463_v51, %v7156_v18  ;;  %v1000_v51 = vcombine.high %v6952_v33, %v6952_v33  ;;  %v1271_v49 = vmax.f32 %v1143_v41, 0.0  ;;  %v927_v33 = vld [vmem:[#allocation6 + $0x340] sm:$0xff] }
 0x37b   : > { %v1145_v22 = vadd.f32 %v6969_v31, %v927_v33 }
 0x37c   : > { %v7171_v63 = vsel %vm1926_vm15, %v1925_v56, %v1920_v46  ;;  %1598 = vadd.xlane.f32.xlu1 %v1387_v28  ;;  %1554 = vadd.xlane.f32.xlu0 %v1365_v57  ;;  %v932_v46 = vld [vmem:[#allocation6 + $0x368] sm:$0xff]  ;;  %v1405_v56 = vmul.f32 %v7130_v50, %v1270_v39  ;;  %v1144_v28 = vadd.f32 %v6969_v31, %v926_v37 }
 0x37d   : > { %v1465_v32 = vpop.xlane.xlu1 %1464  ;;  %v7173_v4 = vpop.xlane.xlu0 %1474  ;;  %v1150_v57 = vadd.f32 %v6969_v31, %v932_v46  ;;  %v7198_v8 = vrot.slane %v1000_v51, %v6810_v26  ;;  %v1406_v40 = vmul.f32 %v7130_v50, %v1271_v49  ;;  %v1273_v51 = vmax.f32 %v1145_v22, 0.0  ;;  %v937_v49 = vld [vmem:[#allocation6 + $0x390] sm:$0xff] }
 0x37e   : > { %v1931_v43 = vrot.slane %v1465_v32, %v7020_v6  ;;  %v1277_v32 = vmax.f32 %v1149_v2, 0.0  ;;  %v1272_v14 = vmax.f32 %v1144_v28, 0.0 }
 0x37f   : > { %v1278_v21 = vmax.f32 %v1150_v57, 0.0 }
 0x380   : > { %1630 = vadd.xlane.f32.xlu1 %v1403_v9  ;;  %1614 = vadd.xlane.f32.xlu0 %v1395_v11  ;;  %v1412_v41 = vmul.f32 %v7130_v50, %v1277_v32  ;;  %v1407_v28 = vmul.f32 %v7130_v50, %v1272_v14  ;;  %v1955_v32 = vrot.slane %v7173_v4, %v7048_v61  ;;  %v930_v4 = vld [vmem:[#allocation6 + $0x358] sm:$0xff] }
 0x381   : > { %v1467_v23 = vpop.xlane.xlu1 %1466  ;;  %v7179_v24 = vpop.xlane.xlu0 %1506  ;;  %v1408_v14 = vmul.f32 %v7130_v50, %v1273_v51  ;;  %v2172_v51 = vrot.slane %v7163_v52, %v7026_v38  ;;  %v916_v52 = vld [vmem:[#allocation6 + $0x2e8] sm:$0xff] }
 0x382   : > { %v1935_v45 = vrot.slane %v1467_v23, %v7026_v38  ;;  %v1136_v23 = vadd.f32 %v6962_v44, %v918_v7 }
 0x384   : > { %v1936_v29 = vsel %vm1828_vm1, %v1935_v45, %v1931_v43  ;;  %1632 = vadd.xlane.f32.xlu1 %v1404_v34  ;;  %1556 = vadd.xlane.f32.xlu0 %v1366_v42  ;;  %v2010_v34 = vrot.slane %v7128_v48, %v7020_v6  ;;  %v928_v43 = vld [vmem:[#allocation6 + $0x348] sm:$0xff]  ;;  %v2019_v42 = vrot.slane %v7144_v1, %v7034_v47  ;;  %v1264_v57 = vmax.f32 %v1136_v23, 0.0 }
 0x385   : > { %v1469_v54 = vpop.xlane.xlu1 %1468  ;;  %v7190_v55 = vpop.xlane.xlu0 %1566  ;;  %v936_v45 = vld [vmem:[#allocation6 + $0x388] sm:$0xff]  ;;  %v1413_v1 = vmul.f32 %v7130_v50, %v1278_v21 }
 0x386   : > { %v1940_v58 = vrot.slane %v1469_v54, %v7034_v47  ;;  %v1154_v54 = vadd.f32 %v7198_v8, %v936_v45 }
 0x388   : > { %v1941_v20 = vsel %vm7828_vm2, %v1940_v58, %v1936_v29  ;;  %1634 = vadd.xlane.f32.xlu1 %v1405_v56  ;;  %1616 = vadd.xlane.f32.xlu0 %v1396_v59  ;;  %v1146_v29 = vadd.f32 %v6969_v31, %v928_v43  ;;  %v1950_v58 = vrot.slane %v7152_v15, %v7045_v60  ;;  %v929_v59 = vld [vmem:[#allocation6 + $0x350] sm:$0xff]  ;;  %v1282_v23 = vmax.f32 %v1154_v54, 0.0 }
 0x389   : > { %v1499_v9 = vpop.xlane.xlu1 %1498  ;;  %v7201_v11 = vpop.xlane.xlu0 %1508  ;;  %v1399_v15 = vmul.f32 %v7130_v50, %v1264_v57  ;;  %v939_v57 = vld [vmem:[#allocation6 + $0x3a0] sm:$0xff] }
 0x38a   : > { %v2014_v39 = vrot.slane %v1499_v9, %v7026_v38  ;;  %v1274_v21 = vmax.f32 %v1146_v29, 0.0 }
 0x38c   : > { %v2015_v2 = vsel %vm1828_vm1, %v2014_v39, %v2010_v34  ;;  %1636 = vadd.xlane.f32.xlu1 %v1406_v40  ;;  %1648 = vadd.xlane.f32.xlu0 %v1412_v41  ;;  %v1147_v34 = vadd.f32 %v6969_v31, %v929_v59  ;;  %v1155_v39 = vadd.f32 %v7198_v8, %v937_v49  ;;  %v938_v40 = vld [vmem:[#allocation6 + $0x398] sm:$0xff] }
 0x38d   : > { %v1471_v37 = vpop.xlane.xlu1 %1470  ;;  %v7213_v46 = vpop.xlane.xlu0 %1568  ;;  %v2020_v48 = vsel %vm7828_vm2, %v2019_v42, %v2015_v2  ;;  %v1409_v45 = vmul.f32 %v7130_v50, %v1274_v21  ;;  %v1417_v42 = vmul.f32 %v7130_v50, %v1282_v23  ;;  %v1148_v2 = vadd.f32 %v6969_v31, %v930_v4 }
 0x38e   : > { %v1945_v56 = vrot.slane %v1471_v37, %v7065_v13  ;;  %v1156_v37 = vadd.f32 %v7198_v8, %v938_v40  ;;  %v1275_v54 = vmax.f32 %v1147_v34, 0.0  ;;  %v2034_v34 = vrot.slane %v7179_v24, %v7048_v61 }
 0x38f   : > { %v2039_v4 = vrot.slane %v7201_v11, %v7079_v35  ;;  %v1134_v40 = vadd.f32 %v6962_v44, %v916_v52 }
 0x390   : > { %v1946_v33 = vsel %vm1842_vm3, %v1945_v56, %v1941_v20  ;;  %1638 = vadd.xlane.f32.xlu1 %v1407_v28  ;;  %1650 = vadd.xlane.f32.xlu0 %v1413_v1  ;;  %v1283_v56 = vmax.f32 %v1155_v39, 0.0  ;;  %v886_v28 = vld [vmem:[#allocation6 + $0x1f8] sm:$0xff]  ;;  %v1410_v21 = vmul.f32 %v7130_v50, %v1275_v54  ;;  %v917_v54 = vld [vmem:[#allocation6 + $0x2f0] sm:$0xff] }
 0x391   : > { %v1951_v7 = vsel %vm1849_vm4, %v1950_v58, %v1946_v33  ;;  %v1503_v9 = vpop.xlane.xlu1 %1502  ;;  %v7227_v22 = vpop.xlane.xlu0 %1480  ;;  %v1284_v33 = vmax.f32 %v1156_v37, 0.0 }
 0x392   : > { %v7234_v20 = vsel %vm1856_vm5, %v1955_v32, %v1951_v7  ;;  %v2024_v1 = vrot.slane %v1503_v9, %v7065_v13  ;;  %v1276_v32 = vmax.f32 %v1148_v2, 0.0  ;;  %v1104_v7 = vadd.f32 %v6939_v5, %v886_v28  ;;  %v941_v28 = vld [vmem:[#allocation6 + $0x3b0] sm:$0xff] }
 0x393   : > { %v1418_v23 = vmul.f32 %v7130_v50, %v1283_v56  ;;  %v1157_v9 = vadd.f32 %v7198_v8, %v939_v57  ;;  %v1419_v11 = vmul.f32 %v7130_v50, %v1284_v33  ;;  %v2182_v56 = vrot.slane %v7190_v55, %v7065_v13  ;;  %v942_v55 = vld [vmem:[#allocation6 + $0x3b8] sm:$0xff] }
 0x394   : > { %1640 = vadd.xlane.f32.xlu1 %v1408_v14  ;;  %1622 = vadd.xlane.f32.xlu0 %v1399_v15  ;;  %v940_v15 = vld [vmem:[#allocation6 + $0x3a8] sm:$0xff]  ;;  %v2025_v39 = vsel %vm1842_vm3, %v2024_v1, %v2020_v48  ;;  %v1411_v2 = vmul.f32 %v7130_v50, %v1276_v32  ;;  %v1232_v37 = vmax.f32 %v1104_v7, 0.0  ;;  %v2187_v1 = vrot.slane %v7213_v46, %v7045_v60  ;;  %v933_v32 = vld [vmem:[#allocation6 + $0x370] sm:$0xff] }
 0x395   : > { %v7236_v41 = vpop.xlane.xlu0 %1482  ;;  %v1561_v43 = vpop.xlane.xlu1 %1560  ;;  %v1158_v24 = vadd.f32 %v7198_v8, %v940_v15 }
 0x396   : > { %v2168_v29 = vrot.slane %v1561_v43, %v7020_v6 }
 0x398   : > { %v2173_v58 = vsel %vm1828_vm1, %v2172_v51, %v2168_v29  ;;  %1642 = vadd.xlane.f32.xlu1 %v1409_v45  ;;  %1658 = vadd.xlane.f32.xlu0 %v1417_v42  ;;  %v1285_v51 = vmax.f32 %v1157_v9, 0.0 }
 0x399   : > { %v7247_v59 = vpop.xlane.xlu0 %1484  ;;  %v1505_v49 = vpop.xlane.xlu1 %1504 }
 0x39a   : > { %v2029_v14 = vrot.slane %v1505_v49, %v7045_v60  ;;  %v1262_v49 = vmax.f32 %v1134_v40, 0.0  ;;  %v1420_v46 = vmul.f32 %v7130_v50, %v1285_v51 }
 0x39c   : > { %v2030_v5 = vsel %vm1849_vm4, %v2029_v14, %v2025_v39  ;;  %1644 = vadd.xlane.f32.xlu1 %v1410_v21  ;;  %1660 = vadd.xlane.f32.xlu0 %v1418_v23  ;;  %v1367_v14 = vmul.f32 %v7130_v50, %v1232_v37  ;;  %v1286_v21 = vmax.f32 %v1158_v24, 0.0  ;;  %v1135_v23 = vadd.f32 %v6962_v44, %v917_v54 }
 0x39d   : > { %v2035_v43 = vsel %vm1856_vm5, %v2034_v34, %v2030_v5  ;;  %v7262_v45 = vpop.xlane.xlu0 %1486  ;;  %v1565_v42 = vpop.xlane.xlu1 %1564  ;;  %v1151_v34 = vadd.f32 %v6969_v31, %v933_v32  ;;  %v943_v5 = vld [vmem:[#allocation6 + $0x3c0] sm:$0xff]  ;;  %v1397_v37 = vmul.f32 %v7130_v50, %v1262_v49  ;;  %v934_v49 = vld [vmem:[#allocation6 + $0x378] sm:$0xff]  ;;  %v1980_v32 = vrot.slane %v7247_v59, %v7072_v25 }
 0x39e   : > { %v2177_v48 = vrot.slane %v1565_v42, %v7034_v47  ;;  %v7269_v29 = vsel %vm1863_vm6, %v2039_v4, %v2035_v43  ;;  %v1160_v4 = vadd.f32 %v7198_v8, %v942_v55  ;;  %v1263_v43 = vmax.f32 %v1135_v23, 0.0  ;;  %v935_v42 = vld [vmem:[#allocation6 + $0x380] sm:$0xff] }
 0x39f   : > { %v1421_v24 = vmul.f32 %v7130_v50, %v1286_v21  ;;  %v1279_v51 = vmax.f32 %v1151_v34, 0.0  ;;  %v1161_v54 = vadd.f32 %v7198_v8, %v943_v5  ;;  %v1152_v34 = vadd.f32 %v6969_v31, %v934_v49 }
 0x3a0   : > { %v2178_v57 = vsel %vm7828_vm2, %v2177_v48, %v2173_v58  ;;  %1646 = vadd.xlane.f32.xlu1 %v1411_v2  ;;  %1662 = vadd.xlane.f32.xlu0 %v1419_v11  ;;  %v1159_v58 = vadd.f32 %v7198_v8, %v941_v28  ;;  %v944_v11 = vld [vmem:[#allocation6 + $0x3c8] sm:$0xff] }
 0x3a1   : > { %v2183_v33 = vsel %vm1842_vm3, %v2182_v56, %v2178_v57  ;;  %v1489_v7 = vpop.xlane.xlu0 %1488  ;;  %v1477_v52 = vpop.xlane.xlu1 %1476  ;;  %v1975_v56 = vrot.slane %v7236_v41, %v7068_v16  ;;  %v1153_v57 = vadd.f32 %v7198_v8, %v935_v42  ;;  %v1162_v21 = vadd.f32 %v7198_v8, %v944_v11  ;;  %v946_v11 = vld [vmem:[#allocation6 + $0x3d8] sm:$0xff] }
 0x3a2   : > { %v1960_v9 = vrot.slane %v1477_v52, %v7079_v35  ;;  %v2188_v15 = vsel %vm1849_vm4, %v2187_v1, %v2183_v33  ;;  %v1287_v48 = vmax.f32 %v1159_v58, 0.0  ;;  %v1288_v1 = vmax.f32 %v1160_v4, 0.0 }
 0x3a3   : > { %v1985_v41 = vrot.slane %v7262_v45, %v7103_v30  ;;  %v1414_v58 = vmul.f32 %v7130_v50, %v1279_v51  ;;  %v1289_v5 = vmax.f32 %v1161_v54, 0.0  ;;  %v1280_v49 = vmax.f32 %v1152_v34, 0.0 }
 0x3a4   : > { %v1961_v39 = vsel %vm1863_vm6, %v1960_v9, %v7234_v20  ;;  %1558 = vadd.xlane.f32.xlu1 %v1367_v14  ;;  %1664 = vadd.xlane.f32.xlu0 %v1420_v46  ;;  %v1970_v20 = vrot.slane %v7227_v22, %v7054_v0  ;;  %v1398_v14 = vmul.f32 %v7130_v50, %v1263_v43 }
 0x3a5   : > { %v1491_v44 = vpop.xlane.xlu0 %1490  ;;  %v1479_v40 = vpop.xlane.xlu1 %1478  ;;  %v1422_v9 = vmul.f32 %v7130_v50, %v1287_v48  ;;  %v1990_v46 = vrot.slane %v1489_v7, %v7113_v27  ;;  %v945_v48 = vld [vmem:[#allocation6 + $0x3d0] sm:$0xff] }
 0x3a6   : > { %v1965_v2 = vrot.slane %v1479_v40, %v7094_v53 }
 0x3a8   : > { %v1966_v28 = vsel %vm1870_vm7, %v1965_v2, %v1961_v39  ;;  %1618 = vadd.xlane.f32.xlu1 %v1397_v37  ;;  %1666 = vadd.xlane.f32.xlu0 %v1421_v24  ;;  %v1995_v39 = vrot.slane %v1491_v44, %v7119_v36  ;;  %v1423_v2 = vmul.f32 %v7130_v50, %v1288_v1  ;;  %v1281_v37 = vmax.f32 %v1153_v57, 0.0 }
 0x3a9   : > { %v1971_v33 = vsel %vm1877_vm8, %v1970_v20, %v1966_v28  ;;  %v1493_v22 = vpop.xlane.xlu0 %1492  ;;  %v1511_v52 = vpop.xlane.xlu1 %1510  ;;  %v1424_v1 = vmul.f32 %v7130_v50, %v1289_v5  ;;  %v1290_v57 = vmax.f32 %v1162_v21, 0.0 }
 0x3aa   : > { %v1976_v23 = vsel %vm1884_vm9, %v1975_v56, %v1971_v33  ;;  %v2044_v55 = vrot.slane %v1511_v52, %v7094_v53  ;;  %v2000_v7 = vrot.slane %v1493_v22, %v7141_v62  ;;  %v1416_v33 = vmul.f32 %v7130_v50, %v1281_v37  ;;  %v948_v52 = vld [vmem:[#allocation6 + $0x3e8] sm:$0xff] }
 0x3ab   : > { %v1981_v59 = vsel %vm1891_vm10, %v1980_v32, %v1976_v23  ;;  %v1163_v22 = vadd.f32 %v7198_v8, %v945_v48  ;;  %v1425_v21 = vmul.f32 %v7130_v50, %v1290_v57 }
 0x3ac   : > { %v1986_v4 = vsel %vm1898_vm11, %v1985_v41, %v1981_v59  ;;  %v2045_v45 = vsel %vm1870_vm7, %v2044_v55, %v7269_v29  ;;  %1620 = vadd.xlane.f32.xlu1 %v1398_v14  ;;  %1668 = vadd.xlane.f32.xlu0 %v1422_v9  ;;  %v947_v14 = vld [vmem:[#allocation6 + $0x3e0] sm:$0xff]  ;;  %v1166_v55 = vadd.f32 %v7198_v8, %v948_v52 }
 0x3ad   : > { %v1991_v40 = vsel %vm1905_vm12, %v1990_v46, %v1986_v4  ;;  %v1495_v43 = vpop.xlane.xlu0 %1494  ;;  %v1571_v42 = vpop.xlane.xlu1 %1570  ;;  %v1165_v9 = vadd.f32 %v7198_v8, %v947_v14  ;;  %v1415_v59 = vmul.f32 %v7130_v50, %v1280_v49  ;;  %v950_v4 = vld [vmem:[#allocation6 + $0x3f8] sm:$0xff] }
 0x3ae   : > { %v1996_v31 = vsel %vm1912_vm13, %v1995_v39, %v1991_v40  ;;  %v2005_v44 = vrot.slane %v1495_v43, %v7156_v18  ;;  %v2192_v24 = vrot.slane %v1571_v42, %v7048_v61  ;;  %v949_v39 = vld [vmem:[#allocation6 + $0x3f0] sm:$0xff] }
 0x3af   : > { %v2001_v29 = vsel %vm1919_vm14, %v2000_v7, %v1996_v31  ;;  %v1294_v7 = vmax.f32 %v1166_v55, 0.0  ;;  %v1293_v43 = vmax.f32 %v1165_v9, 0.0  ;;  %v1167_v42 = vadd.f32 %v7198_v8, %v949_v39 }
 0x3b0   : > { %v2006_v20 = vsel %vm1926_vm15, %v2005_v44, %v2001_v29  ;;  %v2193_v51 = vsel %vm1856_vm5, %v2192_v24, %v2188_v15  ;;  %1652 = vadd.xlane.f32.xlu1 %v1414_v58  ;;  %1670 = vadd.xlane.f32.xlu0 %v1423_v2  ;;  %v1164_v15 = vadd.f32 %v7198_v8, %v946_v11  ;;  %v1291_v58 = vmax.f32 %v1163_v22, 0.0 }
 0x3b1   : > { %v7326_v54 = vsel %vm7826_vm0, %v2006_v20, %v7171_v63  ;;  %v7328_v56 = vpop.xlane.xlu0 %1588  ;;  %v1513_v28 = vpop.xlane.xlu1 %1512  ;;  %v1168_v44 = vadd.f32 %v7198_v8, %v950_v4  ;;  %v1295_v11 = vmax.f32 %v1167_v42, 0.0  ;;  %vm7827_vm0 = vcmask 1042434  }
 0x3b2   : > { %v2049_v32 = vrot.slane %v1513_v28, %v7054_v0  ;;  %v1292_v34 = vmax.f32 %v1164_v15, 0.0  ;;  %v1426_v37 = vmul.f32 %v7130_v50, %v1291_v58  ;;  %v1428_v28 = vmul.f32 %v7130_v50, %v1293_v43 }
 0x3b4   : > { %v2050_v63 = vsel %vm1877_vm8, %v2049_v32, %v2045_v45  ;;  %1672 = vadd.xlane.f32.xlu0 %v1424_v1  ;;  %1656 = vadd.xlane.f32.xlu1 %v1416_v33  ;;  %v1427_v31 = vmul.f32 %v7130_v50, %v1292_v34  ;;  %v1296_v1 = vmax.f32 %v1168_v44, 0.0  ;;  %v1430_v33 = vmul.f32 %v7130_v50, %v1295_v11 }
 0x3b5   : > { %v7336_v41 = vpop.xlane.xlu0 %1590  ;;  %v1573_v23 = vpop.xlane.xlu1 %1572 }
 0x3b6   : > { %v2197_v46 = vrot.slane %v1573_v23, %v7079_v35  ;;  %v1431_v22 = vmul.f32 %v7130_v50, %v1296_v1 }
 0x3b8   : > { %v2198_v45 = vsel %vm1863_vm6, %v2197_v46, %v2193_v51  ;;  %1674 = vadd.xlane.f32.xlu0 %v1425_v21  ;;  %1654 = vadd.xlane.f32.xlu1 %v1415_v59  ;;  %v1429_v51 = vmul.f32 %v7130_v50, %v1294_v7 }
 0x3b9   : > { %v7344_v5 = vpop.xlane.xlu0 %1530  ;;  %v1515_v40 = vpop.xlane.xlu1 %1514 }
 0x3ba   : > { %v2054_v2 = vrot.slane %v1515_v40, %v7068_v16 }
 0x3bc   : > { %v2055_v24 = vsel %vm1884_vm9, %v2054_v2, %v2050_v63  ;;  %1676 = vadd.xlane.f32.xlu0 %v1426_v37  ;;  %1678 = vadd.xlane.f32.xlu1 %v1427_v31 }
 0x3bd   : > { %v7352_v29 = vpop.xlane.xlu0 %1532  ;;  %v1575_v48 = vpop.xlane.xlu1 %1574 }
 0x3be   : > { %v2202_v20 = vrot.slane %v1575_v48, %v7094_v53 }
 0x3c0   : > { %v2203_v57 = vsel %vm1870_vm7, %v2202_v20, %v2198_v45  ;;  %1682 = vadd.xlane.f32.xlu0 %v1429_v51  ;;  %1680 = vadd.xlane.f32.xlu1 %v1428_v28 }
 0x3c1   : > { %v7358_v8 = vpop.xlane.xlu0 %1534  ;;  %v1517_v49 = vpop.xlane.xlu1 %1516 }
 0x3c2   : > { %v2059_v32 = vrot.slane %v1517_v49, %v7072_v25 }
 0x3c4   : > { %v2060_v15 = vsel %vm1891_vm10, %v2059_v32, %v2055_v24  ;;  %1684 = vadd.xlane.f32.xlu0 %v1430_v33  ;;  %1686 = vadd.xlane.f32.xlu1 %v1431_v22 }
 0x3c5   : > { %v1577_v52 = vpop.xlane.xlu1 %1576  ;;  %v7364_v14 = vpop.xlane.xlu0 %1592 }
 0x3c6   : > { %v2207_v63 = vrot.slane %v1577_v52, %v7054_v0 }
 0x3c8   : > { %v2208_v23 = vsel %vm1877_vm8, %v2207_v63, %v2203_v57 }
 0x3c9   : > { %v1519_v21 = vpop.xlane.xlu1 %1518  ;;  %v7368_v55 = vpop.xlane.xlu0 %1624 }
 0x3ca   : > { %v2064_v9 = vrot.slane %v1519_v21, %v7103_v30 }
 0x3cc   : > { %v2065_v46 = vsel %vm1898_vm11, %v2064_v9, %v2060_v15 }
 0x3cd   : > { %v1579_v59 = vpop.xlane.xlu1 %1578  ;;  %v7372_v50 = vpop.xlane.xlu0 %1628 }
 0x3ce   : > { %v2212_v58 = vrot.slane %v1579_v59, %v7068_v16 }
 0x3d0   : > { %v2213_v34 = vsel %vm1884_vm9, %v2212_v58, %v2208_v23 }
 0x3d1   : > { %v1521_v39 = vpop.xlane.xlu1 %1520  ;;  %v7376_v4 = vpop.xlane.xlu0 %1540 }
 0x3d2   : > { %v2069_v45 = vrot.slane %v1521_v39, %v7113_v27  ;;  %v2242_v39 = vrot.slane %v7336_v41, %v7156_v18  ;;  %v2103_v41 = vrot.slane %v7358_v8, %v7065_v13 }
 0x3d4   : > { %v2070_v40 = vsel %vm1905_vm12, %v2069_v45, %v2065_v46 }
 0x3d5   : > { %v1581_v7 = vpop.xlane.xlu1 %1580  ;;  %v7380_v43 = vpop.xlane.xlu0 %1600 }
 0x3d6   : > { %v2217_v42 = vrot.slane %v1581_v7, %v7072_v25 }
 0x3d8   : > { %v2218_v2 = vsel %vm1891_vm10, %v2217_v42, %v2213_v34  ;;  %v2237_v34 = vrot.slane %v7328_v56, %v7141_v62  ;;  %v2098_v56 = vrot.slane %v7352_v29, %v7034_v47 }
 0x3d9   : > { %v1523_v37 = vpop.xlane.xlu1 %1522  ;;  %v7384_v31 = vpop.xlane.xlu0 %1542 }
 0x3da   : > { %v2074_v44 = vrot.slane %v1523_v37, %v7119_v36 }
 0x3dc   : > { %v2075_v24 = vsel %vm1912_vm13, %v2074_v44, %v2070_v40 }
 0x3dd   : > { %v1583_v48 = vpop.xlane.xlu1 %1582  ;;  %v7388_v11 = vpop.xlane.xlu0 %1602 }
 0x3de   : > { %v2222_v20 = vrot.slane %v1583_v48, %v7103_v30 }
 0x3e0   : > { %v2223_v51 = vsel %vm1898_vm11, %v2222_v20, %v2218_v2 }
 0x3e1   : > { %v1525_v28 = vpop.xlane.xlu1 %1524  ;;  %v7392_v1 = vpop.xlane.xlu0 %1544 }
 0x3e2   : > { %v2079_v57 = vrot.slane %v1525_v28, %v7141_v62 }
 0x3e4   : > { %v2080_v49 = vsel %vm1919_vm14, %v2079_v57, %v2075_v24 }
 0x3e5   : > { %v1585_v32 = vpop.xlane.xlu1 %1584  ;;  %v7396_v33 = vpop.xlane.xlu0 %1604 }
 0x3e6   : > { %v2227_v22 = vrot.slane %v1585_v32, %v7113_v27 }
 0x3e8   : > { %v2228_v15 = vsel %vm1905_vm12, %v2227_v22, %v2223_v51 }
 0x3e9   : > { %v1527_v52 = vpop.xlane.xlu1 %1526  ;;  %v7400_v63 = vpop.xlane.xlu0 %1546 }
 0x3ea   : > { %v2084_v23 = vrot.slane %v1527_v52, %v7156_v18 }
 0x3ec   : > { %v2085_v21 = vsel %vm1926_vm15, %v2084_v23, %v2080_v49 }
 0x3ed   : > { %v7406_v9 = vsel %vm7827_vm0, %v2085_v21, %v7326_v54  ;;  %v1587_v46 = vpop.xlane.xlu1 %1586  ;;  %v7408_v59 = vpop.xlane.xlu0 %1606  ;;  %v2093_v54 = vrot.slane %v7344_v5, %v7026_v38  ;;  %v2247_v5 = vrot.slane %v7364_v14, %v7020_v6  ;;  %vm7831_vm0 = vcmask 1043459  }
 0x3ee   : > { %v2232_v58 = vrot.slane %v1587_v46, %v7119_v36  ;;  %v2326_v46 = vrot.slane %v7368_v55, %v7020_v6  ;;  %v2123_v55 = vrot.slane %v7384_v31, %v7094_v53 }
 0x3f0   : > { %v2233_v45 = vsel %vm1912_vm13, %v2232_v58, %v2228_v15 }
 0x3f1   : > { %v2238_v40 = vsel %vm1919_vm14, %v2237_v34, %v2233_v45  ;;  %v1529_v7 = vpop.xlane.xlu1 %1528  ;;  %v1549_v42 = vpop.xlane.xlu0 %1548  ;;  %v2335_v34 = vrot.slane %v7372_v50, %v7034_v47  ;;  %v2128_v50 = vrot.slane %v7392_v1, %v7054_v0  ;;  %v2271_v1 = vrot.slane %v7388_v11, %v7048_v61 }
 0x3f2   : > { %v7420_v2 = vsel %vm1926_vm15, %v2242_v39, %v2238_v40  ;;  %v2089_v37 = vrot.slane %v1529_v7, %v7020_v6  ;;  %v2138_v31 = vrot.slane %v1549_v42, %v7072_v25  ;;  %v2281_v11 = vrot.slane %v7408_v59, %v7094_v53 }
 0x3f4   : > { %v2094_v44 = vsel %vm1828_vm1, %v2093_v54, %v2089_v37  ;;  %v2118_v37 = vrot.slane %v7376_v4, %v7079_v35  ;;  %v2266_v4 = vrot.slane %v7380_v43, %v7045_v60 }
 0x3f5   : > { %v2099_v24 = vsel %vm7828_vm2, %v2098_v56, %v2094_v44  ;;  %v1595_v48 = vpop.xlane.xlu1 %1594  ;;  %v1609_v20 = vpop.xlane.xlu0 %1608 }
 0x3f6   : > { %v2251_v51 = vrot.slane %v1595_v48, %v7026_v38  ;;  %v2104_v28 = vsel %vm1842_vm3, %v2103_v41, %v2099_v24  ;;  %v2133_v48 = vrot.slane %v7400_v63, %v7068_v16 }
 0x3f8   : > { %v2252_v57 = vsel %vm1828_vm1, %v2251_v51, %v2247_v5 }
 0x3f9   : > { %v1537_v49 = vpop.xlane.xlu1 %1536  ;;  %v1551_v29 = vpop.xlane.xlu0 %1550 }
 0x3fa   : > { %v2108_v32 = vrot.slane %v1537_v49, %v7045_v60 }
 0x3fc   : > { %v2109_v8 = vsel %vm1849_vm4, %v2108_v32, %v2104_v28  ;;  %v2276_v32 = vrot.slane %v7396_v33, %v7079_v35 }
 0x3fd   : > { %v1597_v22 = vpop.xlane.xlu1 %1596  ;;  %v1611_v15 = vpop.xlane.xlu0 %1610 }
 0x3fe   : > { %v2256_v52 = vrot.slane %v1597_v22, %v7034_v47 }
 0x400   : > { %v2257_v23 = vsel %vm7828_vm2, %v2256_v52, %v2252_v57  ;;  %v2143_v57 = vrot.slane %v1551_v29, %v7103_v30 }
 0x401   : > { %v1627_v21 = vpop.xlane.xlu1 %1626  ;;  %v1553_v14 = vpop.xlane.xlu0 %1552 }
 0x402   : > { %v2330_v58 = vrot.slane %v1627_v21, %v7026_v38 }
 0x404   : > { %v2331_v39 = vsel %vm1828_vm1, %v2330_v58, %v2326_v46  ;;  %v2286_v46 = vrot.slane %v1609_v20, %v7054_v0  ;;  %v2291_v58 = vrot.slane %v1611_v15, %v7068_v16 }
 0x405   : > { %v1539_v45 = vpop.xlane.xlu1 %1538  ;;  %v1613_v40 = vpop.xlane.xlu0 %1612  ;;  %v7445_v7 = vsel %vm7828_vm2, %v2335_v34, %v2331_v39  ;;  %vm7829_vm2 = vcmask 1044484  }
 0x406   : > { %v2113_v54 = vrot.slane %v1539_v45, %v7048_v61  ;;  %v2296_v59 = vrot.slane %v1613_v40, %v7072_v25 }
 0x408   : > { %v2114_v56 = vsel %vm1856_vm5, %v2113_v54, %v2109_v8  ;;  %v2148_v8 = vrot.slane %v1553_v14, %v7113_v27 }
 0x409   : > { %v2119_v41 = vsel %vm1863_vm6, %v2118_v37, %v2114_v56  ;;  %v1599_v44 = vpop.xlane.xlu1 %1598  ;;  %v1555_v24 = vpop.xlane.xlu0 %1554 }
 0x40a   : > { %v2124_v5 = vsel %vm1870_vm7, %v2123_v55, %v2119_v41  ;;  %v2261_v51 = vrot.slane %v1599_v44, %v7065_v13  ;;  %v2153_v21 = vrot.slane %v1555_v24, %v7119_v36 }
 0x40b   : > { %v2129_v28 = vsel %vm1877_vm8, %v2128_v50, %v2124_v5 }
 0x40c   : > { %v2262_v49 = vsel %vm1842_vm3, %v2261_v51, %v2257_v23  ;;  %v2134_v63 = vsel %vm1884_vm9, %v2133_v48, %v2129_v28 }
 0x40d   : > { %v2267_v43 = vsel %vm1849_vm4, %v2266_v4, %v2262_v49  ;;  %v2139_v42 = vsel %vm1891_vm10, %v2138_v31, %v2134_v63  ;;  %v1631_v22 = vpop.xlane.xlu1 %1630  ;;  %v1615_v52 = vpop.xlane.xlu0 %1614 }
 0x40e   : > { %v2272_v29 = vsel %vm1856_vm5, %v2271_v1, %v2267_v43  ;;  %v2144_v23 = vsel %vm1898_vm11, %v2143_v57, %v2139_v42  ;;  %v2340_v43 = vrot.slane %v1631_v22, %v7065_v13 }
 0x40f   : > { %v2277_v33 = vsel %vm1863_vm6, %v2276_v32, %v2272_v29  ;;  %v2149_v14 = vsel %vm1905_vm12, %v2148_v8, %v2144_v23 }
 0x410   : > { %v2154_v34 = vsel %vm1912_vm13, %v2153_v21, %v2149_v14  ;;  %v2282_v39 = vsel %vm1870_vm7, %v2281_v11, %v2277_v33 }
 0x411   : > { %v2287_v45 = vsel %vm1877_vm8, %v2286_v46, %v2282_v39  ;;  %v1633_v54 = vpop.xlane.xlu1 %1632  ;;  %v1557_v37 = vpop.xlane.xlu0 %1556  ;;  %v2341_v39 = vsel %vm1842_vm3, %v2340_v43, %v7445_v7 }
 0x412   : > { %v2292_v55 = vsel %vm1884_vm9, %v2291_v58, %v2287_v45  ;;  %v2158_v57 = vrot.slane %v1557_v37, %v7141_v62  ;;  %v2345_v11 = vrot.slane %v1633_v54, %v7045_v60  ;;  %v2301_v58 = vrot.slane %v1615_v52, %v7103_v30 }
 0x413   : > { %v2297_v20 = vsel %vm1891_vm10, %v2296_v59, %v2292_v55 }
 0x414   : > { %v2159_v8 = vsel %vm1919_vm14, %v2158_v57, %v2154_v34  ;;  %v2302_v59 = vsel %vm1898_vm11, %v2301_v58, %v2297_v20  ;;  %v2346_v45 = vsel %vm1849_vm4, %v2345_v11, %v2341_v39 }
 0x415   : > { %v1635_v56 = vpop.xlane.xlu1 %1634  ;;  %v1617_v50 = vpop.xlane.xlu0 %1616 }
 0x416   : > { %v2350_v46 = vrot.slane %v1635_v56, %v7048_v61  ;;  %v2306_v33 = vrot.slane %v1617_v50, %v7113_v27 }
 0x418   : > { %v2307_v52 = vsel %vm1905_vm12, %v2306_v33, %v2302_v59 }
 0x419   : > { %v1637_v41 = vpop.xlane.xlu1 %1636  ;;  %v7489_v44 = vpop.xlane.xlu0 %1648 }
 0x41a   : > { %v2355_v22 = vrot.slane %v1637_v41, %v7079_v35 }
 0x41d   : > { %v1639_v15 = vpop.xlane.xlu1 %1638  ;;  %v7491_v24 = vpop.xlane.xlu0 %1650 }
 0x421   : > { %v1641_v48 = vpop.xlane.xlu1 %1640  ;;  %v1623_v5 = vpop.xlane.xlu0 %1622 }
 0x422   : > { %v2365_v54 = vrot.slane %v1641_v48, %v7054_v0  ;;  %v2321_v41 = vrot.slane %v1623_v5, %v7156_v18 }
 0x425   : > { %v1643_v51 = vpop.xlane.xlu1 %1642  ;;  %v7493_v40 = vpop.xlane.xlu0 %1658 }
 0x426   : > { %v2370_v56 = vrot.slane %v1643_v51, %v7068_v16 }
 0x429   : > { %v1645_v4 = vpop.xlane.xlu1 %1644  ;;  %v7495_v31 = vpop.xlane.xlu0 %1660 }
 0x42a   : > { %v2375_v20 = vrot.slane %v1645_v4, %v7072_v25  ;;  %v2414_v58 = vrot.slane %v7495_v31, %v7034_v47 }
 0x42d   : > { %v1647_v28 = vpop.xlane.xlu1 %1646  ;;  %v7497_v1 = vpop.xlane.xlu0 %1662 }
 0x42e   : > { %v2380_v57 = vrot.slane %v1647_v28, %v7103_v30 }
 0x431   : > { %v1559_v49 = vpop.xlane.xlu1 %1558  ;;  %v7500_v63 = vpop.xlane.xlu0 %1664 }
 0x432   : > { %v2163_v32 = vrot.slane %v1559_v49, %v7156_v18 }
 0x434   : > { %v2164_v42 = vsel %vm1926_vm15, %v2163_v32, %v2159_v8 }
 0x435   : > { %v2486_v29 = vsel %vm7831_vm0, %v2164_v42, %v7406_v9  ;;  %v1619_v23 = vpop.xlane.xlu1 %1618  ;;  %v1667_v21 = vpop.xlane.xlu0 %1666  ;;  %v2360_v9 = vrot.slane %v1639_v15, %v7094_v53  ;;  %vm2491_vm0 = vcmask 1046534  }
 0x436   : > { %v2488_v14 = vsel %vm7829_vm2, %v7420_v2, %v2486_v29  ;;  %v2311_v34 = vrot.slane %v1619_v23, %v7119_v36  ;;  %vm7830_vm2 = vcmask 1045509   ;;  %v2351_v2 = vsel %vm1856_vm5, %v2350_v46, %v2346_v45 }
 0x437   : > { %v2356_v7 = vsel %vm1863_vm6, %v2355_v22, %v2351_v2  ;;  %v2385_v29 = vrot.slane %v7489_v44, %v7113_v27  ;;  %v2409_v46 = vrot.slane %v7493_v40, %v7026_v38  ;;  %v2419_v44 = vrot.slane %v7497_v1, %v7065_v13 }
 0x438   : > { %v2312_v15 = vsel %vm1912_vm13, %v2311_v34, %v2307_v52  ;;  %v2361_v48 = vsel %vm1870_vm7, %v2360_v9, %v2356_v7  ;;  %v2390_v34 = vrot.slane %v7491_v24, %v7119_v36  ;;  %v2424_v38 = vrot.slane %v7500_v63, %v7045_v60 }
 0x439   : > { %v1621_v37 = vpop.xlane.xlu1 %1620  ;;  %v1669_v55 = vpop.xlane.xlu0 %1668  ;;  %v2366_v32 = vsel %vm1877_vm8, %v2365_v54, %v2361_v48  ;;  %v2429_v47 = vrot.slane %v1667_v21, %v7048_v61 }
 0x43a   : > { %v2316_v50 = vrot.slane %v1621_v37, %v7141_v62  ;;  %v2371_v42 = vsel %vm1884_vm9, %v2370_v56, %v2366_v32  ;;  %v2434_v13 = vrot.slane %v1669_v55, %v7079_v35 }
 0x43b   : > { %v2376_v4 = vsel %vm1891_vm10, %v2375_v20, %v2371_v42  ;;  %v5416_v42 = vld [vmem:[#allocation9] sm:$0xff]  }
 0x43c   : > { %v2317_v49 = vsel %vm1919_vm14, %v2316_v50, %v2312_v15  ;;  %v2381_v11 = vsel %vm1898_vm11, %v2380_v57, %v2376_v4  ;;  %5036 = vmatpush3.bf16.msra.mxu1 %v5416_v42  ;;  %v5419_v4 = vld [vmem:[#allocation9 + $0x48] sm:$0xff]   ;;  %v5455_v42 = vld [vmem:[#allocation9 + $0x158] sm:$0xff]  }
 0x43d   : > { %v2322_v51 = vsel %vm1926_vm15, %v2321_v41, %v2317_v49  ;;  %v1653_v8 = vpop.xlane.xlu1 %1652  ;;  %v1671_v43 = vpop.xlane.xlu0 %1670  ;;  %v2386_v22 = vsel %vm1905_vm12, %v2385_v29, %v2381_v11  ;;  %5037 = vmatprep.subr.bf16.mxu1 %v6217_v3  ;;  %v5422_v11 = vld [vmem:[#allocation9 + $0x18] sm:$0xff]  }
 0x43e   : > { %v2490_v5 = vsel %vm7830_vm2, %v2322_v51, %v2488_v14  ;;  %v2395_v14 = vrot.slane %v1653_v8, %v7141_v62  ;;  %vm7886_vm2 = vcmask 195712   ;;  %v2391_v31 = vsel %vm1912_vm13, %v2390_v34, %v2386_v22  ;;  %v5425_v22 = vld [vmem:[#allocation9 + $0x60] sm:$0xff]   ;;  %v5427_v34 = vld [vmem:[#allocation9 + $0x68] sm:$0xff]  }
 0x43f   : > { %v2439_v60 = vrot.slane %v1671_v43, %v7094_v53 }
 0x440   : > { %v2396_v1 = vsel %vm1919_vm14, %v2395_v14, %v2391_v31  ;;  %v5426_v14 = vld [vmem:[#allocation9 + $0x28] sm:$0xff]  }
 0x441   : > { %v1673_v28 = vpop.xlane.xlu0 %1672  ;;  %v1657_v23 = vpop.xlane.xlu1 %1656 }
 0x442   : > { %v2405_v33 = vrot.slane %v1657_v23, %v7020_v6  ;;  %v2444_v61 = vrot.slane %v1673_v28, %v7054_v0 }
 0x444   : > { %v2410_v39 = vsel %vm1828_vm1, %v2409_v46, %v2405_v33  ;;  %vm2493_vm1 = vcmask 1047559   ;;  %v5423_v33 = vld [vmem:[#allocation9 + $0x58] sm:$0xff]  }
 0x445   : > { %v2415_v6 = vsel %vm7886_vm2, %v2414_v58, %v2410_v39  ;;  %v1675_v40 = vpop.xlane.xlu0 %1674  ;;  %v1655_v9 = vpop.xlane.xlu1 %1654  ;;  %vm1690_vm2 = vcmp.lt.s32.totalorder %v7008_v10, 16  ;;  %v5421_v10 = vld [vmem:[#allocation9 + $0x50] sm:$0xff]   ;;  %v5424_v58 = vld [vmem:[#allocation9 + $0x20] sm:$0xff]  }
 0x446   : > { %v2420_v59 = vsel %vm1842_vm3, %v2419_v44, %v2415_v6  ;;  %v2400_v24 = vrot.slane %v1655_v9, %v7156_v18  ;;  %v2449_v55 = vrot.slane %v1675_v40, %v7068_v16  ;;  %v5428_v44 = vld [vmem:[#allocation9 + $0x30] sm:$0xff]   ;;  %v5431_v6 = vld [vmem:[#allocation9 + $0x78] sm:$0xff]   ;;  %v4426_v9 = vstv %s4423_s15  ;;  %s6221_s15 = smov [#allocation29]  }
 0x447   : > { %v2425_v45 = vsel %vm1849_vm4, %v2424_v38, %v2420_v59  ;;  %v5429_v39 = vld [vmem:[#allocation9 + $0x70] sm:$0xff]   ;;  %v5430_v38 = vld [vmem:[#allocation9 + $0x38] sm:$0xff]   ;;  %vm4427_vm3 = vcmp.lt.s32.totalorder %v6798_v17, %v4426_v9  ;;  %vm7888_vm4 = vmmov 0   ;;  %s6066_s5 = sshll.u32 %s6221_s15, 4  ;;  %s6067_s5 = int_to_ptr.vmem [resolvable:$false] %s6066_s5 }
 0x448   : > { %v2430_v63 = vsel %vm1856_vm5, %v2429_v47, %v2425_v45  ;;  %v2401_v54 = vsel %vm1926_vm15, %v2400_v24, %v2396_v1  ;;  %v7606_v31 = vsel %vm4427_vm3, 1.0, %v6217_v3  ;;  %v5470_v9 = vld [vmem:[#allocation9 + $0x198] sm:$0xff]   ;;  %vm7889_vm5 = vcmask 1041409   ;;  %s6068_s6 = scalar_lea.vmem %s6067_s5, 256  ;;  %p6069_p13 = scmp.lt.s32.totalorder %s4475_s26, %s6067_s5 }
 0x449   : > { %v2435_v21 = vsel %vm1863_vm6, %v2434_v13, %v2430_v63  ;;  %v1677_v37 = vpop.xlane.xlu0 %1676  ;;  %v1679_v2 = vpop.xlane.xlu1 %1678  ;;  %v2492_v52 = vsel %vm2491_vm0, %v2401_v54, %v2490_v5  ;;  %v5417_v5 = vld [vmem:[#allocation9 + $0x40] sm:$0xff]   ;;  %vm7890_vm6 = vcmask 1042434   ;;  %p6070_p4 = scmp.lt.s32.totalorder %s6068_s6, %s6062_s16 }
 0x44a   : > { %v2440_v35 = vsel %vm1870_vm7, %v2439_v60, %v2435_v21  ;;  %v2454_v56 = vrot.slane %v1677_v37, %v7072_v25  ;;  %v2459_v7 = vrot.slane %v1679_v2, %v7103_v30  ;;  %5056 = vmatpush3.bf16.msra.mxu0 %v5417_v5  ;;  %v5432_v60 = vld [vmem:[#allocation9 + $0x80] sm:$0xff]   ;;  %v5434_v37 = vld [vmem:[#allocation9 + $0x88] sm:$0xff]   ;;  %vm7891_vm7 = vcmask 1043459  }
 0x44b   : > { %v2445_v53 = vsel %vm1877_vm8, %v2444_v61, %v2440_v35  ;;  %5057 = vmatprep.subr.bf16.mxu0 %v6217_v3  ;;  %v5433_v61 = vld [vmem:[#allocation9 + $0xc0] sm:$0xff]   ;;  %v5435_v2 = vld [vmem:[#allocation9 + $0xc8] sm:$0xff]   ;;  %v5437_v35 = vld [vmem:[#allocation9 + $0xd0] sm:$0xff]   ;;  %vm7892_vm8 = vcmask 1044484   ;;  %p6071_p0 = por %p6070_p4, %p6069_p13 }
 0x44c   : > { %v2450_v50 = vsel %vm1884_vm9, %v2449_v55, %v2445_v53  ;;  %v5438_v55 = vld [vmem:[#allocation9 + $0x98] sm:$0xff]   ;;  %v5440_v53 = vld [vmem:[#allocation9 + $0xa0] sm:$0xff]   ;;  %vm7893_vm9 = vcmask 1045509  }
 0x44d   : > { %v2455_v0 = vsel %vm1891_vm10, %v2454_v56, %v2450_v50  ;;  %v1683_v41 = vpop.xlane.xlu0 %1682  ;;  %v1681_v20 = vpop.xlane.xlu1 %1680  ;;  %v5439_v56 = vld [vmem:[#allocation9 + $0xd8] sm:$0xff]   ;;  %v5441_v50 = vld [vmem:[#allocation9 + $0xe0] sm:$0xff]   ;;  %p6072_p5 = pnand %p6071_p0, %p6065_p10 }
 0x44e   : > { %v2460_v15 = vsel %vm1898_vm11, %v2459_v7, %v2455_v0  ;;  %v2464_v48 = vrot.slane %v1681_v20, %v7113_v27  ;;  %v2469_v57 = vrot.slane %v1683_v41, %v7119_v36  ;;  %5058 = vmatpush3.bf16.msra.mxu0 %v5419_v4  ;;  %v5442_v7 = vld [vmem:[#allocation9 + $0xa8] sm:$0xff]   ;;  %v5444_v41 = vld [vmem:[#allocation9 + $0xb0] sm:$0xff]   ;;  %v5456_v5 = vld [vmem:[#allocation9 + $0x120] sm:$0xff]  }
 0x44f   : > { %5059 = vmatprep.subr.bf16.mxu0 %v6217_v3  ;;  %v5443_v0 = vld [vmem:[#allocation9 + $0xe8] sm:$0xff]   ;;  %v5445_v20 = vld [vmem:[#allocation9 + $0xf0] sm:$0xff]  }
 0x450   : > { %v2465_v16 = vsel %vm1905_vm12, %v2464_v48, %v2460_v15  ;;  %v5446_v15 = vld [vmem:[#allocation9 + $0xb8] sm:$0xff]  }
 0x451   : > { %v1685_v49 = vpop.xlane.xlu0 %1684  ;;  %v1687_v25 = vpop.xlane.xlu1 %1686  ;;  %v2470_v30 = vsel %vm1912_vm13, %v2469_v57, %v2465_v16  ;;  %v5447_v57 = vld [vmem:[#allocation9 + $0xf8] sm:$0xff]  }
 0x452   : > { %v2474_v32 = vrot.slane %v1685_v49, %v7141_v62  ;;  %v2479_v51 = vrot.slane %v1687_v25, %v7156_v18  ;;  %v5418_v62 = vld [vmem:[#allocation9 + $0x8] sm:$0xff]   ;;  %v5420_v18 = vld [vmem:[#allocation9 + $0x10] sm:$0xff]   ;;  %5060 = vmatpush3.bf16.msra.mxu0 %v5421_v10  ;;  %v5448_v49 = vld [vmem:[#allocation9 + $0x100] sm:$0xff]  }
 0x453   : > { %5038 = vmatpush3.bf16.msra.mxu1 %v5418_v62  ;;  %5061 = vmatprep.subr.bf16.mxu0 %v6217_v3  ;;  %v5457_v62 = vld [vmem:[#allocation9 + $0x160] sm:$0xff]   ;;  %v5459_v10 = vld [vmem:[#allocation9 + $0x168] sm:$0xff]  }
 0x454   : > { %v2475_v8 = vsel %vm1919_vm14, %v2474_v32, %v2470_v30  ;;  %5039 = vmatprep.subr.bf16.mxu1 %v6217_v3  ;;  %v5449_v32 = vld [vmem:[#allocation9 + $0x140] sm:$0xff]   ;;  %v5450_v30 = vld [vmem:[#allocation9 + $0x108] sm:$0xff]  }
 0x455   : > { %v2480_v43 = vsel %vm1926_vm15, %v2479_v51, %v2475_v8  ;;  %v5451_v8 = vld [vmem:[#allocation9 + $0x148] sm:$0xff]  }
 0x456   : > { %v2494_v27 = vsel %vm2493_vm1, %v2480_v43, %v2492_v52  ;;  %5062 = vmatpush3.bf16.msra.mxu0 %v5423_v33  ;;  %v5436_v52 = vld [vmem:[#allocation9 + $0x90] sm:$0xff]  }
 0x457   : > { %v2496_v36 = vsel %vm1690_vm2, %v2494_v27, -1e+30  ;;  %5040 = vmatpush3.bf16.msra.mxu1 %v5420_v18  ;;  %5063 = vmatprep.subr.bf16.mxu0 %v6217_v3  ;;  %v5452_v43 = vld [vmem:[#allocation9 + $0x110] sm:$0xff]   ;;  %v5458_v18 = vld [vmem:[#allocation9 + $0x128] sm:$0xff]  }
 0x458   : > { %2497 = vmax.xlane.f32.xlu0 %v2496_v36  ;;  %5041 = vmatprep.subr.bf16.mxu1 %v6217_v3  ;;  %v5453_v27 = vld [vmem:[#allocation9 + $0x150] sm:$0xff]  }
 0x45a   : > { %5064 = vmatpush3.bf16.msra.mxu0 %v5425_v22 }
 0x45b   : > { %5042 = vmatpush3.bf16.msra.mxu1 %v5422_v11  ;;  %5065 = vmatprep.subr.bf16.mxu0 %v6217_v3 }
 0x45c   : > { %5043 = vmatprep.subr.bf16.mxu1 %v6217_v3 }
 0x45e   : > { %5066 = vmatpush3.bf16.msra.mxu0 %v5427_v34 }
 0x45f   : > { %5044 = vmatpush3.bf16.msra.mxu1 %v5424_v58  ;;  %5067 = vmatprep.subr.bf16.mxu0 %v6217_v3  ;;  %v5463_v58 = vld [vmem:[#allocation9 + $0x178] sm:$0xff]  }
 0x460   : > { %5045 = vmatprep.subr.bf16.mxu1 %v6217_v3 }
 0x462   : > { %5068 = vmatpush3.bf16.msra.mxu0 %v5429_v39 }
 0x463   : > { %5046 = vmatpush3.bf16.msra.mxu1 %v5426_v14  ;;  %5069 = vmatprep.subr.bf16.mxu0 %v6217_v3  ;;  %v5464_v14 = vld [vmem:[#allocation9 + $0x180] sm:$0xff]  }
 0x464   : > { %5047 = vmatprep.subr.bf16.mxu1 %v6217_v3 }
 0x466   : > { %5070 = vmatpush3.bf16.msra.mxu0 %v5431_v6  ;;  %v5468_v6 = vld [vmem:[#allocation9 + $0x190] sm:$0xff]  }
 0x467   : > { %5048 = vmatpush3.bf16.msra.mxu1 %v5428_v44  ;;  %5095 = vmatprep.subr.bf16.mxu0 %v6217_v3  ;;  %v5465_v44 = vld [vmem:[#allocation9 + $0x1c0] sm:$0xff]  }
 0x468   : > { %5049 = vmatprep.subr.bf16.mxu1 %v6217_v3 }
 0x46b   : > { %5050 = vmatpush3.bf16.msra.mxu1 %v5430_v38  ;;  %v5466_v38 = vld [vmem:[#allocation9 + $0x188] sm:$0xff]  }
 0x46c   : > { %5075 = vmatprep.subr.bf16.mxu1 %v6217_v3 }
 0x4e5   : > { %v2498_v29 = vpop.xlane.xlu0 %2497 }
 0x4e6   : > { %v2499_v28 = vsub.f32 %v2496_v36, %v2498_v29  ;;  %v5454_v36 = vld [vmem:[#allocation9 + $0x118] sm:$0xff]   ;;  %v5460_v29 = vld [vmem:[#allocation9 + $0x130] sm:$0xff]  }
 0x4e8   : > { %v2500_v23 = vmul.f32 1.442695, %v2499_v28  ;;  %v5461_v28 = vld [vmem:[#allocation9 + $0x170] sm:$0xff]  }
 0x4ea   : > { %5632 = vpow2.f32 %v2500_v23 }
 0x4f4   : > { %v5633_v46 = vpop.eup %5632 }
 0x4f5   : > { %2502 = vadd.xlane.f32.xlu1 %v5633_v46 }
 0x582   : > { %v2503_v40 = vpop.xlane.xlu1 %2502 }
 0x583   : > { %5634 = vrcp.f32 %v2503_v40  ;;  %v5469_v40 = vld [vmem:[#allocation9 + $0x1d0] sm:$0xff]  }
 0x58d   : > { %v5635_v47 = vpop.eup %5634 }
 0x58e   : > { %v7608_v59 = vmul.f32 %v5635_v47, %v5633_v46  ;;  %v5462_v46 = vld [vmem:[#allocation9 + $0x138] sm:$0xff]  }
 0x58f   : > { %v5471_v47 = vld [vmem:[#allocation9 + $0x1d8] sm:$0xff]  }
 0x590   : > { %v2514_v24 = vrot.slane %v7608_v59, %v6801_v19  ;;  %v4440_v13 = vmul.f32 %v7606_v31, %v7608_v59  ;;  %v2507_v4 = vcombine.high %v7608_v59, %v7608_v59  ;;  %v5472_v59 = vld [vmem:[#allocation9 + $0x1a0] sm:$0xff]  }
 0x592   : > { %v2522_v1 = vcombine.high %v2514_v24, %v2514_v24  ;;  %v2530_v45 = vrot.slane %v2514_v24, %v6801_v19  ;;  %4441 = vst [vmem:[%s6774_s1] sm:$0xff] %v4440_v13  ;;  %v2521_v11 = vrot.slane %v2507_v4, %v6801_v19  ;;  %v5473_v24 = vld [vmem:[#allocation9 + $0x1e0] sm:$0xff]   ;;  %v5474_v13 = vld [vmem:[#allocation9 + $0x1a8] sm:$0xff]  }
 0x593   : > { %v5505_v4 = vld [vmem:[#allocation24 + $0x4c] ss:$16 sps:$4 sm:$0xff]  }
 0x594   : > { %v2564_v63 = vpack.c.bf16 %v2530_v45, %v2530_v45  ;;  %v2544_v54 = vrot.slane %v2522_v1, %v6801_v19  ;;  %v2552_v48 = vcombine.high %v2530_v45, %v2530_v45  ;;  %v2523_v23 = vcombine.high %v2521_v11, %v2521_v11  ;;  %v5475_v1 = vld [vmem:[#allocation9 + $0x1e8] sm:$0xff]   ;;  %v5476_v45 = vld [vmem:[#allocation9 + $0x1b0] sm:$0xff]  }
 0x595   : > { %v2537_v33 = vrot.slane %v2521_v11, %v6801_v19  ;;  %v5508_v11 = vld [vmem:[#allocation24 + $0x64] ss:$16 sps:$4 sm:$0xff]  }
 0x596   : > { %5052 = vmatmul.mubr.bf16.vlgmr.msra.gmra.mrb[0].mxu1 %v2564_v63  ;;  %v2565_v21 = vpack.c.bf16 %v2544_v54, %v2544_v54  ;;  %v2554_v16 = vcombine.high %v2544_v54, %v2544_v54  ;;  %v2566_v25 = vpack.c.bf16 %v2552_v48, %v2552_v48  ;;  %v2551_v22 = vrot.slane %v2523_v23, %v6801_v19  ;;  %v5467_v19 = vld [vmem:[#allocation9 + $0x1c8] sm:$0xff]   ;;  %v5478_v63 = vld [vmem:[#allocation9 + $0x1b8] sm:$0xff]  }
 0x597   : > { %5076 = vmatpush3.bf16.msra.mxu1 %v5432_v60  ;;  %5091 = vmatprep.mubr.msk.bf16.mxu1 %vm7888_vm4, %v6217_v3  ;;  %v2568_v34 = vpack.c.bf16 %v2537_v33, %v2537_v33  ;;  %v5477_v60 = vld [vmem:[#allocation9 + $0x1f0] sm:$0xff]   ;;  %v2553_v54 = vcombine.high %v2537_v33, %v2537_v33  ;;  %v6220_v23 = vmov 0  }
 0x598   : > { %5072 = vmatmul.mubr.bf16.vlgmr.msra.gmra.mrb[4].mxu0 %v2565_v21  ;;  %5077 = vmatprep.subr.bf16.mxu1 %v6217_v3  ;;  %v2567_v51 = vpack.c.bf16 %v2554_v16, %v2554_v16  ;;  %v2569_v39 = vpack.c.bf16 %v2551_v22, %v2551_v22  ;;  %v2555_v21 = vcombine.high %v2551_v22, %v2551_v22  ;;  %v5514_v33 = vld [vmem:[#allocation24 + $0x84] ss:$16 sps:$4 sm:$0xff]  }
 0x599   : > { %5096 = vmatpush3.bf16.msra.mxu0 %v5433_v61  ;;  %5111 = vmatprep.mubr.msk.bf16.mxu0 %vm7888_vm4, %v6217_v3  ;;  %v5479_v61 = vld [vmem:[#allocation9 + $0x1f8] sm:$0xff]  }
 0x59a   : > { %5097 = vmatprep.subr.bf16.mxu0 %v6217_v3 }
 0x59b   : > { %5078 = vmatpush3.bf16.msra.mxu1 %v5434_v37  ;;  %v5480_v37 = vld [vmem:[#allocation19] sm:$0xff]  }
 0x59c   : > { %5079 = vmatprep.subr.bf16.mxu1 %v6217_v3 }
 0x59d   : > { %5098 = vmatpush3.bf16.msra.mxu0 %v5435_v2  ;;  %v2570_v2 = vpack.c.bf16 %v2553_v54, %v2553_v54  ;;  %v5526_v54 = vld [vmem:[#allocation24 + $0xc4] ss:$16 sps:$4 sm:$0xff]  }
 0x59e   : > { %5099 = vmatprep.subr.bf16.mxu0 %v6217_v3 }
 0x59f   : > { %5080 = vmatpush3.bf16.msra.mxu1 %v5436_v52  ;;  %v2571_v52 = vpack.c.bf16 %v2555_v21, %v2555_v21  ;;  %v5524_v21 = vld [vmem:[#allocation24 + $0xc0] ss:$16 sps:$4 sm:$0xff]  }
 0x5a0   : > { %5081 = vmatprep.subr.bf16.mxu1 %v6217_v3 }
 0x5a1   : > { %5100 = vmatpush3.bf16.msra.mxu0 %v5437_v35  ;;  %v5481_v35 = vld [vmem:[#allocation19 + $0x8] sm:$0xff]  }
 0x5a2   : > { %5101 = vmatprep.subr.bf16.mxu0 %v6217_v3 }
 0x5a3   : > { %5082 = vmatpush3.bf16.msra.mxu1 %v5438_v55  ;;  %v5482_v55 = vld [vmem:[#allocation19 + $0x10] sm:$0xff]  }
 0x5a4   : > { %5083 = vmatprep.subr.bf16.mxu1 %v6217_v3 }
 0x5a5   : > { %5102 = vmatpush3.bf16.msra.mxu0 %v5439_v56  ;;  %v5483_v56 = vld [vmem:[#allocation19 + $0x18] sm:$0xff]  }
 0x5a6   : > { %5103 = vmatprep.subr.bf16.mxu0 %v6217_v3 }
 0x5a7   : > { %5084 = vmatpush3.bf16.msra.mxu1 %v5440_v53  ;;  %v5484_v53 = vld [vmem:[#allocation19 + $0x20] sm:$0xff]  }
 0x5a8   : > { %5085 = vmatprep.subr.bf16.mxu1 %v6217_v3 }
 0x5a9   : > { %5104 = vmatpush3.bf16.msra.mxu0 %v5441_v50  ;;  %v5485_v50 = vld [vmem:[#allocation19 + $0x28] sm:$0xff]  }
 0x5aa   : > { %5105 = vmatprep.subr.bf16.mxu0 %v6217_v3 }
 0x5ab   : > { %5086 = vmatpush3.bf16.msra.mxu1 %v5442_v7  ;;  %v5486_v7 = vld [vmem:[#allocation19 + $0x30] sm:$0xff]  }
 0x5ac   : > { %5087 = vmatprep.subr.bf16.mxu1 %v6217_v3 }
 0x5ad   : > { %5106 = vmatpush3.bf16.msra.mxu0 %v5443_v0  ;;  %v5487_v0 = vld [vmem:[#allocation19 + $0x38] sm:$0xff]  }
 0x5ae   : > { %5107 = vmatprep.subr.bf16.mxu0 %v6217_v3 }
 0x5af   : > { %5088 = vmatpush3.bf16.msra.mxu1 %v5444_v41 }
 0x5b0   : > { %5089 = vmatprep.subr.bf16.mxu1 %v6217_v3 }
 0x5b1   : > { %5108 = vmatpush3.bf16.msra.mxu0 %v5445_v20 }
 0x5b2   : > { %5109 = vmatprep.subr.bf16.mxu0 %v6217_v3 }
 0x5b3   : > { %5090 = vmatpush3.bf16.msra.mxu1 %v5446_v15 }
 0x5b4   : > { %5115 = vmatprep.subr.bf16.mxu1 %v6217_v3 }
 0x5b5   : > { %5110 = vmatpush3.bf16.msra.mxu0 %v5447_v57 }
 0x5b6   : > { %5092 = vmatmul.mubr.bf16.vlgmr.msra.gmra.mrb[4].mxu1 %v2566_v25  ;;  %5135 = vmatprep.subr.bf16.mxu0 %v6217_v3 }
 0x5b7   : > { %5116 = vmatpush3.bf16.msra.mxu1 %v5448_v49  ;;  %5131 = vmatprep.mubr.msk.bf16.mxu1 %vm7888_vm4, %v6217_v3 }
 0x5b8   : > { %5112 = vmatmul.mubr.bf16.vlgmr.msra.gmra.mrb[8].mxu0 %v2567_v51  ;;  %5117 = vmatprep.subr.bf16.mxu1 %v6217_v3 }
 0x5b9   : > { %5136 = vmatpush3.bf16.msra.mxu0 %v5449_v32  ;;  %5151 = vmatprep.mubr.msk.bf16.mxu0 %vm7888_vm4, %v6217_v3 }
 0x5ba   : > { %5137 = vmatprep.subr.bf16.mxu0 %v6217_v3 }
 0x5bb   : > { %5118 = vmatpush3.bf16.msra.mxu1 %v5450_v30  ;;  %v5488_v30 = vld [vmem:[#allocation24] ss:$16 sps:$4 sm:$0xff]  }
 0x5bc   : > { %5119 = vmatprep.subr.bf16.mxu1 %v6217_v3 }
 0x5bd   : > { %5138 = vmatpush3.bf16.msra.mxu0 %v5451_v8  ;;  %v5490_v8 = vld [vmem:[#allocation24 + $0x4] ss:$16 sps:$4 sm:$0xff]  }
 0x5be   : > { %5139 = vmatprep.subr.bf16.mxu0 %v6217_v3 }
 0x5bf   : > { %5120 = vmatpush3.bf16.msra.mxu1 %v5452_v43  ;;  %v5491_v43 = vld [vmem:[#allocation24 + $0x8] ss:$16 sps:$4 sm:$0xff]  }
 0x5c0   : > { %5121 = vmatprep.subr.bf16.mxu1 %v6217_v3 }
 0x5c1   : > { %5140 = vmatpush3.bf16.msra.mxu0 %v5453_v27  ;;  %v5493_v27 = vld [vmem:[#allocation24 + $0xc] ss:$16 sps:$4 sm:$0xff]  }
 0x5c2   : > { %5141 = vmatprep.subr.bf16.mxu0 %v6217_v3 }
 0x5c3   : > { %5122 = vmatpush3.bf16.msra.mxu1 %v5454_v36  ;;  %v5496_v36 = vld [vmem:[#allocation24 + $0x24] ss:$16 sps:$4 sm:$0xff]  }
 0x5c4   : > { %5123 = vmatprep.subr.bf16.mxu1 %v6217_v3 }
 0x5c5   : > { %5142 = vmatpush3.bf16.msra.mxu0 %v5455_v42  ;;  %v5494_v42 = vld [vmem:[#allocation24 + $0x20] ss:$16 sps:$4 sm:$0xff]  }
 0x5c6   : > { %5143 = vmatprep.subr.bf16.mxu0 %v6217_v3 }
 0x5c7   : > { %5124 = vmatpush3.bf16.msra.mxu1 %v5456_v5  ;;  %v5497_v5 = vld [vmem:[#allocation24 + $0x28] ss:$16 sps:$4 sm:$0xff]  }
 0x5c8   : > { %5125 = vmatprep.subr.bf16.mxu1 %v6217_v3 }
 0x5c9   : > { %5144 = vmatpush3.bf16.msra.mxu0 %v5457_v62  ;;  %v5502_v62 = vld [vmem:[#allocation24 + $0x44] ss:$16 sps:$4 sm:$0xff]  }
 0x5ca   : > { %5145 = vmatprep.subr.bf16.mxu0 %v6217_v3 }
 0x5cb   : > { %5126 = vmatpush3.bf16.msra.mxu1 %v5458_v18  ;;  %v5500_v18 = vld [vmem:[#allocation24 + $0x40] ss:$16 sps:$4 sm:$0xff]  }
 0x5cc   : > { %5127 = vmatprep.subr.bf16.mxu1 %v6217_v3 }
 0x5cd   : > { %5146 = vmatpush3.bf16.msra.mxu0 %v5459_v10  ;;  %v5503_v10 = vld [vmem:[#allocation24 + $0x48] ss:$16 sps:$4 sm:$0xff]  }
 0x5ce   : > { %5147 = vmatprep.subr.bf16.mxu0 %v6217_v3 }
 0x5cf   : > { %5128 = vmatpush3.bf16.msra.mxu1 %v5460_v29  ;;  %v5511_v29 = vld [vmem:[#allocation24 + $0x6c] ss:$16 sps:$4 sm:$0xff]  }
 0x5d0   : > { %5129 = vmatprep.subr.bf16.mxu1 %v6217_v3 }
 0x5d1   : > { %5148 = vmatpush3.bf16.msra.mxu0 %v5461_v28  ;;  %v5506_v28 = vld [vmem:[#allocation24 + $0x60] ss:$16 sps:$4 sm:$0xff]  }
 0x5d2   : > { %5149 = vmatprep.subr.bf16.mxu0 %v6217_v3 }
 0x5d3   : > { %5130 = vmatpush3.bf16.msra.mxu1 %v5462_v46  ;;  %v5509_v46 = vld [vmem:[#allocation24 + $0x68] ss:$16 sps:$4 sm:$0xff]  }
 0x5d4   : > { %5155 = vmatprep.subr.bf16.mxu1 %v6217_v3 }
 0x5d5   : > { %5150 = vmatpush3.bf16.msra.mxu0 %v5463_v58  ;;  %v5517_v58 = vld [vmem:[#allocation24 + $0x8c] ss:$16 sps:$4 sm:$0xff]  }
 0x5d6   : > { %5132 = vmatmul.mubr.bf16.vlgmr.msra.gmra.mrb[8].mxu1 %v2568_v34  ;;  %5175 = vmatprep.subr.bf16.mxu0 %v6217_v3 }
 0x5d7   : > { %5156 = vmatpush3.bf16.msra.mxu1 %v5464_v14  ;;  %5171 = vmatprep.mubr.msk.bf16.mxu1 %vm7888_vm4, %v6217_v3 }
 0x5d8   : > { %5152 = vmatmul.mubr.bf16.vlgmr.msra.gmra.mrb[12].mxu0 %v2569_v39  ;;  %5157 = vmatprep.subr.bf16.mxu1 %v6217_v3 }
 0x5d9   : > { %5176 = vmatpush3.bf16.msra.mxu0 %v5465_v44  ;;  %5191 = vmatprep.mubr.msk.bf16.mxu0 %vm7888_vm4, %v6217_v3  ;;  %v5512_v44 = vld [vmem:[#allocation24 + $0x80] ss:$16 sps:$4 sm:$0xff]  }
 0x5da   : > { %5177 = vmatprep.subr.bf16.mxu0 %v6217_v3 }
 0x5db   : > { %5158 = vmatpush3.bf16.msra.mxu1 %v5466_v38 }
 0x5dc   : > { %5159 = vmatprep.subr.bf16.mxu1 %v6217_v3 }
 0x5dd   : > { %5178 = vmatpush3.bf16.msra.mxu0 %v5467_v19  ;;  %v5515_v19 = vld [vmem:[#allocation24 + $0x88] ss:$16 sps:$4 sm:$0xff]  }
 0x5de   : > { %5179 = vmatprep.subr.bf16.mxu0 %v6217_v3 }
 0x5df   : > { %5160 = vmatpush3.bf16.msra.mxu1 %v5468_v6  ;;  %v5520_v6 = vld [vmem:[#allocation24 + $0xa4] ss:$16 sps:$4 sm:$0xff]  }
 0x5e0   : > { %5161 = vmatprep.subr.bf16.mxu1 %v6217_v3 }
 0x5e1   : > { %5180 = vmatpush3.bf16.msra.mxu0 %v5469_v40 }
 0x5e2   : > { %5181 = vmatprep.subr.bf16.mxu0 %v6217_v3 }
 0x5e3   : > { %5162 = vmatpush3.bf16.msra.mxu1 %v5470_v9 }
 0x5e4   : > { %5163 = vmatprep.subr.bf16.mxu1 %v6217_v3 }
 0x5e5   : > { %5182 = vmatpush3.bf16.msra.mxu0 %v5471_v47 }
 0x5e6   : > { %5183 = vmatprep.subr.bf16.mxu0 %v6217_v3 }
 0x5e7   : > { %5164 = vmatpush3.bf16.msra.mxu1 %v5472_v59 }
 0x5e8   : > { %5165 = vmatprep.subr.bf16.mxu1 %v6217_v3 }
 0x5e9   : > { %5184 = vmatpush3.bf16.msra.mxu0 %v5473_v24  ;;  %v5523_v24 = vld [vmem:[#allocation24 + $0xac] ss:$16 sps:$4 sm:$0xff]  }
 0x5ea   : > { %5185 = vmatprep.subr.bf16.mxu0 %v6217_v3 }
 0x5eb   : > { %5166 = vmatpush3.bf16.msra.mxu1 %v5474_v13 }
 0x5ec   : > { %5167 = vmatprep.subr.bf16.mxu1 %v6217_v3 }
 0x5ed   : > { %5186 = vmatpush3.bf16.msra.mxu0 %v5475_v1 }
 0x5ee   : > { %5187 = vmatprep.subr.bf16.mxu0 %v6217_v3 }
 0x5ef   : > { %5168 = vmatpush3.bf16.msra.mxu1 %v5476_v45 }
 0x5f0   : > { %5169 = vmatprep.subr.bf16.mxu1 %v6217_v3 }
 0x5f1   : > { %5188 = vmatpush3.bf16.msra.mxu0 %v5477_v60  ;;  %v5518_v60 = vld [vmem:[#allocation24 + $0xa0] ss:$16 sps:$4 sm:$0xff]  }
 0x5f2   : > { %5189 = vmatprep.subr.bf16.mxu0 %v6217_v3 }
 0x5f3   : > { %5170 = vmatpush3.bf16.msra.mxu1 %v5478_v63  ;;  %v5521_v63 = vld [vmem:[#allocation24 + $0xa8] ss:$16 sps:$4 sm:$0xff]  }
 0x5f4   : > { %5195 = vmatprep.subr.bf16.mxu1 %v6217_v3 }
 0x5f5   : > { %5190 = vmatpush3.bf16.msra.mxu0 %v5479_v61  ;;  %v5529_v61 = vld [vmem:[#allocation24 + $0xcc] ss:$16 sps:$4 sm:$0xff]  }
 0x5f6   : > { %5172 = vmatmul.mubr.bf16.vlgmr.msra.gmra.mrb[12].mxu1 %v2570_v2  ;;  %3771 = vmatprep.subr.bf16.mxu0 %v5490_v8  ;;  %v5532_v2 = vld [vmem:[#allocation24 + $0xe4] ss:$16 sps:$4 sm:$0xff]  }
 0x5f7   : > { %5196 = vmatpush3.bf16.msra.mxu1 %v5480_v37  ;;  %5211 = vmatprep.mubr.msk.bf16.mxu1 %vm7888_vm4, %v6217_v3  ;;  %v5527_v37 = vld [vmem:[#allocation24 + $0xc8] ss:$16 sps:$4 sm:$0xff]  }
 0x5f8   : > { %5192 = vmatmul.mubr.bf16.vlgmr.msra.gmra.mrb[16].mxu0 %v2571_v52  ;;  %5197 = vmatprep.subr.bf16.mxu1 %v6217_v3  ;;  %v5535_v52 = vld [vmem:[#allocation24 + $0xec] ss:$16 sps:$4 sm:$0xff]  }
 0x5f9   : > { %3772 = vmatpush1.bf16.msra.mxu0 %v5488_v30  ;;  %3803 = vmatprep.mubr.bf16.mxu0 %v6220_v23 }
 0x5fa   : > { %3773 = vmatprep.subr.bf16.mxu0 %v5496_v36 }
 0x5fb   : > { %5198 = vmatpush3.bf16.msra.mxu1 %v5481_v35  ;;  %v5530_v35 = vld [vmem:[#allocation24 + $0xe0] ss:$16 sps:$4 sm:$0xff]  }
 0x5fc   : > { %5199 = vmatprep.subr.bf16.mxu1 %v6217_v3 }
 0x5fd   : > { %3774 = vmatpush1.bf16.msra.mxu0 %v5494_v42 }
 0x5fe   : > { %3775 = vmatprep.subr.bf16.mxu0 %v5502_v62 }
 0x5ff   : > { %5200 = vmatpush3.bf16.msra.mxu1 %v5482_v55  ;;  %v5533_v55 = vld [vmem:[#allocation24 + $0xe8] ss:$16 sps:$4 sm:$0xff]  }
 0x600   : > { %5201 = vmatprep.subr.bf16.mxu1 %v6217_v3 }
 0x601   : > { %3776 = vmatpush1.bf16.msra.mxu0 %v5500_v18 }
 0x602   : > { %3777 = vmatprep.subr.bf16.mxu0 %v5508_v11 }
 0x603   : > { %5202 = vmatpush3.bf16.msra.mxu1 %v5483_v56  ;;  %v5538_v56 = vld [vmem:[#allocation22 + $0x4] ss:$16 sps:$4 sm:$0xff]  }
 0x604   : > { %5203 = vmatprep.subr.bf16.mxu1 %v6217_v3 }
 0x605   : > { %3778 = vmatpush1.bf16.msra.mxu0 %v5506_v28 }
 0x606   : > { %3779 = vmatprep.subr.bf16.mxu0 %v5514_v33 }
 0x607   : > { %5204 = vmatpush3.bf16.msra.mxu1 %v5484_v53  ;;  %v5541_v53 = vld [vmem:[#allocation22 + $0xc] ss:$16 sps:$4 sm:$0xff]  }
 0x608   : > { %5205 = vmatprep.subr.bf16.mxu1 %v6217_v3 }
 0x609   : > { %3780 = vmatpush1.bf16.msra.mxu0 %v5512_v44 }
 0x60a   : > { %3781 = vmatprep.subr.bf16.mxu0 %v5520_v6  ;;  %v5544_v6 = vld [vmem:[#allocation22 + $0x24] ss:$16 sps:$4 sm:$0xff]  }
 0x60b   : > { %5206 = vmatpush3.bf16.msra.mxu1 %v5485_v50 }
 0x60c   : > { %5207 = vmatprep.subr.bf16.mxu1 %v6217_v3 }
 0x60d   : > { %3782 = vmatpush1.bf16.msra.mxu0 %v5518_v60  ;;  %v5559_v60 = vld [vmem:[#allocation22 + $0x6c] ss:$16 sps:$4 sm:$0xff]  }
 0x60e   : > { %3783 = vmatprep.subr.bf16.mxu0 %v5526_v54  ;;  %v5557_v54 = vld [vmem:[#allocation22 + $0x68] ss:$16 sps:$4 sm:$0xff]  }
 0x60f   : > { %5208 = vmatpush3.bf16.msra.mxu1 %v5486_v7 }
 0x610   : > { %5209 = vmatprep.subr.bf16.mxu1 %v6217_v3  ;;  %v5499_v3 = vld [vmem:[#allocation24 + $0x2c] ss:$16 sps:$4 sm:$0xff]  }
 0x611   : > { %3784 = vmatpush1.bf16.msra.mxu0 %v5524_v21  ;;  %v5565_v21 = vld [vmem:[#allocation22 + $0x8c] ss:$16 sps:$4 sm:$0xff]  }
 0x612   : > { %3785 = vmatprep.subr.bf16.mxu0 %v5532_v2  ;;  %v5563_v2 = vld [vmem:[#allocation22 + $0x88] ss:$16 sps:$4 sm:$0xff]  }
 0x613   : > { %5210 = vmatpush3.bf16.msra.mxu1 %v5487_v0 }
 0x614   : > { %3812 = vmatprep.subr.bf16.mxu1 %v5493_v27 }
 0x615   : > { %3786 = vmatpush1.bf16.msra.mxu0 %v5530_v35  ;;  %v5571_v35 = vld [vmem:[#allocation22 + $0xac] ss:$16 sps:$4 sm:$0xff]  }
 0x616   : > { %5212 = vmatmul.mubr.bf16.vlgmr.msra.gmra.mrb[16].mxu1 %v6791_v12  ;;  %4013 = vmatprep.subr.bf16.mxu0 %v5538_v56  ;;  %v5569_v56 = vld [vmem:[#allocation22 + $0xa8] ss:$16 sps:$4 sm:$0xff]  }
 0x617   : > { %3813 = vmatpush1.bf16.msra.mxu1 %v5491_v43  ;;  %3844 = vmatprep.mubr.bf16.mxu1 %v6220_v23 }
 0x618   : > { %3814 = vmatprep.subr.bf16.mxu1 %v5499_v3 }
 0x61b   : > { %3815 = vmatpush1.bf16.msra.mxu1 %v5497_v5 }
 0x61c   : > { %3816 = vmatprep.subr.bf16.mxu1 %v5505_v4 }
 0x61f   : > { %3817 = vmatpush1.bf16.msra.mxu1 %v5503_v10  ;;  %v4809_v10 = vld [vmem:[#allocation21] ss:$0 sm:$0xff] }
 0x620   : > { %3818 = vmatprep.subr.bf16.mxu1 %v5511_v29 }
 0x623   : > { %3819 = vmatpush1.bf16.msra.mxu1 %v5509_v46 }
 0x624   : > { %3820 = vmatprep.subr.bf16.mxu1 %v5517_v58 }
 0x627   : > { %3821 = vmatpush1.bf16.msra.mxu1 %v5515_v19 }
 0x628   : > { %3822 = vmatprep.subr.bf16.mxu1 %v5523_v24  ;;  %v5553_v24 = vld [vmem:[#allocation22 + $0x4c] ss:$16 sps:$4 sm:$0xff]  }
 0x62b   : > { %3823 = vmatpush1.bf16.msra.mxu1 %v5521_v63  ;;  %v5554_v63 = vld [vmem:[#allocation22 + $0x60] ss:$16 sps:$4 sm:$0xff]  }
 0x62c   : > { %3824 = vmatprep.subr.bf16.mxu1 %v5529_v61  ;;  %v5562_v61 = vld [vmem:[#allocation22 + $0x84] ss:$16 sps:$4 sm:$0xff]  }
 0x62f   : > { %3825 = vmatpush1.bf16.msra.mxu1 %v5527_v37  ;;  %v5560_v37 = vld [vmem:[#allocation22 + $0x80] ss:$16 sps:$4 sm:$0xff]  }
 0x630   : > { %3826 = vmatprep.subr.bf16.mxu1 %v5535_v52  ;;  %v5568_v52 = vld [vmem:[#allocation22 + $0xa4] ss:$16 sps:$4 sm:$0xff]  }
 0x633   : > { %3827 = vmatpush1.bf16.msra.mxu1 %v5533_v55  ;;  %v5566_v55 = vld [vmem:[#allocation22 + $0xa0] ss:$16 sps:$4 sm:$0xff]  }
 0x634   : > { %4054 = vmatprep.subr.bf16.mxu1 %v5541_v53  ;;  %v5574_v53 = vld [vmem:[#allocation22 + $0xc4] ss:$16 sps:$4 sm:$0xff]  }
 0x669   : > { %v2782_v41 = vpop.f32.mrb[0].mxu1 }
 0x66a   : > { %v5053_v20 = vpop.f32.mrb[1].mxu1 }
 0x66b   : > { %v2785_v15 = vpop.f32.mrb[2].mxu1  ;;  %v2870_v48 = vpop.f32.mrb[4].mxu0 }
 0x66c   : > { %v3529_v57 = vrot.slane %v2870_v48, 7  ;;  %v5054_v16 = vpop.f32.mrb[3].mxu1  ;;  %v5073_v49 = vpop.f32.mrb[5].mxu0 }
 0x66d   : > { %v2873_v25 = vpop.f32.mrb[6].mxu0 }
 0x66e   : > { %v3530_v32 = vsel %vm7889_vm5, %v3529_v57, %v2782_v41  ;;  %v5074_v51 = vpop.f32.mrb[7].mxu0 }
 0x689   : > { %v2958_v22 = vpop.f32.mrb[4].mxu1 }
 0x68a   : > { %v3531_v14 = vrot.slane %v2958_v22, 6  ;;  %v5093_v34 = vpop.f32.mrb[5].mxu1 }
 0x68b   : > { %v2961_v39 = vpop.f32.mrb[6].mxu1  ;;  %v3046_v38 = vpop.f32.mrb[8].mxu0 }
 0x68c   : > { %v3532_v40 = vsel %vm7890_vm6, %v3531_v14, %v3530_v32  ;;  %v3533_v9 = vrot.slane %v3046_v38, 5  ;;  %v5094_v47 = vpop.f32.mrb[7].mxu1  ;;  %v5113_v59 = vpop.f32.mrb[9].mxu0  ;;  %v5536_v39 = vld [vmem:[#allocation22] ss:$16 sps:$4 sm:$0xff]  }
 0x68d   : > { %v3049_v13 = vpop.f32.mrb[10].mxu0  ;;  %v5539_v38 = vld [vmem:[#allocation22 + $0x8] ss:$16 sps:$4 sm:$0xff]   ;;  %v5550_v59 = vld [vmem:[#allocation22 + $0x44] ss:$16 sps:$4 sm:$0xff]  }
 0x68e   : > { %v3534_v1 = vsel %vm7891_vm7, %v3533_v9, %v3532_v40  ;;  %v5114_v45 = vpop.f32.mrb[11].mxu0  ;;  %v5547_v40 = vld [vmem:[#allocation22 + $0x2c] ss:$16 sps:$4 sm:$0xff]   ;;  %v5542_v9 = vld [vmem:[#allocation22 + $0x20] ss:$16 sps:$4 sm:$0xff]  }
 0x68f   : > { %v5545_v47 = vld [vmem:[#allocation22 + $0x28] ss:$16 sps:$4 sm:$0xff]   ;;  %v5548_v13 = vld [vmem:[#allocation22 + $0x40] ss:$16 sps:$4 sm:$0xff]   ;;  %v5556_v45 = vld [vmem:[#allocation22 + $0x64] ss:$16 sps:$4 sm:$0xff]  }
 0x6a9   : > { %v3134_v50 = vpop.f32.mrb[8].mxu1 }
 0x6aa   : > { %v3535_v7 = vrot.slane %v3134_v50, 4  ;;  %v5133_v0 = vpop.f32.mrb[9].mxu1  ;;  %v5577_v50 = vld [vmem:[#allocation22 + $0xcc] ss:$16 sps:$4 sm:$0xff]  }
 0x6ab   : > { %v3137_v41 = vpop.f32.mrb[10].mxu1  ;;  %v3222_v20 = vpop.f32.mrb[12].mxu0  ;;  %v5575_v0 = vld [vmem:[#allocation22 + $0xc8] ss:$16 sps:$4 sm:$0xff]  }
 0x6ac   : > { %v3536_v15 = vsel %vm7892_vm8, %v3535_v7, %v3534_v1  ;;  %v3537_v48 = vrot.slane %v3222_v20, 3  ;;  %v5134_v57 = vpop.f32.mrb[11].mxu1  ;;  %v5153_v16 = vpop.f32.mrb[13].mxu0  ;;  %v5551_v1 = vld [vmem:[#allocation22 + $0x48] ss:$16 sps:$4 sm:$0xff]  }
 0x6ad   : > { %v3225_v49 = vpop.f32.mrb[14].mxu0  ;;  %v5572_v7 = vld [vmem:[#allocation22 + $0xc0] ss:$16 sps:$4 sm:$0xff]   ;;  %v5580_v41 = vld [vmem:[#allocation22 + $0xe4] ss:$16 sps:$4 sm:$0xff]  }
 0x6ae   : > { %v3538_v25 = vsel %vm7893_vm9, %v3537_v48, %v3536_v15  ;;  %v5154_v32 = vpop.f32.mrb[15].mxu0  ;;  %v5583_v20 = vld [vmem:[#allocation22 + $0xec] ss:$16 sps:$4 sm:$0xff]   ;;  %v5578_v15 = vld [vmem:[#allocation22 + $0xe0] ss:$16 sps:$4 sm:$0xff]  }
 0x6af   : > { %v5581_v48 = vld [vmem:[#allocation22 + $0xe8] ss:$16 sps:$4 sm:$0xff]   ;;  %v5586_v57 = vld [vmem:[#allocation25 + $0x4] ss:$16 sps:$4 sm:$0xff]   ;;  %v5589_v16 = vld [vmem:[#allocation25 + $0xc] ss:$16 sps:$4 sm:$0xff]  }
 0x6b0   : > { %v3545_v49 = vld [vmem:[%s6741_s22] sm:$0xf]  ;;  %s4448_s22 = scalar_lea.sflag [#allocation30], %s6738_s23 }
 0x6b1   : > { %v5587_v32 = vld [vmem:[#allocation25 + $0x8] ss:$16 sps:$4 sm:$0xff]  }
 0x6c9   : > { %v3310_v51 = vpop.f32.mrb[12].mxu1 }
 0x6ca   : > { %v3539_v30 = vrot.slane %v3310_v51, 2  ;;  %v5173_v8 = vpop.f32.mrb[13].mxu1  ;;  %v5592_v51 = vld [vmem:[#allocation25 + $0x24] ss:$16 sps:$4 sm:$0xff]  }
 0x6cb   : > { %v3313_v43 = vpop.f32.mrb[14].mxu1  ;;  %v3398_v27 = vpop.f32.mrb[16].mxu0  ;;  %v5590_v8 = vld [vmem:[#allocation25 + $0x20] ss:$16 sps:$4 sm:$0xff]  }
 0x6cc   : > { %v3540_v36 = vsel %vm2491_vm0, %v3539_v30, %v3538_v25  ;;  %v3541_v3 = vrot.slane %v3398_v27, 1  ;;  %v5174_v42 = vpop.f32.mrb[15].mxu1  ;;  %v5193_v5 = vpop.f32.mrb[17].mxu0  ;;  %v5584_v25 = vld [vmem:[#allocation25] ss:$16 sps:$4 sm:$0xff]  }
 0x6cd   : > { %v3401_v62 = vpop.f32.mrb[18].mxu0  ;;  %v5595_v30 = vld [vmem:[#allocation25 + $0x2c] ss:$16 sps:$4 sm:$0xff]   ;;  %v5593_v43 = vld [vmem:[#allocation25 + $0x28] ss:$16 sps:$4 sm:$0xff]  }
 0x6ce   : > { %v3542_v4 = vsel %vm2493_vm1, %v3541_v3, %v3540_v36  ;;  %v5194_v18 = vpop.f32.mrb[19].mxu0  ;;  %v5598_v27 = vld [vmem:[#allocation25 + $0x44] ss:$16 sps:$4 sm:$0xff]   ;;  %v5601_v36 = vld [vmem:[#allocation25 + $0x4c] ss:$16 sps:$4 sm:$0xff]  }
 0x6cf   : > { %v5596_v3 = vld [vmem:[#allocation25 + $0x40] ss:$16 sps:$4 sm:$0xff]   ;;  %v5599_v42 = vld [vmem:[#allocation25 + $0x48] ss:$16 sps:$4 sm:$0xff]   ;;  %v5604_v5 = vld [vmem:[#allocation25 + $0x64] ss:$16 sps:$4 sm:$0xff]  }
 0x6d0   : > { %v5607_v62 = vld [vmem:[#allocation25 + $0x6c] ss:$16 sps:$4 sm:$0xff]   ;;  %v5605_v18 = vld [vmem:[#allocation25 + $0x68] ss:$16 sps:$4 sm:$0xff]  }
 0x6e9   : > { %v3509_v11 = vpop.f32.mrb[16].mxu1 }
 0x6ea   : > { %v3510_v29 = vadd.f32 %v4809_v10, %v3509_v11  ;;  %v5213_v28 = vpop.f32.mrb[17].mxu1  ;;  %v5610_v10 = vld [vmem:[#allocation25 + $0x84] ss:$16 sps:$4 sm:$0xff]   ;;  %v5613_v11 = vld [vmem:[#allocation25 + $0x8c] ss:$16 sps:$4 sm:$0xff]  }
 0x6eb   : > { %v3512_v46 = vpop.f32.mrb[18].mxu1  ;;  %v5616_v28 = vld [vmem:[#allocation25 + $0xa4] ss:$16 sps:$4 sm:$0xff]  }
 0x6ec   : > { %v4818_v33 = vmul.f32 -1.442695, %v3510_v29  ;;  %v5214_v58 = vpop.f32.mrb[19].mxu1  ;;  %v5608_v29 = vld [vmem:[#allocation25 + $0x80] ss:$16 sps:$4 sm:$0xff]  }
 0x6ed   : > { %v5619_v46 = vld [vmem:[#allocation25 + $0xac] ss:$16 sps:$4 sm:$0xff]   ;;  %v5617_v58 = vld [vmem:[#allocation25 + $0xa8] ss:$16 sps:$4 sm:$0xff]  }
 0x6ee   : > { %5636 = vpow2.f32 %v4818_v33  ;;  %v5614_v33 = vld [vmem:[#allocation25 + $0xa0] ss:$16 sps:$4 sm:$0xff]  }
 0x6f8   : > { %v5637_v22 = vpop.eup %5636 }
 0x6f9   : > { %v3518_v14 = vadd.f32 1.0, %v5637_v22  ;;  %v5622_v22 = vld [vmem:[#allocation25 + $0xc4] ss:$16 sps:$4 sm:$0xff]  }
 0x6fb   : > { %5638 = vrcp.f32 %v3518_v14  ;;  %v5625_v14 = vld [vmem:[#allocation25 + $0xcc] ss:$16 sps:$4 sm:$0xff]  }
 0x705   : > { %v5639_v34 = vpop.eup %5638 }
 0x706   : > { %v3544_v44 = vmul.f32 %v5639_v34, %v3542_v4  ;;  %v5602_v4 = vld [vmem:[#allocation25 + $0x60] ss:$16 sps:$4 sm:$0xff]  }
 0x707   : > { %v5620_v34 = vld [vmem:[#allocation25 + $0xc0] ss:$16 sps:$4 sm:$0xff]  }
 0x708   : > { %v3578_v19 = vpack.c.bf16 %v3544_v44, %v3544_v44  ;;  %v5623_v44 = vld [vmem:[#allocation25 + $0xc8] ss:$16 sps:$4 sm:$0xff]  }
 0x70a   : > { %3804 = vmatmul.mubr.bf16.vlgmr.msra.gmra.mrb[20].mxu0 %v3578_v19  ;;  %3845 = vmatmul.mubr.bf16.vlgmr.msra.gmra.mrb[20].mxu1 %v3578_v19  ;;  %v5626_v19 = vld [vmem:[#allocation25 + $0xe0] ss:$16 sps:$4 sm:$0xff]  }
 0x70b   : > { %4014 = vmatpush1.bf16.msra.mxu0 %v5536_v39  ;;  %4055 = vmatpush1.bf16.msra.mxu1 %v5539_v38  ;;  %v5628_v39 = vld [vmem:[#allocation25 + $0xe4] ss:$16 sps:$4 sm:$0xff]   ;;  %v5631_v38 = vld [vmem:[#allocation25 + $0xec] ss:$16 sps:$4 sm:$0xff]  }
 0x70c   : > { %4015 = vmatprep.subr.bf16.mxu0 %v5544_v6  ;;  %4056 = vmatprep.subr.bf16.mxu1 %v5547_v40  ;;  %v5629_v6 = vld [vmem:[#allocation25 + $0xe8] ss:$16 sps:$4 sm:$0xff]  }
 0x70d   : > { %4045 = vmatprep.mubr.bf16.mxu0 %v6220_v23  ;;  %4086 = vmatprep.mubr.bf16.mxu1 %v6220_v23 }
 0x70f   : > { %4016 = vmatpush1.bf16.msra.mxu0 %v5542_v9  ;;  %4057 = vmatpush1.bf16.msra.mxu1 %v5545_v47 }
 0x710   : > { %4017 = vmatprep.subr.bf16.mxu0 %v5550_v59  ;;  %4058 = vmatprep.subr.bf16.mxu1 %v5553_v24 }
 0x713   : > { %4018 = vmatpush1.bf16.msra.mxu0 %v5548_v13  ;;  %4059 = vmatpush1.bf16.msra.mxu1 %v5551_v1 }
 0x714   : > { %4019 = vmatprep.subr.bf16.mxu0 %v5556_v45  ;;  %4060 = vmatprep.subr.bf16.mxu1 %v5559_v60 }
 0x717   : > { %4020 = vmatpush1.bf16.msra.mxu0 %v5554_v63  ;;  %4061 = vmatpush1.bf16.msra.mxu1 %v5557_v54 }
 0x718   : > { %4021 = vmatprep.subr.bf16.mxu0 %v5562_v61  ;;  %4062 = vmatprep.subr.bf16.mxu1 %v5565_v21 }
 0x71b   : > { %4022 = vmatpush1.bf16.msra.mxu0 %v5560_v37  ;;  %4063 = vmatpush1.bf16.msra.mxu1 %v5563_v2 }
 0x71c   : > { %4023 = vmatprep.subr.bf16.mxu0 %v5568_v52  ;;  %4064 = vmatprep.subr.bf16.mxu1 %v5571_v35 }
 0x71f   : > { %4024 = vmatpush1.bf16.msra.mxu0 %v5566_v55  ;;  %4065 = vmatpush1.bf16.msra.mxu1 %v5569_v56 }
 0x720   : > { %4025 = vmatprep.subr.bf16.mxu0 %v5574_v53  ;;  %4066 = vmatprep.subr.bf16.mxu1 %v5577_v50 }
 0x723   : > { %4026 = vmatpush1.bf16.msra.mxu0 %v5572_v7  ;;  %4067 = vmatpush1.bf16.msra.mxu1 %v5575_v0 }
 0x724   : > { %4027 = vmatprep.subr.bf16.mxu0 %v5580_v41  ;;  %4068 = vmatprep.subr.bf16.mxu1 %v5583_v20 }
 0x727   : > { %4028 = vmatpush1.bf16.msra.mxu0 %v5578_v15  ;;  %4069 = vmatpush1.bf16.msra.mxu1 %v5581_v48 }
 0x728   : > { %4287 = vmatprep.subr.bf16.mxu0 %v5586_v57  ;;  %4328 = vmatprep.subr.bf16.mxu1 %v5589_v16 }
 0x72a   : > { %4046 = vmatmul.mubr.bf16.vlgmr.msra.gmra.mrb[24].mxu0 %v3545_v49  ;;  %4087 = vmatmul.mubr.bf16.vlgmr.msra.gmra.mrb[24].mxu1 %v3545_v49 }
 0x72b   : > { %4288 = vmatpush1.bf16.msra.mxu0 %v5584_v25  ;;  %4329 = vmatpush1.bf16.msra.mxu1 %v5587_v32 }
 0x72c   : > { %4289 = vmatprep.subr.bf16.mxu0 %v5592_v51  ;;  %4330 = vmatprep.subr.bf16.mxu1 %v5595_v30 }
 0x72d   : > { %4319 = vmatprep.mubr.bf16.mxu0 %v6220_v23  ;;  %4360 = vmatprep.mubr.bf16.mxu1 %v6220_v23  ;;  %v5611_v23 = vld [vmem:[#allocation25 + $0x88] ss:$16 sps:$4 sm:$0xff]  }
 0x72f   : > { %4290 = vmatpush1.bf16.msra.mxu0 %v5590_v8  ;;  %4331 = vmatpush1.bf16.msra.mxu1 %v5593_v43 }
 0x730   : > { %4291 = vmatprep.subr.bf16.mxu0 %v5598_v27  ;;  %4332 = vmatprep.subr.bf16.mxu1 %v5601_v36 }
 0x733   : > { %4292 = vmatpush1.bf16.msra.mxu0 %v5596_v3  ;;  %4333 = vmatpush1.bf16.msra.mxu1 %v5599_v42 }
 0x734   : > { %4293 = vmatprep.subr.bf16.mxu0 %v5604_v5  ;;  %4334 = vmatprep.subr.bf16.mxu1 %v5607_v62 }
 0x737   : > { %4294 = vmatpush1.bf16.msra.mxu0 %v5602_v4  ;;  %4335 = vmatpush1.bf16.msra.mxu1 %v5605_v18 }
 0x738   : > { %4295 = vmatprep.subr.bf16.mxu0 %v5610_v10  ;;  %4336 = vmatprep.subr.bf16.mxu1 %v5613_v11 }
 0x73b   : > { %4296 = vmatpush1.bf16.msra.mxu0 %v5608_v29  ;;  %4337 = vmatpush1.bf16.msra.mxu1 %v5611_v23 }
 0x73c   : > { %4297 = vmatprep.subr.bf16.mxu0 %v5616_v28  ;;  %4338 = vmatprep.subr.bf16.mxu1 %v5619_v46 }
 0x73f   : > { %4298 = vmatpush1.bf16.msra.mxu0 %v5614_v33  ;;  %4339 = vmatpush1.bf16.msra.mxu1 %v5617_v58 }
 0x740   : > { %4299 = vmatprep.subr.bf16.mxu0 %v5622_v22  ;;  %4340 = vmatprep.subr.bf16.mxu1 %v5625_v14 }
 0x743   : > { %4300 = vmatpush1.bf16.msra.mxu0 %v5620_v34  ;;  %4341 = vmatpush1.bf16.msra.mxu1 %v5623_v44 }
 0x744   : > { %4301 = vmatprep.subr.bf16.mxu0 %v5628_v39  ;;  %4342 = vmatprep.subr.bf16.mxu1 %v5631_v38 }
 0x747   : > { %4302 = vmatpush1.bf16.msra.mxu0 %v5626_v19  ;;  %4343 = vmatpush1.bf16.msra.mxu1 %v5629_v6 }
 0x74a   : > { %4320 = vmatmul.mubr.bf16.vlgmr.msra.gmra.mrb[28].mxu0 %v6791_v12  ;;  %4361 = vmatmul.mubr.bf16.vlgmr.msra.gmra.mrb[28].mxu1 %v6791_v12 }
 0x74b   : > { %6075 = shalt.err (!%p6072_p5)
}
 0x74c   : > { %s6076_s1 = scalar_lea.hbm %s7713_s27, 128  ;;  %s6080_s0 = scalar_lea.hbm %s7895_s24, 896 }
 0x74d   : > { %p6077_p1 = scmp.ne.s32.totalorder %s7713_s27, %s6076_s1  ;;  %p6081_p11 = scmp.lt.u32.totalorder %s7713_s27, %s7895_s24 }
 0x74e   : > { %p6082_p3 = scmp.lt.u32.totalorder %s6080_s0, %s6076_s1  ;;  %p6084_p9 = scmp.lt.u32.totalorder %s6076_s1, %s7713_s27 }
 0x74f   : > { %p6078_p2 = pnand %p6077_p1, %p7896_p12 }
 0x750   : > { %p6083_p8 = por %p6082_p3, %p6081_p11 }
 0x751   : > { %p6079_p7 = pneg %p6078_p2 }
 0x752   : > { %p6085_p6 = por %p6084_p9, %p6083_p8 }
 0x754   : > { %p6086_p10 = pnand %p6085_p6, %p6079_p7 }
 0x756   : > { %6089 = shalt.err (!%p6086_p10)
}
 0x757   : > { %5270 = dma.vmem_to_hbm [thread:$0]  (%p7896_p12), %s4475_s26, 128, %s7713_s27, %s4448_s22   ;;  %v4373_v53 = vld [vmem:[#allocation27] sm:$0xf]  ;;  %v4381_v50 = vsub.s32 1, %v6798_v17  ;;  %v4389_v32 = vsub.s32 3, %v6798_v17  ;;  %v4385_v5 = vsub.s32 2, %v6798_v17 }
 0x758   : > { %v4378_v7 = vrot.slane %v4373_v53, %v6810_v26  ;;  %v710_v58 = vld [vmem:[#allocation3] sm:$0xff]  ;;  %v4431_v14 = vsub.f32 1.0, %v7606_v31  ;;  %s4461_s6 = sshll.u32 %s6772_s3, 4  ;;  %s7897_s22 = sld [smem:[#allocation54_spill]]  ;;  %s7749_s6 = int_to_ptr.vmem [resolvable:$true] %s4461_s6 }
 0x759   : > { %v4382_v20 = vrot.slane %v4373_v53, %v4381_v50  ;;  %v4390_v26 = vrot.slane %v4373_v53, %v4389_v32  ;;  %v4386_v4 = vrot.slane %v4373_v53, %v4385_v5  ;;  %s4443_s1 = scalar_lea.sflag [#allocation8], %s6738_s23  ;;  %s6090_s4 = scalar_lea.vmem %s7749_s6, 128 }
 0x75a   : > { %v4435_v19 = vmul.f32 %v4431_v14, %v710_v58  ;;  %p6091_p13 = scmp.ne.s32.totalorder %s7749_s6, %s6090_s4  ;;  %s6222_s19 = smov [#allocation28]  }
 0x75b   : > { %s6094_s21 = sshll.u32 %s6222_s19, 4  ;;  %s6095_s21 = int_to_ptr.vmem [resolvable:$false] %s6094_s21 }
 0x75c   : > { %p6092_p4 = pnand %p6091_p13, %p7896_p12  ;;  %s6096_s0 = scalar_lea.vmem %s6095_s21, 256 }
 0x75d   : > { %p6097_p5 = scmp.lt.s32.totalorder %s7749_s6, %s6095_s21  ;;  %p6098_p1 = scmp.lt.s32.totalorder %s6096_s0, %s6090_s4 }
 0x75e   : > { %s7747_s16 = scalar_lea.hbm %s7897_s22, %s4921_s2  ;;  %p6093_p0 = pneg %p6092_p4 }
 0x75f   : > { %p6099_p2 = por %p6098_p1, %p6097_p5 }
 0x761   : > { %p6100_p7 = pnand %p6099_p2, %p6093_p0 }
 0x7dd   : > { %v3805_v12 = vpop.f32.mrb[20].mxu0  ;;  %v3846_v40 = vpop.f32.mrb[20].mxu1 }
 0x7de   : > { %v3807_v9 = vpop.f32.mrb[21].mxu0  ;;  %v3848_v47 = vpop.f32.mrb[21].mxu1 }
 0x7df   : > { %v3809_v59 = vpop.f32.mrb[22].mxu0  ;;  %v3850_v24 = vpop.f32.mrb[22].mxu1 }
 0x7e0   : > { %v3810_v13 = vpop.f32.mrb[23].mxu0  ;;  %v3851_v1 = vpop.f32.mrb[23].mxu1  ;;  %v5657_v59 = vld [vmem:[#allocation2] sm:$0xff] }
 0x7e1   : > { %v4432_v24 = vmul.f32 %v5657_v59, %v4431_v14 }
 0x7fd   : > { %v4047_v45 = vpop.f32.mrb[24].mxu0  ;;  %v4088_v60 = vpop.f32.mrb[24].mxu1 }
 0x7fe   : > { %v4048_v63 = vadd.f32 %v4047_v45, %v3805_v12  ;;  %v4089_v54 = vadd.f32 %v4088_v60, %v3846_v40  ;;  %v4049_v61 = vpop.f32.mrb[25].mxu0  ;;  %v4090_v21 = vpop.f32.mrb[25].mxu1 }
 0x7ff   : > { %v4050_v37 = vadd.f32 %v4049_v61, %v3807_v9  ;;  %v4091_v2 = vadd.f32 %v4090_v21, %v3848_v47  ;;  %v4051_v52 = vpop.f32.mrb[26].mxu0  ;;  %v4092_v35 = vpop.f32.mrb[26].mxu1 }
 0x800   : > { %v4052_v55 = vpop.f32.mrb[27].mxu0  ;;  %v4093_v56 = vpop.f32.mrb[27].mxu1 }
 0x81d   : > { %v4321_v0 = vpop.f32.mrb[28].mxu0  ;;  %v4362_v41 = vpop.f32.mrb[28].mxu1 }
 0x81e   : > { %v4369_v15 = vadd.f32 %v4321_v0, %v4048_v63  ;;  %v4371_v48 = vadd.f32 %v4362_v41, %v4089_v54  ;;  %v4323_v57 = vpop.f32.mrb[29].mxu0  ;;  %v4364_v16 = vpop.f32.mrb[29].mxu1 }
 0x81f   : > { %v4370_v49 = vadd.f32 %v4323_v57, %v4050_v37  ;;  %v4372_v25 = vadd.f32 %v4364_v16, %v4091_v2  ;;  %v4325_v51 = vpop.f32.mrb[30].mxu0  ;;  %v4366_v30 = vpop.f32.mrb[30].mxu1 }
 0x820   : > { %v4395_v8 = vadd.f32 %v4378_v7, %v4369_v15  ;;  %v4326_v43 = vpop.f32.mrb[31].mxu0  ;;  %v4367_v27 = vpop.f32.mrb[31].mxu1  ;;  %v4397_v10 = vadd.f32 %v4386_v4, %v4371_v48 }
 0x821   : > { %v4396_v36 = vadd.f32 %v4382_v20, %v4370_v49  ;;  %v4398_v62 = vadd.f32 %v4390_v26, %v4372_v25 }
 0x822   : > { %v4915_v3 = vmul.f32 -1.442695, %v4395_v8 }
 0x823   : > { %v4916_v42 = vmul.f32 -1.442695, %v4396_v36  ;;  %v4917_v18 = vmul.f32 -1.442695, %v4398_v62 }
 0x824   : > { %5640 = vpow2.f32 %v4915_v3 }
 0x825   : > { %5642 = vpow2.f32 %v4916_v42 }
 0x826   : > { %5644 = vpow2.f32 %v4917_v18 }
 0x827   : > { %5646 = vtanh.f32 %v4397_v10 }
 0x82e   : > { %v5641_v11 = vpop.eup %5640 }
 0x82f   : > { %v5643_v29 = vpop.eup %5642  ;;  %v4402_v23 = vadd.f32 1.0, %v5641_v11 }
 0x830   : > { %v4408_v28 = vadd.f32 1.0, %v5643_v29  ;;  %v5645_v46 = vpop.eup %5644 }
 0x831   : > { %5648 = vrcp.f32 %v4402_v23  ;;  %v5647_v33 = vpop.eup %5646  ;;  %v4415_v44 = vadd.f32 1.0, %v5645_v46 }
 0x832   : > { %5650 = vrcp.f32 %v4408_v28 }
 0x833   : > { %5652 = vrcp.f32 %v4415_v44 }
 0x83b   : > { %v5649_v22 = vpop.eup %5648 }
 0x83c   : > { %v5651_v17 = vpop.eup %5650  ;;  %v4419_v34 = vmul.f32 %v5649_v22, %v5647_v33 }
 0x83d   : > { %v4418_v39 = vmul.f32 %v5651_v17, %v710_v58  ;;  %v5653_v40 = vpop.eup %5652 }
 0x83f   : > { %v4420_v38 = vadd.f32 %v4419_v34, %v4418_v39 }
 0x841   : > { %5654 = vtanh.f32 %v4420_v38  ;;  %v4434_v6 = vmul.f32 %v7606_v31, %v4420_v38 }
 0x843   : > { %v4436_v12 = vadd.f32 %v4435_v19, %v4434_v6 }
 0x845   : > { %4438 = vst [vmem:[#allocation3] sm:$0xff] %v4436_v12 }
 0x84b   : > { %v5655_v9 = vpop.eup %5654 }
 0x84c   : > { %v4422_v47 = vmul.f32 %v5655_v9, %v5653_v40 }
 0x84e   : > { %v4430_v13 = vmul.f32 %v7606_v31, %v4422_v47 }
 0x850   : > { %v4433_v1 = vadd.f32 %v4432_v24, %v4430_v13 }
 0x852   : > { %4437 = vst [vmem:[#allocation2] sm:$0xff] %v4433_v1  ;;  %4439 = vst [vmem:[%s6772_s3] sm:$0xff] %v4433_v1 }
 0x853   : > { %6103 = shalt.err (!%p6100_p7)
}
 0x854   : > { %s6104_s23 = scalar_lea.hbm %s7747_s16, 128  ;;  %s6108_s15 = scalar_lea.hbm %s7897_s22, 896 }
 0x855   : > { %p6105_p11 = scmp.ne.s32.totalorder %s7747_s16, %s6104_s23  ;;  %p6109_p9 = scmp.lt.u32.totalorder %s7747_s16, %s7897_s22 }
 0x856   : > { %p6110_p6 = scmp.lt.u32.totalorder %s6108_s15, %s6104_s23  ;;  %p6112_p13 = scmp.lt.u32.totalorder %s6104_s23, %s7747_s16 }
 0x857   : > { %p6106_p3 = pnand %p6105_p11, %p7896_p12 }
 0x858   : > { %p6111_p10 = por %p6110_p6, %p6109_p9 }
 0x859   : > { %p6107_p8 = pneg %p6106_p3 }
 0x85a   : > { %p6113_p4 = por %p6112_p13, %p6111_p10 }
 0x85c   : > { %p6114_p0 = pnand %p6113_p4, %p6107_p8 }
 0x85e   : > { %6117 = shalt.err (!%p6114_p0)
}
 0x85f   : > { %5269 = dma.vmem_to_hbm [thread:$0]  (%p7896_p12), %s7749_s6, 128, %s7747_s16, %s4443_s1  }
 0x860 PF: > { %s7898_s26 = sld [smem:[#allocation43_spill]]  ;;  %p5351_p5 = scmp.ge.s32.totalorder %s6194_s18, 2 }
 0x861   : > { %p7899_p1 = scmp.ne.s32.totalorder %s7862_s28, 0 }
 0x863   : > { %p5318_p2 = pnand %p5351_p5, %p7899_p1 }
 0x866   : > { %s4486_s4 = sand.u32 1, %s7898_s26  }
 0x867   : > { %s4487_s19 = scalar_lea.sflag [#allocation8], %s4486_s4 }
 0x868   : > { %6173 = dma.done.wait (!%p5318_p2), %s4487_s19, 128  }
 0x869   : > { %6175 = vsyncadd (!%p5318_p2), %s4487_s19, 4294967168  ;;  %s4496_s21 = scalar_lea.sflag [#allocation30], %s4486_s4 }
 0x86a   : > { %6177 = dma.done.wait (!%p5318_p2), %s4496_s21, 128  }
 0x86b   : > { %6179 = vsyncadd (!%p5318_p2), %s4496_s21, 4294967168  ;;  %s7900_s3 = sld [smem:[#allocation44_spill]]  ;;  %p41_p12 = scmp.ge.s32.totalorder %s6658_s25, 9  }
 0x86c   : > { %s7901_s0 = smov %s6190_s17  ;;  %s7902_s17 = smov %s6670_s30 }
 0x86d   : > { %s7903_s18 = smov %s6658_s25  ;;  %43 = sbr.rel (!%p41_p12) target bundleno = 32 (0x20), region = 193 }
 0x874   :  { %4501 = vsyncpa [#allocation7], 1 }
 0x875   :  { %4503 = vsyncpa [#allocation7 + $0x1], 1 }
 0x876   :  { %4504 = vsyncpa [#allocation10], 1 }
 0x877   :  { %4505 = vsyncpa [#allocation14], 1 }
 0x878   :  { %4506 = vsyncpa [#allocation17], 1 }
 0x879   :  { %4507 = vsyncpa [#allocation20], 1 }
 0x87a   :  { %4508 = vsyncpa [#allocation23], 1 }
 0x87b   :  { %4509 = vsyncpa [#allocation26], 1 }
 0x87c   :  { %4510 = vsyncpa [#allocation8], 1 }
 0x87d   :  { %4512 = vsyncpa [#allocation8 + $0x1], 1 }
 0x87e   :  { %4513 = vsyncpa [#allocation30], 1 }
 0x87f   :  { %4515 = vsyncpa [#allocation30 + $0x1], 1 }

// kernel: tpu_custom_call.1
= control target key start
LH: loop header
LB: loop body
LE: loop exit
PB: predicated region body
PF: predicated region fallthrough
CT: control target
= control target key end

     0   :  { %s7791_s0 = inlined_call_operand.hbm [shape: s32[7], index: 0, kind: input, shape index: {}]   ;;  %s7792_s1 = inlined_call_operand.hbm [shape: f32[8,128,128], index: 1, kind: input, shape index: {}]   ;;  %s7793_s2 = inlined_call_operand.hbm [shape: bf16[8,128,128], index: 2, kind: input, shape index: {}]   ;;  %s7794_s3 = inlined_call_operand.hbm [shape: bf16[7,8,128], index: 3, kind: input, shape index: {}]   ;;  %s7795_s4 = inlined_call_operand.hbm [shape: f32[8,128], index: 4, kind: input, shape index: {}]   ;;  %s7796_s5 = inlined_call_operand.hbm [shape: f32[8,128], index: 5, kind: input, shape index: {}]   ;;  %s7797_s6 = inlined_call_operand.hbm [shape: bf16[128,128], index: 6, kind: input, shape index: {}]   ;;  %s7798_s7 = inlined_call_operand.hbm [shape: f32[1,128], index: 7, kind: input, shape index: {}]   ;;  %s7799_s8 = inlined_call_operand.hbm [shape: f32[1,128], index: 8, kind: input, shape index: {}]   ;;  %s7800_s9 = inlined_call_operand.hbm [shape: bf16[128,128], index: 9, kind: input, shape index: {}]   ;;  %s7801_s10 = inlined_call_operand.hbm [shape: f32[1,128], index: 10, kind: input, shape index: {}]   ;;  %s7802_s11 = inlined_call_operand.hbm [shape: bf16[128,512], index: 11, kind: input, shape index: {}]   ;;  %s7803_s12 = inlined_call_operand.hbm [shape: bf16[128,512], index: 12, kind: input, shape index: {}]   ;;  %s7804_s13 = inlined_call_operand.hbm [shape: bf16[128,512], index: 13, kind: input, shape index: {}]   ;;  %s7805_s14 = inlined_call_operand.hbm [shape: f32[1,512], index: 14, kind: input, shape index: {}]   ;;  %s7806_s15 = inlined_call_operand.hbm [shape: f32[7,8,128], index: 15, kind: output, shape index: {0}]   ;;  %s7807_s16 = inlined_call_operand.hbm [shape: f32[7,8,128], index: 16, kind: output, shape index: {1}]  }
   0x1   :  { %7832 = sst [smem:[#allocation47_spill]] %s7791_s0 }
   0x2   :  { %7833 = sst [smem:[#allocation48_spill]] %s7792_s1  ;;  %s7841_s23 = sld [smem:[#allocation47_spill]] }
   0x3   :  { %7834 = sst [smem:[#allocation49_spill]] %s7793_s2 }
   0x4   :  { %7835 = sst [smem:[#allocation50_spill]] %s7794_s3 }
   0x5   :  { %7836 = sst [smem:[#allocation51_spill]] %s7795_s4 }
   0x6   :  { %7837 = sst [smem:[#allocation52_spill]] %s7796_s5 }
   0x7   :  { %7838 = sst [smem:[#allocation53_spill]] %s7797_s6 }
   0x8   :  { %7839 = sst [smem:[#allocation54_spill]] %s7806_s15  ;;  %s5658_s3 = scalar_lea.hbm %s7841_s23, 16 }
   0x9   :  { %7840 = sst [smem:[#allocation55_spill]] %s7807_s16  ;;  %p5659_p0 = scmp.ne.s32.totalorder %s7841_s23, %s5658_s3 }
   0xa   :  { %p5662_p1 = scmp.lt.u32.totalorder %s5658_s3, %s7841_s23 }
   0xc   :  { %p5664_p2 = pnand %p5662_p1, %p5659_p0 }
   0xe   :  { %5667 = shalt.err (!%p5664_p2)  }
   0xf   :  { %s6196_s28 = smov [#allocation5]  }
  0x10   :  { %23 = dma.hbm_to_smem %s7841_s23, 16, %s6196_s28, [#allocation4] }
  0x11   :  { %6134 = dma.done.wait [#allocation4], 16 }
  0x12   :  { %6135 = vsyncadd [#allocation4], 4294967280 }
  0x13   :  { %25 = sfence }
  0x14   :  { %26 = vsyncpa [#allocation7], 0 }
  0x15   :  { %27 = vsyncpa [#allocation10], 0 }
  0x16   :  { %28 = vsyncpa [#allocation14], 0 }
  0x17   :  { %29 = vsyncpa [#allocation17], 0 }
  0x18   :  { %30 = vsyncpa [#allocation20], 0 }
  0x19   :  { %31 = vsyncpa [#allocation23], 0 }
  0x1a   :  { %32 = vsyncpa [#allocation26], 0 }
  0x1b   :  { %33 = vsyncpa [#allocation8], 0 }
  0x1c   :  { %35 = vsyncpa [#allocation8 + $0x1], 0 }
  0x1d   :  { %36 = vsyncpa [#allocation30], 0 }
  0x1e   :  { %38 = vsyncpa [#allocation30 + $0x1], 0  ;;  %s6320_s3 = smov 0   ;;  %s6322_s0 = smov 0  }
  0x1f   :  { %s6324_s17 = smov 0   ;;  %s6326_s18 = smov 0  }
  0x20 LB: > { %7842 = sst [smem:[#allocation43_spill]] %s6182_s3  ;;  %s6197_s19 = smov [#allocation6]   ;;  %s6194_s18 = sphi %s6326_s18, %s7903_s18   ;;  %s6190_s17 = sphi %s6324_s17, %s7902_s17   ;;  %s6186_s0 = sphi %s6322_s0, %s7901_s0   ;;  %s6182_s3 = sphi %s6320_s3, %s7900_s3  }
  0x21   : > { %7843 = sst [smem:[#allocation44_spill]] %s6186_s0  ;;  %s412_s20 = sshll.u32 %s6197_s19, 4  ;;  %s6347_s20 = int_to_ptr.vmem [resolvable:$true] %s412_s20 }
  0x22   : > { %s6341_s21 = sadd.s32 4294967295, %s6194_s18   ;;  %p4700_p3 = scmp.ge.s32.totalorder %s6194_s18, 1 }
  0x23   : > { %7844 = sst [smem:[#allocation45_spill]] %s6341_s21  ;;  %p7818_p4 = scmp.eq.s32.totalorder %s6341_s21, 0 }
  0x24   : > { %p400_p5 = scmp.lt.s32.totalorder %s6194_s18, 8  ;;  %s6198_s23 = smov [#allocation9]  }
  0x25   : > { %s425_s24 = sshll.u32 %s6198_s23, 4  ;;  %s6199_s26 = smov [#allocation13]   ;;  %s6361_s24 = int_to_ptr.vmem [resolvable:$true] %s425_s24 }
  0x26   : > { %p6349_p7 = pnand %p4700_p3, %p400_p5  ;;  %s6363_s27 = sshll.u32 %s6199_s26, 4  ;;  %s451_s27 = int_to_ptr.vmem [resolvable:$true] %s6363_s27 }
  0x27   : > { %s7848_s1 = sld [smem:[#allocation48_spill]] }
  0x28   : > { %s7845_s22 = scalar_select %p6349_p7, 1, 0 }
  0x29   : > { %p5273_p8 = pneg %p6349_p7 }
  0x2a   : > { %7846 = sst [smem:[#allocation46_spill]] %s7845_s22 }
  0x2b   : > { %p6357_p9 = pnand %p5273_p8, %p7818_p4 }
  0x2d   : > { %s5668_s30 = scalar_lea.hbm %s7848_s1, 16384  ;;  %p6373_p11 = pneg %p6357_p9 }
  0x2e   : > { %p5669_p10 = scmp.ne.s32.totalorder %s7848_s1, %s5668_s30  ;;  %p5675_p0 = scmp.lt.u32.totalorder %s5668_s30, %s7848_s1 }
  0x30   : > { %p5671_p12 = pnand %p6373_p11, %p5669_p10 }
  0x32   : > { %p5672_p13 = pneg %p5671_p12 }
  0x34   : > { %p5677_p1 = pnand %p5675_p0, %p5672_p13 }
  0x36   : > { %5680 = shalt.err (!%p5677_p1)
}
  0x37   : > { %s5681_s15 = scalar_lea.vmem %s6347_s20, 16384  ;;  %p5689_p8 = scmp.lt.s32.totalorder %s6347_s20, %s6347_s20 }
  0x38   : > { %p5682_p2 = scmp.ne.s32.totalorder %s6347_s20, %s5681_s15  ;;  %p5690_p6 = scmp.lt.s32.totalorder %s5681_s15, %s5681_s15 }
  0x3a   : > { %p5684_p3 = pnand %p5682_p2, %p6373_p11  ;;  %p5691_p10 = por %p5690_p6, %p5689_p8 }
  0x3c   : > { %p5685_p5 = pneg %p5684_p3 }
  0x3e   : > { %p5692_p12 = pnand %p5691_p10, %p5685_p5 }
  0x40   : > { %5695 = shalt.err (!%p5692_p12)
}
  0x41   : > { %s6200_s28 = smov 128   ;;  %s6201_s16 = smov 8  }
  0x42   : > { %5276 = dma.hbm_to_vmem [thread:$0]  (!%p6357_p9), %s7848_s1, 16384, %s6347_s20, [#allocation7], %s6200_s28, %s6200_s28, %s6201_s16  }
  0x43   : > { %s7850_s2 = sld [smem:[#allocation49_spill]] }
  0x49   : > { %s5696_s22 = scalar_lea.hbm %s7850_s2, 8192 }
  0x4a   : > { %p5697_p6 = scmp.ne.s32.totalorder %s7850_s2, %s5696_s22  ;;  %p5703_p1 = scmp.lt.u32.totalorder %s5696_s22, %s7850_s2 }
  0x4c   : > { %p5699_p13 = pnand %p5697_p6, %p6373_p11 }
  0x4e   : > { %p5700_p0 = pneg %p5699_p13 }
  0x50   : > { %p5705_p2 = pnand %p5703_p1, %p5700_p0 }
  0x52   : > { %5708 = shalt.err (!%p5705_p2)
}
  0x53   : > { %s5709_s20 = scalar_lea.vmem %s6361_s24, 8192  ;;  %p5717_p10 = scmp.lt.s32.totalorder %s6361_s24, %s6361_s24 }
  0x54   : > { %p5710_p3 = scmp.ne.s32.totalorder %s6361_s24, %s5709_s20  ;;  %p5718_p12 = scmp.lt.s32.totalorder %s5709_s20, %s5709_s20 }
  0x56   : > { %p5712_p5 = pnand %p5710_p3, %p6373_p11  ;;  %p5719_p6 = por %p5718_p12, %p5717_p10 }
  0x58   : > { %p5713_p8 = pneg %p5712_p5 }
  0x5a   : > { %p5720_p13 = pnand %p5719_p6, %p5713_p8 }
  0x5c   : > { %5723 = shalt.err (!%p5720_p13)
}
  0x5d   : > { %s7820_s3 = smov 64   ;;  %s7822_s0 = smov 4  }
  0x5e   : > { %5279 = dma.hbm_to_vmem [thread:$0]  (!%p6357_p9), %s7850_s2, 8192, %s6361_s24, [#allocation10], %s7820_s3, %s7820_s3, %s7822_s0  }
  0x5f   : > { %s7851_s5 = sld [smem:[#allocation52_spill]] }
  0x65   : > { %s5724_s29 = scalar_lea.hbm %s7851_s5, 128 }
  0x66   : > { %p5725_p0 = scmp.ne.s32.totalorder %s7851_s5, %s5724_s29  ;;  %p5731_p3 = scmp.lt.u32.totalorder %s5724_s29, %s7851_s5 }
  0x68   : > { %p5727_p1 = pnand %p5725_p0, %p6373_p11 }
  0x6a   : > { %p5728_p2 = pneg %p5727_p1 }
  0x6c   : > { %p5733_p5 = pnand %p5731_p3, %p5728_p2 }
  0x6e   : > { %5736 = shalt.err (!%p5733_p5)
}
  0x6f   : > { %s5737_s20 = scalar_lea.vmem %s451_s27, 128  ;;  %p5745_p6 = scmp.lt.s32.totalorder %s451_s27, %s451_s27 }
  0x70   : > { %p5738_p8 = scmp.ne.s32.totalorder %s451_s27, %s5737_s20  ;;  %p5746_p13 = scmp.lt.s32.totalorder %s5737_s20, %s5737_s20 }
  0x72   : > { %p5740_p10 = pnand %p5738_p8, %p6373_p11  ;;  %p5747_p4 = por %p5746_p13, %p5745_p6 }
  0x74   : > { %p5741_p12 = pneg %p5740_p10 }
  0x76   : > { %p5748_p7 = pnand %p5747_p4, %p5741_p12 }
  0x78   : > { %5751 = shalt.err (!%p5748_p7)
}
  0x79   : > { %5285 = dma.hbm_to_vmem [thread:$0]  (!%p6357_p9), %s7851_s5, 128, %s451_s27, [#allocation14]  }
  0x7a   : > { %s6204_s22 = smov [#allocation16]   ;;  %s6205_s16 = smov [#allocation19]  }
  0x7b   : > { %s474_s28 = sshll.u32 %s6204_s22, 4  ;;  %s495_s29 = sshll.u32 %s6205_s16, 4  ;;  %s475_s28 = int_to_ptr.vmem [resolvable:$true] %s474_s28  ;;  %s496_s29 = int_to_ptr.vmem [resolvable:$true] %s495_s29 }
  0x7c   : > { %s5752_s26 = scalar_lea.hbm %s7798_s7, 16 }
  0x7d   : > { %p5753_p4 = scmp.ne.s32.totalorder %s7798_s7, %s5752_s26  ;;  %p5759_p1 = scmp.lt.u32.totalorder %s5752_s26, %s7798_s7 }
  0x7f   : > { %p5755_p7 = pnand %p5753_p4, %p6373_p11 }
  0x81   : > { %p5756_p0 = pneg %p5755_p7 }
  0x83   : > { %p5761_p2 = pnand %p5759_p1, %p5756_p0 }
  0x85   : > { %5764 = shalt.err (!%p5761_p2)
}
  0x86   : > { %s5765_s27 = scalar_lea.vmem %s475_s28, 16  ;;  %s5772_s21 = scalar_lea.vmem %s475_s28, 32 }
  0x87   : > { %p5766_p3 = scmp.ne.s32.totalorder %s475_s28, %s5765_s27  ;;  %p5773_p10 = scmp.lt.s32.totalorder %s475_s28, %s475_s28 }
  0x88   : > { %p5774_p12 = scmp.lt.s32.totalorder %s5772_s21, %s5765_s27 }
  0x89   : > { %p5768_p5 = pnand %p5766_p3, %p6373_p11 }
  0x8a   : > { %p5775_p6 = por %p5774_p12, %p5773_p10 }
  0x8b   : > { %p5769_p8 = pneg %p5768_p5 }
  0x8d   : > { %p5776_p13 = pnand %p5775_p6, %p5769_p8 }
  0x8f   : > { %5779 = shalt.err (!%p5776_p13)
}
  0x90   : > { %5291 = dma.hbm_to_vmem [thread:$0]  (!%p6357_p9), %s7798_s7, 16, %s475_s28, [#allocation17]  }
  0x91   : > { %s5780_s19 = scalar_lea.hbm %s7800_s9, 1024 }
  0x92   : > { %p5781_p4 = scmp.ne.s32.totalorder %s7800_s9, %s5780_s19  ;;  %p5787_p1 = scmp.lt.u32.totalorder %s5780_s19, %s7800_s9 }
  0x94   : > { %p5783_p7 = pnand %p5781_p4, %p6373_p11 }
  0x96   : > { %p5784_p0 = pneg %p5783_p7 }
  0x98   : > { %p5789_p2 = pnand %p5787_p1, %p5784_p0 }
  0x9a   : > { %5792 = shalt.err (!%p5789_p2)
}
  0x9b   : > { %s5793_s27 = scalar_lea.vmem %s496_s29, 1024  ;;  %p5801_p10 = scmp.lt.s32.totalorder %s496_s29, %s496_s29 }
  0x9c   : > { %p5794_p3 = scmp.ne.s32.totalorder %s496_s29, %s5793_s27  ;;  %p5802_p12 = scmp.lt.s32.totalorder %s5793_s27, %s5793_s27 }
  0x9e   : > { %p5796_p5 = pnand %p5794_p3, %p6373_p11  ;;  %p5803_p6 = por %p5802_p12, %p5801_p10 }
  0xa0   : > { %p5797_p8 = pneg %p5796_p5 }
  0xa2   : > { %p5804_p13 = pnand %p5803_p6, %p5797_p8 }
  0xa4   : > { %5807 = shalt.err (!%p5804_p13)
}
  0xa5   : > { %s7852_s28 = smov 64   ;;  %s6206_s16 = smov [#allocation22]  }
  0xa6   : > { %5297 = dma.hbm_to_vmem [thread:$0]  (!%p6357_p9), %s7800_s9, 1024, %s496_s29, [#allocation20], %s7852_s28, %s7852_s28, %s7822_s0  }
  0xa7   : > { %s519_s3 = sshll.u32 %s6206_s16, 4  ;;  %s5808_s26 = scalar_lea.hbm %s7802_s11, 4096  ;;  %s520_s3 = int_to_ptr.vmem [resolvable:$true] %s519_s3 }
  0xa8   : > { %p5809_p4 = scmp.ne.s32.totalorder %s7802_s11, %s5808_s26  ;;  %p5815_p1 = scmp.lt.u32.totalorder %s5808_s26, %s7802_s11 }
  0xaa   : > { %p5811_p7 = pnand %p5809_p4, %p6373_p11 }
  0xac   : > { %p5812_p0 = pneg %p5811_p7 }
  0xae   : > { %p5817_p2 = pnand %p5815_p1, %p5812_p0 }
  0xb0   : > { %5820 = shalt.err (!%p5817_p2)
}
  0xb1   : > { %s5821_s29 = scalar_lea.vmem %s520_s3, 4096  ;;  %p5829_p10 = scmp.lt.s32.totalorder %s520_s3, %s520_s3 }
  0xb2   : > { %p5822_p3 = scmp.ne.s32.totalorder %s520_s3, %s5821_s29  ;;  %p5830_p12 = scmp.lt.s32.totalorder %s5821_s29, %s5821_s29 }
  0xb4   : > { %p5824_p5 = pnand %p5822_p3, %p6373_p11  ;;  %p5831_p6 = por %p5830_p12, %p5829_p10 }
  0xb6   : > { %p5825_p8 = pneg %p5824_p5 }
  0xb8   : > { %p5832_p13 = pnand %p5831_p6, %p5825_p8 }
  0xba   : > { %5835 = shalt.err (!%p5832_p13)
}
  0xbb   : > { %s6207_s21 = smov 256   ;;  %s6208_s22 = smov 16  }
  0xbc   : > { %5303 = dma.hbm_to_vmem [thread:$0]  (!%p6357_p9), %s7802_s11, 4096, %s520_s3, [#allocation23], %s6207_s21, %s6207_s21, %s6208_s22  }
  0xbd   : > { %s6209_s19 = smov [#allocation25]   ;;  %s6210_s15 = smov [#allocation12]  }
  0xbe   : > { %s545_s26 = sshll.u32 %s6209_s19, 4  ;;  %s439_s20 = sshll.u32 %s6210_s15, 4  ;;  %s546_s26 = int_to_ptr.vmem [resolvable:$true] %s545_s26  ;;  %s6499_s20 = int_to_ptr.vmem [resolvable:$true] %s439_s20 }
  0xbf   : > { %s5836_s29 = scalar_lea.hbm %s7804_s13, 4096 }
  0xc0   : > { %p5837_p4 = scmp.ne.s32.totalorder %s7804_s13, %s5836_s29  ;;  %p5843_p1 = scmp.lt.u32.totalorder %s5836_s29, %s7804_s13 }
  0xc2   : > { %p5839_p7 = pnand %p5837_p4, %p6373_p11 }
  0xc4   : > { %p5840_p0 = pneg %p5839_p7 }
  0xc6   : > { %p5845_p2 = pnand %p5843_p1, %p5840_p0 }
  0xc8   : > { %5848 = shalt.err (!%p5845_p2)
}
  0xc9   : > { %s5849_s30 = scalar_lea.vmem %s546_s26, 4096  ;;  %p5857_p10 = scmp.lt.s32.totalorder %s546_s26, %s546_s26 }
  0xca   : > { %p5850_p3 = scmp.ne.s32.totalorder %s546_s26, %s5849_s30  ;;  %p5858_p12 = scmp.lt.s32.totalorder %s5849_s30, %s5849_s30 }
  0xcc   : > { %p5852_p5 = pnand %p5850_p3, %p6373_p11  ;;  %p5859_p6 = por %p5858_p12, %p5857_p10 }
  0xce   : > { %p5853_p8 = pneg %p5852_p5 }
  0xd0   : > { %p5860_p13 = pnand %p5859_p6, %p5853_p8 }
  0xd2   : > { %5863 = shalt.err (!%p5860_p13)
}
  0xd3   : > { %5309 = dma.hbm_to_vmem [thread:$0]  (!%p6357_p9), %s7804_s13, 4096, %s546_s26, [#allocation26], %s6207_s21, %s6207_s21, %s6208_s22  }
  0xd4   : > { %s7853_s4 = sld [smem:[#allocation51_spill]] }
  0xda   : > { %s5864_s24 = scalar_lea.hbm %s7853_s4, 128 }
  0xdb   : > { %p5865_p4 = scmp.ne.s32.totalorder %s7853_s4, %s5864_s24  ;;  %p5871_p1 = scmp.lt.u32.totalorder %s5864_s24, %s7853_s4 }
  0xdd   : > { %p5867_p7 = pnand %p5865_p4, %p6373_p11 }
  0xdf   : > { %p5868_p0 = pneg %p5867_p7 }
  0xe1   : > { %p5873_p2 = pnand %p5871_p1, %p5868_p0 }
  0xe3   : > { %5876 = shalt.err (!%p5873_p2)
}
  0xe4   : > { %s5877_s26 = scalar_lea.vmem %s6499_s20, 128  ;;  %p5885_p10 = scmp.lt.s32.totalorder %s6499_s20, %s6499_s20 }
  0xe5   : > { %p5878_p3 = scmp.ne.s32.totalorder %s6499_s20, %s5877_s26  ;;  %p5886_p12 = scmp.lt.s32.totalorder %s5877_s26, %s5877_s26 }
  0xe7   : > { %p5880_p5 = pnand %p5878_p3, %p6373_p11  ;;  %p5887_p6 = por %p5886_p12, %p5885_p10 }
  0xe9   : > { %p5881_p8 = pneg %p5880_p5 }
  0xeb   : > { %p5888_p13 = pnand %p5887_p6, %p5881_p8 }
  0xed   : > { %5891 = shalt.err (!%p5888_p13)
}
  0xee   : > { %5282 = dma.hbm_to_vmem [thread:$0]  (!%p6357_p9), %s7853_s4, 128, %s6499_s20, [#allocation10]  }
  0xef   : > { %s6211_s0 = smov [#allocation15]   ;;  %s6212_s15 = smov [#allocation18]  }
  0xf0   : > { %s460_s19 = sshll.u32 %s6211_s0, 4  ;;  %s485_s24 = sshll.u32 %s6212_s15, 4  ;;  %s461_s19 = int_to_ptr.vmem [resolvable:$true] %s460_s19  ;;  %s6545_s24 = int_to_ptr.vmem [resolvable:$true] %s485_s24 }
  0xf1   : > { %s7854_s6 = sld [smem:[#allocation53_spill]] }
  0xf7   : > { %s5892_s16 = scalar_lea.hbm %s7854_s6, 1024 }
  0xf8   : > { %p5893_p4 = scmp.ne.s32.totalorder %s7854_s6, %s5892_s16  ;;  %p5899_p1 = scmp.lt.u32.totalorder %s5892_s16, %s7854_s6 }
  0xfa   : > { %p5895_p7 = pnand %p5893_p4, %p6373_p11 }
  0xfc   : > { %p5896_p0 = pneg %p5895_p7 }
  0xfe   : > { %p5901_p2 = pnand %p5899_p1, %p5896_p0 }
 0x100   : > { %5904 = shalt.err (!%p5901_p2)
}
 0x101   : > { %s5905_s1 = scalar_lea.vmem %s461_s19, 1024  ;;  %p5913_p10 = scmp.lt.s32.totalorder %s461_s19, %s461_s19 }
 0x102   : > { %p5906_p3 = scmp.ne.s32.totalorder %s461_s19, %s5905_s1  ;;  %p5914_p12 = scmp.lt.s32.totalorder %s5905_s1, %s5905_s1 }
 0x104   : > { %p5908_p5 = pnand %p5906_p3, %p6373_p11  ;;  %p5915_p6 = por %p5914_p12, %p5913_p10 }
 0x106   : > { %p5909_p8 = pneg %p5908_p5 }
 0x108   : > { %p5916_p13 = pnand %p5915_p6, %p5909_p8 }
 0x10a   : > { %5919 = shalt.err (!%p5916_p13)
}
 0x10b   : > { %s7855_s0 = smov 4   ;;  %s5920_s3 = scalar_lea.hbm %s7799_s8, 16 }
 0x10c   : > { %5288 = dma.hbm_to_vmem [thread:$0]  (!%p6357_p9), %s7854_s6, 1024, %s461_s19, [#allocation14], %s7852_s28, %s7852_s28, %s7855_s0  }
 0x10d   : > { %p5921_p4 = scmp.ne.s32.totalorder %s7799_s8, %s5920_s3  ;;  %p5927_p1 = scmp.lt.u32.totalorder %s5920_s3, %s7799_s8 }
 0x10f   : > { %p5923_p7 = pnand %p5921_p4, %p6373_p11 }
 0x111   : > { %p5924_p0 = pneg %p5923_p7 }
 0x113   : > { %p5929_p2 = pnand %p5927_p1, %p5924_p0 }
 0x115   : > { %5932 = shalt.err (!%p5929_p2)
}
 0x116   : > { %s5933_s28 = scalar_lea.vmem %s6545_s24, 16  ;;  %s5940_s19 = scalar_lea.vmem %s6545_s24, 32 }
 0x117   : > { %p5934_p3 = scmp.ne.s32.totalorder %s6545_s24, %s5933_s28  ;;  %p5941_p10 = scmp.lt.s32.totalorder %s6545_s24, %s6545_s24 }
 0x118   : > { %p5942_p12 = scmp.lt.s32.totalorder %s5940_s19, %s5933_s28 }
 0x119   : > { %p5936_p5 = pnand %p5934_p3, %p6373_p11 }
 0x11a   : > { %p5943_p6 = por %p5942_p12, %p5941_p10 }
 0x11b   : > { %p5937_p8 = pneg %p5936_p5 }
 0x11d   : > { %p5944_p13 = pnand %p5943_p6, %p5937_p8 }
 0x11f   : > { %5947 = shalt.err (!%p5944_p13)
}
 0x120   : > { %5294 = dma.hbm_to_vmem [thread:$0]  (!%p6357_p9), %s7799_s8, 16, %s6545_s24, [#allocation17]  }
 0x121   : > { %s6213_s27 = smov [#allocation21]   ;;  %s6214_s16 = smov [#allocation24]  }
 0x122   : > { %s509_s29 = sshll.u32 %s6213_s27, 4  ;;  %s532_s3 = sshll.u32 %s6214_s16, 4  ;;  %s510_s29 = int_to_ptr.vmem [resolvable:$true] %s509_s29  ;;  %s6592_s3 = int_to_ptr.vmem [resolvable:$true] %s532_s3 }
 0x123   : > { %s5948_s20 = scalar_lea.hbm %s7801_s10, 16 }
 0x124   : > { %p5949_p4 = scmp.ne.s32.totalorder %s7801_s10, %s5948_s20  ;;  %p5955_p1 = scmp.lt.u32.totalorder %s5948_s20, %s7801_s10 }
 0x126   : > { %p5951_p7 = pnand %p5949_p4, %p6373_p11 }
 0x128   : > { %p5952_p0 = pneg %p5951_p7 }
 0x12a   : > { %p5957_p2 = pnand %p5955_p1, %p5952_p0 }
 0x12c   : > { %5960 = shalt.err (!%p5957_p2)
}
 0x12d   : > { %s5961_s0 = scalar_lea.vmem %s510_s29, 16  ;;  %s5968_s15 = scalar_lea.vmem %s510_s29, 32 }
 0x12e   : > { %p5962_p3 = scmp.ne.s32.totalorder %s510_s29, %s5961_s0  ;;  %p5969_p10 = scmp.lt.s32.totalorder %s510_s29, %s510_s29 }
 0x12f   : > { %p5970_p12 = scmp.lt.s32.totalorder %s5968_s15, %s5961_s0 }
 0x130   : > { %p5964_p5 = pnand %p5962_p3, %p6373_p11 }
 0x131   : > { %p5971_p6 = por %p5970_p12, %p5969_p10 }
 0x132   : > { %p5965_p8 = pneg %p5964_p5 }
 0x134   : > { %p5972_p13 = pnand %p5971_p6, %p5965_p8 }
 0x136   : > { %5975 = shalt.err (!%p5972_p13)
}
 0x137   : > { %5300 = dma.hbm_to_vmem [thread:$0]  (!%p6357_p9), %s7801_s10, 16, %s510_s29, [#allocation20]  }
 0x138   : > { %s5976_s20 = scalar_lea.hbm %s7803_s12, 4096 }
 0x139   : > { %p5977_p4 = scmp.ne.s32.totalorder %s7803_s12, %s5976_s20  ;;  %p5983_p1 = scmp.lt.u32.totalorder %s5976_s20, %s7803_s12 }
 0x13b   : > { %p5979_p7 = pnand %p5977_p4, %p6373_p11 }
 0x13d   : > { %p5980_p0 = pneg %p5979_p7 }
 0x13f   : > { %p5985_p2 = pnand %p5983_p1, %p5980_p0 }
 0x141   : > { %5988 = shalt.err (!%p5985_p2)
}
 0x142   : > { %s5989_s29 = scalar_lea.vmem %s6592_s3, 4096  ;;  %p5997_p10 = scmp.lt.s32.totalorder %s6592_s3, %s6592_s3 }
 0x143   : > { %p5990_p3 = scmp.ne.s32.totalorder %s6592_s3, %s5989_s29  ;;  %p5998_p12 = scmp.lt.s32.totalorder %s5989_s29, %s5989_s29 }
 0x145   : > { %p5992_p5 = pnand %p5990_p3, %p6373_p11  ;;  %p5999_p6 = por %p5998_p12, %p5997_p10 }
 0x147   : > { %p5993_p8 = pneg %p5992_p5 }
 0x149   : > { %p6000_p13 = pnand %p5999_p6, %p5993_p8 }
 0x14b   : > { %6003 = shalt.err (!%p6000_p13)
}
 0x14c   : > { %5306 = dma.hbm_to_vmem [thread:$0]  (!%p6357_p9), %s7803_s12, 4096, %s6592_s3, [#allocation23], %s6207_s21, %s6207_s21, %s6208_s22  }
 0x14d   : > { %s6215_s27 = smov [#allocation27]   ;;  %s6004_s20 = scalar_lea.hbm %s7805_s14, 64 }
 0x14e   : > { %s559_s16 = sshll.u32 %s6215_s27, 4  ;;  %p6005_p4 = scmp.ne.s32.totalorder %s7805_s14, %s6004_s20  ;;  %s560_s16 = int_to_ptr.vmem [resolvable:$true] %s559_s16 }
 0x14f   : > { %p6011_p1 = scmp.lt.u32.totalorder %s6004_s20, %s7805_s14 }
 0x150   : > { %p6007_p7 = pnand %p6005_p4, %p6373_p11 }
 0x152   : > { %p6008_p0 = pneg %p6007_p7 }
 0x154   : > { %p6013_p2 = pnand %p6011_p1, %p6008_p0 }
 0x156   : > { %6016 = shalt.err (!%p6013_p2)
}
 0x157   : > { %s6017_s21 = scalar_lea.vmem %s560_s16, 64  ;;  %p6025_p10 = scmp.lt.s32.totalorder %s560_s16, %s560_s16 }
 0x158   : > { %p6018_p3 = scmp.ne.s32.totalorder %s560_s16, %s6017_s21  ;;  %p6026_p12 = scmp.lt.s32.totalorder %s6017_s21, %s6017_s21 }
 0x15a   : > { %p6020_p5 = pnand %p6018_p3, %p6373_p11  ;;  %p6027_p6 = por %p6026_p12, %p6025_p10 }
 0x15c   : > { %p6021_p8 = pneg %p6020_p5 }
 0x15e   : > { %p6028_p13 = pnand %p6027_p6, %p6021_p8 }
 0x160   : > { %6031 = shalt.err (!%p6028_p13)
}
 0x161   : > { %s7856_s29 = sld [smem:[#allocation44_spill]]  ;;  %s7857_s23 = sld [smem:[#allocation43_spill]] }
 0x162   : > { %s7858_s0 = sld [smem:[#allocation45_spill]]  ;;  %s4699_s15 = sadd.s32 4294967294, %s6194_s18  }
 0x163   : > { %5312 = dma.hbm_to_vmem [thread:$0]  (!%p6357_p9), %s7805_s14, 64, %s560_s16, [#allocation26]  }
 0x164   : > { %s6658_s25 = sadd.s32 1, %s6194_s18   ;;  %s93_s27 = sadd.s32 1, %s6190_s17 }
 0x165   : > { %s90_s26 = ssub.s32 %s6194_s18, %s6658_s25  ;;  %p101_p7 = scmp.eq.s32.totalorder %s6194_s18, 0 }
 0x166   : > { %p91_p4 = scmp.eq.s32.totalorder %s90_s26, 0  ;;  %p367_p8 = scmp.eq.s32.totalorder %s4699_s15, 6 }
 0x167   : > { %p100_p11 = scmp.ne.s32.totalorder %s6190_s17, %s7856_s29  ;;  %p106_p0 = scmp.ne.s32.totalorder %s7856_s29, %s7857_s23 }
 0x168   : > { %p361_p1 = scmp.eq.s32.totalorder %s7858_s0, 6  ;;  %p7859_p3 = scmp.eq.s32.totalorder %s7858_s0, 0 }
 0x169   : > { %s6670_s30 = scalar_select %p91_p4, %s6190_s17, %s93_s27  }
 0x16a   : > { %p102_p2 = por %p101_p7, %p100_p11  ;;  %p6674_p5 = por %p7859_p3, %p106_p0 }
 0x16b   : > { %p6678_p9 = por %p361_p1, %p100_p11  ;;  %p5337_p10 = scmp.lt.s32.totalorder %s6194_s18, 7 }
 0x16c   : > { %s570_s1 = sand.u32 1, %s6194_s18   ;;  %p6684_p12 = por %p367_p8, %p106_p0 }
 0x16d   : > { %s7861_s20 = scalar_select %p6678_p9, 1, 0 }
 0x16e   : > { %s7862_s28 = scalar_select %p6684_p12, 1, 0 }
 0x16f   : > { %s572_s19 = sand.u32 1, %s6190_s17   ;;  %s4716_s24 = sshll.u32 %s6194_s18, 6 }
 0x170   : > { %s4715_s21 = sshll.u32 %s572_s19, 2  ;;  %s7863_s29 = sld [smem:[#allocation50_spill]] }
 0x171   : > { %p6695_p6 = pnand %p5337_p10, %p102_p2  ;;  %s574_s15 = scalar_lea.vmem [#allocation11], %s4715_s21 }
 0x172   : > { %s581_s27 = sshll.u32 %s574_s15, 4  ;;  %s571_s26 = scalar_lea.sflag [#allocation7], %s570_s1  ;;  %s6699_s27 = int_to_ptr.vmem [resolvable:$true] %s581_s27 }
 0x173   : > { %p6034_p11 = pneg %p6695_p6 }
 0x176   : > { %s6693_s23 = scalar_lea.hbm %s7863_s29, %s4716_s24  ;;  %s6037_s3 = scalar_lea.hbm %s7863_s29, 448 }
 0x177   : > { %s6032_s19 = scalar_lea.hbm %s6693_s23, 64  ;;  %p6038_p0 = scmp.lt.u32.totalorder %s6693_s23, %s7863_s29 }
 0x178   : > { %p6033_p13 = scmp.ne.s32.totalorder %s6693_s23, %s6032_s19  ;;  %p6039_p1 = scmp.lt.u32.totalorder %s6037_s3, %s6032_s19 }
 0x179   : > { %p6041_p3 = scmp.lt.u32.totalorder %s6032_s19, %s6693_s23 }
 0x17a   : > { %p6035_p4 = pnand %p6034_p11, %p6033_p13  ;;  %p6040_p2 = por %p6039_p1, %p6038_p0 }
 0x17c   : > { %p6036_p7 = pneg %p6035_p4  ;;  %p6042_p8 = por %p6041_p3, %p6040_p2 }
 0x17e   : > { %p6043_p10 = pnand %p6042_p8, %p6036_p7 }
 0x180   : > { %6046 = shalt.err (!%p6043_p10)
}
 0x181   : > { %s6047_s1 = scalar_lea.vmem %s6699_s27, 64  ;;  %s6216_s21 = smov [#allocation11]  }
 0x182   : > { %p6048_p13 = scmp.ne.s32.totalorder %s6699_s27, %s6047_s1  ;;  %s6052_s15 = sshll.u32 %s6216_s21, 4  ;;  %s6053_s15 = int_to_ptr.vmem [resolvable:$false] %s6052_s15 }
 0x183   : > { %s6054_s2 = scalar_lea.vmem %s6053_s15, 128  ;;  %p6055_p9 = scmp.lt.s32.totalorder %s6699_s27, %s6053_s15 }
 0x184   : > { %p6050_p4 = pnand %p6048_p13, %p6034_p11  ;;  %p6056_p0 = scmp.lt.s32.totalorder %s6054_s2, %s6047_s1 }
 0x186   : > { %p6051_p12 = pneg %p6050_p4  ;;  %p6057_p1 = por %p6056_p0, %p6055_p9 }
 0x188   : > { %p6058_p2 = pnand %p6057_p1, %p6051_p12 }
 0x18a   : > { %6061 = shalt.err (!%p6058_p2)
}
 0x18b   : > { %5316 = dma.hbm_to_vmem [thread:$0]  (!%p6695_p6), %s6693_s23, 64, %s6699_s27, %s571_s26  }
 0x18c   : > { %s7865_s4 = sld [smem:[#allocation46_spill]] }
 0x192   : > { %p7866_p7 = scmp.ne.s32.totalorder %s7865_s4, 0 }
 0x193   : > { %s7867_s19 = sld [smem:[#allocation45_spill]] (!%p7866_p7) }
 0x194   : > { %590 = sbr.rel (%p7866_p7) target bundleno = 2144 (0x860), region = 76 }
 0x199   : > { %p7868_p11 = scmp.eq.s32.totalorder (!%p7866_p7), %s7867_s19, 0 }
 0x19b   : > { %6137 = dma.done.wait (%p7868_p11), [#allocation7], 16384   ;;  %p7869_p3 = pmov %p7868_p11 }
 0x19d   : > { %6139 = vsyncadd (%p7869_p3), [#allocation7], 4294950912  ;;  %p7870_p8 = pmov %p7869_p3 }
 0x19e   : > { %p7871_p9 = pmov %p7869_p3 }
 0x19f   : > { %6141 = dma.done.wait (%p7870_p8), [#allocation10], 8192  }
 0x1a0   : > { %6143 = vsyncadd (%p7871_p9), [#allocation10], 4294959104  ;;  %s7872_s0 = sld [smem:[#allocation44_spill]]  ;;  %s600_s24 = sand.u32 1, %s7867_s19  }
 0x1a1   : > { %s601_s26 = scalar_lea.sflag [#allocation7], %s600_s24 }
 0x1a6   : > { %s6738_s23 = sand.u32 1, %s7872_s0  }
 0x1a7   : > { %s4720_s27 = sshll.u32 %s6738_s23, 2 }
 0x1a8   : > { %s6741_s22 = scalar_lea.vmem [#allocation11], %s4720_s27 }
 0x1a9   : > { %6145 = dma.done.wait (%p6674_p5), %s601_s26, 64  }
 0x1aa   : > { %6147 = vsyncadd (%p6674_p5), %s601_s26, 4294967232  ;;  %p7873_p12 = pmov %p7869_p3 }
 0x1ab   : > { %p7874_p6 = pmov %p7869_p3 }
 0x1ac   : > { %6149 = dma.done.wait (%p7873_p12), [#allocation10], 128  }
 0x1ad   : > { %6151 = vsyncadd (%p7874_p6), [#allocation10], 4294967168  ;;  %p7875_p10 = pmov %p7869_p3 }
 0x1ae   : > { %p7876_p13 = pmov %p7869_p3 }
 0x1af   : > { %6153 = dma.done.wait (%p7875_p10), [#allocation14], 1152  }
 0x1b0   : > { %6155 = vsyncadd (%p7876_p13), [#allocation14], 4294966144  ;;  %p7877_p4 = pmov %p7869_p3 }
 0x1b1   : > { %p7878_p0 = pmov %p7869_p3 }
 0x1b2   : > { %6157 = dma.done.wait (%p7877_p4), [#allocation17], 32  }
 0x1b3   : > { %6159 = vsyncadd (%p7878_p0), [#allocation17], 4294967264  ;;  %p7879_p5 = pmov %p7878_p0 }
 0x1b4   : > { %p7880_p1 = pmov %p7878_p0 }
 0x1b5   : > { %6161 = dma.done.wait (%p7879_p5), [#allocation20], 1040  }
 0x1b6   : > { %6163 = vsyncadd (%p7880_p1), [#allocation20], 4294966256  ;;  %p7881_p2 = pmov %p7878_p0 }
 0x1b7   : > { %p7882_p7 = pmov %p7878_p0 }
 0x1b8   : > { %6165 = dma.done.wait (%p7881_p2), [#allocation23], 8192  }
 0x1b9   : > { %6167 = vsyncadd (%p7882_p7), [#allocation23], 4294959104  ;;  %p7883_p11 = pmov %p7878_p0 }
 0x1ba   : > { %p7884_p3 = pmov %p7878_p0 }
 0x1bb   : > { %6169 = dma.done.wait (%p7883_p11), [#allocation26], 4160  }
 0x1bc   : > { %6171 = vsyncadd (%p7884_p3), [#allocation26], 4294963136  ;;  %s4732_s16 = sshll.u32 %s6738_s23, 3  ;;  %p7885_p8 = scmp.ne.s32.totalorder %s7867_s19, 0 }
 0x1bd   : > { %s6772_s3 = scalar_lea.vmem [#allocation28], %s4732_s16  ;;  %s6774_s1 = scalar_lea.vmem [#allocation29], %s4732_s16  ;;  %v705_v0 = vld [vmem:[#allocation12] sm:$0xff] (!%p7885_p8)  ;;  %v707_v1 = vld [vmem:[#allocation13] sm:$0xff] (!%p7885_p8) }
 0x1be   : > { %704 = sbr.rel (%p7885_p8) target bundleno = 453 (0x1c5), region = 136  ;;  %706 = vst [vmem:[#allocation2] sm:$0xff] (!%p7885_p8), %v705_v0  ;;  %708 = vst [vmem:[#allocation3] sm:$0xff] (!%p7885_p8), %v707_v1 }
 0x1c5 PF: > { %v5408_v2 = vld [vmem:[#allocation15] sm:$0xff]   ;;  %v6217_v3 = vmov 0.0   ;;  %v5409_v4 = vld [vmem:[#allocation15 + $0x8] sm:$0xff]   ;;  %vm7824_vm0 = vmmov 0   ;;  %v5410_v5 = vld [vmem:[#allocation15 + $0x10] sm:$0xff]   ;;  %v956_v15 = vlaneseq  ;;  %vm1828_vm1 = vcmask 130112  }
 0x1c6   : > { %5015 = vmatprep.subr.bf16.mxu0 %v6217_v3  ;;  %5035 = vmatprep.subr.bf16.mxu1 %v6217_v3  ;;  %v5411_v6 = vld [vmem:[#allocation15 + $0x18] sm:$0xff]   ;;  %v5412_v7 = vld [vmem:[#allocation15 + $0x20] sm:$0xff]   ;;  %v5413_v8 = vld [vmem:[#allocation15 + $0x28] sm:$0xff]   ;;  %v6219_v13 = vmov 1966171168   ;;  %vm7828_vm2 = vcmask 195712  }
 0x1c7   : > { %5016 = vmatpush3.bf16.msra.mxu0 %v5408_v2  ;;  %5031 = vmatprep.mubr.msk.bf16.mxu0 %vm7824_vm0, %v6217_v3  ;;  %v5414_v9 = vld [vmem:[#allocation15 + $0x30] sm:$0xff]   ;;  %v5415_v10 = vld [vmem:[#allocation15 + $0x38] sm:$0xff]   ;;  %v954_v14 = vunpack.c.l.s4 %v6219_v13  ;;  %v6798_v17 = vshrl.u32 %v956_v15, 7  ;;  %v4735_v18 = vld [vmem:[#allocation16] ss:$0 sm:$0xff]  ;;  %vm1842_vm3 = vcmask 261312  }
 0x1c8   : > { %5017 = vmatprep.subr.bf16.mxu0 %v6217_v3  ;;  %5051 = vmatprep.mubr.msk.bf16.mxu1 %vm7824_vm0, %v6217_v3  ;;  %v709_v11 = vld [vmem:[#allocation2] sm:$0xff]  ;;  %v827_v28 = vld [vmem:[#allocation6 + $0x20] sm:$0xff]  ;;  %v828_v31 = vld [vmem:[#allocation6 + $0x28] sm:$0xff]  ;;  %vm1849_vm4 = vcmask 326912   ;;  %vm1856_vm5 = vcmask 392512   ;;  %vm1863_vm6 = vcmask 458112  }
 0x1c9   : > { %v6791_v12 = vpack.c.bf16 %v709_v11, %v709_v11  ;;  %v955_v16 = vunpack.c.0.s8 %v954_v14  ;;  %v6810_v26 = vsub.s32 0, %v6798_v17  ;;  %v823_v29 = vld [vmem:[#allocation6] sm:$0xff]  ;;  %v824_v32 = vld [vmem:[#allocation6 + $0x8] sm:$0xff]  ;;  %v825_v36 = vld [vmem:[#allocation6 + $0x10] sm:$0xff]  ;;  %vm1870_vm7 = vcmask 523712   ;;  %s7887_s21 = sld [smem:[#allocation45_spill]] }
 0x1ca   : > { %v831_v35 = vld [vmem:[#allocation6 + $0x40] sm:$0xff]  ;;  %v6819_v37 = vld [vmem:[#allocation18] ss:$0 sm:$0xff]  ;;  %v832_v48 = vld [vmem:[#allocation6 + $0x48] sm:$0xff]  ;;  %vm1877_vm8 = vcmask 589312   ;;  %vm1884_vm9 = vcmask 654912  }
 0x1cb   : > { %5018 = vmatpush3.bf16.msra.mxu0 %v5409_v4  ;;  %v6801_v19 = vsub.s32 %v955_v16, %v6798_v17  ;;  %v826_v49 = vld [vmem:[#allocation6 + $0x18] sm:$0xff]  ;;  %v833_v56 = vld [vmem:[#allocation6 + $0x50] sm:$0xff]  ;;  %v835_v14 = vld [vmem:[#allocation6 + $0x60] sm:$0xff]  ;;  %vm1891_vm10 = vcmask 720512   ;;  %vm1898_vm11 = vcmask 786112   ;;  %vm1905_vm12 = vcmask 851712  }
 0x1cc   : > { %5019 = vmatprep.subr.bf16.mxu0 %v6217_v3  ;;  %v829_v57 = vld [vmem:[#allocation6 + $0x30] sm:$0xff]  ;;  %v834_v1 = vld [vmem:[#allocation6 + $0x58] sm:$0xff]  ;;  %v855_v16 = vld [vmem:[#allocation6 + $0x100] sm:$0xff]  ;;  %vm1912_vm13 = vcmask 917312   ;;  %vm1919_vm14 = vcmask 982912   ;;  %vm1926_vm15 = vcmask 1048512  }
 0x1cd   : > { %v830_v2 = vld [vmem:[#allocation6 + $0x38] sm:$0xff]  ;;  %s7894_s0 = sld [smem:[#allocation55_spill]]  ;;  %s4474_s26 = sshll.u32 %s6774_s1, 4  ;;  %s4475_s26 = int_to_ptr.vmem [resolvable:$true] %s4474_s26 }
 0x1ce   : > { %s6062_s16 = scalar_lea.vmem %s4475_s26, 128  ;;  %p7896_p12 = scmp.ne.s32.totalorder %s7861_s20, 0 }
 0x1cf   : > { %5020 = vmatpush3.bf16.msra.mxu0 %v5410_v5  ;;  %s4423_s15 = sld [smem:[#allocation5 + %s7887_s21]]  ;;  %s4921_s2 = sshll.u32 %s7887_s21, 7 }
 0x1d0   : > { %5021 = vmatprep.subr.bf16.mxu0 %v6217_v3  ;;  %p6063_p9 = scmp.ne.s32.totalorder %s4475_s26, %s6062_s16 }
 0x1d2   : > { %p6064_p6 = pnand %p6063_p9, %p7896_p12 }
 0x1d3   : > { %5022 = vmatpush3.bf16.msra.mxu0 %v5411_v6  ;;  %s7895_s24 = smov %s7894_s0  ;;  %s7713_s27 = scalar_lea.hbm %s7894_s0, %s4921_s2 }
 0x1d4   : > { %5023 = vmatprep.subr.bf16.mxu0 %v6217_v3  ;;  %p6065_p10 = pneg %p6064_p6 }
 0x1d7   : > { %5024 = vmatpush3.bf16.msra.mxu0 %v5412_v7 }
 0x1d8   : > { %5025 = vmatprep.subr.bf16.mxu0 %v6217_v3 }
 0x1db   : > { %5026 = vmatpush3.bf16.msra.mxu0 %v5413_v8 }
 0x1dc   : > { %5027 = vmatprep.subr.bf16.mxu0 %v6217_v3 }
 0x1df   : > { %5028 = vmatpush3.bf16.msra.mxu0 %v5414_v9 }
 0x1e0   : > { %5029 = vmatprep.subr.bf16.mxu0 %v6217_v3 }
 0x1e3   : > { %5030 = vmatpush3.bf16.msra.mxu0 %v5415_v10 }
 0x1e4   : > { %5055 = vmatprep.subr.bf16.mxu0 %v6217_v3 }
 0x1e6   : > { %5032 = vmatmul.mubr.bf16.vlgmr.msra.gmra.mrb[0].mxu0 %v6791_v12 }
 0x1e7   : > { %5071 = vmatprep.mubr.msk.bf16.mxu0 %vm7824_vm0, %v6217_v3  ;;  %vm7826_vm0 = vcmask 1041409  }
 0x2b9   : > { %v817_v20 = vpop.f32.mrb[0].mxu0 }
 0x2ba   : > { %v6803_v21 = vadd.f32 %v4735_v18, %v817_v20  ;;  %v5033_v22 = vpop.f32.mrb[1].mxu0 }
 0x2bb   : > { %v820_v23 = vpop.f32.mrb[2].mxu0 }
 0x2bc   : > { %v6807_v24 = vrot.slane %v6803_v21, %v6801_v19  ;;  %v5034_v25 = vpop.f32.mrb[3].mxu0  ;;  %v952_v4 = vcombine.high %v6803_v21, %v6803_v21 }
 0x2be   : > { %v975_v27 = vrot.slane %v6807_v24, %v6801_v19  ;;  %v967_v5 = vcombine.high %v6807_v24, %v6807_v24  ;;  %v6847_v18 = vrot.slane %v952_v4, %v6801_v19 }
 0x2c0   : > { %v6815_v30 = vrot.slane %v975_v27, %v6810_v26  ;;  %v997_v58 = vcombine.high %v975_v27, %v975_v27  ;;  %v6850_v20 = vrot.slane %v967_v5, %v6801_v19 }
 0x2c2   : > { %v1045_v33 = vadd.f32 %v6815_v30, %v827_v28  ;;  %v1041_v34 = vadd.f32 %v6815_v30, %v823_v29  ;;  %v1046_v40 = vadd.f32 %v6815_v30, %v828_v31  ;;  %v1042_v41 = vadd.f32 %v6815_v30, %v824_v32  ;;  %v836_v28 = vld [vmem:[#allocation6 + $0x68] sm:$0xff]  ;;  %v857_v29 = vld [vmem:[#allocation6 + $0x110] sm:$0xff] }
 0x2c3   : > { %v1049_v42 = vadd.f32 %v6815_v30, %v831_v35  ;;  %v1043_v43 = vadd.f32 %v6815_v30, %v825_v36  ;;  %v1050_v51 = vadd.f32 %v6815_v30, %v832_v48  ;;  %v1044_v55 = vadd.f32 %v6815_v30, %v826_v49  ;;  %v838_v49 = vld [vmem:[#allocation6 + $0x78] sm:$0xff] }
 0x2c4   : > { %v1173_v38 = vmax.f32 %v1045_v33, 0.0  ;;  %v1169_v39 = vmax.f32 %v1041_v34, 0.0  ;;  %v1174_v46 = vmax.f32 %v1046_v40, 0.0  ;;  %v1170_v47 = vmax.f32 %v1042_v41, 0.0  ;;  %v837_v40 = vld [vmem:[#allocation6 + $0x70] sm:$0xff]  ;;  %v843_v41 = vld [vmem:[#allocation6 + $0xa0] sm:$0xff] }
 0x2c5   : > { %v1177_v50 = vmax.f32 %v1049_v42, 0.0  ;;  %v1171_v54 = vmax.f32 %v1043_v43, 0.0  ;;  %v1178_v59 = vmax.f32 %v1050_v51, 0.0  ;;  %v1051_v60 = vadd.f32 %v6815_v30, %v833_v56 }
 0x2c6   : > { %v1308_v44 = vmul.f32 %v6819_v37, %v1173_v38  ;;  %v1304_v45 = vmul.f32 %v6819_v37, %v1169_v39  ;;  %v1309_v52 = vmul.f32 %v6819_v37, %v1174_v46  ;;  %v1305_v53 = vmul.f32 %v6819_v37, %v1170_v47 }
 0x2c7   : > { %v1312_v61 = vmul.f32 %v6819_v37, %v1177_v50  ;;  %v1306_v62 = vmul.f32 %v6819_v37, %v1171_v54  ;;  %v1172_v63 = vmax.f32 %v1044_v55, 0.0  ;;  %v1047_v0 = vadd.f32 %v6815_v30, %v829_v57  ;;  %v888_v50 = vld [vmem:[#allocation6 + $0x208] sm:$0xff]  ;;  %v839_v57 = vld [vmem:[#allocation6 + $0x80] sm:$0xff] }
 0x2c8   : > { %1440 = vadd.xlane.f32.xlu1 %v1308_v44  ;;  %1432 = vadd.xlane.f32.xlu0 %v1304_v45  ;;  %v6840_v6 = vrot.slane %v997_v58, %v6810_v26  ;;  %v1313_v7 = vmul.f32 %v6819_v37, %v1178_v59  ;;  %v1179_v8 = vmax.f32 %v1051_v60, 0.0  ;;  %v1052_v11 = vadd.f32 %v6815_v30, %v834_v1  ;;  %v844_v58 = vld [vmem:[#allocation6 + $0xa8] sm:$0xff] }
 0x2c9   : > { %v1307_v9 = vmul.f32 %v6819_v37, %v1172_v63  ;;  %v1175_v10 = vmax.f32 %v1047_v0, 0.0  ;;  %v1048_v13 = vadd.f32 %v6815_v30, %v830_v2  ;;  %v1053_v21 = vadd.f32 %v6815_v30, %v835_v14  ;;  %v840_v1 = vld [vmem:[#allocation6 + $0x88] sm:$0xff] }
 0x2ca   : > { %v1073_v22 = vadd.f32 %v6840_v6, %v855_v16  ;;  %v1314_v23 = vmul.f32 %v6819_v37, %v1179_v8  ;;  %v1180_v25 = vmax.f32 %v1052_v11, 0.0  ;;  %v6858_v31 = vrot.slane %v6847_v18, %v6801_v19  ;;  %v860_v2 = vld [vmem:[#allocation6 + $0x128] sm:$0xff]  ;;  %v890_v11 = vld [vmem:[#allocation6 + $0x218] sm:$0xff] }
 0x2cb   : > { %v1310_v24 = vmul.f32 %v6819_v37, %v1175_v10  ;;  %v1176_v27 = vmax.f32 %v1048_v13, 0.0  ;;  %v6862_v32 = vrot.slane %v6850_v20, %v6810_v26  ;;  %v1181_v33 = vmax.f32 %v1053_v21, 0.0  ;;  %v841_v10 = vld [vmem:[#allocation6 + $0x90] sm:$0xff] }
 0x2cc   : > { %1442 = vadd.xlane.f32.xlu1 %v1309_v52  ;;  %1434 = vadd.xlane.f32.xlu0 %v1305_v53  ;;  %v1054_v34 = vadd.f32 %v6815_v30, %v836_v28  ;;  %v1315_v35 = vmul.f32 %v6819_v37, %v1180_v25  ;;  %v1201_v38 = vmax.f32 %v1073_v22, 0.0  ;;  %v1075_v39 = vadd.f32 %v6840_v6, %v857_v29  ;;  %v861_v25 = vld [vmem:[#allocation6 + $0x130] sm:$0xff] }
 0x2cd   : > { %v1311_v36 = vmul.f32 %v6819_v37, %v1176_v27  ;;  %v6870_v42 = vrot.slane %v6858_v31, %v6810_v26  ;;  %v1055_v44 = vadd.f32 %v6815_v30, %v837_v40  ;;  %v1316_v45 = vmul.f32 %v6819_v37, %v1181_v33 }
 0x2ce   : > { %v1182_v43 = vmax.f32 %v1054_v34, 0.0  ;;  %v1336_v46 = vmul.f32 %v6819_v37, %v1201_v38  ;;  %v1203_v47 = vmax.f32 %v1075_v39, 0.0  ;;  %v1061_v48 = vadd.f32 %v6862_v32, %v843_v41  ;;  %v891_v38 = vld [vmem:[#allocation6 + $0x220] sm:$0xff] }
 0x2cf   : > { %v1183_v52 = vmax.f32 %v1055_v44, 0.0  ;;  %v1056_v55 = vadd.f32 %v6815_v30, %v838_v49  ;;  %v1106_v56 = vadd.f32 %v6870_v42, %v888_v50  ;;  %v1057_v59 = vadd.f32 %v6862_v32, %v839_v57 }
 0x2d0   : > { %1448 = vadd.xlane.f32.xlu1 %v1312_v61  ;;  %1436 = vadd.xlane.f32.xlu0 %v1306_v62  ;;  %v1317_v51 = vmul.f32 %v6819_v37, %v1182_v43  ;;  %v1338_v53 = vmul.f32 %v6819_v37, %v1203_v47  ;;  %v1189_v54 = vmax.f32 %v1061_v48, 0.0  ;;  %v1062_v60 = vadd.f32 %v6862_v32, %v844_v58  ;;  %v847_v47 = vld [vmem:[#allocation6 + $0xc0] sm:$0xff] }
 0x2d1   : > { %v1318_v61 = vmul.f32 %v6819_v37, %v1183_v52  ;;  %v1184_v63 = vmax.f32 %v1056_v55, 0.0  ;;  %v1234_v0 = vmax.f32 %v1106_v56, 0.0  ;;  %v1185_v30 = vmax.f32 %v1057_v59, 0.0  ;;  %v887_v55 = vld [vmem:[#allocation6 + $0x200] sm:$0xff] }
 0x2d2   : > { %v1324_v62 = vmul.f32 %v6819_v37, %v1189_v54  ;;  %v1058_v4 = vadd.f32 %v6862_v32, %v840_v1  ;;  %v1190_v8 = vmax.f32 %v1062_v60, 0.0  ;;  %v1059_v22 = vadd.f32 %v6862_v32, %v841_v10  ;;  %v848_v54 = vld [vmem:[#allocation6 + $0xc8] sm:$0xff] }
 0x2d3   : > { %v1319_v5 = vmul.f32 %v6819_v37, %v1184_v63  ;;  %v1320_v13 = vmul.f32 %v6819_v37, %v1185_v30  ;;  %v1109_v40 = vadd.f32 %v6870_v42, %v891_v38  ;;  %v1066_v60 = vadd.f32 %v6862_v32, %v848_v54  ;;  %v859_v63 = vld [vmem:[#allocation6 + $0x120] sm:$0xff] }
 0x2d4   : > { %1450 = vadd.xlane.f32.xlu1 %v1313_v7  ;;  %1438 = vadd.xlane.f32.xlu0 %v1307_v9  ;;  %v1369_v7 = vmul.f32 %v6819_v37, %v1234_v0  ;;  %v1078_v9 = vadd.f32 %v6840_v6, %v860_v2  ;;  %v1186_v14 = vmax.f32 %v1058_v4, 0.0  ;;  %v1325_v16 = vmul.f32 %v6819_v37, %v1190_v8  ;;  %v889_v8 = vld [vmem:[#allocation6 + $0x210] sm:$0xff] }
 0x2d5   : > { %v1187_v33 = vmax.f32 %v1059_v22, 0.0  ;;  %v1237_v52 = vmax.f32 %v1109_v40, 0.0  ;;  %v1194_v30 = vmax.f32 %v1066_v60, 0.0  ;;  %v1107_v10 = vadd.f32 %v6870_v42, %v889_v8  ;;  %v845_v22 = vld [vmem:[#allocation6 + $0xb0] sm:$0xff]  ;;  %v863_v60 = vld [vmem:[#allocation6 + $0x140] sm:$0xff] }
 0x2d6   : > { %v1206_v21 = vmax.f32 %v1078_v9, 0.0  ;;  %v1321_v27 = vmul.f32 %v6819_v37, %v1186_v14 }
 0x2d7   : > { %v1322_v41 = vmul.f32 %v6819_v37, %v1187_v33  ;;  %v1372_v58 = vmul.f32 %v6819_v37, %v1237_v52  ;;  %v852_v33 = vld [vmem:[#allocation6 + $0xe8] sm:$0xff] }
 0x2d8   : > { %1452 = vadd.xlane.f32.xlu1 %v1314_v23  ;;  %1444 = vadd.xlane.f32.xlu0 %v1310_v24  ;;  %v1108_v23 = vadd.f32 %v6870_v42, %v890_v11  ;;  %v856_v24 = vld [vmem:[#allocation6 + $0x108] sm:$0xff]  ;;  %v1341_v29 = vmul.f32 %v6819_v37, %v1206_v21  ;;  %v1329_v11 = vmul.f32 %v6819_v37, %v1194_v30  ;;  %v851_v21 = vld [vmem:[#allocation6 + $0xe0] sm:$0xff]  ;;  %v902_v30 = vld [vmem:[#allocation6 + $0x278] sm:$0xff] }
 0x2d9   : > { %v1074_v28 = vadd.f32 %v6840_v6, %v856_v24  ;;  %v1069_v24 = vadd.f32 %v6862_v32, %v851_v21  ;;  %v1070_v40 = vadd.f32 %v6862_v32, %v852_v33  ;;  %v892_v52 = vld [vmem:[#allocation6 + $0x228] sm:$0xff] }
 0x2da   : > { %v1236_v34 = vmax.f32 %v1108_v23, 0.0  ;;  %v1110_v54 = vadd.f32 %v6870_v42, %v892_v52  ;;  %v903_v52 = vld [vmem:[#allocation6 + $0x280] sm:$0xff] }
 0x2db   : > { %v1202_v44 = vmax.f32 %v1074_v28, 0.0  ;;  %v1235_v28 = vmax.f32 %v1107_v10, 0.0  ;;  %v1120_v10 = vadd.f32 %v6870_v42, %v902_v30  ;;  %v921_v30 = vld [vmem:[#allocation6 + $0x310] sm:$0xff] }
 0x2dc   : > { %1454 = vadd.xlane.f32.xlu1 %v1315_v35  ;;  %1446 = vadd.xlane.f32.xlu0 %v1311_v36  ;;  %v1079_v35 = vadd.f32 %v6840_v6, %v861_v25  ;;  %v842_v36 = vld [vmem:[#allocation6 + $0x98] sm:$0xff]  ;;  %v1371_v43 = vmul.f32 %v6819_v37, %v1236_v34 }
 0x2dd   : > { %v1060_v39 = vadd.f32 %v6862_v32, %v842_v36  ;;  %v1337_v50 = vmul.f32 %v6819_v37, %v1202_v44  ;;  %v846_v34 = vld [vmem:[#allocation6 + $0xb8] sm:$0xff]  ;;  %v1197_v36 = vmax.f32 %v1069_v24, 0.0  ;;  %v1370_v38 = vmul.f32 %v6819_v37, %v1235_v28  ;;  %v873_v28 = vld [vmem:[#allocation6 + $0x190] sm:$0xff] }
 0x2de   : > { %v862_v44 = vld [vmem:[#allocation6 + $0x138] sm:$0xff] }
 0x2df   : > { %v1188_v48 = vmax.f32 %v1060_v39, 0.0 }
 0x2e0   : > { %1456 = vadd.xlane.f32.xlu1 %v1316_v45  ;;  %1496 = vadd.xlane.f32.xlu0 %v1336_v46  ;;  %v1207_v45 = vmax.f32 %v1079_v35, 0.0  ;;  %v858_v46 = vld [vmem:[#allocation6 + $0x118] sm:$0xff] }
 0x2e1   : > { %v1076_v49 = vadd.f32 %v6840_v6, %v858_v46  ;;  %v1323_v56 = vmul.f32 %v6819_v37, %v1188_v48  ;;  %v1198_v48 = vmax.f32 %v1070_v40, 0.0  ;;  %v874_v40 = vld [vmem:[#allocation6 + $0x198] sm:$0xff] }
 0x2e3   : > { %v1204_v57 = vmax.f32 %v1076_v49, 0.0 }
 0x2e4   : > { %1458 = vadd.xlane.f32.xlu1 %v1317_v51  ;;  %1500 = vadd.xlane.f32.xlu0 %v1338_v53  ;;  %v1342_v51 = vmul.f32 %v6819_v37, %v1207_v45  ;;  %v1065_v53 = vadd.f32 %v6862_v32, %v847_v47  ;;  %v1332_v45 = vmul.f32 %v6819_v37, %v1197_v36 }
 0x2e5   : > { %v1339_v0 = vmul.f32 %v6819_v37, %v1204_v57 }
 0x2e6   : > { %v1193_v59 = vmax.f32 %v1065_v53, 0.0 }
 0x2e8   : > { %1460 = vadd.xlane.f32.xlu1 %v1318_v61  ;;  %1472 = vadd.xlane.f32.xlu0 %v1324_v62  ;;  %v1105_v61 = vadd.f32 %v6870_v42, %v887_v55  ;;  %v849_v62 = vld [vmem:[#allocation6 + $0xd0] sm:$0xff]  ;;  %v1328_v2 = vmul.f32 %v6819_v37, %v1193_v59  ;;  %v1333_v55 = vmul.f32 %v6819_v37, %v1198_v48 }
 0x2e9   : > { %v1067_v1 = vadd.f32 %v6862_v32, %v849_v62  ;;  %v901_v59 = vld [vmem:[#allocation6 + $0x270] sm:$0xff] }
 0x2ea   : > { %v1233_v4 = vmax.f32 %v1105_v61, 0.0  ;;  %v999_v61 = vcombine.high %v6850_v20, %v6850_v20  ;;  %v1119_v62 = vadd.f32 %v6870_v42, %v901_v59  ;;  %v866_v59 = vld [vmem:[#allocation6 + $0x158] sm:$0xff] }
 0x2eb   : > { %v1195_v14 = vmax.f32 %v1067_v1, 0.0 }
 0x2ec   : > { %1462 = vadd.xlane.f32.xlu1 %v1319_v5  ;;  %1562 = vadd.xlane.f32.xlu0 %v1369_v7  ;;  %v1077_v5 = vadd.f32 %v6840_v6, %v859_v63  ;;  %v850_v7 = vld [vmem:[#allocation6 + $0xd8] sm:$0xff]  ;;  %v1081_v63 = vadd.f32 %v6840_v6, %v863_v60  ;;  %v919_v60 = vld [vmem:[#allocation6 + $0x300] sm:$0xff] }
 0x2ed   : > { %v1068_v9 = vadd.f32 %v6862_v32, %v850_v7  ;;  %v1330_v25 = vmul.f32 %v6819_v37, %v1195_v14  ;;  %v1247_v7 = vmax.f32 %v1119_v62, 0.0  ;;  %v864_v14 = vld [vmem:[#allocation6 + $0x148] sm:$0xff] }
 0x2ee   : > { %v1209_v8 = vmax.f32 %v1081_v63, 0.0 }
 0x2ef   : > { %v1196_v23 = vmax.f32 %v1068_v9, 0.0  ;;  %v1382_v21 = vmul.f32 %v6819_v37, %v1247_v7 }
 0x2f0   : > { %1464 = vadd.xlane.f32.xlu1 %v1320_v13  ;;  %1474 = vadd.xlane.f32.xlu0 %v1325_v16  ;;  %v1368_v13 = vmul.f32 %v6819_v37, %v1233_v4  ;;  %v1205_v16 = vmax.f32 %v1077_v5, 0.0  ;;  %v893_v4 = vld [vmem:[#allocation6 + $0x230] sm:$0xff]  ;;  %v6939_v5 = vrot.slane %v999_v61, %v6810_v26 }
 0x2f1   : > { %v1331_v35 = vmul.f32 %v6819_v37, %v1196_v23  ;;  %v1248_v23 = vmax.f32 %v1120_v10, 0.0 }
 0x2f4   : > { %1466 = vadd.xlane.f32.xlu1 %v1321_v27  ;;  %1506 = vadd.xlane.f32.xlu0 %v1341_v29  ;;  %v1340_v27 = vmul.f32 %v6819_v37, %v1205_v16  ;;  %v1063_v29 = vadd.f32 %v6862_v32, %v845_v22  ;;  %v968_v16 = vcombine.high %v6847_v18, %v6847_v18 }
 0x2f5   : > { %v1344_v22 = vmul.f32 %v6819_v37, %v1209_v8 }
 0x2f6   : > { %v1191_v39 = vmax.f32 %v1063_v29, 0.0  ;;  %v894_v29 = vld [vmem:[#allocation6 + $0x238] sm:$0xff]  ;;  %v6952_v33 = vrot.slane %v968_v16, %v6801_v19 }
 0x2f7   : > { %v1112_v18 = vadd.f32 %v6870_v42, %v894_v29 }
 0x2f8   : > { %1468 = vadd.xlane.f32.xlu1 %v1322_v41  ;;  %1566 = vadd.xlane.f32.xlu0 %v1371_v43  ;;  %v1064_v41 = vadd.f32 %v6862_v32, %v846_v34  ;;  %v853_v43 = vld [vmem:[#allocation6 + $0xf0] sm:$0xff]  ;;  %v1326_v47 = vmul.f32 %v6819_v37, %v1191_v39  ;;  %v1091_v34 = vadd.f32 %v6939_v5, %v873_v28 }
 0x2f9   : > { %v1071_v46 = vadd.f32 %v6862_v32, %v853_v43  ;;  %v998_v43 = vcombine.high %v6858_v31, %v6858_v31 }
 0x2fa   : > { %v1192_v49 = vmax.f32 %v1064_v41, 0.0  ;;  %v865_v41 = vld [vmem:[#allocation6 + $0x150] sm:$0xff] }
 0x2fb   : > { %v1199_v57 = vmax.f32 %v1071_v46, 0.0  ;;  %v1083_v46 = vadd.f32 %v6840_v6, %v865_v41  ;;  %v6969_v31 = vrot.slane %v998_v43, %v6810_v26 }
 0x2fc   : > { %1498 = vadd.xlane.f32.xlu1 %v1337_v50  ;;  %1508 = vadd.xlane.f32.xlu0 %v1342_v51  ;;  %v1080_v50 = vadd.f32 %v6840_v6, %v862_v44  ;;  %v854_v51 = vld [vmem:[#allocation6 + $0xf8] sm:$0xff]  ;;  %v6962_v44 = vrot.slane %v6952_v33, %v6810_v26 }
 0x2fd   : > { %v1072_v53 = vadd.f32 %v6862_v32, %v854_v51  ;;  %v1334_v32 = vmul.f32 %v6819_v37, %v1199_v57  ;;  %v895_v51 = vld [vmem:[#allocation6 + $0x240] sm:$0xff]  ;;  %v1139_v7 = vadd.f32 %v6969_v31, %v921_v30  ;;  %v870_v30 = vld [vmem:[#allocation6 + $0x178] sm:$0xff] }
 0x2fe   : > { %v1113_v57 = vadd.f32 %v6870_v42, %v895_v51 }
 0x2ff   : > { %v1200_v1 = vmax.f32 %v1072_v53, 0.0 }
 0x300   : > { %1470 = vadd.xlane.f32.xlu1 %v1323_v56  ;;  %1568 = vadd.xlane.f32.xlu0 %v1372_v58  ;;  %v1327_v56 = vmul.f32 %v6819_v37, %v1192_v49  ;;  %v1208_v58 = vmax.f32 %v1080_v50, 0.0  ;;  %v1219_v49 = vmax.f32 %v1091_v34, 0.0  ;;  %v1240_v50 = vmax.f32 %v1112_v18, 0.0 }
 0x301   : > { %v1335_v20 = vmul.f32 %v6819_v37, %v1200_v1  ;;  %v1241_v63 = vmax.f32 %v1113_v57, 0.0  ;;  %v1137_v1 = vadd.f32 %v6969_v31, %v919_v60  ;;  %v879_v57 = vld [vmem:[#allocation6 + $0x1c0] sm:$0xff] }
 0x303   : > { %v1376_v8 = vmul.f32 %v6819_v37, %v1241_v63  ;;  %v1265_v10 = vmax.f32 %v1137_v1, 0.0 }
 0x304   : > { %1502 = vadd.xlane.f32.xlu1 %v1339_v0  ;;  %1480 = vadd.xlane.f32.xlu0 %v1328_v2  ;;  %v1343_v0 = vmul.f32 %v6819_v37, %v1208_v58  ;;  %v1238_v2 = vmax.f32 %v1110_v54, 0.0  ;;  %v1211_v54 = vmax.f32 %v1083_v46, 0.0  ;;  %v1121_v58 = vadd.f32 %v6962_v44, %v903_v52 }
 0x306   : > { %v1373_v9 = vmul.f32 %v6819_v37, %v1238_v2  ;;  %v1346_v62 = vmul.f32 %v6819_v37, %v1211_v54  ;;  %v896_v2 = vld [vmem:[#allocation6 + $0x248] sm:$0xff] }
 0x308   : > { %1482 = vadd.xlane.f32.xlu0 %v1329_v11  ;;  %1560 = vadd.xlane.f32.xlu1 %v1368_v13  ;;  %v1111_v11 = vadd.f32 %v6870_v42, %v893_v4  ;;  %v872_v13 = vld [vmem:[#allocation6 + $0x188] sm:$0xff]  ;;  %v1114_v4 = vadd.f32 %v6870_v42, %v896_v2 }
 0x30a   : > { %v1239_v24 = vmax.f32 %v1111_v11, 0.0  ;;  %v867_v11 = vld [vmem:[#allocation6 + $0x160] sm:$0xff] }
 0x30c   : > { %1484 = vadd.xlane.f32.xlu0 %v1330_v25  ;;  %1504 = vadd.xlane.f32.xlu1 %v1340_v27  ;;  %v1090_v25 = vadd.f32 %v6939_v5, %v872_v13  ;;  %v1082_v27 = vadd.f32 %v6840_v6, %v864_v14  ;;  %v1374_v36 = vmul.f32 %v6819_v37, %v1239_v24  ;;  %v877_v13 = vld [vmem:[#allocation6 + $0x1b0] sm:$0xff]  ;;  %v1267_v24 = vmax.f32 %v1139_v7, 0.0 }
 0x30d   : > { %v1085_v14 = vadd.f32 %v6840_v6, %v867_v11  ;;  %v1095_v16 = vadd.f32 %v6939_v5, %v877_v13  ;;  %v1088_v11 = vadd.f32 %v6840_v6, %v870_v30 }
 0x30e   : > { %v1210_v39 = vmax.f32 %v1082_v27, 0.0  ;;  %v907_v27 = vld [vmem:[#allocation6 + $0x2a0] sm:$0xff]  ;;  %v1402_v18 = vmul.f32 %v6819_v37, %v1267_v24  ;;  %v900_v24 = vld [vmem:[#allocation6 + $0x268] sm:$0xff] }
 0x30f   : > { %v1213_v28 = vmax.f32 %v1085_v14, 0.0  ;;  %v1223_v29 = vmax.f32 %v1095_v16, 0.0 }
 0x310   : > { %1486 = vadd.xlane.f32.xlu0 %v1331_v35  ;;  %1564 = vadd.xlane.f32.xlu1 %v1370_v38  ;;  %v1383_v35 = vmul.f32 %v6819_v37, %v1248_v23  ;;  %v1218_v38 = vmax.f32 %v1090_v25, 0.0  ;;  %v1345_v48 = vmul.f32 %v6819_v37, %v1210_v39  ;;  %v1242_v23 = vmax.f32 %v1114_v4, 0.0  ;;  %v897_v25 = vld [vmem:[#allocation6 + $0x250] sm:$0xff]  ;;  %v878_v39 = vld [vmem:[#allocation6 + $0x1b8] sm:$0xff] }
 0x311   : > { %v1358_v41 = vmul.f32 %v6819_v37, %v1223_v29 }
 0x312   : > { %v1377_v34 = vmul.f32 %v6819_v37, %v1242_v23 }
 0x314   : > { %1488 = vadd.xlane.f32.xlu0 %v1332_v45  ;;  %1476 = vadd.xlane.f32.xlu1 %v1326_v47  ;;  %v1092_v45 = vadd.f32 %v6939_v5, %v874_v40  ;;  %v1353_v47 = vmul.f32 %v6819_v37, %v1218_v38  ;;  %v868_v38 = vld [vmem:[#allocation6 + $0x168] sm:$0xff]  ;;  %v1348_v40 = vmul.f32 %v6819_v37, %v1213_v28 }
 0x315   : > { %v1086_v46 = vadd.f32 %v6840_v6, %v868_v38 }
 0x316   : > { %v1220_v53 = vmax.f32 %v1092_v45, 0.0 }
 0x317   : > { %v1214_v54 = vmax.f32 %v1086_v46, 0.0 }
 0x318   : > { %1490 = vadd.xlane.f32.xlu0 %v1333_v55  ;;  %1478 = vadd.xlane.f32.xlu1 %v1327_v56  ;;  %v1354_v55 = vmul.f32 %v6819_v37, %v1219_v49  ;;  %v1375_v56 = vmul.f32 %v6819_v37, %v1240_v50  ;;  %v1355_v61 = vmul.f32 %v6819_v37, %v1220_v53  ;;  %v908_v49 = vld [vmem:[#allocation6 + $0x2a8] sm:$0xff] }
 0x319   : > { %v1126_v51 = vadd.f32 %v6962_v44, %v908_v49  ;;  %v1349_v60 = vmul.f32 %v6819_v37, %v1214_v54 }
 0x31b   : > { %v1254_v63 = vmax.f32 %v1126_v51, 0.0 }
 0x31c   : > { %1492 = vadd.xlane.f32.xlu0 %v1334_v32  ;;  %1510 = vadd.xlane.f32.xlu1 %v1343_v0  ;;  %v1249_v32 = vmax.f32 %v1121_v58, 0.0  ;;  %v1084_v0 = vadd.f32 %v6840_v6, %v866_v59  ;;  %v1097_v59 = vadd.f32 %v6939_v5, %v879_v57 }
 0x31d   : > { %v1389_v7 = vmul.f32 %v6819_v37, %v1254_v63 }
 0x31e   : > { %v1225_v2 = vmax.f32 %v1097_v59, 0.0  ;;  %v911_v59 = vld [vmem:[#allocation6 + $0x2c0] sm:$0xff] }
 0x320   : > { %1494 = vadd.xlane.f32.xlu0 %v1335_v20  ;;  %1570 = vadd.xlane.f32.xlu1 %v1373_v9  ;;  %v1384_v20 = vmul.f32 %v6819_v37, %v1249_v32  ;;  %v1212_v9 = vmax.f32 %v1084_v0, 0.0  ;;  %v899_v32 = vld [vmem:[#allocation6 + $0x260] sm:$0xff]  ;;  %v909_v0 = vld [vmem:[#allocation6 + $0x2b0] sm:$0xff] }
 0x324   : > { %1588 = vadd.xlane.f32.xlu0 %v1382_v21  ;;  %1512 = vadd.xlane.f32.xlu1 %v1344_v22  ;;  %v1347_v21 = vmul.f32 %v6819_v37, %v1212_v9  ;;  %v1400_v22 = vmul.f32 %v6819_v37, %v1265_v10  ;;  %v880_v9 = vld [vmem:[#allocation6 + $0x1c8] sm:$0xff]  ;;  %v7008_v10 = vand.u32 127, %v956_v15  ;;  %v1216_v15 = vmax.f32 %v1088_v11, 0.0 }
 0x325   : > { %v1098_v14 = vadd.f32 %v6939_v5, %v880_v9 }
 0x326   : > { %v1823_v13 = vadd.s32 4294967288, %v7008_v10  ;;  %v1872_v46 = vadd.s32 4294967232, %v7008_v10 }
 0x328   : > { %1590 = vadd.xlane.f32.xlu0 %v1383_v35  ;;  %1572 = vadd.xlane.f32.xlu1 %v1374_v36  ;;  %v1115_v35 = vadd.f32 %v6870_v42, %v897_v25  ;;  %v1125_v36 = vadd.f32 %v6962_v44, %v907_v27  ;;  %v910_v25 = vld [vmem:[#allocation6 + $0x2b8] sm:$0xff]  ;;  %v1830_v27 = vadd.s32 4294967280, %v7008_v10  ;;  %v7026_v38 = vsub.s32 %v1823_v13, %v6798_v17 }
 0x32a   : > { %v1243_v43 = vmax.f32 %v1115_v35, 0.0  ;;  %v1253_v45 = vmax.f32 %v1125_v36, 0.0 }
 0x32c   : > { %1530 = vadd.xlane.f32.xlu0 %v1353_v47  ;;  %1514 = vadd.xlane.f32.xlu1 %v1345_v48  ;;  %v1096_v47 = vadd.f32 %v6939_v5, %v878_v39  ;;  %v898_v48 = vld [vmem:[#allocation6 + $0x258] sm:$0xff]  ;;  %v1378_v52 = vmul.f32 %v6819_v37, %v1243_v43  ;;  %v1388_v53 = vmul.f32 %v6819_v37, %v1253_v45  ;;  %v1851_v43 = vadd.s32 4294967256, %v7008_v10  ;;  %v881_v45 = vld [vmem:[#allocation6 + $0x1d0] sm:$0xff] }
 0x32d   : > { %v1116_v50 = vadd.f32 %v6870_v42, %v898_v48  ;;  %v1128_v39 = vadd.f32 %v6962_v44, %v910_v25  ;;  %v904_v48 = vld [vmem:[#allocation6 + $0x288] sm:$0xff] }
 0x32e   : > { %v1122_v63 = vadd.f32 %v6962_v44, %v904_v48  ;;  %v1893_v48 = vadd.s32 4294967208, %v7008_v10 }
 0x32f   : > { %v1256_v57 = vmax.f32 %v1128_v39, 0.0 }
 0x330   : > { %1532 = vadd.xlane.f32.xlu0 %v1354_v55  ;;  %1574 = vadd.xlane.f32.xlu1 %v1375_v56  ;;  %v1224_v55 = vmax.f32 %v1096_v47, 0.0  ;;  %v869_v56 = vld [vmem:[#allocation6 + $0x170] sm:$0xff]  ;;  %v7034_v47 = vsub.s32 %v1830_v27, %v6798_v17 }
 0x331   : > { %v1087_v58 = vadd.f32 %v6840_v6, %v869_v56  ;;  %v7020_v6 = vsub.s32 %v7008_v10, %v6798_v17  ;;  %v1391_v11 = vmul.f32 %v6819_v37, %v1256_v57  ;;  %v905_v27 = vld [vmem:[#allocation6 + $0x290] sm:$0xff]  ;;  %v1900_v57 = vadd.s32 4294967200, %v7008_v10 }
 0x333   : > { %v1215_v1 = vmax.f32 %v1087_v58, 0.0  ;;  %v1099_v58 = vadd.f32 %v6939_v5, %v881_v45  ;;  %v912_v45 = vld [vmem:[#allocation6 + $0x2c8] sm:$0xff] }
 0x334   : > { %1534 = vadd.xlane.f32.xlu0 %v1355_v61  ;;  %1516 = vadd.xlane.f32.xlu1 %v1346_v62  ;;  %v1359_v61 = vmul.f32 %v6819_v37, %v1224_v55  ;;  %v1244_v62 = vmax.f32 %v1116_v50, 0.0 }
 0x335   : > { %v1350_v16 = vmul.f32 %v6819_v37, %v1215_v1  ;;  %v1886_v1 = vadd.s32 4294967216, %v7008_v10 }
 0x336   : > { %v1379_v4 = vmul.f32 %v6819_v37, %v1244_v62  ;;  %v1879_v62 = vadd.s32 4294967224, %v7008_v10 }
 0x337   : > { %v7072_v25 = vsub.s32 %v1886_v1, %v6798_v17  ;;  %v883_v1 = vld [vmem:[#allocation6 + $0x1e0] sm:$0xff] }
 0x338   : > { %1576 = vadd.xlane.f32.xlu1 %v1376_v8  ;;  %1592 = vadd.xlane.f32.xlu0 %v1384_v20  ;;  %v1117_v8 = vadd.f32 %v6870_v42, %v899_v32  ;;  %v1127_v20 = vadd.f32 %v6962_v44, %v909_v0  ;;  %v7054_v0 = vsub.s32 %v1872_v46, %v6798_v17 }
 0x33a   : > { %v1255_v23 = vmax.f32 %v1127_v20, 0.0  ;;  %v1129_v20 = vadd.f32 %v6962_v44, %v911_v59  ;;  %v920_v59 = vld [vmem:[#allocation6 + $0x308] sm:$0xff] }
 0x33c   : > { %1518 = vadd.xlane.f32.xlu1 %v1347_v21  ;;  %1624 = vadd.xlane.f32.xlu0 %v1400_v22  ;;  %v1360_v21 = vmul.f32 %v6819_v37, %v1225_v2  ;;  %v1245_v22 = vmax.f32 %v1117_v8, 0.0  ;;  %v1390_v36 = vmul.f32 %v6819_v37, %v1255_v23  ;;  %v1858_v8 = vadd.s32 4294967248, %v7008_v10  ;;  %v882_v23 = vld [vmem:[#allocation6 + $0x1d8] sm:$0xff] }
 0x33e   : > { %v1380_v35 = vmul.f32 %v6819_v37, %v1245_v22  ;;  %v875_v22 = vld [vmem:[#allocation6 + $0x1a0] sm:$0xff] }
 0x340   : > { %1578 = vadd.xlane.f32.xlu1 %v1377_v34  ;;  %1628 = vadd.xlane.f32.xlu0 %v1402_v18  ;;  %v1226_v34 = vmax.f32 %v1098_v14, 0.0  ;;  %v1118_v18 = vadd.f32 %v6870_v42, %v900_v24  ;;  %v1351_v42 = vmul.f32 %v6819_v37, %v1216_v15  ;;  %v1227_v14 = vmax.f32 %v1099_v58, 0.0 }
 0x341   : > { %v1865_v15 = vadd.s32 4294967240, %v7008_v10  ;;  %v1130_v58 = vadd.f32 %v6962_v44, %v912_v45 }
 0x342   : > { %v1361_v51 = vmul.f32 %v6819_v37, %v1226_v34 }
 0x344   : > { %1520 = vadd.xlane.f32.xlu1 %v1348_v40  ;;  %1540 = vadd.xlane.f32.xlu0 %v1358_v41  ;;  %v871_v40 = vld [vmem:[#allocation6 + $0x180] sm:$0xff]  ;;  %v1844_v41 = vadd.s32 4294967264, %v7008_v10 }
 0x345   : > { %v1089_v54 = vadd.f32 %v6939_v5, %v871_v40  ;;  %v1362_v40 = vmul.f32 %v6819_v37, %v1227_v14  ;;  %v1258_v14 = vmax.f32 %v1130_v58, 0.0  ;;  %v884_v58 = vld [vmem:[#allocation6 + $0x1e8] sm:$0xff] }
 0x348   : > { %1580 = vadd.xlane.f32.xlu1 %v1378_v52  ;;  %1600 = vadd.xlane.f32.xlu0 %v1388_v53  ;;  %v1246_v52 = vmax.f32 %v1118_v18, 0.0  ;;  %v1837_v53 = vadd.s32 4294967272, %v7008_v10 }
 0x34a   : > { %v7065_v13 = vsub.s32 %v1837_v53, %v6798_v17  ;;  %v7094_v53 = vsub.s32 %v1865_v15, %v6798_v17 }
 0x34c   : > { %1522 = vadd.xlane.f32.xlu1 %v1349_v60  ;;  %1542 = vadd.xlane.f32.xlu0 %v1359_v61  ;;  %v7045_v60 = vsub.s32 %v1844_v41, %v6798_v17  ;;  %v7048_v61 = vsub.s32 %v1851_v43, %v6798_v17  ;;  %v1093_v41 = vadd.f32 %v6939_v5, %v875_v22  ;;  %v876_v22 = vld [vmem:[#allocation6 + $0x1a8] sm:$0xff] }
 0x34d   : > { %v1100_v43 = vadd.f32 %v6939_v5, %v882_v23 }
 0x350   : > { %1582 = vadd.xlane.f32.xlu1 %v1379_v4  ;;  %1602 = vadd.xlane.f32.xlu0 %v1389_v7  ;;  %v1381_v4 = vmul.f32 %v6819_v37, %v1246_v52  ;;  %v1217_v7 = vmax.f32 %v1089_v54, 0.0 }
 0x352   : > { %v1352_v18 = vmul.f32 %v6819_v37, %v1217_v7  ;;  %v1907_v7 = vadd.s32 4294967192, %v7008_v10 }
 0x354   : > { %1524 = vadd.xlane.f32.xlu1 %v1350_v16  ;;  %1544 = vadd.xlane.f32.xlu0 %v1360_v21  ;;  %v7068_v16 = vsub.s32 %v1879_v62, %v6798_v17  ;;  %v1250_v21 = vmax.f32 %v1122_v63, 0.0  ;;  %v1221_v63 = vmax.f32 %v1093_v41, 0.0 }
 0x355   : > { %v7016_v28 = vpop.xlane.xlu1 %1440  ;;  %v1433_v29 = vpop.xlane.xlu0 %1432 }
 0x356   : > { %v1822_v55 = vrot.slane %v1433_v29, %v7020_v6  ;;  %v1385_v46 = vmul.f32 %v6819_v37, %v1250_v21  ;;  %v1101_v21 = vadd.f32 %v6939_v5, %v883_v1 }
 0x358   : > { %1584 = vadd.xlane.f32.xlu1 %v1380_v35  ;;  %1604 = vadd.xlane.f32.xlu0 %v1390_v36  ;;  %v7079_v35 = vsub.s32 %v1858_v8, %v6798_v17  ;;  %v1257_v36 = vmax.f32 %v1129_v20, 0.0  ;;  %v1138_v20 = vadd.f32 %v6969_v31, %v920_v59 }
 0x359   : > { %v7036_v49 = vpop.xlane.xlu1 %1442  ;;  %v1435_v50 = vpop.xlane.xlu0 %1434 }
 0x35a   : > { %v1827_v56 = vrot.slane %v1435_v50, %v7026_v38  ;;  %v1123_v50 = vadd.f32 %v6962_v44, %v905_v27  ;;  %v7113_v27 = vsub.s32 %v1900_v57, %v6798_v17  ;;  %v1266_v45 = vmax.f32 %v1138_v20, 0.0  ;;  %v906_v57 = vld [vmem:[#allocation6 + $0x298] sm:$0xff] }
 0x35c   : > { %v1829_v32 = vsel %vm1828_vm1, %v1827_v56, %v1822_v55  ;;  %1526 = vadd.xlane.f32.xlu1 %v1351_v42  ;;  %1546 = vadd.xlane.f32.xlu0 %v1361_v51  ;;  %v1848_v42 = vrot.slane %v7016_v28, %v7045_v60  ;;  %v1855_v51 = vrot.slane %v7036_v49, %v7048_v61 }
 0x35d   : > { %v7057_v2 = vpop.xlane.xlu1 %1448  ;;  %v1437_v30 = vpop.xlane.xlu0 %1436  ;;  %v1392_v56 = vmul.f32 %v6819_v37, %v1257_v36  ;;  %v7119_v36 = vsub.s32 %v1907_v7, %v6798_v17 }
 0x35e   : > { %v1834_v9 = vrot.slane %v1437_v30, %v7034_v47  ;;  %v7103_v30 = vsub.s32 %v1893_v48, %v6798_v17 }
 0x360   : > { %v1836_v24 = vsel %vm7828_vm2, %v1834_v9, %v1829_v32  ;;  %1586 = vadd.xlane.f32.xlu1 %v1381_v4  ;;  %1606 = vadd.xlane.f32.xlu0 %v1391_v11  ;;  %v1228_v32 = vmax.f32 %v1100_v43, 0.0  ;;  %v1251_v4 = vmax.f32 %v1123_v50, 0.0  ;;  %v7130_v50 = vld [vmem:[#allocation18] ss:$0 sm:$0xff] }
 0x361   : > { %v7075_v29 = vpop.xlane.xlu1 %1450  ;;  %v1439_v34 = vpop.xlane.xlu0 %1438 }
 0x362   : > { %v1841_v39 = vrot.slane %v1439_v34, %v7065_v13  ;;  %v1363_v15 = vmul.f32 %v6819_v37, %v1228_v32  ;;  %v1876_v34 = vrot.slane %v7057_v2, %v7054_v0  ;;  %v1883_v41 = vrot.slane %v7075_v29, %v7068_v16 }
 0x364   : > { %v1843_v52 = vsel %vm1842_vm3, %v1841_v39, %v1836_v24  ;;  %1528 = vadd.xlane.f32.xlu1 %v1352_v18  ;;  %1548 = vadd.xlane.f32.xlu0 %v1362_v40  ;;  %v1356_v24 = vmul.f32 %v6819_v37, %v1221_v63  ;;  %v1386_v18 = vmul.f32 %v6819_v37, %v1251_v4  ;;  %v1914_v39 = vadd.s32 4294967184, %v7008_v10  ;;  %v913_v40 = vld [vmem:[#allocation6 + $0x2d0] sm:$0xff] }
 0x365   : > { %v1850_v54 = vsel %vm1849_vm4, %v1848_v42, %v1843_v52  ;;  %v1453_v28 = vpop.xlane.xlu1 %1452  ;;  %v1445_v55 = vpop.xlane.xlu0 %1444  ;;  %v1094_v42 = vadd.f32 %v6939_v5, %v876_v22  ;;  %v1229_v52 = vmax.f32 %v1101_v21, 0.0  ;;  %v922_v21 = vld [vmem:[#allocation6 + $0x318] sm:$0xff] }
 0x366   : > { %v1857_v49 = vsel %vm1856_vm5, %v1855_v51, %v1850_v54  ;;  %v1862_v62 = vrot.slane %v1445_v55, %v7079_v35  ;;  %v1890_v2 = vrot.slane %v1453_v28, %v7072_v25  ;;  %v1393_v51 = vmul.f32 %v7130_v50, %v1258_v14  ;;  %v914_v22 = vld [vmem:[#allocation6 + $0x2d8] sm:$0xff] }
 0x367   : > { %v1364_v4 = vmul.f32 %v7130_v50, %v1229_v52  ;;  %v1222_v7 = vmax.f32 %v1094_v42, 0.0  ;;  %v1102_v14 = vadd.f32 %v6939_v5, %v884_v58 }
 0x368   : > { %v1864_v8 = vsel %vm1863_vm6, %v1862_v62, %v1857_v49  ;;  %1594 = vadd.xlane.f32.xlu1 %v1385_v46  ;;  %1608 = vadd.xlane.f32.xlu0 %v1392_v56  ;;  %v1131_v56 = vadd.f32 %v6962_v44, %v913_v40  ;;  %v1401_v49 = vmul.f32 %v7130_v50, %v1266_v45 }
 0x369   : > { %v1455_v9 = vpop.xlane.xlu1 %1454  ;;  %v1447_v11 = vpop.xlane.xlu0 %1446  ;;  %v7141_v62 = vsub.s32 %v1914_v39, %v6798_v17  ;;  %v1140_v39 = vadd.f32 %v6969_v31, %v922_v21  ;;  %v1132_v40 = vadd.f32 %v6962_v44, %v914_v22  ;;  %v1230_v42 = vmax.f32 %v1102_v14, 0.0  ;;  %v925_v21 = vld [vmem:[#allocation6 + $0x330] sm:$0xff]  ;;  %v931_v22 = vld [vmem:[#allocation6 + $0x360] sm:$0xff] }
 0x36a   : > { %v1869_v23 = vrot.slane %v1447_v11, %v7094_v53  ;;  %v1897_v29 = vrot.slane %v1455_v9, %v7103_v30  ;;  %v1259_v9 = vmax.f32 %v1131_v56, 0.0  ;;  %v1124_v11 = vadd.f32 %v6962_v44, %v906_v57 }
 0x36b   : > { %v1365_v57 = vmul.f32 %v7130_v50, %v1230_v42 }
 0x36c   : > { %v1871_v43 = vsel %vm1870_vm7, %v1869_v23, %v1864_v8  ;;  %1536 = vadd.xlane.f32.xlu1 %v1356_v24  ;;  %1550 = vadd.xlane.f32.xlu0 %v1363_v15  ;;  %v1921_v8 = vadd.s32 4294967176, %v7008_v10  ;;  %v1252_v45 = vmax.f32 %v1124_v11, 0.0 }
 0x36d   : > { %v1878_v37 = vsel %vm1877_vm8, %v1876_v34, %v1871_v43  ;;  %v1457_v46 = vpop.xlane.xlu1 %1456  ;;  %v7128_v48 = vpop.xlane.xlu0 %1496  ;;  %v1357_v34 = vmul.f32 %v7130_v50, %v1222_v7  ;;  %v1394_v43 = vmul.f32 %v7130_v50, %v1259_v9 }
 0x36e   : > { %v1885_v54 = vsel %vm1884_vm9, %v1883_v41, %v1878_v37  ;;  %v1904_v55 = vrot.slane %v1457_v46, %v7113_v27  ;;  %v885_v37 = vld [vmem:[#allocation6 + $0x1f0] sm:$0xff] }
 0x36f   : > { %v1892_v28 = vsel %vm1891_vm10, %v1890_v2, %v1885_v54  ;;  %v923_v2 = vld [vmem:[#allocation6 + $0x320] sm:$0xff]  ;;  %v1260_v54 = vmax.f32 %v1132_v40, 0.0  ;;  %v1103_v58 = vadd.f32 %v6939_v5, %v885_v37  ;;  %v926_v37 = vld [vmem:[#allocation6 + $0x338] sm:$0xff] }
 0x370   : > { %v1899_v59 = vsel %vm1898_vm11, %v1897_v29, %v1892_v28  ;;  %1596 = vadd.xlane.f32.xlu1 %v1386_v18  ;;  %1610 = vadd.xlane.f32.xlu0 %v1393_v51  ;;  %v7156_v18 = vsub.s32 %v1921_v8, %v6798_v17  ;;  %v1268_v29 = vmax.f32 %v1140_v39, 0.0  ;;  %v1387_v28 = vmul.f32 %v7130_v50, %v1252_v45 }
 0x371   : > { %v1906_v63 = vsel %vm1905_vm12, %v1904_v55, %v1899_v59  ;;  %v1459_v32 = vpop.xlane.xlu1 %1458  ;;  %v7144_v1 = vpop.xlane.xlu0 %1500  ;;  %v1141_v55 = vadd.f32 %v6969_v31, %v923_v2  ;;  %v924_v59 = vld [vmem:[#allocation6 + $0x328] sm:$0xff]  ;;  %v1395_v11 = vmul.f32 %v7130_v50, %v1260_v54  ;;  %v1231_v14 = vmax.f32 %v1103_v58, 0.0 }
 0x372   : > { %v1911_v20 = vrot.slane %v1459_v32, %v7119_v36  ;;  %v1142_v8 = vadd.f32 %v6969_v31, %v924_v59  ;;  %v1403_v9 = vmul.f32 %v7130_v50, %v1268_v29  ;;  %v1149_v2 = vadd.f32 %v6969_v31, %v931_v22 }
 0x373   : > { %v1269_v7 = vmax.f32 %v1141_v55, 0.0  ;;  %v1366_v42 = vmul.f32 %v7130_v50, %v1231_v14 }
 0x374   : > { %v1913_v23 = vsel %vm1912_vm13, %v1911_v20, %v1906_v63  ;;  %1626 = vadd.xlane.f32.xlu1 %v1401_v49  ;;  %1552 = vadd.xlane.f32.xlu0 %v1364_v4  ;;  %v915_v49 = vld [vmem:[#allocation6 + $0x2e0] sm:$0xff]  ;;  %v1270_v39 = vmax.f32 %v1142_v8, 0.0 }
 0x375   : > { %v1461_v24 = vpop.xlane.xlu1 %1460  ;;  %v7152_v15 = vpop.xlane.xlu0 %1472  ;;  %v1133_v20 = vadd.f32 %v6962_v44, %v915_v49 }
 0x376   : > { %v1918_v41 = vrot.slane %v1461_v24, %v7141_v62 }
 0x377   : > { %v1261_v40 = vmax.f32 %v1133_v20, 0.0 }
 0x378   : > { %v1920_v46 = vsel %vm1919_vm14, %v1918_v41, %v1913_v23  ;;  %1538 = vadd.xlane.f32.xlu1 %v1357_v34  ;;  %1612 = vadd.xlane.f32.xlu0 %v1394_v43  ;;  %v1404_v34 = vmul.f32 %v7130_v50, %v1269_v7  ;;  %v1143_v41 = vadd.f32 %v6969_v31, %v925_v21  ;;  %v918_v7 = vld [vmem:[#allocation6 + $0x2f8] sm:$0xff] }
 0x379   : > { %v1463_v51 = vpop.xlane.xlu1 %1462  ;;  %v7163_v52 = vpop.xlane.xlu0 %1562  ;;  %v1396_v59 = vmul.f32 %v7130_v50, %v1261_v40 }
 0x37a   : > { %v1925_v56 = vrot.slane %v1463_v51, %v7156_v18  ;;  %v1000_v51 = vcombine.high %v6952_v33, %v6952_v33  ;;  %v1271_v49 = vmax.f32 %v1143_v41, 0.0  ;;  %v927_v33 = vld [vmem:[#allocation6 + $0x340] sm:$0xff] }
 0x37b   : > { %v1145_v22 = vadd.f32 %v6969_v31, %v927_v33 }
 0x37c   : > { %v7171_v63 = vsel %vm1926_vm15, %v1925_v56, %v1920_v46  ;;  %1598 = vadd.xlane.f32.xlu1 %v1387_v28  ;;  %1554 = vadd.xlane.f32.xlu0 %v1365_v57  ;;  %v932_v46 = vld [vmem:[#allocation6 + $0x368] sm:$0xff]  ;;  %v1405_v56 = vmul.f32 %v7130_v50, %v1270_v39  ;;  %v1144_v28 = vadd.f32 %v6969_v31, %v926_v37 }
 0x37d   : > { %v1465_v32 = vpop.xlane.xlu1 %1464  ;;  %v7173_v4 = vpop.xlane.xlu0 %1474  ;;  %v1150_v57 = vadd.f32 %v6969_v31, %v932_v46  ;;  %v7198_v8 = vrot.slane %v1000_v51, %v6810_v26  ;;  %v1406_v40 = vmul.f32 %v7130_v50, %v1271_v49  ;;  %v1273_v51 = vmax.f32 %v1145_v22, 0.0  ;;  %v937_v49 = vld [vmem:[#allocation6 + $0x390] sm:$0xff] }
 0x37e   : > { %v1931_v43 = vrot.slane %v1465_v32, %v7020_v6  ;;  %v1277_v32 = vmax.f32 %v1149_v2, 0.0  ;;  %v1272_v14 = vmax.f32 %v1144_v28, 0.0 }
 0x37f   : > { %v1278_v21 = vmax.f32 %v1150_v57, 0.0 }
 0x380   : > { %1630 = vadd.xlane.f32.xlu1 %v1403_v9  ;;  %1614 = vadd.xlane.f32.xlu0 %v1395_v11  ;;  %v1412_v41 = vmul.f32 %v7130_v50, %v1277_v32  ;;  %v1407_v28 = vmul.f32 %v7130_v50, %v1272_v14  ;;  %v1955_v32 = vrot.slane %v7173_v4, %v7048_v61  ;;  %v930_v4 = vld [vmem:[#allocation6 + $0x358] sm:$0xff] }
 0x381   : > { %v1467_v23 = vpop.xlane.xlu1 %1466  ;;  %v7179_v24 = vpop.xlane.xlu0 %1506  ;;  %v1408_v14 = vmul.f32 %v7130_v50, %v1273_v51  ;;  %v2172_v51 = vrot.slane %v7163_v52, %v7026_v38  ;;  %v916_v52 = vld [vmem:[#allocation6 + $0x2e8] sm:$0xff] }
 0x382   : > { %v1935_v45 = vrot.slane %v1467_v23, %v7026_v38  ;;  %v1136_v23 = vadd.f32 %v6962_v44, %v918_v7 }
 0x384   : > { %v1936_v29 = vsel %vm1828_vm1, %v1935_v45, %v1931_v43  ;;  %1632 = vadd.xlane.f32.xlu1 %v1404_v34  ;;  %1556 = vadd.xlane.f32.xlu0 %v1366_v42  ;;  %v2010_v34 = vrot.slane %v7128_v48, %v7020_v6  ;;  %v928_v43 = vld [vmem:[#allocation6 + $0x348] sm:$0xff]  ;;  %v2019_v42 = vrot.slane %v7144_v1, %v7034_v47  ;;  %v1264_v57 = vmax.f32 %v1136_v23, 0.0 }
 0x385   : > { %v1469_v54 = vpop.xlane.xlu1 %1468  ;;  %v7190_v55 = vpop.xlane.xlu0 %1566  ;;  %v936_v45 = vld [vmem:[#allocation6 + $0x388] sm:$0xff]  ;;  %v1413_v1 = vmul.f32 %v7130_v50, %v1278_v21 }
 0x386   : > { %v1940_v58 = vrot.slane %v1469_v54, %v7034_v47  ;;  %v1154_v54 = vadd.f32 %v7198_v8, %v936_v45 }
 0x388   : > { %v1941_v20 = vsel %vm7828_vm2, %v1940_v58, %v1936_v29  ;;  %1634 = vadd.xlane.f32.xlu1 %v1405_v56  ;;  %1616 = vadd.xlane.f32.xlu0 %v1396_v59  ;;  %v1146_v29 = vadd.f32 %v6969_v31, %v928_v43  ;;  %v1950_v58 = vrot.slane %v7152_v15, %v7045_v60  ;;  %v929_v59 = vld [vmem:[#allocation6 + $0x350] sm:$0xff]  ;;  %v1282_v23 = vmax.f32 %v1154_v54, 0.0 }
 0x389   : > { %v1499_v9 = vpop.xlane.xlu1 %1498  ;;  %v7201_v11 = vpop.xlane.xlu0 %1508  ;;  %v1399_v15 = vmul.f32 %v7130_v50, %v1264_v57  ;;  %v939_v57 = vld [vmem:[#allocation6 + $0x3a0] sm:$0xff] }
 0x38a   : > { %v2014_v39 = vrot.slane %v1499_v9, %v7026_v38  ;;  %v1274_v21 = vmax.f32 %v1146_v29, 0.0 }
 0x38c   : > { %v2015_v2 = vsel %vm1828_vm1, %v2014_v39, %v2010_v34  ;;  %1636 = vadd.xlane.f32.xlu1 %v1406_v40  ;;  %1648 = vadd.xlane.f32.xlu0 %v1412_v41  ;;  %v1147_v34 = vadd.f32 %v6969_v31, %v929_v59  ;;  %v1155_v39 = vadd.f32 %v7198_v8, %v937_v49  ;;  %v938_v40 = vld [vmem:[#allocation6 + $0x398] sm:$0xff] }
 0x38d   : > { %v1471_v37 = vpop.xlane.xlu1 %1470  ;;  %v7213_v46 = vpop.xlane.xlu0 %1568  ;;  %v2020_v48 = vsel %vm7828_vm2, %v2019_v42, %v2015_v2  ;;  %v1409_v45 = vmul.f32 %v7130_v50, %v1274_v21  ;;  %v1417_v42 = vmul.f32 %v7130_v50, %v1282_v23  ;;  %v1148_v2 = vadd.f32 %v6969_v31, %v930_v4 }
 0x38e   : > { %v1945_v56 = vrot.slane %v1471_v37, %v7065_v13  ;;  %v1156_v37 = vadd.f32 %v7198_v8, %v938_v40  ;;  %v1275_v54 = vmax.f32 %v1147_v34, 0.0  ;;  %v2034_v34 = vrot.slane %v7179_v24, %v7048_v61 }
 0x38f   : > { %v2039_v4 = vrot.slane %v7201_v11, %v7079_v35  ;;  %v1134_v40 = vadd.f32 %v6962_v44, %v916_v52 }
 0x390   : > { %v1946_v33 = vsel %vm1842_vm3, %v1945_v56, %v1941_v20  ;;  %1638 = vadd.xlane.f32.xlu1 %v1407_v28  ;;  %1650 = vadd.xlane.f32.xlu0 %v1413_v1  ;;  %v1283_v56 = vmax.f32 %v1155_v39, 0.0  ;;  %v886_v28 = vld [vmem:[#allocation6 + $0x1f8] sm:$0xff]  ;;  %v1410_v21 = vmul.f32 %v7130_v50, %v1275_v54  ;;  %v917_v54 = vld [vmem:[#allocation6 + $0x2f0] sm:$0xff] }
 0x391   : > { %v1951_v7 = vsel %vm1849_vm4, %v1950_v58, %v1946_v33  ;;  %v1503_v9 = vpop.xlane.xlu1 %1502  ;;  %v7227_v22 = vpop.xlane.xlu0 %1480  ;;  %v1284_v33 = vmax.f32 %v1156_v37, 0.0 }
 0x392   : > { %v7234_v20 = vsel %vm1856_vm5, %v1955_v32, %v1951_v7  ;;  %v2024_v1 = vrot.slane %v1503_v9, %v7065_v13  ;;  %v1276_v32 = vmax.f32 %v1148_v2, 0.0  ;;  %v1104_v7 = vadd.f32 %v6939_v5, %v886_v28  ;;  %v941_v28 = vld [vmem:[#allocation6 + $0x3b0] sm:$0xff] }
 0x393   : > { %v1418_v23 = vmul.f32 %v7130_v50, %v1283_v56  ;;  %v1157_v9 = vadd.f32 %v7198_v8, %v939_v57  ;;  %v1419_v11 = vmul.f32 %v7130_v50, %v1284_v33  ;;  %v2182_v56 = vrot.slane %v7190_v55, %v7065_v13  ;;  %v942_v55 = vld [vmem:[#allocation6 + $0x3b8] sm:$0xff] }
 0x394   : > { %1640 = vadd.xlane.f32.xlu1 %v1408_v14  ;;  %1622 = vadd.xlane.f32.xlu0 %v1399_v15  ;;  %v940_v15 = vld [vmem:[#allocation6 + $0x3a8] sm:$0xff]  ;;  %v2025_v39 = vsel %vm1842_vm3, %v2024_v1, %v2020_v48  ;;  %v1411_v2 = vmul.f32 %v7130_v50, %v1276_v32  ;;  %v1232_v37 = vmax.f32 %v1104_v7, 0.0  ;;  %v2187_v1 = vrot.slane %v7213_v46, %v7045_v60  ;;  %v933_v32 = vld [vmem:[#allocation6 + $0x370] sm:$0xff] }
 0x395   : > { %v7236_v41 = vpop.xlane.xlu0 %1482  ;;  %v1561_v43 = vpop.xlane.xlu1 %1560  ;;  %v1158_v24 = vadd.f32 %v7198_v8, %v940_v15 }
 0x396   : > { %v2168_v29 = vrot.slane %v1561_v43, %v7020_v6 }
 0x398   : > { %v2173_v58 = vsel %vm1828_vm1, %v2172_v51, %v2168_v29  ;;  %1642 = vadd.xlane.f32.xlu1 %v1409_v45  ;;  %1658 = vadd.xlane.f32.xlu0 %v1417_v42  ;;  %v1285_v51 = vmax.f32 %v1157_v9, 0.0 }
 0x399   : > { %v7247_v59 = vpop.xlane.xlu0 %1484  ;;  %v1505_v49 = vpop.xlane.xlu1 %1504 }
 0x39a   : > { %v2029_v14 = vrot.slane %v1505_v49, %v7045_v60  ;;  %v1262_v49 = vmax.f32 %v1134_v40, 0.0  ;;  %v1420_v46 = vmul.f32 %v7130_v50, %v1285_v51 }
 0x39c   : > { %v2030_v5 = vsel %vm1849_vm4, %v2029_v14, %v2025_v39  ;;  %1644 = vadd.xlane.f32.xlu1 %v1410_v21  ;;  %1660 = vadd.xlane.f32.xlu0 %v1418_v23  ;;  %v1367_v14 = vmul.f32 %v7130_v50, %v1232_v37  ;;  %v1286_v21 = vmax.f32 %v1158_v24, 0.0  ;;  %v1135_v23 = vadd.f32 %v6962_v44, %v917_v54 }
 0x39d   : > { %v2035_v43 = vsel %vm1856_vm5, %v2034_v34, %v2030_v5  ;;  %v7262_v45 = vpop.xlane.xlu0 %1486  ;;  %v1565_v42 = vpop.xlane.xlu1 %1564  ;;  %v1151_v34 = vadd.f32 %v6969_v31, %v933_v32  ;;  %v943_v5 = vld [vmem:[#allocation6 + $0x3c0] sm:$0xff]  ;;  %v1397_v37 = vmul.f32 %v7130_v50, %v1262_v49  ;;  %v934_v49 = vld [vmem:[#allocation6 + $0x378] sm:$0xff]  ;;  %v1980_v32 = vrot.slane %v7247_v59, %v7072_v25 }
 0x39e   : > { %v2177_v48 = vrot.slane %v1565_v42, %v7034_v47  ;;  %v7269_v29 = vsel %vm1863_vm6, %v2039_v4, %v2035_v43  ;;  %v1160_v4 = vadd.f32 %v7198_v8, %v942_v55  ;;  %v1263_v43 = vmax.f32 %v1135_v23, 0.0  ;;  %v935_v42 = vld [vmem:[#allocation6 + $0x380] sm:$0xff] }
 0x39f   : > { %v1421_v24 = vmul.f32 %v7130_v50, %v1286_v21  ;;  %v1279_v51 = vmax.f32 %v1151_v34, 0.0  ;;  %v1161_v54 = vadd.f32 %v7198_v8, %v943_v5  ;;  %v1152_v34 = vadd.f32 %v6969_v31, %v934_v49 }
 0x3a0   : > { %v2178_v57 = vsel %vm7828_vm2, %v2177_v48, %v2173_v58  ;;  %1646 = vadd.xlane.f32.xlu1 %v1411_v2  ;;  %1662 = vadd.xlane.f32.xlu0 %v1419_v11  ;;  %v1159_v58 = vadd.f32 %v7198_v8, %v941_v28  ;;  %v944_v11 = vld [vmem:[#allocation6 + $0x3c8] sm:$0xff] }
 0x3a1   : > { %v2183_v33 = vsel %vm1842_vm3, %v2182_v56, %v2178_v57  ;;  %v1489_v7 = vpop.xlane.xlu0 %1488  ;;  %v1477_v52 = vpop.xlane.xlu1 %1476  ;;  %v1975_v56 = vrot.slane %v7236_v41, %v7068_v16  ;;  %v1153_v57 = vadd.f32 %v7198_v8, %v935_v42  ;;  %v1162_v21 = vadd.f32 %v7198_v8, %v944_v11  ;;  %v946_v11 = vld [vmem:[#allocation6 + $0x3d8] sm:$0xff] }
 0x3a2   : > { %v1960_v9 = vrot.slane %v1477_v52, %v7079_v35  ;;  %v2188_v15 = vsel %vm1849_vm4, %v2187_v1, %v2183_v33  ;;  %v1287_v48 = vmax.f32 %v1159_v58, 0.0  ;;  %v1288_v1 = vmax.f32 %v1160_v4, 0.0 }
 0x3a3   : > { %v1985_v41 = vrot.slane %v7262_v45, %v7103_v30  ;;  %v1414_v58 = vmul.f32 %v7130_v50, %v1279_v51  ;;  %v1289_v5 = vmax.f32 %v1161_v54, 0.0  ;;  %v1280_v49 = vmax.f32 %v1152_v34, 0.0 }
 0x3a4   : > { %v1961_v39 = vsel %vm1863_vm6, %v1960_v9, %v7234_v20  ;;  %1558 = vadd.xlane.f32.xlu1 %v1367_v14  ;;  %1664 = vadd.xlane.f32.xlu0 %v1420_v46  ;;  %v1970_v20 = vrot.slane %v7227_v22, %v7054_v0  ;;  %v1398_v14 = vmul.f32 %v7130_v50, %v1263_v43 }
 0x3a5   : > { %v1491_v44 = vpop.xlane.xlu0 %1490  ;;  %v1479_v40 = vpop.xlane.xlu1 %1478  ;;  %v1422_v9 = vmul.f32 %v7130_v50, %v1287_v48  ;;  %v1990_v46 = vrot.slane %v1489_v7, %v7113_v27  ;;  %v945_v48 = vld [vmem:[#allocation6 + $0x3d0] sm:$0xff] }
 0x3a6   : > { %v1965_v2 = vrot.slane %v1479_v40, %v7094_v53 }
 0x3a8   : > { %v1966_v28 = vsel %vm1870_vm7, %v1965_v2, %v1961_v39  ;;  %1618 = vadd.xlane.f32.xlu1 %v1397_v37  ;;  %1666 = vadd.xlane.f32.xlu0 %v1421_v24  ;;  %v1995_v39 = vrot.slane %v1491_v44, %v7119_v36  ;;  %v1423_v2 = vmul.f32 %v7130_v50, %v1288_v1  ;;  %v1281_v37 = vmax.f32 %v1153_v57, 0.0 }
 0x3a9   : > { %v1971_v33 = vsel %vm1877_vm8, %v1970_v20, %v1966_v28  ;;  %v1493_v22 = vpop.xlane.xlu0 %1492  ;;  %v1511_v52 = vpop.xlane.xlu1 %1510  ;;  %v1424_v1 = vmul.f32 %v7130_v50, %v1289_v5  ;;  %v1290_v57 = vmax.f32 %v1162_v21, 0.0 }
 0x3aa   : > { %v1976_v23 = vsel %vm1884_vm9, %v1975_v56, %v1971_v33  ;;  %v2044_v55 = vrot.slane %v1511_v52, %v7094_v53  ;;  %v2000_v7 = vrot.slane %v1493_v22, %v7141_v62  ;;  %v1416_v33 = vmul.f32 %v7130_v50, %v1281_v37  ;;  %v948_v52 = vld [vmem:[#allocation6 + $0x3e8] sm:$0xff] }
 0x3ab   : > { %v1981_v59 = vsel %vm1891_vm10, %v1980_v32, %v1976_v23  ;;  %v1163_v22 = vadd.f32 %v7198_v8, %v945_v48  ;;  %v1425_v21 = vmul.f32 %v7130_v50, %v1290_v57 }
 0x3ac   : > { %v1986_v4 = vsel %vm1898_vm11, %v1985_v41, %v1981_v59  ;;  %v2045_v45 = vsel %vm1870_vm7, %v2044_v55, %v7269_v29  ;;  %1620 = vadd.xlane.f32.xlu1 %v1398_v14  ;;  %1668 = vadd.xlane.f32.xlu0 %v1422_v9  ;;  %v947_v14 = vld [vmem:[#allocation6 + $0x3e0] sm:$0xff]  ;;  %v1166_v55 = vadd.f32 %v7198_v8, %v948_v52 }
 0x3ad   : > { %v1991_v40 = vsel %vm1905_vm12, %v1990_v46, %v1986_v4  ;;  %v1495_v43 = vpop.xlane.xlu0 %1494  ;;  %v1571_v42 = vpop.xlane.xlu1 %1570  ;;  %v1165_v9 = vadd.f32 %v7198_v8, %v947_v14  ;;  %v1415_v59 = vmul.f32 %v7130_v50, %v1280_v49  ;;  %v950_v4 = vld [vmem:[#allocation6 + $0x3f8] sm:$0xff] }
 0x3ae   : > { %v1996_v31 = vsel %vm1912_vm13, %v1995_v39, %v1991_v40  ;;  %v2005_v44 = vrot.slane %v1495_v43, %v7156_v18  ;;  %v2192_v24 = vrot.slane %v1571_v42, %v7048_v61  ;;  %v949_v39 = vld [vmem:[#allocation6 + $0x3f0] sm:$0xff] }
 0x3af   : > { %v2001_v29 = vsel %vm1919_vm14, %v2000_v7, %v1996_v31  ;;  %v1294_v7 = vmax.f32 %v1166_v55, 0.0  ;;  %v1293_v43 = vmax.f32 %v1165_v9, 0.0  ;;  %v1167_v42 = vadd.f32 %v7198_v8, %v949_v39 }
 0x3b0   : > { %v2006_v20 = vsel %vm1926_vm15, %v2005_v44, %v2001_v29  ;;  %v2193_v51 = vsel %vm1856_vm5, %v2192_v24, %v2188_v15  ;;  %1652 = vadd.xlane.f32.xlu1 %v1414_v58  ;;  %1670 = vadd.xlane.f32.xlu0 %v1423_v2  ;;  %v1164_v15 = vadd.f32 %v7198_v8, %v946_v11  ;;  %v1291_v58 = vmax.f32 %v1163_v22, 0.0 }
 0x3b1   : > { %v7326_v54 = vsel %vm7826_vm0, %v2006_v20, %v7171_v63  ;;  %v7328_v56 = vpop.xlane.xlu0 %1588  ;;  %v1513_v28 = vpop.xlane.xlu1 %1512  ;;  %v1168_v44 = vadd.f32 %v7198_v8, %v950_v4  ;;  %v1295_v11 = vmax.f32 %v1167_v42, 0.0  ;;  %vm7827_vm0 = vcmask 1042434  }
 0x3b2   : > { %v2049_v32 = vrot.slane %v1513_v28, %v7054_v0  ;;  %v1292_v34 = vmax.f32 %v1164_v15, 0.0  ;;  %v1426_v37 = vmul.f32 %v7130_v50, %v1291_v58  ;;  %v1428_v28 = vmul.f32 %v7130_v50, %v1293_v43 }
 0x3b4   : > { %v2050_v63 = vsel %vm1877_vm8, %v2049_v32, %v2045_v45  ;;  %1672 = vadd.xlane.f32.xlu0 %v1424_v1  ;;  %1656 = vadd.xlane.f32.xlu1 %v1416_v33  ;;  %v1427_v31 = vmul.f32 %v7130_v50, %v1292_v34  ;;  %v1296_v1 = vmax.f32 %v1168_v44, 0.0  ;;  %v1430_v33 = vmul.f32 %v7130_v50, %v1295_v11 }
 0x3b5   : > { %v7336_v41 = vpop.xlane.xlu0 %1590  ;;  %v1573_v23 = vpop.xlane.xlu1 %1572 }
 0x3b6   : > { %v2197_v46 = vrot.slane %v1573_v23, %v7079_v35  ;;  %v1431_v22 = vmul.f32 %v7130_v50, %v1296_v1 }
 0x3b8   : > { %v2198_v45 = vsel %vm1863_vm6, %v2197_v46, %v2193_v51  ;;  %1674 = vadd.xlane.f32.xlu0 %v1425_v21  ;;  %1654 = vadd.xlane.f32.xlu1 %v1415_v59  ;;  %v1429_v51 = vmul.f32 %v7130_v50, %v1294_v7 }
 0x3b9   : > { %v7344_v5 = vpop.xlane.xlu0 %1530  ;;  %v1515_v40 = vpop.xlane.xlu1 %1514 }
 0x3ba   : > { %v2054_v2 = vrot.slane %v1515_v40, %v7068_v16 }
 0x3bc   : > { %v2055_v24 = vsel %vm1884_vm9, %v2054_v2, %v2050_v63  ;;  %1676 = vadd.xlane.f32.xlu0 %v1426_v37  ;;  %1678 = vadd.xlane.f32.xlu1 %v1427_v31 }
 0x3bd   : > { %v7352_v29 = vpop.xlane.xlu0 %1532  ;;  %v1575_v48 = vpop.xlane.xlu1 %1574 }
 0x3be   : > { %v2202_v20 = vrot.slane %v1575_v48, %v7094_v53 }
 0x3c0   : > { %v2203_v57 = vsel %vm1870_vm7, %v2202_v20, %v2198_v45  ;;  %1682 = vadd.xlane.f32.xlu0 %v1429_v51  ;;  %1680 = vadd.xlane.f32.xlu1 %v1428_v28 }
 0x3c1   : > { %v7358_v8 = vpop.xlane.xlu0 %1534  ;;  %v1517_v49 = vpop.xlane.xlu1 %1516 }
 0x3c2   : > { %v2059_v32 = vrot.slane %v1517_v49, %v7072_v25 }
 0x3c4   : > { %v2060_v15 = vsel %vm1891_vm10, %v2059_v32, %v2055_v24  ;;  %1684 = vadd.xlane.f32.xlu0 %v1430_v33  ;;  %1686 = vadd.xlane.f32.xlu1 %v1431_v22 }
 0x3c5   : > { %v1577_v52 = vpop.xlane.xlu1 %1576  ;;  %v7364_v14 = vpop.xlane.xlu0 %1592 }
 0x3c6   : > { %v2207_v63 = vrot.slane %v1577_v52, %v7054_v0 }
 0x3c8   : > { %v2208_v23 = vsel %vm1877_vm8, %v2207_v63, %v2203_v57 }
 0x3c9   : > { %v1519_v21 = vpop.xlane.xlu1 %1518  ;;  %v7368_v55 = vpop.xlane.xlu0 %1624 }
 0x3ca   : > { %v2064_v9 = vrot.slane %v1519_v21, %v7103_v30 }
 0x3cc   : > { %v2065_v46 = vsel %vm1898_vm11, %v2064_v9, %v2060_v15 }
 0x3cd   : > { %v1579_v59 = vpop.xlane.xlu1 %1578  ;;  %v7372_v50 = vpop.xlane.xlu0 %1628 }
 0x3ce   : > { %v2212_v58 = vrot.slane %v1579_v59, %v7068_v16 }
 0x3d0   : > { %v2213_v34 = vsel %vm1884_vm9, %v2212_v58, %v2208_v23 }
 0x3d1   : > { %v1521_v39 = vpop.xlane.xlu1 %1520  ;;  %v7376_v4 = vpop.xlane.xlu0 %1540 }
 0x3d2   : > { %v2069_v45 = vrot.slane %v1521_v39, %v7113_v27  ;;  %v2242_v39 = vrot.slane %v7336_v41, %v7156_v18  ;;  %v2103_v41 = vrot.slane %v7358_v8, %v7065_v13 }
 0x3d4   : > { %v2070_v40 = vsel %vm1905_vm12, %v2069_v45, %v2065_v46 }
 0x3d5   : > { %v1581_v7 = vpop.xlane.xlu1 %1580  ;;  %v7380_v43 = vpop.xlane.xlu0 %1600 }
 0x3d6   : > { %v2217_v42 = vrot.slane %v1581_v7, %v7072_v25 }
 0x3d8   : > { %v2218_v2 = vsel %vm1891_vm10, %v2217_v42, %v2213_v34  ;;  %v2237_v34 = vrot.slane %v7328_v56, %v7141_v62  ;;  %v2098_v56 = vrot.slane %v7352_v29, %v7034_v47 }
 0x3d9   : > { %v1523_v37 = vpop.xlane.xlu1 %1522  ;;  %v7384_v31 = vpop.xlane.xlu0 %1542 }
 0x3da   : > { %v2074_v44 = vrot.slane %v1523_v37, %v7119_v36 }
 0x3dc   : > { %v2075_v24 = vsel %vm1912_vm13, %v2074_v44, %v2070_v40 }
 0x3dd   : > { %v1583_v48 = vpop.xlane.xlu1 %1582  ;;  %v7388_v11 = vpop.xlane.xlu0 %1602 }
 0x3de   : > { %v2222_v20 = vrot.slane %v1583_v48, %v7103_v30 }
 0x3e0   : > { %v2223_v51 = vsel %vm1898_vm11, %v2222_v20, %v2218_v2 }
 0x3e1   : > { %v1525_v28 = vpop.xlane.xlu1 %1524  ;;  %v7392_v1 = vpop.xlane.xlu0 %1544 }
 0x3e2   : > { %v2079_v57 = vrot.slane %v1525_v28, %v7141_v62 }
 0x3e4   : > { %v2080_v49 = vsel %vm1919_vm14, %v2079_v57, %v2075_v24 }
 0x3e5   : > { %v1585_v32 = vpop.xlane.xlu1 %1584  ;;  %v7396_v33 = vpop.xlane.xlu0 %1604 }
 0x3e6   : > { %v2227_v22 = vrot.slane %v1585_v32, %v7113_v27 }
 0x3e8   : > { %v2228_v15 = vsel %vm1905_vm12, %v2227_v22, %v2223_v51 }
 0x3e9   : > { %v1527_v52 = vpop.xlane.xlu1 %1526  ;;  %v7400_v63 = vpop.xlane.xlu0 %1546 }
 0x3ea   : > { %v2084_v23 = vrot.slane %v1527_v52, %v7156_v18 }
 0x3ec   : > { %v2085_v21 = vsel %vm1926_vm15, %v2084_v23, %v2080_v49 }
 0x3ed   : > { %v7406_v9 = vsel %vm7827_vm0, %v2085_v21, %v7326_v54  ;;  %v1587_v46 = vpop.xlane.xlu1 %1586  ;;  %v7408_v59 = vpop.xlane.xlu0 %1606  ;;  %v2093_v54 = vrot.slane %v7344_v5, %v7026_v38  ;;  %v2247_v5 = vrot.slane %v7364_v14, %v7020_v6  ;;  %vm7831_vm0 = vcmask 1043459  }
 0x3ee   : > { %v2232_v58 = vrot.slane %v1587_v46, %v7119_v36  ;;  %v2326_v46 = vrot.slane %v7368_v55, %v7020_v6  ;;  %v2123_v55 = vrot.slane %v7384_v31, %v7094_v53 }
 0x3f0   : > { %v2233_v45 = vsel %vm1912_vm13, %v2232_v58, %v2228_v15 }
 0x3f1   : > { %v2238_v40 = vsel %vm1919_vm14, %v2237_v34, %v2233_v45  ;;  %v1529_v7 = vpop.xlane.xlu1 %1528  ;;  %v1549_v42 = vpop.xlane.xlu0 %1548  ;;  %v2335_v34 = vrot.slane %v7372_v50, %v7034_v47  ;;  %v2128_v50 = vrot.slane %v7392_v1, %v7054_v0  ;;  %v2271_v1 = vrot.slane %v7388_v11, %v7048_v61 }
 0x3f2   : > { %v7420_v2 = vsel %vm1926_vm15, %v2242_v39, %v2238_v40  ;;  %v2089_v37 = vrot.slane %v1529_v7, %v7020_v6  ;;  %v2138_v31 = vrot.slane %v1549_v42, %v7072_v25  ;;  %v2281_v11 = vrot.slane %v7408_v59, %v7094_v53 }
 0x3f4   : > { %v2094_v44 = vsel %vm1828_vm1, %v2093_v54, %v2089_v37  ;;  %v2118_v37 = vrot.slane %v7376_v4, %v7079_v35  ;;  %v2266_v4 = vrot.slane %v7380_v43, %v7045_v60 }
 0x3f5   : > { %v2099_v24 = vsel %vm7828_vm2, %v2098_v56, %v2094_v44  ;;  %v1595_v48 = vpop.xlane.xlu1 %1594  ;;  %v1609_v20 = vpop.xlane.xlu0 %1608 }
 0x3f6   : > { %v2251_v51 = vrot.slane %v1595_v48, %v7026_v38  ;;  %v2104_v28 = vsel %vm1842_vm3, %v2103_v41, %v2099_v24  ;;  %v2133_v48 = vrot.slane %v7400_v63, %v7068_v16 }
 0x3f8   : > { %v2252_v57 = vsel %vm1828_vm1, %v2251_v51, %v2247_v5 }
 0x3f9   : > { %v1537_v49 = vpop.xlane.xlu1 %1536  ;;  %v1551_v29 = vpop.xlane.xlu0 %1550 }
 0x3fa   : > { %v2108_v32 = vrot.slane %v1537_v49, %v7045_v60 }
 0x3fc   : > { %v2109_v8 = vsel %vm1849_vm4, %v2108_v32, %v2104_v28  ;;  %v2276_v32 = vrot.slane %v7396_v33, %v7079_v35 }
 0x3fd   : > { %v1597_v22 = vpop.xlane.xlu1 %1596  ;;  %v1611_v15 = vpop.xlane.xlu0 %1610 }
 0x3fe   : > { %v2256_v52 = vrot.slane %v1597_v22, %v7034_v47 }
 0x400   : > { %v2257_v23 = vsel %vm7828_vm2, %v2256_v52, %v2252_v57  ;;  %v2143_v57 = vrot.slane %v1551_v29, %v7103_v30 }
 0x401   : > { %v1627_v21 = vpop.xlane.xlu1 %1626  ;;  %v1553_v14 = vpop.xlane.xlu0 %1552 }
 0x402   : > { %v2330_v58 = vrot.slane %v1627_v21, %v7026_v38 }
 0x404   : > { %v2331_v39 = vsel %vm1828_vm1, %v2330_v58, %v2326_v46  ;;  %v2286_v46 = vrot.slane %v1609_v20, %v7054_v0  ;;  %v2291_v58 = vrot.slane %v1611_v15, %v7068_v16 }
 0x405   : > { %v1539_v45 = vpop.xlane.xlu1 %1538  ;;  %v1613_v40 = vpop.xlane.xlu0 %1612  ;;  %v7445_v7 = vsel %vm7828_vm2, %v2335_v34, %v2331_v39  ;;  %vm7829_vm2 = vcmask 1044484  }
 0x406   : > { %v2113_v54 = vrot.slane %v1539_v45, %v7048_v61  ;;  %v2296_v59 = vrot.slane %v1613_v40, %v7072_v25 }
 0x408   : > { %v2114_v56 = vsel %vm1856_vm5, %v2113_v54, %v2109_v8  ;;  %v2148_v8 = vrot.slane %v1553_v14, %v7113_v27 }
 0x409   : > { %v2119_v41 = vsel %vm1863_vm6, %v2118_v37, %v2114_v56  ;;  %v1599_v44 = vpop.xlane.xlu1 %1598  ;;  %v1555_v24 = vpop.xlane.xlu0 %1554 }
 0x40a   : > { %v2124_v5 = vsel %vm1870_vm7, %v2123_v55, %v2119_v41  ;;  %v2261_v51 = vrot.slane %v1599_v44, %v7065_v13  ;;  %v2153_v21 = vrot.slane %v1555_v24, %v7119_v36 }
 0x40b   : > { %v2129_v28 = vsel %vm1877_vm8, %v2128_v50, %v2124_v5 }
 0x40c   : > { %v2262_v49 = vsel %vm1842_vm3, %v2261_v51, %v2257_v23  ;;  %v2134_v63 = vsel %vm1884_vm9, %v2133_v48, %v2129_v28 }
 0x40d   : > { %v2267_v43 = vsel %vm1849_vm4, %v2266_v4, %v2262_v49  ;;  %v2139_v42 = vsel %vm1891_vm10, %v2138_v31, %v2134_v63  ;;  %v1631_v22 = vpop.xlane.xlu1 %1630  ;;  %v1615_v52 = vpop.xlane.xlu0 %1614 }
 0x40e   : > { %v2272_v29 = vsel %vm1856_vm5, %v2271_v1, %v2267_v43  ;;  %v2144_v23 = vsel %vm1898_vm11, %v2143_v57, %v2139_v42  ;;  %v2340_v43 = vrot.slane %v1631_v22, %v7065_v13 }
 0x40f   : > { %v2277_v33 = vsel %vm1863_vm6, %v2276_v32, %v2272_v29  ;;  %v2149_v14 = vsel %vm1905_vm12, %v2148_v8, %v2144_v23 }
 0x410   : > { %v2154_v34 = vsel %vm1912_vm13, %v2153_v21, %v2149_v14  ;;  %v2282_v39 = vsel %vm1870_vm7, %v2281_v11, %v2277_v33 }
 0x411   : > { %v2287_v45 = vsel %vm1877_vm8, %v2286_v46, %v2282_v39  ;;  %v1633_v54 = vpop.xlane.xlu1 %1632  ;;  %v1557_v37 = vpop.xlane.xlu0 %1556  ;;  %v2341_v39 = vsel %vm1842_vm3, %v2340_v43, %v7445_v7 }
 0x412   : > { %v2292_v55 = vsel %vm1884_vm9, %v2291_v58, %v2287_v45  ;;  %v2158_v57 = vrot.slane %v1557_v37, %v7141_v62  ;;  %v2345_v11 = vrot.slane %v1633_v54, %v7045_v60  ;;  %v2301_v58 = vrot.slane %v1615_v52, %v7103_v30 }
 0x413   : > { %v2297_v20 = vsel %vm1891_vm10, %v2296_v59, %v2292_v55 }
 0x414   : > { %v2159_v8 = vsel %vm1919_vm14, %v2158_v57, %v2154_v34  ;;  %v2302_v59 = vsel %vm1898_vm11, %v2301_v58, %v2297_v20  ;;  %v2346_v45 = vsel %vm1849_vm4, %v2345_v11, %v2341_v39 }
 0x415   : > { %v1635_v56 = vpop.xlane.xlu1 %1634  ;;  %v1617_v50 = vpop.xlane.xlu0 %1616 }
 0x416   : > { %v2350_v46 = vrot.slane %v1635_v56, %v7048_v61  ;;  %v2306_v33 = vrot.slane %v1617_v50, %v7113_v27 }
 0x418   : > { %v2307_v52 = vsel %vm1905_vm12, %v2306_v33, %v2302_v59 }
 0x419   : > { %v1637_v41 = vpop.xlane.xlu1 %1636  ;;  %v7489_v44 = vpop.xlane.xlu0 %1648 }
 0x41a   : > { %v2355_v22 = vrot.slane %v1637_v41, %v7079_v35 }
 0x41d   : > { %v1639_v15 = vpop.xlane.xlu1 %1638  ;;  %v7491_v24 = vpop.xlane.xlu0 %1650 }
 0x421   : > { %v1641_v48 = vpop.xlane.xlu1 %1640  ;;  %v1623_v5 = vpop.xlane.xlu0 %1622 }
 0x422   : > { %v2365_v54 = vrot.slane %v1641_v48, %v7054_v0  ;;  %v2321_v41 = vrot.slane %v1623_v5, %v7156_v18 }
 0x425   : > { %v1643_v51 = vpop.xlane.xlu1 %1642  ;;  %v7493_v40 = vpop.xlane.xlu0 %1658 }
 0x426   : > { %v2370_v56 = vrot.slane %v1643_v51, %v7068_v16 }
 0x429   : > { %v1645_v4 = vpop.xlane.xlu1 %1644  ;;  %v7495_v31 = vpop.xlane.xlu0 %1660 }
 0x42a   : > { %v2375_v20 = vrot.slane %v1645_v4, %v7072_v25  ;;  %v2414_v58 = vrot.slane %v7495_v31, %v7034_v47 }
 0x42d   : > { %v1647_v28 = vpop.xlane.xlu1 %1646  ;;  %v7497_v1 = vpop.xlane.xlu0 %1662 }
 0x42e   : > { %v2380_v57 = vrot.slane %v1647_v28, %v7103_v30 }
 0x431   : > { %v1559_v49 = vpop.xlane.xlu1 %1558  ;;  %v7500_v63 = vpop.xlane.xlu0 %1664 }
 0x432   : > { %v2163_v32 = vrot.slane %v1559_v49, %v7156_v18 }
 0x434   : > { %v2164_v42 = vsel %vm1926_vm15, %v2163_v32, %v2159_v8 }
 0x435   : > { %v2486_v29 = vsel %vm7831_vm0, %v2164_v42, %v7406_v9  ;;  %v1619_v23 = vpop.xlane.xlu1 %1618  ;;  %v1667_v21 = vpop.xlane.xlu0 %1666  ;;  %v2360_v9 = vrot.slane %v1639_v15, %v7094_v53  ;;  %vm2491_vm0 = vcmask 1046534  }
 0x436   : > { %v2488_v14 = vsel %vm7829_vm2, %v7420_v2, %v2486_v29  ;;  %v2311_v34 = vrot.slane %v1619_v23, %v7119_v36  ;;  %vm7830_vm2 = vcmask 1045509   ;;  %v2351_v2 = vsel %vm1856_vm5, %v2350_v46, %v2346_v45 }
 0x437   : > { %v2356_v7 = vsel %vm1863_vm6, %v2355_v22, %v2351_v2  ;;  %v2385_v29 = vrot.slane %v7489_v44, %v7113_v27  ;;  %v2409_v46 = vrot.slane %v7493_v40, %v7026_v38  ;;  %v2419_v44 = vrot.slane %v7497_v1, %v7065_v13 }
 0x438   : > { %v2312_v15 = vsel %vm1912_vm13, %v2311_v34, %v2307_v52  ;;  %v2361_v48 = vsel %vm1870_vm7, %v2360_v9, %v2356_v7  ;;  %v2390_v34 = vrot.slane %v7491_v24, %v7119_v36  ;;  %v2424_v38 = vrot.slane %v7500_v63, %v7045_v60 }
 0x439   : > { %v1621_v37 = vpop.xlane.xlu1 %1620  ;;  %v1669_v55 = vpop.xlane.xlu0 %1668  ;;  %v2366_v32 = vsel %vm1877_vm8, %v2365_v54, %v2361_v48  ;;  %v2429_v47 = vrot.slane %v1667_v21, %v7048_v61 }
 0x43a   : > { %v2316_v50 = vrot.slane %v1621_v37, %v7141_v62  ;;  %v2371_v42 = vsel %vm1884_vm9, %v2370_v56, %v2366_v32  ;;  %v2434_v13 = vrot.slane %v1669_v55, %v7079_v35 }
 0x43b   : > { %v2376_v4 = vsel %vm1891_vm10, %v2375_v20, %v2371_v42  ;;  %v5416_v42 = vld [vmem:[#allocation9] sm:$0xff]  }
 0x43c   : > { %v2317_v49 = vsel %vm1919_vm14, %v2316_v50, %v2312_v15  ;;  %v2381_v11 = vsel %vm1898_vm11, %v2380_v57, %v2376_v4  ;;  %5036 = vmatpush3.bf16.msra.mxu1 %v5416_v42  ;;  %v5419_v4 = vld [vmem:[#allocation9 + $0x48] sm:$0xff]   ;;  %v5455_v42 = vld [vmem:[#allocation9 + $0x158] sm:$0xff]  }
 0x43d   : > { %v2322_v51 = vsel %vm1926_vm15, %v2321_v41, %v2317_v49  ;;  %v1653_v8 = vpop.xlane.xlu1 %1652  ;;  %v1671_v43 = vpop.xlane.xlu0 %1670  ;;  %v2386_v22 = vsel %vm1905_vm12, %v2385_v29, %v2381_v11  ;;  %5037 = vmatprep.subr.bf16.mxu1 %v6217_v3  ;;  %v5422_v11 = vld [vmem:[#allocation9 + $0x18] sm:$0xff]  }
 0x43e   : > { %v2490_v5 = vsel %vm7830_vm2, %v2322_v51, %v2488_v14  ;;  %v2395_v14 = vrot.slane %v1653_v8, %v7141_v62  ;;  %vm7886_vm2 = vcmask 195712   ;;  %v2391_v31 = vsel %vm1912_vm13, %v2390_v34, %v2386_v22  ;;  %v5425_v22 = vld [vmem:[#allocation9 + $0x60] sm:$0xff]   ;;  %v5427_v34 = vld [vmem:[#allocation9 + $0x68] sm:$0xff]  }
 0x43f   : > { %v2439_v60 = vrot.slane %v1671_v43, %v7094_v53 }
 0x440   : > { %v2396_v1 = vsel %vm1919_vm14, %v2395_v14, %v2391_v31  ;;  %v5426_v14 = vld [vmem:[#allocation9 + $0x28] sm:$0xff]  }
 0x441   : > { %v1673_v28 = vpop.xlane.xlu0 %1672  ;;  %v1657_v23 = vpop.xlane.xlu1 %1656 }
 0x442   : > { %v2405_v33 = vrot.slane %v1657_v23, %v7020_v6  ;;  %v2444_v61 = vrot.slane %v1673_v28, %v7054_v0 }
 0x444   : > { %v2410_v39 = vsel %vm1828_vm1, %v2409_v46, %v2405_v33  ;;  %vm2493_vm1 = vcmask 1047559   ;;  %v5423_v33 = vld [vmem:[#allocation9 + $0x58] sm:$0xff]  }
 0x445   : > { %v2415_v6 = vsel %vm7886_vm2, %v2414_v58, %v2410_v39  ;;  %v1675_v40 = vpop.xlane.xlu0 %1674  ;;  %v1655_v9 = vpop.xlane.xlu1 %1654  ;;  %vm1690_vm2 = vcmp.lt.s32.totalorder %v7008_v10, 16  ;;  %v5421_v10 = vld [vmem:[#allocation9 + $0x50] sm:$0xff]   ;;  %v5424_v58 = vld [vmem:[#allocation9 + $0x20] sm:$0xff]  }
 0x446   : > { %v2420_v59 = vsel %vm1842_vm3, %v2419_v44, %v2415_v6  ;;  %v2400_v24 = vrot.slane %v1655_v9, %v7156_v18  ;;  %v2449_v55 = vrot.slane %v1675_v40, %v7068_v16  ;;  %v5428_v44 = vld [vmem:[#allocation9 + $0x30] sm:$0xff]   ;;  %v5431_v6 = vld [vmem:[#allocation9 + $0x78] sm:$0xff]   ;;  %v4426_v9 = vstv %s4423_s15  ;;  %s6221_s15 = smov [#allocation29]  }
 0x447   : > { %v2425_v45 = vsel %vm1849_vm4, %v2424_v38, %v2420_v59  ;;  %v5429_v39 = vld [vmem:[#allocation9 + $0x70] sm:$0xff]   ;;  %v5430_v38 = vld [vmem:[#allocation9 + $0x38] sm:$0xff]   ;;  %vm4427_vm3 = vcmp.lt.s32.totalorder %v6798_v17, %v4426_v9  ;;  %vm7888_vm4 = vmmov 0   ;;  %s6066_s5 = sshll.u32 %s6221_s15, 4  ;;  %s6067_s5 = int_to_ptr.vmem [resolvable:$false] %s6066_s5 }
 0x448   : > { %v2430_v63 = vsel %vm1856_vm5, %v2429_v47, %v2425_v45  ;;  %v2401_v54 = vsel %vm1926_vm15, %v2400_v24, %v2396_v1  ;;  %v7606_v31 = vsel %vm4427_vm3, 1.0, %v6217_v3  ;;  %v5470_v9 = vld [vmem:[#allocation9 + $0x198] sm:$0xff]   ;;  %vm7889_vm5 = vcmask 1041409   ;;  %s6068_s6 = scalar_lea.vmem %s6067_s5, 256  ;;  %p6069_p13 = scmp.lt.s32.totalorder %s4475_s26, %s6067_s5 }
 0x449   : > { %v2435_v21 = vsel %vm1863_vm6, %v2434_v13, %v2430_v63  ;;  %v1677_v37 = vpop.xlane.xlu0 %1676  ;;  %v1679_v2 = vpop.xlane.xlu1 %1678  ;;  %v2492_v52 = vsel %vm2491_vm0, %v2401_v54, %v2490_v5  ;;  %v5417_v5 = vld [vmem:[#allocation9 + $0x40] sm:$0xff]   ;;  %vm7890_vm6 = vcmask 1042434   ;;  %p6070_p4 = scmp.lt.s32.totalorder %s6068_s6, %s6062_s16 }
 0x44a   : > { %v2440_v35 = vsel %vm1870_vm7, %v2439_v60, %v2435_v21  ;;  %v2454_v56 = vrot.slane %v1677_v37, %v7072_v25  ;;  %v2459_v7 = vrot.slane %v1679_v2, %v7103_v30  ;;  %5056 = vmatpush3.bf16.msra.mxu0 %v5417_v5  ;;  %v5432_v60 = vld [vmem:[#allocation9 + $0x80] sm:$0xff]   ;;  %v5434_v37 = vld [vmem:[#allocation9 + $0x88] sm:$0xff]   ;;  %vm7891_vm7 = vcmask 1043459  }
 0x44b   : > { %v2445_v53 = vsel %vm1877_vm8, %v2444_v61, %v2440_v35  ;;  %5057 = vmatprep.subr.bf16.mxu0 %v6217_v3  ;;  %v5433_v61 = vld [vmem:[#allocation9 + $0xc0] sm:$0xff]   ;;  %v5435_v2 = vld [vmem:[#allocation9 + $0xc8] sm:$0xff]   ;;  %v5437_v35 = vld [vmem:[#allocation9 + $0xd0] sm:$0xff]   ;;  %vm7892_vm8 = vcmask 1044484   ;;  %p6071_p0 = por %p6070_p4, %p6069_p13 }
 0x44c   : > { %v2450_v50 = vsel %vm1884_vm9, %v2449_v55, %v2445_v53  ;;  %v5438_v55 = vld [vmem:[#allocation9 + $0x98] sm:$0xff]   ;;  %v5440_v53 = vld [vmem:[#allocation9 + $0xa0] sm:$0xff]   ;;  %vm7893_vm9 = vcmask 1045509  }
 0x44d   : > { %v2455_v0 = vsel %vm1891_vm10, %v2454_v56, %v2450_v50  ;;  %v1683_v41 = vpop.xlane.xlu0 %1682  ;;  %v1681_v20 = vpop.xlane.xlu1 %1680  ;;  %v5439_v56 = vld [vmem:[#allocation9 + $0xd8] sm:$0xff]   ;;  %v5441_v50 = vld [vmem:[#allocation9 + $0xe0] sm:$0xff]   ;;  %p6072_p5 = pnand %p6071_p0, %p6065_p10 }
 0x44e   : > { %v2460_v15 = vsel %vm1898_vm11, %v2459_v7, %v2455_v0  ;;  %v2464_v48 = vrot.slane %v1681_v20, %v7113_v27  ;;  %v2469_v57 = vrot.slane %v1683_v41, %v7119_v36  ;;  %5058 = vmatpush3.bf16.msra.mxu0 %v5419_v4  ;;  %v5442_v7 = vld [vmem:[#allocation9 + $0xa8] sm:$0xff]   ;;  %v5444_v41 = vld [vmem:[#allocation9 + $0xb0] sm:$0xff]   ;;  %v5456_v5 = vld [vmem:[#allocation9 + $0x120] sm:$0xff]  }
 0x44f   : > { %5059 = vmatprep.subr.bf16.mxu0 %v6217_v3  ;;  %v5443_v0 = vld [vmem:[#allocation9 + $0xe8] sm:$0xff]   ;;  %v5445_v20 = vld [vmem:[#allocation9 + $0xf0] sm:$0xff]  }
 0x450   : > { %v2465_v16 = vsel %vm1905_vm12, %v2464_v48, %v2460_v15  ;;  %v5446_v15 = vld [vmem:[#allocation9 + $0xb8] sm:$0xff]  }
 0x451   : > { %v1685_v49 = vpop.xlane.xlu0 %1684  ;;  %v1687_v25 = vpop.xlane.xlu1 %1686  ;;  %v2470_v30 = vsel %vm1912_vm13, %v2469_v57, %v2465_v16  ;;  %v5447_v57 = vld [vmem:[#allocation9 + $0xf8] sm:$0xff]  }
 0x452   : > { %v2474_v32 = vrot.slane %v1685_v49, %v7141_v62  ;;  %v2479_v51 = vrot.slane %v1687_v25, %v7156_v18  ;;  %v5418_v62 = vld [vmem:[#allocation9 + $0x8] sm:$0xff]   ;;  %v5420_v18 = vld [vmem:[#allocation9 + $0x10] sm:$0xff]   ;;  %5060 = vmatpush3.bf16.msra.mxu0 %v5421_v10  ;;  %v5448_v49 = vld [vmem:[#allocation9 + $0x100] sm:$0xff]  }
 0x453   : > { %5038 = vmatpush3.bf16.msra.mxu1 %v5418_v62  ;;  %5061 = vmatprep.subr.bf16.mxu0 %v6217_v3  ;;  %v5457_v62 = vld [vmem:[#allocation9 + $0x160] sm:$0xff]   ;;  %v5459_v10 = vld [vmem:[#allocation9 + $0x168] sm:$0xff]  }
 0x454   : > { %v2475_v8 = vsel %vm1919_vm14, %v2474_v32, %v2470_v30  ;;  %5039 = vmatprep.subr.bf16.mxu1 %v6217_v3  ;;  %v5449_v32 = vld [vmem:[#allocation9 + $0x140] sm:$0xff]   ;;  %v5450_v30 = vld [vmem:[#allocation9 + $0x108] sm:$0xff]  }
 0x455   : > { %v2480_v43 = vsel %vm1926_vm15, %v2479_v51, %v2475_v8  ;;  %v5451_v8 = vld [vmem:[#allocation9 + $0x148] sm:$0xff]  }
 0x456   : > { %v2494_v27 = vsel %vm2493_vm1, %v2480_v43, %v2492_v52  ;;  %5062 = vmatpush3.bf16.msra.mxu0 %v5423_v33  ;;  %v5436_v52 = vld [vmem:[#allocation9 + $0x90] sm:$0xff]  }
 0x457   : > { %v2496_v36 = vsel %vm1690_vm2, %v2494_v27, -1e+30  ;;  %5040 = vmatpush3.bf16.msra.mxu1 %v5420_v18  ;;  %5063 = vmatprep.subr.bf16.mxu0 %v6217_v3  ;;  %v5452_v43 = vld [vmem:[#allocation9 + $0x110] sm:$0xff]   ;;  %v5458_v18 = vld [vmem:[#allocation9 + $0x128] sm:$0xff]  }
 0x458   : > { %2497 = vmax.xlane.f32.xlu0 %v2496_v36  ;;  %5041 = vmatprep.subr.bf16.mxu1 %v6217_v3  ;;  %v5453_v27 = vld [vmem:[#allocation9 + $0x150] sm:$0xff]  }
 0x45a   : > { %5064 = vmatpush3.bf16.msra.mxu0 %v5425_v22 }
 0x45b   : > { %5042 = vmatpush3.bf16.msra.mxu1 %v5422_v11  ;;  %5065 = vmatprep.subr.bf16.mxu0 %v6217_v3 }
 0x45c   : > { %5043 = vmatprep.subr.bf16.mxu1 %v6217_v3 }
 0x45e   : > { %5066 = vmatpush3.bf16.msra.mxu0 %v5427_v34 }
 0x45f   : > { %5044 = vmatpush3.bf16.msra.mxu1 %v5424_v58  ;;  %5067 = vmatprep.subr.bf16.mxu0 %v6217_v3  ;;  %v5463_v58 = vld [vmem:[#allocation9 + $0x178] sm:$0xff]  }
 0x460   : > { %5045 = vmatprep.subr.bf16.mxu1 %v6217_v3 }
 0x462   : > { %5068 = vmatpush3.bf16.msra.mxu0 %v5429_v39 }
 0x463   : > { %5046 = vmatpush3.bf16.msra.mxu1 %v5426_v14  ;;  %5069 = vmatprep.subr.bf16.mxu0 %v6217_v3  ;;  %v5464_v14 = vld [vmem:[#allocation9 + $0x180] sm:$0xff]  }
 0x464   : > { %5047 = vmatprep.subr.bf16.mxu1 %v6217_v3 }
 0x466   : > { %5070 = vmatpush3.bf16.msra.mxu0 %v5431_v6  ;;  %v5468_v6 = vld [vmem:[#allocation9 + $0x190] sm:$0xff]  }
 0x467   : > { %5048 = vmatpush3.bf16.msra.mxu1 %v5428_v44  ;;  %5095 = vmatprep.subr.bf16.mxu0 %v6217_v3  ;;  %v5465_v44 = vld [vmem:[#allocation9 + $0x1c0] sm:$0xff]  }
 0x468   : > { %5049 = vmatprep.subr.bf16.mxu1 %v6217_v3 }
 0x46b   : > { %5050 = vmatpush3.bf16.msra.mxu1 %v5430_v38  ;;  %v5466_v38 = vld [vmem:[#allocation9 + $0x188] sm:$0xff]  }
 0x46c   : > { %5075 = vmatprep.subr.bf16.mxu1 %v6217_v3 }
 0x4e5   : > { %v2498_v29 = vpop.xlane.xlu0 %2497 }
 0x4e6   : > { %v2499_v28 = vsub.f32 %v2496_v36, %v2498_v29  ;;  %v5454_v36 = vld [vmem:[#allocation9 + $0x118] sm:$0xff]   ;;  %v5460_v29 = vld [vmem:[#allocation9 + $0x130] sm:$0xff]  }
 0x4e8   : > { %v2500_v23 = vmul.f32 1.442695, %v2499_v28  ;;  %v5461_v28 = vld [vmem:[#allocation9 + $0x170] sm:$0xff]  }
 0x4ea   : > { %5632 = vpow2.f32 %v2500_v23 }
 0x4f4   : > { %v5633_v46 = vpop.eup %5632 }
 0x4f5   : > { %2502 = vadd.xlane.f32.xlu1 %v5633_v46 }
 0x582   : > { %v2503_v40 = vpop.xlane.xlu1 %2502 }
 0x583   : > { %5634 = vrcp.f32 %v2503_v40  ;;  %v5469_v40 = vld [vmem:[#allocation9 + $0x1d0] sm:$0xff]  }
 0x58d   : > { %v5635_v47 = vpop.eup %5634 }
 0x58e   : > { %v7608_v59 = vmul.f32 %v5635_v47, %v5633_v46  ;;  %v5462_v46 = vld [vmem:[#allocation9 + $0x138] sm:$0xff]  }
 0x58f   : > { %v5471_v47 = vld [vmem:[#allocation9 + $0x1d8] sm:$0xff]  }
 0x590   : > { %v2514_v24 = vrot.slane %v7608_v59, %v6801_v19  ;;  %v4440_v13 = vmul.f32 %v7606_v31, %v7608_v59  ;;  %v2507_v4 = vcombine.high %v7608_v59, %v7608_v59  ;;  %v5472_v59 = vld [vmem:[#allocation9 + $0x1a0] sm:$0xff]  }
 0x592   : > { %v2522_v1 = vcombine.high %v2514_v24, %v2514_v24  ;;  %v2530_v45 = vrot.slane %v2514_v24, %v6801_v19  ;;  %4441 = vst [vmem:[%s6774_s1] sm:$0xff] %v4440_v13  ;;  %v2521_v11 = vrot.slane %v2507_v4, %v6801_v19  ;;  %v5473_v24 = vld [vmem:[#allocation9 + $0x1e0] sm:$0xff]   ;;  %v5474_v13 = vld [vmem:[#allocation9 + $0x1a8] sm:$0xff]  }
 0x593   : > { %v5505_v4 = vld [vmem:[#allocation24 + $0x4c] ss:$16 sps:$4 sm:$0xff]  }
 0x594   : > { %v2564_v63 = vpack.c.bf16 %v2530_v45, %v2530_v45  ;;  %v2544_v54 = vrot.slane %v2522_v1, %v6801_v19  ;;  %v2552_v48 = vcombine.high %v2530_v45, %v2530_v45  ;;  %v2523_v23 = vcombine.high %v2521_v11, %v2521_v11  ;;  %v5475_v1 = vld [vmem:[#allocation9 + $0x1e8] sm:$0xff]   ;;  %v5476_v45 = vld [vmem:[#allocation9 + $0x1b0] sm:$0xff]  }
 0x595   : > { %v2537_v33 = vrot.slane %v2521_v11, %v6801_v19  ;;  %v5508_v11 = vld [vmem:[#allocation24 + $0x64] ss:$16 sps:$4 sm:$0xff]  }
 0x596   : > { %5052 = vmatmul.mubr.bf16.vlgmr.msra.gmra.mrb[0].mxu1 %v2564_v63  ;;  %v2565_v21 = vpack.c.bf16 %v2544_v54, %v2544_v54  ;;  %v2554_v16 = vcombine.high %v2544_v54, %v2544_v54  ;;  %v2566_v25 = vpack.c.bf16 %v2552_v48, %v2552_v48  ;;  %v2551_v22 = vrot.slane %v2523_v23, %v6801_v19  ;;  %v5467_v19 = vld [vmem:[#allocation9 + $0x1c8] sm:$0xff]   ;;  %v5478_v63 = vld [vmem:[#allocation9 + $0x1b8] sm:$0xff]  }
 0x597   : > { %5076 = vmatpush3.bf16.msra.mxu1 %v5432_v60  ;;  %5091 = vmatprep.mubr.msk.bf16.mxu1 %vm7888_vm4, %v6217_v3  ;;  %v2568_v34 = vpack.c.bf16 %v2537_v33, %v2537_v33  ;;  %v5477_v60 = vld [vmem:[#allocation9 + $0x1f0] sm:$0xff]   ;;  %v2553_v54 = vcombine.high %v2537_v33, %v2537_v33  ;;  %v6220_v23 = vmov 0  }
 0x598   : > { %5072 = vmatmul.mubr.bf16.vlgmr.msra.gmra.mrb[4].mxu0 %v2565_v21  ;;  %5077 = vmatprep.subr.bf16.mxu1 %v6217_v3  ;;  %v2567_v51 = vpack.c.bf16 %v2554_v16, %v2554_v16  ;;  %v2569_v39 = vpack.c.bf16 %v2551_v22, %v2551_v22  ;;  %v2555_v21 = vcombine.high %v2551_v22, %v2551_v22  ;;  %v5514_v33 = vld [vmem:[#allocation24 + $0x84] ss:$16 sps:$4 sm:$0xff]  }
 0x599   : > { %5096 = vmatpush3.bf16.msra.mxu0 %v5433_v61  ;;  %5111 = vmatprep.mubr.msk.bf16.mxu0 %vm7888_vm4, %v6217_v3  ;;  %v5479_v61 = vld [vmem:[#allocation9 + $0x1f8] sm:$0xff]  }
 0x59a   : > { %5097 = vmatprep.subr.bf16.mxu0 %v6217_v3 }
 0x59b   : > { %5078 = vmatpush3.bf16.msra.mxu1 %v5434_v37  ;;  %v5480_v37 = vld [vmem:[#allocation19] sm:$0xff]  }
 0x59c   : > { %5079 = vmatprep.subr.bf16.mxu1 %v6217_v3 }
 0x59d   : > { %5098 = vmatpush3.bf16.msra.mxu0 %v5435_v2  ;;  %v2570_v2 = vpack.c.bf16 %v2553_v54, %v2553_v54  ;;  %v5526_v54 = vld [vmem:[#allocation24 + $0xc4] ss:$16 sps:$4 sm:$0xff]  }
 0x59e   : > { %5099 = vmatprep.subr.bf16.mxu0 %v6217_v3 }
 0x59f   : > { %5080 = vmatpush3.bf16.msra.mxu1 %v5436_v52  ;;  %v2571_v52 = vpack.c.bf16 %v2555_v21, %v2555_v21  ;;  %v5524_v21 = vld [vmem:[#allocation24 + $0xc0] ss:$16 sps:$4 sm:$0xff]  }
 0x5a0   : > { %5081 = vmatprep.subr.bf16.mxu1 %v6217_v3 }
 0x5a1   : > { %5100 = vmatpush3.bf16.msra.mxu0 %v5437_v35  ;;  %v5481_v35 = vld [vmem:[#allocation19 + $0x8] sm:$0xff]  }
 0x5a2   : > { %5101 = vmatprep.subr.bf16.mxu0 %v6217_v3 }
 0x5a3   : > { %5082 = vmatpush3.bf16.msra.mxu1 %v5438_v55  ;;  %v5482_v55 = vld [vmem:[#allocation19 + $0x10] sm:$0xff]  }
 0x5a4   : > { %5083 = vmatprep.subr.bf16.mxu1 %v6217_v3 }
 0x5a5   : > { %5102 = vmatpush3.bf16.msra.mxu0 %v5439_v56  ;;  %v5483_v56 = vld [vmem:[#allocation19 + $0x18] sm:$0xff]  }
 0x5a6   : > { %5103 = vmatprep.subr.bf16.mxu0 %v6217_v3 }
 0x5a7   : > { %5084 = vmatpush3.bf16.msra.mxu1 %v5440_v53  ;;  %v5484_v53 = vld [vmem:[#allocation19 + $0x20] sm:$0xff]  }
 0x5a8   : > { %5085 = vmatprep.subr.bf16.mxu1 %v6217_v3 }
 0x5a9   : > { %5104 = vmatpush3.bf16.msra.mxu0 %v5441_v50  ;;  %v5485_v50 = vld [vmem:[#allocation19 + $0x28] sm:$0xff]  }
 0x5aa   : > { %5105 = vmatprep.subr.bf16.mxu0 %v6217_v3 }
 0x5ab   : > { %5086 = vmatpush3.bf16.msra.mxu1 %v5442_v7  ;;  %v5486_v7 = vld [vmem:[#allocation19 + $0x30] sm:$0xff]  }
 0x5ac   : > { %5087 = vmatprep.subr.bf16.mxu1 %v6217_v3 }
 0x5ad   : > { %5106 = vmatpush3.bf16.msra.mxu0 %v5443_v0  ;;  %v5487_v0 = vld [vmem:[#allocation19 + $0x38] sm:$0xff]  }
 0x5ae   : > { %5107 = vmatprep.subr.bf16.mxu0 %v6217_v3 }
 0x5af   : > { %5088 = vmatpush3.bf16.msra.mxu1 %v5444_v41 }
 0x5b0   : > { %5089 = vmatprep.subr.bf16.mxu1 %v6217_v3 }
 0x5b1   : > { %5108 = vmatpush3.bf16.msra.mxu0 %v5445_v20 }
 0x5b2   : > { %5109 = vmatprep.subr.bf16.mxu0 %v6217_v3 }
 0x5b3   : > { %5090 = vmatpush3.bf16.msra.mxu1 %v5446_v15 }
 0x5b4   : > { %5115 = vmatprep.subr.bf16.mxu1 %v6217_v3 }
 0x5b5   : > { %5110 = vmatpush3.bf16.msra.mxu0 %v5447_v57 }
 0x5b6   : > { %5092 = vmatmul.mubr.bf16.vlgmr.msra.gmra.mrb[4].mxu1 %v2566_v25  ;;  %5135 = vmatprep.subr.bf16.mxu0 %v6217_v3 }
 0x5b7   : > { %5116 = vmatpush3.bf16.msra.mxu1 %v5448_v49  ;;  %5131 = vmatprep.mubr.msk.bf16.mxu1 %vm7888_vm4, %v6217_v3 }
 0x5b8   : > { %5112 = vmatmul.mubr.bf16.vlgmr.msra.gmra.mrb[8].mxu0 %v2567_v51  ;;  %5117 = vmatprep.subr.bf16.mxu1 %v6217_v3 }
 0x5b9   : > { %5136 = vmatpush3.bf16.msra.mxu0 %v5449_v32  ;;  %5151 = vmatprep.mubr.msk.bf16.mxu0 %vm7888_vm4, %v6217_v3 }
 0x5ba   : > { %5137 = vmatprep.subr.bf16.mxu0 %v6217_v3 }
 0x5bb   : > { %5118 = vmatpush3.bf16.msra.mxu1 %v5450_v30  ;;  %v5488_v30 = vld [vmem:[#allocation24] ss:$16 sps:$4 sm:$0xff]  }
 0x5bc   : > { %5119 = vmatprep.subr.bf16.mxu1 %v6217_v3 }
 0x5bd   : > { %5138 = vmatpush3.bf16.msra.mxu0 %v5451_v8  ;;  %v5490_v8 = vld [vmem:[#allocation24 + $0x4] ss:$16 sps:$4 sm:$0xff]  }
 0x5be   : > { %5139 = vmatprep.subr.bf16.mxu0 %v6217_v3 }
 0x5bf   : > { %5120 = vmatpush3.bf16.msra.mxu1 %v5452_v43  ;;  %v5491_v43 = vld [vmem:[#allocation24 + $0x8] ss:$16 sps:$4 sm:$0xff]  }
 0x5c0   : > { %5121 = vmatprep.subr.bf16.mxu1 %v6217_v3 }
 0x5c1   : > { %5140 = vmatpush3.bf16.msra.mxu0 %v5453_v27  ;;  %v5493_v27 = vld [vmem:[#allocation24 + $0xc] ss:$16 sps:$4 sm:$0xff]  }
 0x5c2   : > { %5141 = vmatprep.subr.bf16.mxu0 %v6217_v3 }
 0x5c3   : > { %5122 = vmatpush3.bf16.msra.mxu1 %v5454_v36  ;;  %v5496_v36 = vld [vmem:[#allocation24 + $0x24] ss:$16 sps:$4 sm:$0xff]  }
 0x5c4   : > { %5123 = vmatprep.subr.bf16.mxu1 %v6217_v3 }
 0x5c5   : > { %5142 = vmatpush3.bf16.msra.mxu0 %v5455_v42  ;;  %v5494_v42 = vld [vmem:[#allocation24 + $0x20] ss:$16 sps:$4 sm:$0xff]  }
 0x5c6   : > { %5143 = vmatprep.subr.bf16.mxu0 %v6217_v3 }
 0x5c7   : > { %5124 = vmatpush3.bf16.msra.mxu1 %v5456_v5  ;;  %v5497_v5 = vld [vmem:[#allocation24 + $0x28] ss:$16 sps:$4 sm:$0xff]  }
 0x5c8   : > { %5125 = vmatprep.subr.bf16.mxu1 %v6217_v3 }
 0x5c9   : > { %5144 = vmatpush3.bf16.msra.mxu0 %v5457_v62  ;;  %v5502_v62 = vld [vmem:[#allocation24 + $0x44] ss:$16 sps:$4 sm:$0xff]  }
 0x5ca   : > { %5145 = vmatprep.subr.bf16.mxu0 %v6217_v3 }
 0x5cb   : > { %5126 = vmatpush3.bf16.msra.mxu1 %v5458_v18  ;;  %v5500_v18 = vld [vmem:[#allocation24 + $0x40] ss:$16 sps:$4 sm:$0xff]  }
 0x5cc   : > { %5127 = vmatprep.subr.bf16.mxu1 %v6217_v3 }
 0x5cd   : > { %5146 = vmatpush3.bf16.msra.mxu0 %v5459_v10  ;;  %v5503_v10 = vld [vmem:[#allocation24 + $0x48] ss:$16 sps:$4 sm:$0xff]  }
 0x5ce   : > { %5147 = vmatprep.subr.bf16.mxu0 %v6217_v3 }
 0x5cf   : > { %5128 = vmatpush3.bf16.msra.mxu1 %v5460_v29  ;;  %v5511_v29 = vld [vmem:[#allocation24 + $0x6c] ss:$16 sps:$4 sm:$0xff]  }
 0x5d0   : > { %5129 = vmatprep.subr.bf16.mxu1 %v6217_v3 }
 0x5d1   : > { %5148 = vmatpush3.bf16.msra.mxu0 %v5461_v28  ;;  %v5506_v28 = vld [vmem:[#allocation24 + $0x60] ss:$16 sps:$4 sm:$0xff]  }
 0x5d2   : > { %5149 = vmatprep.subr.bf16.mxu0 %v6217_v3 }
 0x5d3   : > { %5130 = vmatpush3.bf16.msra.mxu1 %v5462_v46  ;;  %v5509_v46 = vld [vmem:[#allocation24 + $0x68] ss:$16 sps:$4 sm:$0xff]  }
 0x5d4   : > { %5155 = vmatprep.subr.bf16.mxu1 %v6217_v3 }
 0x5d5   : > { %5150 = vmatpush3.bf16.msra.mxu0 %v5463_v58  ;;  %v5517_v58 = vld [vmem:[#allocation24 + $0x8c] ss:$16 sps:$4 sm:$0xff]  }
 0x5d6   : > { %5132 = vmatmul.mubr.bf16.vlgmr.msra.gmra.mrb[8].mxu1 %v2568_v34  ;;  %5175 = vmatprep.subr.bf16.mxu0 %v6217_v3 }
 0x5d7   : > { %5156 = vmatpush3.bf16.msra.mxu1 %v5464_v14  ;;  %5171 = vmatprep.mubr.msk.bf16.mxu1 %vm7888_vm4, %v6217_v3 }
 0x5d8   : > { %5152 = vmatmul.mubr.bf16.vlgmr.msra.gmra.mrb[12].mxu0 %v2569_v39  ;;  %5157 = vmatprep.subr.bf16.mxu1 %v6217_v3 }
 0x5d9   : > { %5176 = vmatpush3.bf16.msra.mxu0 %v5465_v44  ;;  %5191 = vmatprep.mubr.msk.bf16.mxu0 %vm7888_vm4, %v6217_v3  ;;  %v5512_v44 = vld [vmem:[#allocation24 + $0x80] ss:$16 sps:$4 sm:$0xff]  }
 0x5da   : > { %5177 = vmatprep.subr.bf16.mxu0 %v6217_v3 }
 0x5db   : > { %5158 = vmatpush3.bf16.msra.mxu1 %v5466_v38 }
 0x5dc   : > { %5159 = vmatprep.subr.bf16.mxu1 %v6217_v3 }
 0x5dd   : > { %5178 = vmatpush3.bf16.msra.mxu0 %v5467_v19  ;;  %v5515_v19 = vld [vmem:[#allocation24 + $0x88] ss:$16 sps:$4 sm:$0xff]  }
 0x5de   : > { %5179 = vmatprep.subr.bf16.mxu0 %v6217_v3 }
 0x5df   : > { %5160 = vmatpush3.bf16.msra.mxu1 %v5468_v6  ;;  %v5520_v6 = vld [vmem:[#allocation24 + $0xa4] ss:$16 sps:$4 sm:$0xff]  }
 0x5e0   : > { %5161 = vmatprep.subr.bf16.mxu1 %v6217_v3 }
 0x5e1   : > { %5180 = vmatpush3.bf16.msra.mxu0 %v5469_v40 }
 0x5e2   : > { %5181 = vmatprep.subr.bf16.mxu0 %v6217_v3 }
 0x5e3   : > { %5162 = vmatpush3.bf16.msra.mxu1 %v5470_v9 }
 0x5e4   : > { %5163 = vmatprep.subr.bf16.mxu1 %v6217_v3 }
 0x5e5   : > { %5182 = vmatpush3.bf16.msra.mxu0 %v5471_v47 }
 0x5e6   : > { %5183 = vmatprep.subr.bf16.mxu0 %v6217_v3 }
 0x5e7   : > { %5164 = vmatpush3.bf16.msra.mxu1 %v5472_v59 }
 0x5e8   : > { %5165 = vmatprep.subr.bf16.mxu1 %v6217_v3 }
 0x5e9   : > { %5184 = vmatpush3.bf16.msra.mxu0 %v5473_v24  ;;  %v5523_v24 = vld [vmem:[#allocation24 + $0xac] ss:$16 sps:$4 sm:$0xff]  }
 0x5ea   : > { %5185 = vmatprep.subr.bf16.mxu0 %v6217_v3 }
 0x5eb   : > { %5166 = vmatpush3.bf16.msra.mxu1 %v5474_v13 }
 0x5ec   : > { %5167 = vmatprep.subr.bf16.mxu1 %v6217_v3 }
 0x5ed   : > { %5186 = vmatpush3.bf16.msra.mxu0 %v5475_v1 }
 0x5ee   : > { %5187 = vmatprep.subr.bf16.mxu0 %v6217_v3 }
 0x5ef   : > { %5168 = vmatpush3.bf16.msra.mxu1 %v5476_v45 }
 0x5f0   : > { %5169 = vmatprep.subr.bf16.mxu1 %v6217_v3 }
 0x5f1   : > { %5188 = vmatpush3.bf16.msra.mxu0 %v5477_v60  ;;  %v5518_v60 = vld [vmem:[#allocation24 + $0xa0] ss:$16 sps:$4 sm:$0xff]  }
 0x5f2   : > { %5189 = vmatprep.subr.bf16.mxu0 %v6217_v3 }
 0x5f3   : > { %5170 = vmatpush3.bf16.msra.mxu1 %v5478_v63  ;;  %v5521_v63 = vld [vmem:[#allocation24 + $0xa8] ss:$16 sps:$4 sm:$0xff]  }
 0x5f4   : > { %5195 = vmatprep.subr.bf16.mxu1 %v6217_v3 }
 0x5f5   : > { %5190 = vmatpush3.bf16.msra.mxu0 %v5479_v61  ;;  %v5529_v61 = vld [vmem:[#allocation24 + $0xcc] ss:$16 sps:$4 sm:$0xff]  }
 0x5f6   : > { %5172 = vmatmul.mubr.bf16.vlgmr.msra.gmra.mrb[12].mxu1 %v2570_v2  ;;  %3771 = vmatprep.subr.bf16.mxu0 %v5490_v8  ;;  %v5532_v2 = vld [vmem:[#allocation24 + $0xe4] ss:$16 sps:$4 sm:$0xff]  }
 0x5f7   : > { %5196 = vmatpush3.bf16.msra.mxu1 %v5480_v37  ;;  %5211 = vmatprep.mubr.msk.bf16.mxu1 %vm7888_vm4, %v6217_v3  ;;  %v5527_v37 = vld [vmem:[#allocation24 + $0xc8] ss:$16 sps:$4 sm:$0xff]  }
 0x5f8   : > { %5192 = vmatmul.mubr.bf16.vlgmr.msra.gmra.mrb[16].mxu0 %v2571_v52  ;;  %5197 = vmatprep.subr.bf16.mxu1 %v6217_v3  ;;  %v5535_v52 = vld [vmem:[#allocation24 + $0xec] ss:$16 sps:$4 sm:$0xff]  }
 0x5f9   : > { %3772 = vmatpush1.bf16.msra.mxu0 %v5488_v30  ;;  %3803 = vmatprep.mubr.bf16.mxu0 %v6220_v23 }
 0x5fa   : > { %3773 = vmatprep.subr.bf16.mxu0 %v5496_v36 }
 0x5fb   : > { %5198 = vmatpush3.bf16.msra.mxu1 %v5481_v35  ;;  %v5530_v35 = vld [vmem:[#allocation24 + $0xe0] ss:$16 sps:$4 sm:$0xff]  }
 0x5fc   : > { %5199 = vmatprep.subr.bf16.mxu1 %v6217_v3 }
 0x5fd   : > { %3774 = vmatpush1.bf16.msra.mxu0 %v5494_v42 }
 0x5fe   : > { %3775 = vmatprep.subr.bf16.mxu0 %v5502_v62 }
 0x5ff   : > { %5200 = vmatpush3.bf16.msra.mxu1 %v5482_v55  ;;  %v5533_v55 = vld [vmem:[#allocation24 + $0xe8] ss:$16 sps:$4 sm:$0xff]  }
 0x600   : > { %5201 = vmatprep.subr.bf16.mxu1 %v6217_v3 }
 0x601   : > { %3776 = vmatpush1.bf16.msra.mxu0 %v5500_v18 }
 0x602   : > { %3777 = vmatprep.subr.bf16.mxu0 %v5508_v11 }
 0x603   : > { %5202 = vmatpush3.bf16.msra.mxu1 %v5483_v56  ;;  %v5538_v56 = vld [vmem:[#allocation22 + $0x4] ss:$16 sps:$4 sm:$0xff]  }
 0x604   : > { %5203 = vmatprep.subr.bf16.mxu1 %v6217_v3 }
 0x605   : > { %3778 = vmatpush1.bf16.msra.mxu0 %v5506_v28 }
 0x606   : > { %3779 = vmatprep.subr.bf16.mxu0 %v5514_v33 }
 0x607   : > { %5204 = vmatpush3.bf16.msra.mxu1 %v5484_v53  ;;  %v5541_v53 = vld [vmem:[#allocation22 + $0xc] ss:$16 sps:$4 sm:$0xff]  }
 0x608   : > { %5205 = vmatprep.subr.bf16.mxu1 %v6217_v3 }
 0x609   : > { %3780 = vmatpush1.bf16.msra.mxu0 %v5512_v44 }
 0x60a   : > { %3781 = vmatprep.subr.bf16.mxu0 %v5520_v6  ;;  %v5544_v6 = vld [vmem:[#allocation22 + $0x24] ss:$16 sps:$4 sm:$0xff]  }
 0x60b   : > { %5206 = vmatpush3.bf16.msra.mxu1 %v5485_v50 }
 0x60c   : > { %5207 = vmatprep.subr.bf16.mxu1 %v6217_v3 }
 0x60d   : > { %3782 = vmatpush1.bf16.msra.mxu0 %v5518_v60  ;;  %v5559_v60 = vld [vmem:[#allocation22 + $0x6c] ss:$16 sps:$4 sm:$0xff]  }
 0x60e   : > { %3783 = vmatprep.subr.bf16.mxu0 %v5526_v54  ;;  %v5557_v54 = vld [vmem:[#allocation22 + $0x68] ss:$16 sps:$4 sm:$0xff]  }
 0x60f   : > { %5208 = vmatpush3.bf16.msra.mxu1 %v5486_v7 }
 0x610   : > { %5209 = vmatprep.subr.bf16.mxu1 %v6217_v3  ;;  %v5499_v3 = vld [vmem:[#allocation24 + $0x2c] ss:$16 sps:$4 sm:$0xff]  }
 0x611   : > { %3784 = vmatpush1.bf16.msra.mxu0 %v5524_v21  ;;  %v5565_v21 = vld [vmem:[#allocation22 + $0x8c] ss:$16 sps:$4 sm:$0xff]  }
 0x612   : > { %3785 = vmatprep.subr.bf16.mxu0 %v5532_v2  ;;  %v5563_v2 = vld [vmem:[#allocation22 + $0x88] ss:$16 sps:$4 sm:$0xff]  }
 0x613   : > { %5210 = vmatpush3.bf16.msra.mxu1 %v5487_v0 }
 0x614   : > { %3812 = vmatprep.subr.bf16.mxu1 %v5493_v27 }
 0x615   : > { %3786 = vmatpush1.bf16.msra.mxu0 %v5530_v35  ;;  %v5571_v35 = vld [vmem:[#allocation22 + $0xac] ss:$16 sps:$4 sm:$0xff]  }
 0x616   : > { %5212 = vmatmul.mubr.bf16.vlgmr.msra.gmra.mrb[16].mxu1 %v6791_v12  ;;  %4013 = vmatprep.subr.bf16.mxu0 %v5538_v56  ;;  %v5569_v56 = vld [vmem:[#allocation22 + $0xa8] ss:$16 sps:$4 sm:$0xff]  }
 0x617   : > { %3813 = vmatpush1.bf16.msra.mxu1 %v5491_v43  ;;  %3844 = vmatprep.mubr.bf16.mxu1 %v6220_v23 }
 0x618   : > { %3814 = vmatprep.subr.bf16.mxu1 %v5499_v3 }
 0x61b   : > { %3815 = vmatpush1.bf16.msra.mxu1 %v5497_v5 }
 0x61c   : > { %3816 = vmatprep.subr.bf16.mxu1 %v5505_v4 }
 0x61f   : > { %3817 = vmatpush1.bf16.msra.mxu1 %v5503_v10  ;;  %v4809_v10 = vld [vmem:[#allocation21] ss:$0 sm:$0xff] }
 0x620   : > { %3818 = vmatprep.subr.bf16.mxu1 %v5511_v29 }
 0x623   : > { %3819 = vmatpush1.bf16.msra.mxu1 %v5509_v46 }
 0x624   : > { %3820 = vmatprep.subr.bf16.mxu1 %v5517_v58 }
 0x627   : > { %3821 = vmatpush1.bf16.msra.mxu1 %v5515_v19 }
 0x628   : > { %3822 = vmatprep.subr.bf16.mxu1 %v5523_v24  ;;  %v5553_v24 = vld [vmem:[#allocation22 + $0x4c] ss:$16 sps:$4 sm:$0xff]  }
 0x62b   : > { %3823 = vmatpush1.bf16.msra.mxu1 %v5521_v63  ;;  %v5554_v63 = vld [vmem:[#allocation22 + $0x60] ss:$16 sps:$4 sm:$0xff]  }
 0x62c   : > { %3824 = vmatprep.subr.bf16.mxu1 %v5529_v61  ;;  %v5562_v61 = vld [vmem:[#allocation22 + $0x84] ss:$16 sps:$4 sm:$0xff]  }
 0x62f   : > { %3825 = vmatpush1.bf16.msra.mxu1 %v5527_v37  ;;  %v5560_v37 = vld [vmem:[#allocation22 + $0x80] ss:$16 sps:$4 sm:$0xff]  }
 0x630   : > { %3826 = vmatprep.subr.bf16.mxu1 %v5535_v52  ;;  %v5568_v52 = vld [vmem:[#allocation22 + $0xa4] ss:$16 sps:$4 sm:$0xff]  }
 0x633   : > { %3827 = vmatpush1.bf16.msra.mxu1 %v5533_v55  ;;  %v5566_v55 = vld [vmem:[#allocation22 + $0xa0] ss:$16 sps:$4 sm:$0xff]  }
 0x634   : > { %4054 = vmatprep.subr.bf16.mxu1 %v5541_v53  ;;  %v5574_v53 = vld [vmem:[#allocation22 + $0xc4] ss:$16 sps:$4 sm:$0xff]  }
 0x669   : > { %v2782_v41 = vpop.f32.mrb[0].mxu1 }
 0x66a   : > { %v5053_v20 = vpop.f32.mrb[1].mxu1 }
 0x66b   : > { %v2785_v15 = vpop.f32.mrb[2].mxu1  ;;  %v2870_v48 = vpop.f32.mrb[4].mxu0 }
 0x66c   : > { %v3529_v57 = vrot.slane %v2870_v48, 7  ;;  %v5054_v16 = vpop.f32.mrb[3].mxu1  ;;  %v5073_v49 = vpop.f32.mrb[5].mxu0 }
 0x66d   : > { %v2873_v25 = vpop.f32.mrb[6].mxu0 }
 0x66e   : > { %v3530_v32 = vsel %vm7889_vm5, %v3529_v57, %v2782_v41  ;;  %v5074_v51 = vpop.f32.mrb[7].mxu0 }
 0x689   : > { %v2958_v22 = vpop.f32.mrb[4].mxu1 }
 0x68a   : > { %v3531_v14 = vrot.slane %v2958_v22, 6  ;;  %v5093_v34 = vpop.f32.mrb[5].mxu1 }
 0x68b   : > { %v2961_v39 = vpop.f32.mrb[6].mxu1  ;;  %v3046_v38 = vpop.f32.mrb[8].mxu0 }
 0x68c   : > { %v3532_v40 = vsel %vm7890_vm6, %v3531_v14, %v3530_v32  ;;  %v3533_v9 = vrot.slane %v3046_v38, 5  ;;  %v5094_v47 = vpop.f32.mrb[7].mxu1  ;;  %v5113_v59 = vpop.f32.mrb[9].mxu0  ;;  %v5536_v39 = vld [vmem:[#allocation22] ss:$16 sps:$4 sm:$0xff]  }
 0x68d   : > { %v3049_v13 = vpop.f32.mrb[10].mxu0  ;;  %v5539_v38 = vld [vmem:[#allocation22 + $0x8] ss:$16 sps:$4 sm:$0xff]   ;;  %v5550_v59 = vld [vmem:[#allocation22 + $0x44] ss:$16 sps:$4 sm:$0xff]  }
 0x68e   : > { %v3534_v1 = vsel %vm7891_vm7, %v3533_v9, %v3532_v40  ;;  %v5114_v45 = vpop.f32.mrb[11].mxu0  ;;  %v5547_v40 = vld [vmem:[#allocation22 + $0x2c] ss:$16 sps:$4 sm:$0xff]   ;;  %v5542_v9 = vld [vmem:[#allocation22 + $0x20] ss:$16 sps:$4 sm:$0xff]  }
 0x68f   : > { %v5545_v47 = vld [vmem:[#allocation22 + $0x28] ss:$16 sps:$4 sm:$0xff]   ;;  %v5548_v13 = vld [vmem:[#allocation22 + $0x40] ss:$16 sps:$4 sm:$0xff]   ;;  %v5556_v45 = vld [vmem:[#allocation22 + $0x64] ss:$16 sps:$4 sm:$0xff]  }
 0x6a9   : > { %v3134_v50 = vpop.f32.mrb[8].mxu1 }
 0x6aa   : > { %v3535_v7 = vrot.slane %v3134_v50, 4  ;;  %v5133_v0 = vpop.f32.mrb[9].mxu1  ;;  %v5577_v50 = vld [vmem:[#allocation22 + $0xcc] ss:$16 sps:$4 sm:$0xff]  }
 0x6ab   : > { %v3137_v41 = vpop.f32.mrb[10].mxu1  ;;  %v3222_v20 = vpop.f32.mrb[12].mxu0  ;;  %v5575_v0 = vld [vmem:[#allocation22 + $0xc8] ss:$16 sps:$4 sm:$0xff]  }
 0x6ac   : > { %v3536_v15 = vsel %vm7892_vm8, %v3535_v7, %v3534_v1  ;;  %v3537_v48 = vrot.slane %v3222_v20, 3  ;;  %v5134_v57 = vpop.f32.mrb[11].mxu1  ;;  %v5153_v16 = vpop.f32.mrb[13].mxu0  ;;  %v5551_v1 = vld [vmem:[#allocation22 + $0x48] ss:$16 sps:$4 sm:$0xff]  }
 0x6ad   : > { %v3225_v49 = vpop.f32.mrb[14].mxu0  ;;  %v5572_v7 = vld [vmem:[#allocation22 + $0xc0] ss:$16 sps:$4 sm:$0xff]   ;;  %v5580_v41 = vld [vmem:[#allocation22 + $0xe4] ss:$16 sps:$4 sm:$0xff]  }
 0x6ae   : > { %v3538_v25 = vsel %vm7893_vm9, %v3537_v48, %v3536_v15  ;;  %v5154_v32 = vpop.f32.mrb[15].mxu0  ;;  %v5583_v20 = vld [vmem:[#allocation22 + $0xec] ss:$16 sps:$4 sm:$0xff]   ;;  %v5578_v15 = vld [vmem:[#allocation22 + $0xe0] ss:$16 sps:$4 sm:$0xff]  }
 0x6af   : > { %v5581_v48 = vld [vmem:[#allocation22 + $0xe8] ss:$16 sps:$4 sm:$0xff]   ;;  %v5586_v57 = vld [vmem:[#allocation25 + $0x4] ss:$16 sps:$4 sm:$0xff]   ;;  %v5589_v16 = vld [vmem:[#allocation25 + $0xc] ss:$16 sps:$4 sm:$0xff]  }
 0x6b0   : > { %v3545_v49 = vld [vmem:[%s6741_s22] sm:$0xf]  ;;  %s4448_s22 = scalar_lea.sflag [#allocation30], %s6738_s23 }
 0x6b1   : > { %v5587_v32 = vld [vmem:[#allocation25 + $0x8] ss:$16 sps:$4 sm:$0xff]  }
 0x6c9   : > { %v3310_v51 = vpop.f32.mrb[12].mxu1 }
 0x6ca   : > { %v3539_v30 = vrot.slane %v3310_v51, 2  ;;  %v5173_v8 = vpop.f32.mrb[13].mxu1  ;;  %v5592_v51 = vld [vmem:[#allocation25 + $0x24] ss:$16 sps:$4 sm:$0xff]  }
 0x6cb   : > { %v3313_v43 = vpop.f32.mrb[14].mxu1  ;;  %v3398_v27 = vpop.f32.mrb[16].mxu0  ;;  %v5590_v8 = vld [vmem:[#allocation25 + $0x20] ss:$16 sps:$4 sm:$0xff]  }
 0x6cc   : > { %v3540_v36 = vsel %vm2491_vm0, %v3539_v30, %v3538_v25  ;;  %v3541_v3 = vrot.slane %v3398_v27, 1  ;;  %v5174_v42 = vpop.f32.mrb[15].mxu1  ;;  %v5193_v5 = vpop.f32.mrb[17].mxu0  ;;  %v5584_v25 = vld [vmem:[#allocation25] ss:$16 sps:$4 sm:$0xff]  }
 0x6cd   : > { %v3401_v62 = vpop.f32.mrb[18].mxu0  ;;  %v5595_v30 = vld [vmem:[#allocation25 + $0x2c] ss:$16 sps:$4 sm:$0xff]   ;;  %v5593_v43 = vld [vmem:[#allocation25 + $0x28] ss:$16 sps:$4 sm:$0xff]  }
 0x6ce   : > { %v3542_v4 = vsel %vm2493_vm1, %v3541_v3, %v3540_v36  ;;  %v5194_v18 = vpop.f32.mrb[19].mxu0  ;;  %v5598_v27 = vld [vmem:[#allocation25 + $0x44] ss:$16 sps:$4 sm:$0xff]   ;;  %v5601_v36 = vld [vmem:[#allocation25 + $0x4c] ss:$16 sps:$4 sm:$0xff]  }
 0x6cf   : > { %v5596_v3 = vld [vmem:[#allocation25 + $0x40] ss:$16 sps:$4 sm:$0xff]   ;;  %v5599_v42 = vld [vmem:[#allocation25 + $0x48] ss:$16 sps:$4 sm:$0xff]   ;;  %v5604_v5 = vld [vmem:[#allocation25 + $0x64] ss:$16 sps:$4 sm:$0xff]  }
 0x6d0   : > { %v5607_v62 = vld [vmem:[#allocation25 + $0x6c] ss:$16 sps:$4 sm:$0xff]   ;;  %v5605_v18 = vld [vmem:[#allocation25 + $0x68] ss:$16 sps:$4 sm:$0xff]  }
 0x6e9   : > { %v3509_v11 = vpop.f32.mrb[16].mxu1 }
 0x6ea   : > { %v3510_v29 = vadd.f32 %v4809_v10, %v3509_v11  ;;  %v5213_v28 = vpop.f32.mrb[17].mxu1  ;;  %v5610_v10 = vld [vmem:[#allocation25 + $0x84] ss:$16 sps:$4 sm:$0xff]   ;;  %v5613_v11 = vld [vmem:[#allocation25 + $0x8c] ss:$16 sps:$4 sm:$0xff]  }
 0x6eb   : > { %v3512_v46 = vpop.f32.mrb[18].mxu1  ;;  %v5616_v28 = vld [vmem:[#allocation25 + $0xa4] ss:$16 sps:$4 sm:$0xff]  }
 0x6ec   : > { %v4818_v33 = vmul.f32 -1.442695, %v3510_v29  ;;  %v5214_v58 = vpop.f32.mrb[19].mxu1  ;;  %v5608_v29 = vld [vmem:[#allocation25 + $0x80] ss:$16 sps:$4 sm:$0xff]  }
 0x6ed   : > { %v5619_v46 = vld [vmem:[#allocation25 + $0xac] ss:$16 sps:$4 sm:$0xff]   ;;  %v5617_v58 = vld [vmem:[#allocation25 + $0xa8] ss:$16 sps:$4 sm:$0xff]  }
 0x6ee   : > { %5636 = vpow2.f32 %v4818_v33  ;;  %v5614_v33 = vld [vmem:[#allocation25 + $0xa0] ss:$16 sps:$4 sm:$0xff]  }
 0x6f8   : > { %v5637_v22 = vpop.eup %5636 }
 0x6f9   : > { %v3518_v14 = vadd.f32 1.0, %v5637_v22  ;;  %v5622_v22 = vld [vmem:[#allocation25 + $0xc4] ss:$16 sps:$4 sm:$0xff]  }
 0x6fb   : > { %5638 = vrcp.f32 %v3518_v14  ;;  %v5625_v14 = vld [vmem:[#allocation25 + $0xcc] ss:$16 sps:$4 sm:$0xff]  }
 0x705   : > { %v5639_v34 = vpop.eup %5638 }
 0x706   : > { %v3544_v44 = vmul.f32 %v5639_v34, %v3542_v4  ;;  %v5602_v4 = vld [vmem:[#allocation25 + $0x60] ss:$16 sps:$4 sm:$0xff]  }
 0x707   : > { %v5620_v34 = vld [vmem:[#allocation25 + $0xc0] ss:$16 sps:$4 sm:$0xff]  }
 0x708   : > { %v3578_v19 = vpack.c.bf16 %v3544_v44, %v3544_v44  ;;  %v5623_v44 = vld [vmem:[#allocation25 + $0xc8] ss:$16 sps:$4 sm:$0xff]  }
 0x70a   : > { %3804 = vmatmul.mubr.bf16.vlgmr.msra.gmra.mrb[20].mxu0 %v3578_v19  ;;  %3845 = vmatmul.mubr.bf16.vlgmr.msra.gmra.mrb[20].mxu1 %v3578_v19  ;;  %v5626_v19 = vld [vmem:[#allocation25 + $0xe0] ss:$16 sps:$4 sm:$0xff]  }
 0x70b   : > { %4014 = vmatpush1.bf16.msra.mxu0 %v5536_v39  ;;  %4055 = vmatpush1.bf16.msra.mxu1 %v5539_v38  ;;  %v5628_v39 = vld [vmem:[#allocation25 + $0xe4] ss:$16 sps:$4 sm:$0xff]   ;;  %v5631_v38 = vld [vmem:[#allocation25 + $0xec] ss:$16 sps:$4 sm:$0xff]  }
 0x70c   : > { %4015 = vmatprep.subr.bf16.mxu0 %v5544_v6  ;;  %4056 = vmatprep.subr.bf16.mxu1 %v5547_v40  ;;  %v5629_v6 = vld [vmem:[#allocation25 + $0xe8] ss:$16 sps:$4 sm:$0xff]  }
 0x70d   : > { %4045 = vmatprep.mubr.bf16.mxu0 %v6220_v23  ;;  %4086 = vmatprep.mubr.bf16.mxu1 %v6220_v23 }
 0x70f   : > { %4016 = vmatpush1.bf16.msra.mxu0 %v5542_v9  ;;  %4057 = vmatpush1.bf16.msra.mxu1 %v5545_v47 }
 0x710   : > { %4017 = vmatprep.subr.bf16.mxu0 %v5550_v59  ;;  %4058 = vmatprep.subr.bf16.mxu1 %v5553_v24 }
 0x713   : > { %4018 = vmatpush1.bf16.msra.mxu0 %v5548_v13  ;;  %4059 = vmatpush1.bf16.msra.mxu1 %v5551_v1 }
 0x714   : > { %4019 = vmatprep.subr.bf16.mxu0 %v5556_v45  ;;  %4060 = vmatprep.subr.bf16.mxu1 %v5559_v60 }
 0x717   : > { %4020 = vmatpush1.bf16.msra.mxu0 %v5554_v63  ;;  %4061 = vmatpush1.bf16.msra.mxu1 %v5557_v54 }
 0x718   : > { %4021 = vmatprep.subr.bf16.mxu0 %v5562_v61  ;;  %4062 = vmatprep.subr.bf16.mxu1 %v5565_v21 }
 0x71b   : > { %4022 = vmatpush1.bf16.msra.mxu0 %v5560_v37  ;;  %4063 = vmatpush1.bf16.msra.mxu1 %v5563_v2 }
 0x71c   : > { %4023 = vmatprep.subr.bf16.mxu0 %v5568_v52  ;;  %4064 = vmatprep.subr.bf16.mxu1 %v5571_v35 }
 0x71f   : > { %4024 = vmatpush1.bf16.msra.mxu0 %v5566_v55  ;;  %4065 = vmatpush1.bf16.msra.mxu1 %v5569_v56 }
 0x720   : > { %4025 = vmatprep.subr.bf16.mxu0 %v5574_v53  ;;  %4066 = vmatprep.subr.bf16.mxu1 %v5577_v50 }
 0x723   : > { %4026 = vmatpush1.bf16.msra.mxu0 %v5572_v7  ;;  %4067 = vmatpush1.bf16.msra.mxu1 %v5575_v0 }
 0x724   : > { %4027 = vmatprep.subr.bf16.mxu0 %v5580_v41  ;;  %4068 = vmatprep.subr.bf16.mxu1 %v5583_v20 }
 0x727   : > { %4028 = vmatpush1.bf16.msra.mxu0 %v5578_v15  ;;  %4069 = vmatpush1.bf16.msra.mxu1 %v5581_v48 }
 0x728   : > { %4287 = vmatprep.subr.bf16.mxu0 %v5586_v57  ;;  %4328 = vmatprep.subr.bf16.mxu1 %v5589_v16 }
 0x72a   : > { %4046 = vmatmul.mubr.bf16.vlgmr.msra.gmra.mrb[24].mxu0 %v3545_v49  ;;  %4087 = vmatmul.mubr.bf16.vlgmr.msra.gmra.mrb[24].mxu1 %v3545_v49 }
 0x72b   : > { %4288 = vmatpush1.bf16.msra.mxu0 %v5584_v25  ;;  %4329 = vmatpush1.bf16.msra.mxu1 %v5587_v32 }
 0x72c   : > { %4289 = vmatprep.subr.bf16.mxu0 %v5592_v51  ;;  %4330 = vmatprep.subr.bf16.mxu1 %v5595_v30 }
 0x72d   : > { %4319 = vmatprep.mubr.bf16.mxu0 %v6220_v23  ;;  %4360 = vmatprep.mubr.bf16.mxu1 %v6220_v23  ;;  %v5611_v23 = vld [vmem:[#allocation25 + $0x88] ss:$16 sps:$4 sm:$0xff]  }
 0x72f   : > { %4290 = vmatpush1.bf16.msra.mxu0 %v5590_v8  ;;  %4331 = vmatpush1.bf16.msra.mxu1 %v5593_v43 }
 0x730   : > { %4291 = vmatprep.subr.bf16.mxu0 %v5598_v27  ;;  %4332 = vmatprep.subr.bf16.mxu1 %v5601_v36 }
 0x733   : > { %4292 = vmatpush1.bf16.msra.mxu0 %v5596_v3  ;;  %4333 = vmatpush1.bf16.msra.mxu1 %v5599_v42 }
 0x734   : > { %4293 = vmatprep.subr.bf16.mxu0 %v5604_v5  ;;  %4334 = vmatprep.subr.bf16.mxu1 %v5607_v62 }
 0x737   : > { %4294 = vmatpush1.bf16.msra.mxu0 %v5602_v4  ;;  %4335 = vmatpush1.bf16.msra.mxu1 %v5605_v18 }
 0x738   : > { %4295 = vmatprep.subr.bf16.mxu0 %v5610_v10  ;;  %4336 = vmatprep.subr.bf16.mxu1 %v5613_v11 }
 0x73b   : > { %4296 = vmatpush1.bf16.msra.mxu0 %v5608_v29  ;;  %4337 = vmatpush1.bf16.msra.mxu1 %v5611_v23 }
 0x73c   : > { %4297 = vmatprep.subr.bf16.mxu0 %v5616_v28  ;;  %4338 = vmatprep.subr.bf16.mxu1 %v5619_v46 }
 0x73f   : > { %4298 = vmatpush1.bf16.msra.mxu0 %v5614_v33  ;;  %4339 = vmatpush1.bf16.msra.mxu1 %v5617_v58 }
 0x740   : > { %4299 = vmatprep.subr.bf16.mxu0 %v5622_v22  ;;  %4340 = vmatprep.subr.bf16.mxu1 %v5625_v14 }
 0x743   : > { %4300 = vmatpush1.bf16.msra.mxu0 %v5620_v34  ;;  %4341 = vmatpush1.bf16.msra.mxu1 %v5623_v44 }
 0x744   : > { %4301 = vmatprep.subr.bf16.mxu0 %v5628_v39  ;;  %4342 = vmatprep.subr.bf16.mxu1 %v5631_v38 }
 0x747   : > { %4302 = vmatpush1.bf16.msra.mxu0 %v5626_v19  ;;  %4343 = vmatpush1.bf16.msra.mxu1 %v5629_v6 }
 0x74a   : > { %4320 = vmatmul.mubr.bf16.vlgmr.msra.gmra.mrb[28].mxu0 %v6791_v12  ;;  %4361 = vmatmul.mubr.bf16.vlgmr.msra.gmra.mrb[28].mxu1 %v6791_v12 }
 0x74b   : > { %6075 = shalt.err (!%p6072_p5)
}
 0x74c   : > { %s6076_s1 = scalar_lea.hbm %s7713_s27, 128  ;;  %s6080_s0 = scalar_lea.hbm %s7895_s24, 896 }
 0x74d   : > { %p6077_p1 = scmp.ne.s32.totalorder %s7713_s27, %s6076_s1  ;;  %p6081_p11 = scmp.lt.u32.totalorder %s7713_s27, %s7895_s24 }
 0x74e   : > { %p6082_p3 = scmp.lt.u32.totalorder %s6080_s0, %s6076_s1  ;;  %p6084_p9 = scmp.lt.u32.totalorder %s6076_s1, %s7713_s27 }
 0x74f   : > { %p6078_p2 = pnand %p6077_p1, %p7896_p12 }
 0x750   : > { %p6083_p8 = por %p6082_p3, %p6081_p11 }
 0x751   : > { %p6079_p7 = pneg %p6078_p2 }
 0x752   : > { %p6085_p6 = por %p6084_p9, %p6083_p8 }
 0x754   : > { %p6086_p10 = pnand %p6085_p6, %p6079_p7 }
 0x756   : > { %6089 = shalt.err (!%p6086_p10)
}
 0x757   : > { %5270 = dma.vmem_to_hbm [thread:$0]  (%p7896_p12), %s4475_s26, 128, %s7713_s27, %s4448_s22   ;;  %v4373_v53 = vld [vmem:[#allocation27] sm:$0xf]  ;;  %v4381_v50 = vsub.s32 1, %v6798_v17  ;;  %v4389_v32 = vsub.s32 3, %v6798_v17  ;;  %v4385_v5 = vsub.s32 2, %v6798_v17 }
 0x758   : > { %v4378_v7 = vrot.slane %v4373_v53, %v6810_v26  ;;  %v710_v58 = vld [vmem:[#allocation3] sm:$0xff]  ;;  %v4431_v14 = vsub.f32 1.0, %v7606_v31  ;;  %s4461_s6 = sshll.u32 %s6772_s3, 4  ;;  %s7897_s22 = sld [smem:[#allocation54_spill]]  ;;  %s7749_s6 = int_to_ptr.vmem [resolvable:$true] %s4461_s6 }
 0x759   : > { %v4382_v20 = vrot.slane %v4373_v53, %v4381_v50  ;;  %v4390_v26 = vrot.slane %v4373_v53, %v4389_v32  ;;  %v4386_v4 = vrot.slane %v4373_v53, %v4385_v5  ;;  %s4443_s1 = scalar_lea.sflag [#allocation8], %s6738_s23  ;;  %s6090_s4 = scalar_lea.vmem %s7749_s6, 128 }
 0x75a   : > { %v4435_v19 = vmul.f32 %v4431_v14, %v710_v58  ;;  %p6091_p13 = scmp.ne.s32.totalorder %s7749_s6, %s6090_s4  ;;  %s6222_s19 = smov [#allocation28]  }
 0x75b   : > { %s6094_s21 = sshll.u32 %s6222_s19, 4  ;;  %s6095_s21 = int_to_ptr.vmem [resolvable:$false] %s6094_s21 }
 0x75c   : > { %p6092_p4 = pnand %p6091_p13, %p7896_p12  ;;  %s6096_s0 = scalar_lea.vmem %s6095_s21, 256 }
 0x75d   : > { %p6097_p5 = scmp.lt.s32.totalorder %s7749_s6, %s6095_s21  ;;  %p6098_p1 = scmp.lt.s32.totalorder %s6096_s0, %s6090_s4 }
 0x75e   : > { %s7747_s16 = scalar_lea.hbm %s7897_s22, %s4921_s2  ;;  %p6093_p0 = pneg %p6092_p4 }
 0x75f   : > { %p6099_p2 = por %p6098_p1, %p6097_p5 }
 0x761   : > { %p6100_p7 = pnand %p6099_p2, %p6093_p0 }
 0x7dd   : > { %v3805_v12 = vpop.f32.mrb[20].mxu0  ;;  %v3846_v40 = vpop.f32.mrb[20].mxu1 }
 0x7de   : > { %v3807_v9 = vpop.f32.mrb[21].mxu0  ;;  %v3848_v47 = vpop.f32.mrb[21].mxu1 }
 0x7df   : > { %v3809_v59 = vpop.f32.mrb[22].mxu0  ;;  %v3850_v24 = vpop.f32.mrb[22].mxu1 }
 0x7e0   : > { %v3810_v13 = vpop.f32.mrb[23].mxu0  ;;  %v3851_v1 = vpop.f32.mrb[23].mxu1  ;;  %v5657_v59 = vld [vmem:[#allocation2] sm:$0xff] }
 0x7e1   : > { %v4432_v24 = vmul.f32 %v5657_v59, %v4431_v14 }
 0x7fd   : > { %v4047_v45 = vpop.f32.mrb[24].mxu0  ;;  %v4088_v60 = vpop.f32.mrb[24].mxu1 }
 0x7fe   : > { %v4048_v63 = vadd.f32 %v4047_v45, %v3805_v12  ;;  %v4089_v54 = vadd.f32 %v4088_v60, %v3846_v40  ;;  %v4049_v61 = vpop.f32.mrb[25].mxu0  ;;  %v4090_v21 = vpop.f32.mrb[25].mxu1 }
 0x7ff   : > { %v4050_v37 = vadd.f32 %v4049_v61, %v3807_v9  ;;  %v4091_v2 = vadd.f32 %v4090_v21, %v3848_v47  ;;  %v4051_v52 = vpop.f32.mrb[26].mxu0  ;;  %v4092_v35 = vpop.f32.mrb[26].mxu1 }
 0x800   : > { %v4052_v55 = vpop.f32.mrb[27].mxu0  ;;  %v4093_v56 = vpop.f32.mrb[27].mxu1 }
 0x81d   : > { %v4321_v0 = vpop.f32.mrb[28].mxu0  ;;  %v4362_v41 = vpop.f32.mrb[28].mxu1 }
 0x81e   : > { %v4369_v15 = vadd.f32 %v4321_v0, %v4048_v63  ;;  %v4371_v48 = vadd.f32 %v4362_v41, %v4089_v54  ;;  %v4323_v57 = vpop.f32.mrb[29].mxu0  ;;  %v4364_v16 = vpop.f32.mrb[29].mxu1 }
 0x81f   : > { %v4370_v49 = vadd.f32 %v4323_v57, %v4050_v37  ;;  %v4372_v25 = vadd.f32 %v4364_v16, %v4091_v2  ;;  %v4325_v51 = vpop.f32.mrb[30].mxu0  ;;  %v4366_v30 = vpop.f32.mrb[30].mxu1 }
 0x820   : > { %v4395_v8 = vadd.f32 %v4378_v7, %v4369_v15  ;;  %v4326_v43 = vpop.f32.mrb[31].mxu0  ;;  %v4367_v27 = vpop.f32.mrb[31].mxu1  ;;  %v4397_v10 = vadd.f32 %v4386_v4, %v4371_v48 }
 0x821   : > { %v4396_v36 = vadd.f32 %v4382_v20, %v4370_v49  ;;  %v4398_v62 = vadd.f32 %v4390_v26, %v4372_v25 }
 0x822   : > { %v4915_v3 = vmul.f32 -1.442695, %v4395_v8 }
 0x823   : > { %v4916_v42 = vmul.f32 -1.442695, %v4396_v36  ;;  %v4917_v18 = vmul.f32 -1.442695, %v4398_v62 }
 0x824   : > { %5640 = vpow2.f32 %v4915_v3 }
 0x825   : > { %5642 = vpow2.f32 %v4916_v42 }
 0x826   : > { %5644 = vpow2.f32 %v4917_v18 }
 0x827   : > { %5646 = vtanh.f32 %v4397_v10 }
 0x82e   : > { %v5641_v11 = vpop.eup %5640 }
 0x82f   : > { %v5643_v29 = vpop.eup %5642  ;;  %v4402_v23 = vadd.f32 1.0, %v5641_v11 }
 0x830   : > { %v4408_v28 = vadd.f32 1.0, %v5643_v29  ;;  %v5645_v46 = vpop.eup %5644 }
 0x831   : > { %5648 = vrcp.f32 %v4402_v23  ;;  %v5647_v33 = vpop.eup %5646  ;;  %v4415_v44 = vadd.f32 1.0, %v5645_v46 }
 0x832   : > { %5650 = vrcp.f32 %v4408_v28 }
 0x833   : > { %5652 = vrcp.f32 %v4415_v44 }
 0x83b   : > { %v5649_v22 = vpop.eup %5648 }
 0x83c   : > { %v5651_v17 = vpop.eup %5650  ;;  %v4419_v34 = vmul.f32 %v5649_v22, %v5647_v33 }
 0x83d   : > { %v4418_v39 = vmul.f32 %v5651_v17, %v710_v58  ;;  %v5653_v40 = vpop.eup %5652 }
 0x83f   : > { %v4420_v38 = vadd.f32 %v4419_v34, %v4418_v39 }
 0x841   : > { %5654 = vtanh.f32 %v4420_v38  ;;  %v4434_v6 = vmul.f32 %v7606_v31, %v4420_v38 }
 0x843   : > { %v4436_v12 = vadd.f32 %v4435_v19, %v4434_v6 }
 0x845   : > { %4438 = vst [vmem:[#allocation3] sm:$0xff] %v4436_v12 }
 0x84b   : > { %v5655_v9 = vpop.eup %5654 }
 0x84c   : > { %v4422_v47 = vmul.f32 %v5655_v9, %v5653_v40 }
 0x84e   : > { %v4430_v13 = vmul.f32 %v7606_v31, %v4422_v47 }
 0x850   : > { %v4433_v1 = vadd.f32 %v4432_v24, %v4430_v13 }
 0x852   : > { %4437 = vst [vmem:[#allocation2] sm:$0xff] %v4433_v1  ;;  %4439 = vst [vmem:[%s6772_s3] sm:$0xff] %v4433_v1 }
 0x853   : > { %6103 = shalt.err (!%p6100_p7)
}
 0x854   : > { %s6104_s23 = scalar_lea.hbm %s7747_s16, 128  ;;  %s6108_s15 = scalar_lea.hbm %s7897_s22, 896 }
 0x855   : > { %p6105_p11 = scmp.ne.s32.totalorder %s7747_s16, %s6104_s23  ;;  %p6109_p9 = scmp.lt.u32.totalorder %s7747_s16, %s7897_s22 }
 0x856   : > { %p6110_p6 = scmp.lt.u32.totalorder %s6108_s15, %s6104_s23  ;;  %p6112_p13 = scmp.lt.u32.totalorder %s6104_s23, %s7747_s16 }
 0x857   : > { %p6106_p3 = pnand %p6105_p11, %p7896_p12 }
 0x858   : > { %p6111_p10 = por %p6110_p6, %p6109_p9 }
 0x859   : > { %p6107_p8 = pneg %p6106_p3 }
 0x85a   : > { %p6113_p4 = por %p6112_p13, %p6111_p10 }
 0x85c   : > { %p6114_p0 = pnand %p6113_p4, %p6107_p8 }
 0x85e   : > { %6117 = shalt.err (!%p6114_p0)
}
 0x85f   : > { %5269 = dma.vmem_to_hbm [thread:$0]  (%p7896_p12), %s7749_s6, 128, %s7747_s16, %s4443_s1  }
 0x860 PF: > { %s7898_s26 = sld [smem:[#allocation43_spill]]  ;;  %p5351_p5 = scmp.ge.s32.totalorder %s6194_s18, 2 }
 0x861   : > { %p7899_p1 = scmp.ne.s32.totalorder %s7862_s28, 0 }
 0x863   : > { %p5318_p2 = pnand %p5351_p5, %p7899_p1 }
 0x866   : > { %s4486_s4 = sand.u32 1, %s7898_s26  }
 0x867   : > { %s4487_s19 = scalar_lea.sflag [#allocation8], %s4486_s4 }
 0x868   : > { %6173 = dma.done.wait (!%p5318_p2), %s4487_s19, 128  }
 0x869   : > { %6175 = vsyncadd (!%p5318_p2), %s4487_s19, 4294967168  ;;  %s4496_s21 = scalar_lea.sflag [#allocation30], %s4486_s4 }
 0x86a   : > { %6177 = dma.done.wait (!%p5318_p2), %s4496_s21, 128  }
 0x86b   : > { %6179 = vsyncadd (!%p5318_p2), %s4496_s21, 4294967168  ;;  %s7900_s3 = sld [smem:[#allocation44_spill]]  ;;  %p41_p12 = scmp.ge.s32.totalorder %s6658_s25, 9  }
 0x86c   : > { %s7901_s0 = smov %s6190_s17  ;;  %s7902_s17 = smov %s6670_s30 }
 0x86d   : > { %s7903_s18 = smov %s6658_s25  ;;  %43 = sbr.rel (!%p41_p12) target bundleno = 32 (0x20), region = 193 }
 0x874   :  { %4501 = vsyncpa [#allocation7], 1 }
 0x875   :  { %4503 = vsyncpa [#allocation7 + $0x1], 1 }
 0x876   :  { %4504 = vsyncpa [#allocation10], 1 }
 0x877   :  { %4505 = vsyncpa [#allocation14], 1 }
 0x878   :  { %4506 = vsyncpa [#allocation17], 1 }
 0x879   :  { %4507 = vsyncpa [#allocation20], 1 }
 0x87a   :  { %4508 = vsyncpa [#allocation23], 1 }
 0x87b   :  { %4509 = vsyncpa [#allocation26], 1 }
 0x87c   :  { %4510 = vsyncpa [#allocation8], 1 }
 0x87d   :  { %4512 = vsyncpa [#allocation8 + $0x1], 1 }
 0x87e   :  { %4513 = vsyncpa [#allocation30], 1 }
 0x87f   :  { %4515 = vsyncpa [#allocation30 + $0x1], 1 }

</bundles_post_ra>
